<compile_context>
chip_gen: v6e
topology: v6e:2x2x1
jax: 0.10.0
libtpu: 0.0.40
codegen_flags: <defaults>
</compile_context>

<pallas_src>
import functools

import jax
import jax.numpy as jnp
from jax import lax
from jax.experimental import pallas as pl
from jax.experimental.pallas import tpu as pltpu


# ------------------------------ fused kernel ------------------------------- #

def _lenet_mxu_kernel(x_ref, t1_ref, b1_ref, t2_ref, b2_ref,
                      fw1_ref, fb1_ref, fw2_ref, fb2_ref, fw3_ref, fb3_ref,
                      out_ref,
                      rhs1_ref, acc1_ref, p1_ref, rhs2_ref, acc2_ref, flat_ref,
                      *, tb):
    """One batch tile (tb images) end-to-end.  Lane axis = (spatial-row, batch).

    x_ref  : (32, 28*tb) bf16   x_ref[x_in, y_in*tb + b]        (rows 28..31 = 0)
    t1_ref : (144, 160)  bf16   conv1 Toeplitz, row = parity*72 + co*12 + x_pool
    t2_ref : (128, 400)  bf16   conv2 Toeplitz, row = parity*64 + co*4  + x_pool
    out_ref: (1, 10, tb) f32
    """
    f32 = jnp.float32
    bf16 = jnp.bfloat16

    # ----------------- conv1 (1->6, 5x5, valid) as one MXU matmul -----------------
    # rhs1[32*i + x_in, y_out*tb + b] = x[b, y_out + i, x_in]   (5 lane-shifted slabs)
    for i in range(5):
        rhs1_ref[pl.ds(32 * i, 32), :] = x_ref[:, pl.ds(i * tb, 24 * tb)]
    acc1_ref[...] = jnp.dot(t1_ref[...], rhs1_ref[...], preferred_element_type=f32)
    # acc1[parity*72 + co*12 + xp, y_out*tb + b] = conv1[b, co, y_out, 2*xp + parity]

    # --------- fused bias + 2x2 max-pool + ReLU -> p1 (conv2 input layout) ---------
    # p1[ci*12 + x, y*tb + b] = relu(pool(conv1))[b, ci, y, x]  ; rows 72..79 are zero
    p1_ref[pl.ds(72, 8), :] = jnp.zeros((8, 12 * tb), bf16)
    b1b = jnp.broadcast_to(b1_ref[...], (72, tb))               # hoisted broadcast
    for s in range(12):                                         # pooled y index
        e = acc1_ref[:, pl.ds((2 * s) * tb, tb)]                # y_out = 2s     (144, tb)
        o = acc1_ref[:, pl.ds((2 * s + 1) * tb, tb)]            # y_out = 2s + 1
        m = jnp.maximum(e, o)
        m = jnp.maximum(m[0:72, :], m[72:144, :]) + b1b         # x-pool via parity halves
        p1_ref[pl.ds(0, 72), pl.ds(s * tb, tb)] = jnp.maximum(m, 0.0).astype(bf16)

    # ----------------- conv2 (6->16, 5x5, valid) as one MXU matmul -----------------
    for i in range(5):
        rhs2_ref[pl.ds(80 * i, 80), :] = p1_ref[:, pl.ds(i * tb, 8 * tb)]
    acc2_ref[...] = jnp.dot(t2_ref[...], rhs2_ref[...], preferred_element_type=f32)
    # acc2[parity*64 + co*4 + xp, y_out*tb + b] = conv2[b, co, y_out, 2*xp + parity]

    # --------- fused bias + 2x2 max-pool + ReLU -> flat (256, tb) bf16 --------------
    # flat row = y*64 + co*4 + x   (fc1 weight columns are pre-permuted to match)
    b2b = jnp.broadcast_to(b2_ref[...], (64, tb))
    for s in range(4):
        e = acc2_ref[:, pl.ds((2 * s) * tb, tb)]
        o = acc2_ref[:, pl.ds((2 * s + 1) * tb, tb)]
        m = jnp.maximum(e, o)
        m = jnp.maximum(m[0:64, :], m[64:128, :]) + b2b
        flat_ref[pl.ds(s * 64, 64), :] = jnp.maximum(m, 0.0).astype(bf16)

    # --------- fc1 -> ReLU -> fc2 -> ReLU -> fc3 (MXU, bf16 in / f32 acc) -----------
    h = jnp.dot(fw1_ref[...], flat_ref[...], preferred_element_type=f32) + fb1_ref[...]
    h = jnp.maximum(h, 0.0).astype(bf16)                        # (120, tb)
    h = jnp.dot(fw2_ref[...], h, preferred_element_type=f32) + fb2_ref[...]
    h = jnp.maximum(h, 0.0).astype(bf16)                        # (84, tb)
    out_ref[0] = jnp.dot(fw3_ref[...], h, preferred_element_type=f32) + fb3_ref[...]


# -------------------------------- wrapper ---------------------------------- #

def _pick_batch_tile(batch):
    # tb=128 when there is plenty of work; tb=64 otherwise so batches in (64, 256]
    # still produce >= 2 grid steps (both v7x TensorCores get a tile).
    return 128 if batch > 128 else 64


@jax.jit
def conv_network_forward(params, x):
    """x: (B, 1, 28, 28) float32 (NCHW)  ->  (B, 10) float32."""
    B = x.shape[0]
    assert x.shape[1:] == (1, 28, 28)
    tb = _pick_batch_tile(B)
    b_pad = -(-B // tb) * tb
    nt = b_pad // tb
    f32, bf16 = jnp.float32, jnp.bfloat16

    # Input: pad batch, transpose to [x_in, tile, y_in, b], fold (y_in, b) onto the
    # lane axis; pad x_in 28 -> 32 with zero rows so in-kernel staging copies are
    # sublane-tile aligned (pure layout plumbing, no replication).
    xp = jnp.pad(x[:, 0].astype(f32), ((0, b_pad - B), (0, 0), (0, 0)))
    xT = xp.reshape(nt, tb, 28, 28).transpose(3, 0, 2, 1)          # (28, nt, 28, tb)
    xT = jnp.pad(xT, ((0, 4), (0, 0), (0, 0), (0, 0)))             # (32, nt, 28, tb)
    xT = xT.reshape(32, nt * 28 * tb).astype(bf16)

    # conv1 lowered to a Toeplitz weight matrix t1 (144, 160):
    #   t1[parity*72 + co*12 + xp, i*32 + x_in] = w1[co, 0, i, x_in - (2*xp + parity)]
    w1 = params["conv1_w"].astype(f32)                             # (6, 1, 5, 5)
    d1 = jnp.arange(28)[None, :] - jnp.arange(24)[:, None]         # x_in - x_out
    t1 = jnp.where((d1 >= 0) & (d1 <= 4),
                   w1[:, 0][:, :, jnp.clip(d1, 0, 4)], 0.0)        # (6, 5, 24, 28)
    t1 = t1.transpose(0, 2, 1, 3)                                  # (6, 24, 5, 28)
    t1 = jnp.pad(t1, ((0, 0), (0, 0), (0, 0), (0, 4)))             # (6, 24, 5, 32)
    t1 = t1.reshape(6, 12, 2, 160).transpose(2, 0, 1, 3).reshape(144, 160).astype(bf16)
    b1r = jnp.repeat(params["conv1_b"].astype(f32), 12).reshape(72, 1)

    # conv2 lowered to t2 (128, 400):
    #   t2[parity*64 + co*4 + xp, i*80 + ci*12 + x_in] = w2[co, ci, i, x_in - (2*xp + parity)]
    w2 = params["conv2_w"].astype(f32)                             # (16, 6, 5, 5)
    d2 = jnp.arange(12)[None, :] - jnp.arange(8)[:, None]
    t2 = jnp.where((d2 >= 0) & (d2 <= 4),
                   w2[:, :, :, jnp.clip(d2, 0, 4)], 0.0)           # (16, 6, 5, 8, 12)
    t2 = t2.transpose(0, 3, 2, 1, 4).reshape(16, 8, 5, 72)         # [co, x_out, i, ci*12+x_in]
    t2 = jnp.pad(t2, ((0, 0), (0, 0), (0, 0), (0, 8)))             # pad each i-block to 80
    t2 = t2.reshape(16, 4, 2, 400).transpose(2, 0, 1, 3).reshape(128, 400).astype(bf16)
    b2r = jnp.repeat(params["conv2_b"].astype(f32), 4).reshape(64, 1)

    # fc weights pre-cast to bf16; fc1 columns permuted from torch (co, y, x) flatten
    # order to the kernel's (y, co, x) flatten order.
    fw1 = (params["fc1_w"].astype(f32).reshape(120, 16, 4, 4)
           .transpose(0, 2, 1, 3).reshape(120, 256).astype(bf16))
    fb1 = params["fc1_b"].astype(f32).reshape(120, 1)
    fw2 = params["fc2_w"].astype(bf16)
    fb2 = params["fc2_b"].astype(f32).reshape(84, 1)
    fw3 = params["fc3_w"].astype(bf16)
    fb3 = params["fc3_b"].astype(f32).reshape(10, 1)

    kernel = functools.partial(_lenet_mxu_kernel, tb=tb)
    out = pl.pallas_call(
        kernel,
        out_shape=jax.ShapeDtypeStruct((nt, 10, tb), jnp.float32),
        grid_spec=pltpu.PrefetchScalarGridSpec(
            num_scalar_prefetch=0,
            grid=(nt,),
            in_specs=[
                pl.BlockSpec((32, 28 * tb), lambda t: (0, t)),     # input tile
                pl.BlockSpec((144, 160), lambda t: (0, 0)),        # t1
                pl.BlockSpec((72, 1), lambda t: (0, 0)),           # conv1 bias rows
                pl.BlockSpec((128, 400), lambda t: (0, 0)),        # t2
                pl.BlockSpec((64, 1), lambda t: (0, 0)),           # conv2 bias rows
                pl.BlockSpec((120, 256), lambda t: (0, 0)),        # fc1 w (bf16)
                pl.BlockSpec((120, 1), lambda t: (0, 0)),
                pl.BlockSpec((84, 120), lambda t: (0, 0)),         # fc2 w (bf16)
                pl.BlockSpec((84, 1), lambda t: (0, 0)),
                pl.BlockSpec((10, 84), lambda t: (0, 0)),          # fc3 w (bf16)
                pl.BlockSpec((10, 1), lambda t: (0, 0)),
            ],
            out_specs=pl.BlockSpec((1, 10, tb), lambda t: (t, 0, 0)),
            scratch_shapes=[
                pltpu.VMEM((160, 24 * tb), jnp.bfloat16),  # rhs1: stacked conv1 input
                pltpu.VMEM((144, 24 * tb), jnp.float32),   # acc1: conv1 pre-activation
                pltpu.VMEM((80, 12 * tb), jnp.bfloat16),   # p1:   pooled conv1 (conv2 layout)
                pltpu.VMEM((400, 8 * tb), jnp.bfloat16),   # rhs2: stacked conv2 input
                pltpu.VMEM((128, 8 * tb), jnp.float32),    # acc2: conv2 pre-activation
                pltpu.VMEM((256, tb), jnp.bfloat16),       # flat: fc1 input (bf16)
            ],
        ),
        compiler_params=pltpu.CompilerParams(
            dimension_semantics=("parallel",),
            vmem_limit_bytes=32 * 1024 * 1024,
        ),
    )(xT, t1, b1r, t2, b2r, fw1, fb1, fw2, fb2, fw3, fb3)
    return out.transpose(0, 2, 1).reshape(b_pad, 10)[:B]           # (B, 10)


# ----------------------------- parameter setup ----------------------------- #

def init_params(key):
    """Deterministic synthetic init matching the PyTorch module's shapes."""
    def uniform(k, shape, fan_in):
        bound = 1.0 / jnp.sqrt(jnp.float32(fan_in))
        return jax.random.uniform(k, shape, jnp.float32, -bound, bound)

    ks = jax.random.split(key, 10)
    return {
        "conv1_w": uniform(ks[0], (6, 1, 5, 5), 1 * 5 * 5),
        "conv1_b": uniform(ks[1], (6,), 1 * 5 * 5),
        "conv2_w": uniform(ks[2], (16, 6, 5, 5), 6 * 5 * 5),
        "conv2_b": uniform(ks[3], (16,), 6 * 5 * 5),
        "fc1_w": uniform(ks[4], (120, 16 * 4 * 4), 16 * 4 * 4),
        "fc1_b": uniform(ks[5], (120,), 16 * 4 * 4),
        "fc2_w": uniform(ks[6], (84, 120), 120),
        "fc2_b": uniform(ks[7], (84,), 120),
        "fc3_w": uniform(ks[8], (10, 84), 84),
        "fc3_b": uniform(ks[9], (10,), 84),
    }


# ----------------------------- JAX reference -------------------------------- #

def _reference_forward(params, x):
    """Pure-JAX (XLA) reference of the PyTorch module, for a sanity check."""
    y = lax.conv_general_dilated(x, params["conv1_w"], (1, 1), "VALID",
                                 dimension_numbers=("NCHW", "OIHW", "NCHW"))
    y = jax.nn.relu(y + params["conv1_b"][None, :, None, None])
    y = lax.reduce_window(y, -jnp.inf, lax.max, (1, 1, 2, 2), (1, 1, 2, 2), "VALID")
    y = lax.conv_general_dilated(y, params["conv2_w"], (1, 1), "VALID",
                                 dimension_numbers=("NCHW", "OIHW", "NCHW"))
    y = jax.nn.relu(y + params["conv2_b"][None, :, None, None])
    y = lax.reduce_window(y, -jnp.inf, lax.max, (1, 1, 2, 2), (1, 1, 2, 2), "VALID")
    y = y.reshape(y.shape[0], -1)
    y = jax.nn.relu(y @ params["fc1_w"].T + params["fc1_b"])
    y = jax.nn.relu(y @ params["fc2_w"].T + params["fc2_b"])
    return y @ params["fc3_w"].T + params["fc3_b"]


if __name__ == "__main__":
    params = init_params(jax.random.PRNGKey(42))

    # Small smoke test (B=2).
    x_small = jax.random.normal(jax.random.PRNGKey(0), (2, 1, 28, 28), dtype=jnp.float32)
    out = jax.block_until_ready(conv_network_forward(params, x_small))
    assert out.shape == (2, 10), out.shape
    assert out.dtype == jnp.float32
    ref = _reference_forward(params, x_small)
    err = float(jnp.max(jnp.abs(out - ref)))
    assert err < 5e-2, f"B=2 max abs error vs reference: {err}"

    # Larger, non-tile-multiple batch: exercises tb=128, grid > 1 and batch padding.
    x_big = jax.random.normal(jax.random.PRNGKey(1), (130, 1, 28, 28), dtype=jnp.float32)
    out_big = jax.block_until_ready(conv_network_forward(params, x_big))
    assert out_big.shape == (130, 10), out_big.shape
    ref_big = _reference_forward(params, x_big)
    err_big = float(jnp.max(jnp.abs(out_big - ref_big)))
    assert err_big < 5e-2, f"B=130 max abs error vs reference: {err_big}"

    print("KERNEL_OK")
</pallas_src>

<mosaic_0001>
module attributes {stable_mosaic.version = 11 : i64} {
  func.func @_lenet_mxu_kernel(%arg0: i32, %arg1: memref<32x1792xbf16, #tpu.memory_space<vmem>>, %arg2: memref<144x160xbf16, #tpu.memory_space<vmem>>, %arg3: memref<72x1xf32, #tpu.memory_space<vmem>>, %arg4: memref<128x400xbf16, #tpu.memory_space<vmem>>, %arg5: memref<64x1xf32, #tpu.memory_space<vmem>>, %arg6: memref<120x256xbf16, #tpu.memory_space<vmem>>, %arg7: memref<120x1xf32, #tpu.memory_space<vmem>>, %arg8: memref<84x120xbf16, #tpu.memory_space<vmem>>, %arg9: memref<84x1xf32, #tpu.memory_space<vmem>>, %arg10: memref<10x84xbf16, #tpu.memory_space<vmem>>, %arg11: memref<10x1xf32, #tpu.memory_space<vmem>>, %arg12: memref<1x10x64xf32, #tpu.memory_space<vmem>>, %arg13: memref<160x1536xbf16, #tpu.memory_space<vmem>>, %arg14: memref<144x1536xf32, #tpu.memory_space<vmem>>, %arg15: memref<80x768xbf16, #tpu.memory_space<vmem>>, %arg16: memref<400x512xbf16, #tpu.memory_space<vmem>>, %arg17: memref<128x512xf32, #tpu.memory_space<vmem>>, %arg18: memref<256x64xbf16, #tpu.memory_space<vmem>>) attributes {dimension_semantics = [#tpu.dimension_semantics<parallel>], iteration_bounds = array<i64: 1>, scalar_prefetch = 0 : i64, scratch_operands = 6 : i64, tpu.core_type = #tpu.core_type<tc>, window_params = [{transform_indices = @transform_0, window_bounds = array<i64: 32, 1792>}, {pipeline_mode = #tpu.pipeline_mode<synchronous>, transform_indices = @transform_1, window_bounds = array<i64: 144, 160>}, {pipeline_mode = #tpu.pipeline_mode<synchronous>, transform_indices = @transform_2, window_bounds = array<i64: 72, 1>}, {pipeline_mode = #tpu.pipeline_mode<synchronous>, transform_indices = @transform_3, window_bounds = array<i64: 128, 400>}, {pipeline_mode = #tpu.pipeline_mode<synchronous>, transform_indices = @transform_4, window_bounds = array<i64: 64, 1>}, {pipeline_mode = #tpu.pipeline_mode<synchronous>, transform_indices = @transform_5, window_bounds = array<i64: 120, 256>}, {pipeline_mode = #tpu.pipeline_mode<synchronous>, transform_indices = @transform_6, window_bounds = array<i64: 120, 1>}, {pipeline_mode = #tpu.pipeline_mode<synchronous>, transform_indices = @transform_7, window_bounds = array<i64: 84, 120>}, {pipeline_mode = #tpu.pipeline_mode<synchronous>, transform_indices = @transform_8, window_bounds = array<i64: 84, 1>}, {pipeline_mode = #tpu.pipeline_mode<synchronous>, transform_indices = @transform_9, window_bounds = array<i64: 10, 84>}, {pipeline_mode = #tpu.pipeline_mode<synchronous>, transform_indices = @transform_10, window_bounds = array<i64: 10, 1>}, {transform_indices = @transform_11, window_bounds = array<i64: 1, 10, 64>}]} {
    %c0 = arith.constant 0 : index
    %c0_0 = arith.constant 0 : index
    %0 = vector.load %arg1[%c0, %c0_0] : memref<32x1792xbf16, #tpu.memory_space<vmem>>, vector<32x1536xbf16>
    %c0_1 = arith.constant 0 : index
    %c0_2 = arith.constant 0 : index
    %1 = vector.load %arg13[%c0_1, %c0_2] : memref<160x1536xbf16, #tpu.memory_space<vmem>>, vector<32x1536xbf16>
    tpu.vector_store %arg13[%c0_1, %c0_2], %0 {strides = array<i32>} : memref<160x1536xbf16, #tpu.memory_space<vmem>>, vector<32x1536xbf16>,
    %c0_3 = arith.constant 0 : index
    %c64 = arith.constant 64 : index
    %2 = vector.load %arg1[%c0_3, %c64] : memref<32x1792xbf16, #tpu.memory_space<vmem>>, vector<32x1536xbf16>
    %c32 = arith.constant 32 : index
    %c0_4 = arith.constant 0 : index
    %3 = vector.load %arg13[%c32, %c0_4] : memref<160x1536xbf16, #tpu.memory_space<vmem>>, vector<32x1536xbf16>
    tpu.vector_store %arg13[%c32, %c0_4], %2 {strides = array<i32>} : memref<160x1536xbf16, #tpu.memory_space<vmem>>, vector<32x1536xbf16>,
    %c0_5 = arith.constant 0 : index
    %c128 = arith.constant 128 : index
    %4 = vector.load %arg1[%c0_5, %c128] : memref<32x1792xbf16, #tpu.memory_space<vmem>>, vector<32x1536xbf16>
    %c64_6 = arith.constant 64 : index
    %c0_7 = arith.constant 0 : index
    %5 = vector.load %arg13[%c64_6, %c0_7] : memref<160x1536xbf16, #tpu.memory_space<vmem>>, vector<32x1536xbf16>
    tpu.vector_store %arg13[%c64_6, %c0_7], %4 {strides = array<i32>} : memref<160x1536xbf16, #tpu.memory_space<vmem>>, vector<32x1536xbf16>,
    %c0_8 = arith.constant 0 : index
    %c192 = arith.constant 192 : index
    %6 = vector.load %arg1[%c0_8, %c192] : memref<32x1792xbf16, #tpu.memory_space<vmem>>, vector<32x1536xbf16>
    %c96 = arith.constant 96 : index
    %c0_9 = arith.constant 0 : index
    %7 = vector.load %arg13[%c96, %c0_9] : memref<160x1536xbf16, #tpu.memory_space<vmem>>, vector<32x1536xbf16>
    tpu.vector_store %arg13[%c96, %c0_9], %6 {strides = array<i32>} : memref<160x1536xbf16, #tpu.memory_space<vmem>>, vector<32x1536xbf16>,
    %c0_10 = arith.constant 0 : index
    %c256 = arith.constant 256 : index
    %8 = vector.load %arg1[%c0_10, %c256] : memref<32x1792xbf16, #tpu.memory_space<vmem>>, vector<32x1536xbf16>
    %c128_11 = arith.constant 128 : index
    %c0_12 = arith.constant 0 : index
    %9 = vector.load %arg13[%c128_11, %c0_12] : memref<160x1536xbf16, #tpu.memory_space<vmem>>, vector<32x1536xbf16>
    tpu.vector_store %arg13[%c128_11, %c0_12], %8 {strides = array<i32>} : memref<160x1536xbf16, #tpu.memory_space<vmem>>, vector<32x1536xbf16>,
    %c0_13 = arith.constant 0 : index
    %c0_14 = arith.constant 0 : index
    %10 = vector.load %arg2[%c0_13, %c0_14] : memref<144x160xbf16, #tpu.memory_space<vmem>>, vector<144x160xbf16>
    %c0_15 = arith.constant 0 : index
    %c0_16 = arith.constant 0 : index
    %11 = vector.load %arg13[%c0_15, %c0_16] : memref<160x1536xbf16, #tpu.memory_space<vmem>>, vector<160x1536xbf16>
    %cst = arith.constant dense<0.000000e+00> : vector<144x1536xf32>
    %12 = tpu.matmul %10, %11, %cst {dimension_numbers = #tpu.dot_dimension_numbers<[1], [0], [0], [1], [0, 0, 1, 1], [], []>} : vector<144x160xbf16>, vector<160x1536xbf16>, vector<144x1536xf32> -> vector<144x1536xf32>
    %c0_17 = arith.constant 0 : index
    %c0_18 = arith.constant 0 : index
    %13 = vector.load %arg14[%c0_17, %c0_18] : memref<144x1536xf32, #tpu.memory_space<vmem>>, vector<144x1536xf32>
    tpu.vector_store %arg14[%c0_17, %c0_18], %12 {strides = array<i32>} : memref<144x1536xf32, #tpu.memory_space<vmem>>, vector<144x1536xf32>,
    %cst_19 = arith.constant 0.000000e+00 : bf16
    %14 = vector.broadcast %cst_19 : bf16 to vector<8x768xbf16>
    %c72 = arith.constant 72 : index
    %c0_20 = arith.constant 0 : index
    %15 = vector.load %arg15[%c72, %c0_20] : memref<80x768xbf16, #tpu.memory_space<vmem>>, vector<8x768xbf16>
    tpu.vector_store %arg15[%c72, %c0_20], %14 {strides = array<i32>} : memref<80x768xbf16, #tpu.memory_space<vmem>>, vector<8x768xbf16>,
    %c0_21 = arith.constant 0 : index
    %c0_22 = arith.constant 0 : index
    %16 = vector.load %arg3[%c0_21, %c0_22] : memref<72x1xf32, #tpu.memory_space<vmem>>, vector<72x1xf32>
    %17 = vector.shape_cast %16 : vector<72x1xf32> to vector<72x1xf32>
    %18 = vector.broadcast %17 : vector<72x1xf32> to vector<72x64xf32>
    %c0_23 = arith.constant 0 : index
    %c0_24 = arith.constant 0 : index
    %19 = vector.load %arg14[%c0_23, %c0_24] : memref<144x1536xf32, #tpu.memory_space<vmem>>, vector<144x64xf32>
    %c0_25 = arith.constant 0 : index
    %c64_26 = arith.constant 64 : index
    %20 = vector.load %arg14[%c0_25, %c64_26] : memref<144x1536xf32, #tpu.memory_space<vmem>>, vector<144x64xf32>
    %21 = arith.maximumf %19, %20 : vector<144x64xf32>
    %22 = vector.extract_strided_slice %21 {offsets = [0, 0], sizes = [72, 64], strides = [1, 1]} : vector<144x64xf32> to vector<72x64xf32>
    %23 = vector.extract_strided_slice %21 {offsets = [72, 0], sizes = [72, 64], strides = [1, 1]} : vector<144x64xf32> to vector<72x64xf32>
    %24 = arith.maximumf %22, %23 : vector<72x64xf32>
    %25 = arith.addf %24, %18 : vector<72x64xf32>
    %cst_27 = arith.constant 0.000000e+00 : f32
    %26 = vector.broadcast %cst_27 : f32 to vector<72x64xf32>
    %27 = arith.maximumf %25, %26 : vector<72x64xf32>
    %28 = arith.truncf %27 : vector<72x64xf32> to vector<72x64xbf16>
    %c0_28 = arith.constant 0 : index
    %c0_29 = arith.constant 0 : index
    %29 = vector.load %arg15[%c0_28, %c0_29] : memref<80x768xbf16, #tpu.memory_space<vmem>>, vector<72x64xbf16>
    tpu.vector_store %arg15[%c0_28, %c0_29], %28 {strides = array<i32>} : memref<80x768xbf16, #tpu.memory_space<vmem>>, vector<72x64xbf16>,
    %c0_30 = arith.constant 0 : index
    %c128_31 = arith.constant 128 : index
    %30 = vector.load %arg14[%c0_30, %c128_31] : memref<144x1536xf32, #tpu.memory_space<vmem>>, vector<144x64xf32>
    %c0_32 = arith.constant 0 : index
    %c192_33 = arith.constant 192 : index
    %31 = vector.load %arg14[%c0_32, %c192_33] : memref<144x1536xf32, #tpu.memory_space<vmem>>, vector<144x64xf32>
    %32 = arith.maximumf %30, %31 : vector<144x64xf32>
    %33 = vector.extract_strided_slice %32 {offsets = [0, 0], sizes = [72, 64], strides = [1, 1]} : vector<144x64xf32> to vector<72x64xf32>
    %34 = vector.extract_strided_slice %32 {offsets = [72, 0], sizes = [72, 64], strides = [1, 1]} : vector<144x64xf32> to vector<72x64xf32>
    %35 = arith.maximumf %33, %34 : vector<72x64xf32>
    %36 = arith.addf %35, %18 : vector<72x64xf32>
    %cst_34 = arith.constant 0.000000e+00 : f32
    %37 = vector.broadcast %cst_34 : f32 to vector<72x64xf32>
    %38 = arith.maximumf %36, %37 : vector<72x64xf32>
    %39 = arith.truncf %38 : vector<72x64xf32> to vector<72x64xbf16>
    %c0_35 = arith.constant 0 : index
    %c64_36 = arith.constant 64 : index
    %40 = vector.load %arg15[%c0_35, %c64_36] : memref<80x768xbf16, #tpu.memory_space<vmem>>, vector<72x64xbf16>
    tpu.vector_store %arg15[%c0_35, %c64_36], %39 {strides = array<i32>} : memref<80x768xbf16, #tpu.memory_space<vmem>>, vector<72x64xbf16>,
    %c0_37 = arith.constant 0 : index
    %c256_38 = arith.constant 256 : index
    %41 = vector.load %arg14[%c0_37, %c256_38] : memref<144x1536xf32, #tpu.memory_space<vmem>>, vector<144x64xf32>
    %c0_39 = arith.constant 0 : index
    %c320 = arith.constant 320 : index
    %42 = vector.load %arg14[%c0_39, %c320] : memref<144x1536xf32, #tpu.memory_space<vmem>>, vector<144x64xf32>
    %43 = arith.maximumf %41, %42 : vector<144x64xf32>
    %44 = vector.extract_strided_slice %43 {offsets = [0, 0], sizes = [72, 64], strides = [1, 1]} : vector<144x64xf32> to vector<72x64xf32>
    %45 = vector.extract_strided_slice %43 {offsets = [72, 0], sizes = [72, 64], strides = [1, 1]} : vector<144x64xf32> to vector<72x64xf32>
    %46 = arith.maximumf %44, %45 : vector<72x64xf32>
    %47 = arith.addf %46, %18 : vector<72x64xf32>
    %cst_40 = arith.constant 0.000000e+00 : f32
    %48 = vector.broadcast %cst_40 : f32 to vector<72x64xf32>
    %49 = arith.maximumf %47, %48 : vector<72x64xf32>
    %50 = arith.truncf %49 : vector<72x64xf32> to vector<72x64xbf16>
    %c0_41 = arith.constant 0 : index
    %c128_42 = arith.constant 128 : index
    %51 = vector.load %arg15[%c0_41, %c128_42] : memref<80x768xbf16, #tpu.memory_space<vmem>>, vector<72x64xbf16>
    tpu.vector_store %arg15[%c0_41, %c128_42], %50 {strides = array<i32>} : memref<80x768xbf16, #tpu.memory_space<vmem>>, vector<72x64xbf16>,
    %c0_43 = arith.constant 0 : index
    %c384 = arith.constant 384 : index
    %52 = vector.load %arg14[%c0_43, %c384] : memref<144x1536xf32, #tpu.memory_space<vmem>>, vector<144x64xf32>
    %c0_44 = arith.constant 0 : index
    %c448 = arith.constant 448 : index
    %53 = vector.load %arg14[%c0_44, %c448] : memref<144x1536xf32, #tpu.memory_space<vmem>>, vector<144x64xf32>
    %54 = arith.maximumf %52, %53 : vector<144x64xf32>
    %55 = vector.extract_strided_slice %54 {offsets = [0, 0], sizes = [72, 64], strides = [1, 1]} : vector<144x64xf32> to vector<72x64xf32>
    %56 = vector.extract_strided_slice %54 {offsets = [72, 0], sizes = [72, 64], strides = [1, 1]} : vector<144x64xf32> to vector<72x64xf32>
    %57 = arith.maximumf %55, %56 : vector<72x64xf32>
    %58 = arith.addf %57, %18 : vector<72x64xf32>
    %cst_45 = arith.constant 0.000000e+00 : f32
    %59 = vector.broadcast %cst_45 : f32 to vector<72x64xf32>
    %60 = arith.maximumf %58, %59 : vector<72x64xf32>
    %61 = arith.truncf %60 : vector<72x64xf32> to vector<72x64xbf16>
    %c0_46 = arith.constant 0 : index
    %c192_47 = arith.constant 192 : index
    %62 = vector.load %arg15[%c0_46, %c192_47] : memref<80x768xbf16, #tpu.memory_space<vmem>>, vector<72x64xbf16>
    tpu.vector_store %arg15[%c0_46, %c192_47], %61 {strides = array<i32>} : memref<80x768xbf16, #tpu.memory_space<vmem>>, vector<72x64xbf16>,
    %c0_48 = arith.constant 0 : index
    %c512 = arith.constant 512 : index
    %63 = vector.load %arg14[%c0_48, %c512] : memref<144x1536xf32, #tpu.memory_space<vmem>>, vector<144x64xf32>
    %c0_49 = arith.constant 0 : index
    %c576 = arith.constant 576 : index
    %64 = vector.load %arg14[%c0_49, %c576] : memref<144x1536xf32, #tpu.memory_space<vmem>>, vector<144x64xf32>
    %65 = arith.maximumf %63, %64 : vector<144x64xf32>
    %66 = vector.extract_strided_slice %65 {offsets = [0, 0], sizes = [72, 64], strides = [1, 1]} : vector<144x64xf32> to vector<72x64xf32>
    %67 = vector.extract_strided_slice %65 {offsets = [72, 0], sizes = [72, 64], strides = [1, 1]} : vector<144x64xf32> to vector<72x64xf32>
    %68 = arith.maximumf %66, %67 : vector<72x64xf32>
    %69 = arith.addf %68, %18 : vector<72x64xf32>
    %cst_50 = arith.constant 0.000000e+00 : f32
    %70 = vector.broadcast %cst_50 : f32 to vector<72x64xf32>
    %71 = arith.maximumf %69, %70 : vector<72x64xf32>
    %72 = arith.truncf %71 : vector<72x64xf32> to vector<72x64xbf16>
    %c0_51 = arith.constant 0 : index
    %c256_52 = arith.constant 256 : index
    %73 = vector.load %arg15[%c0_51, %c256_52] : memref<80x768xbf16, #tpu.memory_space<vmem>>, vector<72x64xbf16>
    tpu.vector_store %arg15[%c0_51, %c256_52], %72 {strides = array<i32>} : memref<80x768xbf16, #tpu.memory_space<vmem>>, vector<72x64xbf16>,
    %c0_53 = arith.constant 0 : index
    %c640 = arith.constant 640 : index
    %74 = vector.load %arg14[%c0_53, %c640] : memref<144x1536xf32, #tpu.memory_space<vmem>>, vector<144x64xf32>
    %c0_54 = arith.constant 0 : index
    %c704 = arith.constant 704 : index
    %75 = vector.load %arg14[%c0_54, %c704] : memref<144x1536xf32, #tpu.memory_space<vmem>>, vector<144x64xf32>
    %76 = arith.maximumf %74, %75 : vector<144x64xf32>
    %77 = vector.extract_strided_slice %76 {offsets = [0, 0], sizes = [72, 64], strides = [1, 1]} : vector<144x64xf32> to vector<72x64xf32>
    %78 = vector.extract_strided_slice %76 {offsets = [72, 0], sizes = [72, 64], strides = [1, 1]} : vector<144x64xf32> to vector<72x64xf32>
    %79 = arith.maximumf %77, %78 : vector<72x64xf32>
    %80 = arith.addf %79, %18 : vector<72x64xf32>
    %cst_55 = arith.constant 0.000000e+00 : f32
    %81 = vector.broadcast %cst_55 : f32 to vector<72x64xf32>
    %82 = arith.maximumf %80, %81 : vector<72x64xf32>
    %83 = arith.truncf %82 : vector<72x64xf32> to vector<72x64xbf16>
    %c0_56 = arith.constant 0 : index
    %c320_57 = arith.constant 320 : index
    %84 = vector.load %arg15[%c0_56, %c320_57] : memref<80x768xbf16, #tpu.memory_space<vmem>>, vector<72x64xbf16>
    tpu.vector_store %arg15[%c0_56, %c320_57], %83 {strides = array<i32>} : memref<80x768xbf16, #tpu.memory_space<vmem>>, vector<72x64xbf16>,
    %c0_58 = arith.constant 0 : index
    %c768 = arith.constant 768 : index
    %85 = vector.load %arg14[%c0_58, %c768] : memref<144x1536xf32, #tpu.memory_space<vmem>>, vector<144x64xf32>
    %c0_59 = arith.constant 0 : index
    %c832 = arith.constant 832 : index
    %86 = vector.load %arg14[%c0_59, %c832] : memref<144x1536xf32, #tpu.memory_space<vmem>>, vector<144x64xf32>
    %87 = arith.maximumf %85, %86 : vector<144x64xf32>
    %88 = vector.extract_strided_slice %87 {offsets = [0, 0], sizes = [72, 64], strides = [1, 1]} : vector<144x64xf32> to vector<72x64xf32>
    %89 = vector.extract_strided_slice %87 {offsets = [72, 0], sizes = [72, 64], strides = [1, 1]} : vector<144x64xf32> to vector<72x64xf32>
    %90 = arith.maximumf %88, %89 : vector<72x64xf32>
    %91 = arith.addf %90, %18 : vector<72x64xf32>
    %cst_60 = arith.constant 0.000000e+00 : f32
    %92 = vector.broadcast %cst_60 : f32 to vector<72x64xf32>
    %93 = arith.maximumf %91, %92 : vector<72x64xf32>
    %94 = arith.truncf %93 : vector<72x64xf32> to vector<72x64xbf16>
    %c0_61 = arith.constant 0 : index
    %c384_62 = arith.constant 384 : index
    %95 = vector.load %arg15[%c0_61, %c384_62] : memref<80x768xbf16, #tpu.memory_space<vmem>>, vector<72x64xbf16>
    tpu.vector_store %arg15[%c0_61, %c384_62], %94 {strides = array<i32>} : memref<80x768xbf16, #tpu.memory_space<vmem>>, vector<72x64xbf16>,
    %c0_63 = arith.constant 0 : index
    %c896 = arith.constant 896 : index
    %96 = vector.load %arg14[%c0_63, %c896] : memref<144x1536xf32, #tpu.memory_space<vmem>>, vector<144x64xf32>
    %c0_64 = arith.constant 0 : index
    %c960 = arith.constant 960 : index
    %97 = vector.load %arg14[%c0_64, %c960] : memref<144x1536xf32, #tpu.memory_space<vmem>>, vector<144x64xf32>
    %98 = arith.maximumf %96, %97 : vector<144x64xf32>
    %99 = vector.extract_strided_slice %98 {offsets = [0, 0], sizes = [72, 64], strides = [1, 1]} : vector<144x64xf32> to vector<72x64xf32>
    %100 = vector.extract_strided_slice %98 {offsets = [72, 0], sizes = [72, 64], strides = [1, 1]} : vector<144x64xf32> to vector<72x64xf32>
    %101 = arith.maximumf %99, %100 : vector<72x64xf32>
    %102 = arith.addf %101, %18 : vector<72x64xf32>
    %cst_65 = arith.constant 0.000000e+00 : f32
    %103 = vector.broadcast %cst_65 : f32 to vector<72x64xf32>
    %104 = arith.maximumf %102, %103 : vector<72x64xf32>
    %105 = arith.truncf %104 : vector<72x64xf32> to vector<72x64xbf16>
    %c0_66 = arith.constant 0 : index
    %c448_67 = arith.constant 448 : index
    %106 = vector.load %arg15[%c0_66, %c448_67] : memref<80x768xbf16, #tpu.memory_space<vmem>>, vector<72x64xbf16>
    tpu.vector_store %arg15[%c0_66, %c448_67], %105 {strides = array<i32>} : memref<80x768xbf16, #tpu.memory_space<vmem>>, vector<72x64xbf16>,
    %c0_68 = arith.constant 0 : index
    %c1024 = arith.constant 1024 : index
    %107 = vector.load %arg14[%c0_68, %c1024] : memref<144x1536xf32, #tpu.memory_space<vmem>>, vector<144x64xf32>
    %c0_69 = arith.constant 0 : index
    %c1088 = arith.constant 1088 : index
    %108 = vector.load %arg14[%c0_69, %c1088] : memref<144x1536xf32, #tpu.memory_space<vmem>>, vector<144x64xf32>
    %109 = arith.maximumf %107, %108 : vector<144x64xf32>
    %110 = vector.extract_strided_slice %109 {offsets = [0, 0], sizes = [72, 64], strides = [1, 1]} : vector<144x64xf32> to vector<72x64xf32>
    %111 = vector.extract_strided_slice %109 {offsets = [72, 0], sizes = [72, 64], strides = [1, 1]} : vector<144x64xf32> to vector<72x64xf32>
    %112 = arith.maximumf %110, %111 : vector<72x64xf32>
    %113 = arith.addf %112, %18 : vector<72x64xf32>
    %cst_70 = arith.constant 0.000000e+00 : f32
    %114 = vector.broadcast %cst_70 : f32 to vector<72x64xf32>
    %115 = arith.maximumf %113, %114 : vector<72x64xf32>
    %116 = arith.truncf %115 : vector<72x64xf32> to vector<72x64xbf16>
    %c0_71 = arith.constant 0 : index
    %c512_72 = arith.constant 512 : index
    %117 = vector.load %arg15[%c0_71, %c512_72] : memref<80x768xbf16, #tpu.memory_space<vmem>>, vector<72x64xbf16>
    tpu.vector_store %arg15[%c0_71, %c512_72], %116 {strides = array<i32>} : memref<80x768xbf16, #tpu.memory_space<vmem>>, vector<72x64xbf16>,
    %c0_73 = arith.constant 0 : index
    %c1152 = arith.constant 1152 : index
    %118 = vector.load %arg14[%c0_73, %c1152] : memref<144x1536xf32, #tpu.memory_space<vmem>>, vector<144x64xf32>
    %c0_74 = arith.constant 0 : index
    %c1216 = arith.constant 1216 : index
    %119 = vector.load %arg14[%c0_74, %c1216] : memref<144x1536xf32, #tpu.memory_space<vmem>>, vector<144x64xf32>
    %120 = arith.maximumf %118, %119 : vector<144x64xf32>
    %121 = vector.extract_strided_slice %120 {offsets = [0, 0], sizes = [72, 64], strides = [1, 1]} : vector<144x64xf32> to vector<72x64xf32>
    %122 = vector.extract_strided_slice %120 {offsets = [72, 0], sizes = [72, 64], strides = [1, 1]} : vector<144x64xf32> to vector<72x64xf32>
    %123 = arith.maximumf %121, %122 : vector<72x64xf32>
    %124 = arith.addf %123, %18 : vector<72x64xf32>
    %cst_75 = arith.constant 0.000000e+00 : f32
    %125 = vector.broadcast %cst_75 : f32 to vector<72x64xf32>
    %126 = arith.maximumf %124, %125 : vector<72x64xf32>
    %127 = arith.truncf %126 : vector<72x64xf32> to vector<72x64xbf16>
    %c0_76 = arith.constant 0 : index
    %c576_77 = arith.constant 576 : index
    %128 = vector.load %arg15[%c0_76, %c576_77] : memref<80x768xbf16, #tpu.memory_space<vmem>>, vector<72x64xbf16>
    tpu.vector_store %arg15[%c0_76, %c576_77], %127 {strides = array<i32>} : memref<80x768xbf16, #tpu.memory_space<vmem>>, vector<72x64xbf16>,
    %c0_78 = arith.constant 0 : index
    %c1280 = arith.constant 1280 : index
    %129 = vector.load %arg14[%c0_78, %c1280] : memref<144x1536xf32, #tpu.memory_space<vmem>>, vector<144x64xf32>
    %c0_79 = arith.constant 0 : index
    %c1344 = arith.constant 1344 : index
    %130 = vector.load %arg14[%c0_79, %c1344] : memref<144x1536xf32, #tpu.memory_space<vmem>>, vector<144x64xf32>
    %131 = arith.maximumf %129, %130 : vector<144x64xf32>
    %132 = vector.extract_strided_slice %131 {offsets = [0, 0], sizes = [72, 64], strides = [1, 1]} : vector<144x64xf32> to vector<72x64xf32>
    %133 = vector.extract_strided_slice %131 {offsets = [72, 0], sizes = [72, 64], strides = [1, 1]} : vector<144x64xf32> to vector<72x64xf32>
    %134 = arith.maximumf %132, %133 : vector<72x64xf32>
    %135 = arith.addf %134, %18 : vector<72x64xf32>
    %cst_80 = arith.constant 0.000000e+00 : f32
    %136 = vector.broadcast %cst_80 : f32 to vector<72x64xf32>
    %137 = arith.maximumf %135, %136 : vector<72x64xf32>
    %138 = arith.truncf %137 : vector<72x64xf32> to vector<72x64xbf16>
    %c0_81 = arith.constant 0 : index
    %c640_82 = arith.constant 640 : index
    %139 = vector.load %arg15[%c0_81, %c640_82] : memref<80x768xbf16, #tpu.memory_space<vmem>>, vector<72x64xbf16>
    tpu.vector_store %arg15[%c0_81, %c640_82], %138 {strides = array<i32>} : memref<80x768xbf16, #tpu.memory_space<vmem>>, vector<72x64xbf16>,
    %c0_83 = arith.constant 0 : index
    %c1408 = arith.constant 1408 : index
    %140 = vector.load %arg14[%c0_83, %c1408] : memref<144x1536xf32, #tpu.memory_space<vmem>>, vector<144x64xf32>
    %c0_84 = arith.constant 0 : index
    %c1472 = arith.constant 1472 : index
    %141 = vector.load %arg14[%c0_84, %c1472] : memref<144x1536xf32, #tpu.memory_space<vmem>>, vector<144x64xf32>
    %142 = arith.maximumf %140, %141 : vector<144x64xf32>
    %143 = vector.extract_strided_slice %142 {offsets = [0, 0], sizes = [72, 64], strides = [1, 1]} : vector<144x64xf32> to vector<72x64xf32>
    %144 = vector.extract_strided_slice %142 {offsets = [72, 0], sizes = [72, 64], strides = [1, 1]} : vector<144x64xf32> to vector<72x64xf32>
    %145 = arith.maximumf %143, %144 : vector<72x64xf32>
    %146 = arith.addf %145, %18 : vector<72x64xf32>
    %cst_85 = arith.constant 0.000000e+00 : f32
    %147 = vector.broadcast %cst_85 : f32 to vector<72x64xf32>
    %148 = arith.maximumf %146, %147 : vector<72x64xf32>
    %149 = arith.truncf %148 : vector<72x64xf32> to vector<72x64xbf16>
    %c0_86 = arith.constant 0 : index
    %c704_87 = arith.constant 704 : index
    %150 = vector.load %arg15[%c0_86, %c704_87] : memref<80x768xbf16, #tpu.memory_space<vmem>>, vector<72x64xbf16>
    tpu.vector_store %arg15[%c0_86, %c704_87], %149 {strides = array<i32>} : memref<80x768xbf16, #tpu.memory_space<vmem>>, vector<72x64xbf16>,
    %c0_88 = arith.constant 0 : index
    %c0_89 = arith.constant 0 : index
    %151 = vector.load %arg15[%c0_88, %c0_89] : memref<80x768xbf16, #tpu.memory_space<vmem>>, vector<80x512xbf16>
    %c0_90 = arith.constant 0 : index
    %c0_91 = arith.constant 0 : index
    %152 = vector.load %arg16[%c0_90, %c0_91] : memref<400x512xbf16, #tpu.memory_space<vmem>>, vector<80x512xbf16>
    tpu.vector_store %arg16[%c0_90, %c0_91], %151 {strides = array<i32>} : memref<400x512xbf16, #tpu.memory_space<vmem>>, vector<80x512xbf16>,
    %c0_92 = arith.constant 0 : index
    %c64_93 = arith.constant 64 : index
    %153 = vector.load %arg15[%c0_92, %c64_93] : memref<80x768xbf16, #tpu.memory_space<vmem>>, vector<80x512xbf16>
    %c80 = arith.constant 80 : index
    %c0_94 = arith.constant 0 : index
    %154 = vector.load %arg16[%c80, %c0_94] : memref<400x512xbf16, #tpu.memory_space<vmem>>, vector<80x512xbf16>
    tpu.vector_store %arg16[%c80, %c0_94], %153 {strides = array<i32>} : memref<400x512xbf16, #tpu.memory_space<vmem>>, vector<80x512xbf16>,
    %c0_95 = arith.constant 0 : index
    %c128_96 = arith.constant 128 : index
    %155 = vector.load %arg15[%c0_95, %c128_96] : memref<80x768xbf16, #tpu.memory_space<vmem>>, vector<80x512xbf16>
    %c160 = arith.constant 160 : index
    %c0_97 = arith.constant 0 : index
    %156 = vector.load %arg16[%c160, %c0_97] : memref<400x512xbf16, #tpu.memory_space<vmem>>, vector<80x512xbf16>
    tpu.vector_store %arg16[%c160, %c0_97], %155 {strides = array<i32>} : memref<400x512xbf16, #tpu.memory_space<vmem>>, vector<80x512xbf16>,
    %c0_98 = arith.constant 0 : index
    %c192_99 = arith.constant 192 : index
    %157 = vector.load %arg15[%c0_98, %c192_99] : memref<80x768xbf16, #tpu.memory_space<vmem>>, vector<80x512xbf16>
    %c240 = arith.constant 240 : index
    %c0_100 = arith.constant 0 : index
    %158 = vector.load %arg16[%c240, %c0_100] : memref<400x512xbf16, #tpu.memory_space<vmem>>, vector<80x512xbf16>
    tpu.vector_store %arg16[%c240, %c0_100], %157 {strides = array<i32>} : memref<400x512xbf16, #tpu.memory_space<vmem>>, vector<80x512xbf16>,
    %c0_101 = arith.constant 0 : index
    %c256_102 = arith.constant 256 : index
    %159 = vector.load %arg15[%c0_101, %c256_102] : memref<80x768xbf16, #tpu.memory_space<vmem>>, vector<80x512xbf16>
    %c320_103 = arith.constant 320 : index
    %c0_104 = arith.constant 0 : index
    %160 = vector.load %arg16[%c320_103, %c0_104] : memref<400x512xbf16, #tpu.memory_space<vmem>>, vector<80x512xbf16>
    tpu.vector_store %arg16[%c320_103, %c0_104], %159 {strides = array<i32>} : memref<400x512xbf16, #tpu.memory_space<vmem>>, vector<80x512xbf16>,
    %c0_105 = arith.constant 0 : index
    %c0_106 = arith.constant 0 : index
    %161 = vector.load %arg4[%c0_105, %c0_106] : memref<128x400xbf16, #tpu.memory_space<vmem>>, vector<128x400xbf16>
    %c0_107 = arith.constant 0 : index
    %c0_108 = arith.constant 0 : index
    %162 = vector.load %arg16[%c0_107, %c0_108] : memref<400x512xbf16, #tpu.memory_space<vmem>>, vector<400x512xbf16>
    %cst_109 = arith.constant dense<0.000000e+00> : vector<128x512xf32>
    %163 = tpu.matmul %161, %162, %cst_109 {dimension_numbers = #tpu.dot_dimension_numbers<[1], [0], [0], [1], [0, 0, 1, 1], [], []>} : vector<128x400xbf16>, vector<400x512xbf16>, vector<128x512xf32> -> vector<128x512xf32>
    %c0_110 = arith.constant 0 : index
    %c0_111 = arith.constant 0 : index
    %164 = vector.load %arg17[%c0_110, %c0_111] : memref<128x512xf32, #tpu.memory_space<vmem>>, vector<128x512xf32>
    tpu.vector_store %arg17[%c0_110, %c0_111], %163 {strides = array<i32>} : memref<128x512xf32, #tpu.memory_space<vmem>>, vector<128x512xf32>,
    %c0_112 = arith.constant 0 : index
    %c0_113 = arith.constant 0 : index
    %165 = vector.load %arg5[%c0_112, %c0_113] : memref<64x1xf32, #tpu.memory_space<vmem>>, vector<64x1xf32>
    %166 = vector.shape_cast %165 : vector<64x1xf32> to vector<64x1xf32>
    %167 = vector.broadcast %166 : vector<64x1xf32> to vector<64x64xf32>
    %c0_114 = arith.constant 0 : index
    %c0_115 = arith.constant 0 : index
    %168 = vector.load %arg17[%c0_114, %c0_115] : memref<128x512xf32, #tpu.memory_space<vmem>>, vector<128x64xf32>
    %c0_116 = arith.constant 0 : index
    %c64_117 = arith.constant 64 : index
    %169 = vector.load %arg17[%c0_116, %c64_117] : memref<128x512xf32, #tpu.memory_space<vmem>>, vector<128x64xf32>
    %170 = arith.maximumf %168, %169 : vector<128x64xf32>
    %171 = vector.extract_strided_slice %170 {offsets = [0, 0], sizes = [64, 64], strides = [1, 1]} : vector<128x64xf32> to vector<64x64xf32>
    %172 = vector.extract_strided_slice %170 {offsets = [64, 0], sizes = [64, 64], strides = [1, 1]} : vector<128x64xf32> to vector<64x64xf32>
    %173 = arith.maximumf %171, %172 : vector<64x64xf32>
    %174 = arith.addf %173, %167 : vector<64x64xf32>
    %cst_118 = arith.constant 0.000000e+00 : f32
    %175 = vector.broadcast %cst_118 : f32 to vector<64x64xf32>
    %176 = arith.maximumf %174, %175 : vector<64x64xf32>
    %177 = arith.truncf %176 : vector<64x64xf32> to vector<64x64xbf16>
    %c0_119 = arith.constant 0 : index
    %c0_120 = arith.constant 0 : index
    %178 = vector.load %arg18[%c0_119, %c0_120] : memref<256x64xbf16, #tpu.memory_space<vmem>>, vector<64x64xbf16>
    tpu.vector_store %arg18[%c0_119, %c0_120], %177 {strides = array<i32>} : memref<256x64xbf16, #tpu.memory_space<vmem>>, vector<64x64xbf16>,
    %c0_121 = arith.constant 0 : index
    %c128_122 = arith.constant 128 : index
    %179 = vector.load %arg17[%c0_121, %c128_122] : memref<128x512xf32, #tpu.memory_space<vmem>>, vector<128x64xf32>
    %c0_123 = arith.constant 0 : index
    %c192_124 = arith.constant 192 : index
    %180 = vector.load %arg17[%c0_123, %c192_124] : memref<128x512xf32, #tpu.memory_space<vmem>>, vector<128x64xf32>
    %181 = arith.maximumf %179, %180 : vector<128x64xf32>
    %182 = vector.extract_strided_slice %181 {offsets = [0, 0], sizes = [64, 64], strides = [1, 1]} : vector<128x64xf32> to vector<64x64xf32>
    %183 = vector.extract_strided_slice %181 {offsets = [64, 0], sizes = [64, 64], strides = [1, 1]} : vector<128x64xf32> to vector<64x64xf32>
    %184 = arith.maximumf %182, %183 : vector<64x64xf32>
    %185 = arith.addf %184, %167 : vector<64x64xf32>
    %cst_125 = arith.constant 0.000000e+00 : f32
    %186 = vector.broadcast %cst_125 : f32 to vector<64x64xf32>
    %187 = arith.maximumf %185, %186 : vector<64x64xf32>
    %188 = arith.truncf %187 : vector<64x64xf32> to vector<64x64xbf16>
    %c64_126 = arith.constant 64 : index
    %c0_127 = arith.constant 0 : index
    %189 = vector.load %arg18[%c64_126, %c0_127] : memref<256x64xbf16, #tpu.memory_space<vmem>>, vector<64x64xbf16>
    tpu.vector_store %arg18[%c64_126, %c0_127], %188 {strides = array<i32>} : memref<256x64xbf16, #tpu.memory_space<vmem>>, vector<64x64xbf16>,
    %c0_128 = arith.constant 0 : index
    %c256_129 = arith.constant 256 : index
    %190 = vector.load %arg17[%c0_128, %c256_129] : memref<128x512xf32, #tpu.memory_space<vmem>>, vector<128x64xf32>
    %c0_130 = arith.constant 0 : index
    %c320_131 = arith.constant 320 : index
    %191 = vector.load %arg17[%c0_130, %c320_131] : memref<128x512xf32, #tpu.memory_space<vmem>>, vector<128x64xf32>
    %192 = arith.maximumf %190, %191 : vector<128x64xf32>
    %193 = vector.extract_strided_slice %192 {offsets = [0, 0], sizes = [64, 64], strides = [1, 1]} : vector<128x64xf32> to vector<64x64xf32>
    %194 = vector.extract_strided_slice %192 {offsets = [64, 0], sizes = [64, 64], strides = [1, 1]} : vector<128x64xf32> to vector<64x64xf32>
    %195 = arith.maximumf %193, %194 : vector<64x64xf32>
    %196 = arith.addf %195, %167 : vector<64x64xf32>
    %cst_132 = arith.constant 0.000000e+00 : f32
    %197 = vector.broadcast %cst_132 : f32 to vector<64x64xf32>
    %198 = arith.maximumf %196, %197 : vector<64x64xf32>
    %199 = arith.truncf %198 : vector<64x64xf32> to vector<64x64xbf16>
    %c128_133 = arith.constant 128 : index
    %c0_134 = arith.constant 0 : index
    %200 = vector.load %arg18[%c128_133, %c0_134] : memref<256x64xbf16, #tpu.memory_space<vmem>>, vector<64x64xbf16>
    tpu.vector_store %arg18[%c128_133, %c0_134], %199 {strides = array<i32>} : memref<256x64xbf16, #tpu.memory_space<vmem>>, vector<64x64xbf16>,
    %c0_135 = arith.constant 0 : index
    %c384_136 = arith.constant 384 : index
    %201 = vector.load %arg17[%c0_135, %c384_136] : memref<128x512xf32, #tpu.memory_space<vmem>>, vector<128x64xf32>
    %c0_137 = arith.constant 0 : index
    %c448_138 = arith.constant 448 : index
    %202 = vector.load %arg17[%c0_137, %c448_138] : memref<128x512xf32, #tpu.memory_space<vmem>>, vector<128x64xf32>
    %203 = arith.maximumf %201, %202 : vector<128x64xf32>
    %204 = vector.extract_strided_slice %203 {offsets = [0, 0], sizes = [64, 64], strides = [1, 1]} : vector<128x64xf32> to vector<64x64xf32>
    %205 = vector.extract_strided_slice %203 {offsets = [64, 0], sizes = [64, 64], strides = [1, 1]} : vector<128x64xf32> to vector<64x64xf32>
    %206 = arith.maximumf %204, %205 : vector<64x64xf32>
    %207 = arith.addf %206, %167 : vector<64x64xf32>
    %cst_139 = arith.constant 0.000000e+00 : f32
    %208 = vector.broadcast %cst_139 : f32 to vector<64x64xf32>
    %209 = arith.maximumf %207, %208 : vector<64x64xf32>
    %210 = arith.truncf %209 : vector<64x64xf32> to vector<64x64xbf16>
    %c192_140 = arith.constant 192 : index
    %c0_141 = arith.constant 0 : index
    %211 = vector.load %arg18[%c192_140, %c0_141] : memref<256x64xbf16, #tpu.memory_space<vmem>>, vector<64x64xbf16>
    tpu.vector_store %arg18[%c192_140, %c0_141], %210 {strides = array<i32>} : memref<256x64xbf16, #tpu.memory_space<vmem>>, vector<64x64xbf16>,
    %c0_142 = arith.constant 0 : index
    %c0_143 = arith.constant 0 : index
    %212 = vector.load %arg6[%c0_142, %c0_143] : memref<120x256xbf16, #tpu.memory_space<vmem>>, vector<120x256xbf16>
    %c0_144 = arith.constant 0 : index
    %c0_145 = arith.constant 0 : index
    %213 = vector.load %arg18[%c0_144, %c0_145] : memref<256x64xbf16, #tpu.memory_space<vmem>>, vector<256x64xbf16>
    %cst_146 = arith.constant dense<0.000000e+00> : vector<120x64xf32>
    %214 = tpu.matmul %212, %213, %cst_146 {dimension_numbers = #tpu.dot_dimension_numbers<[1], [0], [0], [1], [0, 0, 1, 1], [], []>} : vector<120x256xbf16>, vector<256x64xbf16>, vector<120x64xf32> -> vector<120x64xf32>
    %c0_147 = arith.constant 0 : index
    %c0_148 = arith.constant 0 : index
    %215 = vector.load %arg7[%c0_147, %c0_148] : memref<120x1xf32, #tpu.memory_space<vmem>>, vector<120x1xf32>
    %216 = vector.broadcast %215 : vector<120x1xf32> to vector<120x64xf32>
    %217 = arith.addf %214, %216 : vector<120x64xf32>
    %cst_149 = arith.constant 0.000000e+00 : f32
    %218 = vector.broadcast %cst_149 : f32 to vector<120x64xf32>
    %219 = arith.maximumf %217, %218 : vector<120x64xf32>
    %220 = arith.truncf %219 : vector<120x64xf32> to vector<120x64xbf16>
    %c0_150 = arith.constant 0 : index
    %c0_151 = arith.constant 0 : index
    %221 = vector.load %arg8[%c0_150, %c0_151] : memref<84x120xbf16, #tpu.memory_space<vmem>>, vector<84x120xbf16>
    %cst_152 = arith.constant dense<0.000000e+00> : vector<84x64xf32>
    %222 = tpu.matmul %221, %220, %cst_152 {dimension_numbers = #tpu.dot_dimension_numbers<[1], [0], [0], [1], [0, 0, 1, 1], [], []>} : vector<84x120xbf16>, vector<120x64xbf16>, vector<84x64xf32> -> vector<84x64xf32>
    %c0_153 = arith.constant 0 : index
    %c0_154 = arith.constant 0 : index
    %223 = vector.load %arg9[%c0_153, %c0_154] : memref<84x1xf32, #tpu.memory_space<vmem>>, vector<84x1xf32>
    %224 = vector.broadcast %223 : vector<84x1xf32> to vector<84x64xf32>
    %225 = arith.addf %222, %224 : vector<84x64xf32>
    %cst_155 = arith.constant 0.000000e+00 : f32
    %226 = vector.broadcast %cst_155 : f32 to vector<84x64xf32>
    %227 = arith.maximumf %225, %226 : vector<84x64xf32>
    %228 = arith.truncf %227 : vector<84x64xf32> to vector<84x64xbf16>
    %c0_156 = arith.constant 0 : index
    %c0_157 = arith.constant 0 : index
    %229 = vector.load %arg10[%c0_156, %c0_157] : memref<10x84xbf16, #tpu.memory_space<vmem>>, vector<10x84xbf16>
    %cst_158 = arith.constant dense<0.000000e+00> : vector<10x64xf32>
    %230 = tpu.matmul %229, %228, %cst_158 {dimension_numbers = #tpu.dot_dimension_numbers<[1], [0], [0], [1], [0, 0, 1, 1], [], []>} : vector<10x84xbf16>, vector<84x64xbf16>, vector<10x64xf32> -> vector<10x64xf32>
    %c0_159 = arith.constant 0 : index
    %c0_160 = arith.constant 0 : index
    %231 = vector.load %arg11[%c0_159, %c0_160] : memref<10x1xf32, #tpu.memory_space<vmem>>, vector<10x1xf32>
    %232 = vector.broadcast %231 : vector<10x1xf32> to vector<10x64xf32>
    %233 = arith.addf %230, %232 : vector<10x64xf32>
    %c0_161 = arith.constant 0 : index
    %c0_162 = arith.constant 0 : index
    %c0_163 = arith.constant 0 : index
    %234 = vector.load %arg12[%c0_161, %c0_162, %c0_163] : memref<1x10x64xf32, #tpu.memory_space<vmem>>, vector<1x10x64xf32>
    %235 = vector.shape_cast %234 : vector<1x10x64xf32> to vector<10x64xf32>
    %236 = vector.shape_cast %233 : vector<10x64xf32> to vector<1x10x64xf32>
    tpu.vector_store %arg12[%c0_161, %c0_162, %c0_163], %236 {strides = array<i32>} : memref<1x10x64xf32, #tpu.memory_space<vmem>>, vector<1x10x64xf32>,
    return
  }
  func.func @transform_0(%arg0: i32) -> (i32, i32) {
    %c0_i32 = arith.constant 0 : i32
    %c0_i32_0 = arith.constant 0 : i32
    return %c0_i32, %arg0 : i32, i32
  }
  func.func @transform_1(%arg0: i32) -> (i32, i32) {
    %c0_i32 = arith.constant 0 : i32
    %c0_i32_0 = arith.constant 0 : i32
    %c0_i32_1 = arith.constant 0 : i32
    return %c0_i32, %c0_i32_0 : i32, i32
  }
  func.func @transform_2(%arg0: i32) -> (i32, i32) {
    %c0_i32 = arith.constant 0 : i32
    %c0_i32_0 = arith.constant 0 : i32
    %c0_i32_1 = arith.constant 0 : i32
    return %c0_i32, %c0_i32_0 : i32, i32
  }
  func.func @transform_3(%arg0: i32) -> (i32, i32) {
    %c0_i32 = arith.constant 0 : i32
    %c0_i32_0 = arith.constant 0 : i32
    %c0_i32_1 = arith.constant 0 : i32
    return %c0_i32, %c0_i32_0 : i32, i32
  }
  func.func @transform_4(%arg0: i32) -> (i32, i32) {
    %c0_i32 = arith.constant 0 : i32
    %c0_i32_0 = arith.constant 0 : i32
    %c0_i32_1 = arith.constant 0 : i32
    return %c0_i32, %c0_i32_0 : i32, i32
  }
  func.func @transform_5(%arg0: i32) -> (i32, i32) {
    %c0_i32 = arith.constant 0 : i32
    %c0_i32_0 = arith.constant 0 : i32
    %c0_i32_1 = arith.constant 0 : i32
    return %c0_i32, %c0_i32_0 : i32, i32
  }
  func.func @transform_6(%arg0: i32) -> (i32, i32) {
    %c0_i32 = arith.constant 0 : i32
    %c0_i32_0 = arith.constant 0 : i32
    %c0_i32_1 = arith.constant 0 : i32
    return %c0_i32, %c0_i32_0 : i32, i32
  }
  func.func @transform_7(%arg0: i32) -> (i32, i32) {
    %c0_i32 = arith.constant 0 : i32
    %c0_i32_0 = arith.constant 0 : i32
    %c0_i32_1 = arith.constant 0 : i32
    return %c0_i32, %c0_i32_0 : i32, i32
  }
  func.func @transform_8(%arg0: i32) -> (i32, i32) {
    %c0_i32 = arith.constant 0 : i32
    %c0_i32_0 = arith.constant 0 : i32
    %c0_i32_1 = arith.constant 0 : i32
    return %c0_i32, %c0_i32_0 : i32, i32
  }
  func.func @transform_9(%arg0: i32) -> (i32, i32) {
    %c0_i32 = arith.constant 0 : i32
    %c0_i32_0 = arith.constant 0 : i32
    %c0_i32_1 = arith.constant 0 : i32
    return %c0_i32, %c0_i32_0 : i32, i32
  }
  func.func @transform_10(%arg0: i32) -> (i32, i32) {
    %c0_i32 = arith.constant 0 : i32
    %c0_i32_0 = arith.constant 0 : i32
    %c0_i32_1 = arith.constant 0 : i32
    return %c0_i32, %c0_i32_0 : i32, i32
  }
  func.func @transform_11(%arg0: i32) -> (i32, i32, i32) {
    %c0_i32 = arith.constant 0 : i32
    %c0_i32_0 = arith.constant 0 : i32
    %c0_i32_1 = arith.constant 0 : i32
    return %arg0, %c0_i32, %c0_i32_0 : i32, i32, i32
  }
}

</mosaic_0001>

<bundles_post_ra>
// kernel: conv_network_forward.1
= control target key start
LH: loop header
LB: loop body
LE: loop exit
PB: predicated region body
PF: predicated region fallthrough
CT: control target
= control target key end

     0   :  { %s9178_s21 = smov 64   ;;  %vm1476_vm0 = vcmask 261120   ;;  %vm227_vm1 = vcmask 1043456   ;;  %vm229_vm2 = vcmask 523264   ;;  %vm2687_vm3 = vcmask 519168   ;;  %s13724_s0 = inlined_call_operand.vmem [shape: bf16[32,1792], index: 0, kind: input, shape index: {}]   ;;  %s13725_s1 = inlined_call_operand.vmem [shape: bf16[144,160], index: 1, kind: input, shape index: {}]   ;;  %s13726_s2 = inlined_call_operand.vmem [shape: f32[72,1], index: 2, kind: input, shape index: {}]   ;;  %s13727_s3 = inlined_call_operand.vmem [shape: bf16[128,400], index: 3, kind: input, shape index: {}]   ;;  %s13728_s4 = inlined_call_operand.vmem [shape: f32[64,1], index: 4, kind: input, shape index: {}]   ;;  %s13729_s6 = inlined_call_operand.vmem [shape: f32[120,1], index: 6, kind: input, shape index: {}]   ;;  %s13730_s5 = inlined_call_operand.vmem [shape: bf16[120,256], index: 5, kind: input, shape index: {}]   ;;  %s13731_s8 = inlined_call_operand.vmem [shape: f32[84,1], index: 8, kind: input, shape index: {}]   ;;  %s13732_s10 = inlined_call_operand.vmem [shape: f32[10,1], index: 10, kind: input, shape index: {}]   ;;  %s13733_s7 = inlined_call_operand.vmem [shape: bf16[84,120], index: 7, kind: input, shape index: {}]   ;;  %s13734_s9 = inlined_call_operand.vmem [shape: bf16[10,84], index: 9, kind: input, shape index: {}]   ;;  %s13735_s11 = inlined_call_operand.vmem [shape: f32[1,10,64], index: 11, kind: output, shape index: {}]  }
   0x1   :  { %v9245_v0 = vld [vmem:[%s13724_s0 + $0xac] sm:$0xff]  ;;  %v9250_v1 = vld [vmem:[%s13724_s0 + $0x74] sm:$0xff]  ;;  %v9264_v3 = vld [vmem:[%s13724_s0 + $0x7c] sm:$0xff]  ;;  %vm2887_vm4 = vcmask 1043968   ;;  %vm6161_vm5 = vcmask 130048   ;;  %vm7924_vm6 = vcmask 982016  }
   0x2   :  { %471 = vrot.lane.b32.xlu1 %v9245_v0, %s9178_s21  ;;  %457 = vrot.lane.b32.xlu0 %v9250_v1, %s9178_s21  ;;  %v9259_v2 = vld [vmem:[%s13724_s0 + $0xb4] sm:$0xff]  ;;  %v9273_v4 = vld [vmem:[%s13724_s0 + $0xc] sm:$0xff]  ;;  %v8199_v6 = vcombine.high %v9250_v1, %v9245_v0  ;;  %vm9181_vm7 = vmmov 0   ;;  %vm8067_vm8 = vcmask 1041408   ;;  %vm8063_vm9 = vcmask 687104  }
   0x3   :  { %v9278_v5 = vld [vmem:[%s13724_s0 + $0x4] sm:$0xff]  ;;  %v9296_v9 = vld [vmem:[%s13724_s0 + $0x3c] sm:$0xff]  ;;  %v9304_v11 = vld [vmem:[%s13724_s0 + $0x70] sm:$0xff]  ;;  %vm8114_vm10 = vcmask 517120  }
   0x4   :  { %v9291_v8 = vld [vmem:[%s13724_s0 + $0x44] sm:$0xff]  ;;  %v102_v10 = vld [vmem:[%s13724_s0 + $0x78] sm:$0xff]  ;;  %v109_v14 = vld [vmem:[%s13724_s0 + $0xb0] sm:$0xff] }
   0x5   :  { %v9323_v15 = vld [vmem:[%s13724_s0 + $0xa8] sm:$0xff]  ;;  %v9334_v17 = vld [vmem:[%s13724_s0] sm:$0xff]  ;;  %v9349_v21 = vld [vmem:[%s13724_s0 + $0x38] sm:$0xff]  ;;  %v9368_v26 = vcombine.high %v102_v10, %v109_v14  ;;  %v9378_v29 = vcombine.low %v102_v10, %v109_v14 }
   0x6   :  { %473 = vrot.lane.b32.xlu1 %v9259_v2, %s9178_s21  ;;  %459 = vrot.lane.b32.xlu0 %v9264_v3, %s9178_s21  ;;  %v88_v16 = vld [vmem:[%s13724_s0 + $0x8] sm:$0xff]  ;;  %v95_v20 = vld [vmem:[%s13724_s0 + $0x40] sm:$0xff] }
   0x7   :  { %v9361_v24 = vld [vmem:[%s13724_s0 + $0xbc] sm:$0xff]  ;;  %v9366_v25 = vld [vmem:[%s13724_s0 + $0x84] sm:$0xff]  ;;  %v9383_v30 = vld [vmem:[%s13724_s0 + $0x4c] sm:$0xff]  ;;  %v9390_v32 = vcombine.high %v88_v16, %v95_v20  ;;  %v9400_v35 = vcombine.low %v88_v16, %v95_v20 }
   0x8   :  { %v9388_v31 = vld [vmem:[%s13724_s0 + $0x14] sm:$0xff]  ;;  %v103_v37 = vld [vmem:[%s13724_s0 + $0x80] sm:$0xff]  ;;  %v96_v39 = vld [vmem:[%s13724_s0 + $0x48] sm:$0xff] }
   0x9   :  { %v110_v36 = vld [vmem:[%s13724_s0 + $0xb8] sm:$0xff]  ;;  %v9411_v38 = vld [vmem:[%s13725_s1 + $0x4] ss:$8 sps:$4 sm:$0xff]   ;;  %v89_v40 = vld [vmem:[%s13724_s0 + $0x10] sm:$0xff] }
   0xa   :  { %431 = vrot.lane.b32.xlu1 %v9273_v4, %s9178_s21  ;;  %429 = vrot.lane.b32.xlu0 %v9278_v5, %s9178_s21  ;;  %v9428_v41 = vld [vmem:[%s13724_s0 + $0xc4] sm:$0xff]  ;;  %v9433_v42 = vld [vmem:[%s13724_s0 + $0x8c] sm:$0xff]  ;;  %v9473_v51 = vcombine.high %v103_v37, %v110_v36  ;;  %v9475_v52 = vcombine.low %v103_v37, %v110_v36  ;;  %v9491_v55 = vcombine.high %v89_v40, %v96_v39 }
   0xb   :  { %8258 = vmatprep.mubr.msk.bf16.mxu0 %vm1476_vm0, %v9411_v38  ;;  %8267 = vmatprep.mubr.msk.bf16.mxu1 %vm1476_vm0, %v9411_v38  ;;  %v9448_v45 = vld [vmem:[%s13724_s0 + $0x54] sm:$0xff]  ;;  %v9453_v46 = vld [vmem:[%s13724_s0 + $0x1c] sm:$0xff]  ;;  %v9471_v50 = vld [vmem:[%s13724_s0 + $0x88] sm:$0xff]  ;;  %v9493_v56 = vcombine.low %v89_v40, %v96_v39 }
   0xc   :  { %v9466_v49 = vld [vmem:[%s13724_s0 + $0xc0] sm:$0xff]  ;;  %v9484_v53 = vld [vmem:[%s13724_s0 + $0x50] sm:$0xff]  ;;  %v9489_v54 = vld [vmem:[%s13724_s0 + $0x18] sm:$0xff] }
   0xd   :  { %v9502_v57 = vld [vmem:[%s13724_s0 + $0xcc] sm:$0xff]  ;;  %v9507_v58 = vld [vmem:[%s13724_s0 + $0x94] sm:$0xff]  ;;  %v9516_v59 = vld [vmem:[%s13724_s0 + $0x5c] sm:$0xff] }
   0xe   :  { %445 = vrot.lane.b32.xlu1 %v9291_v8, %s9178_s21  ;;  %443 = vrot.lane.b32.xlu0 %v9296_v9, %s9178_s21  ;;  %v9521_v60 = vld [vmem:[%s13724_s0 + $0x24] sm:$0xff]  ;;  %v9535_v62 = vld [vmem:[%s13724_s0 + $0x90] sm:$0xff] }
   0xf   :  { %v9530_v61 = vld [vmem:[%s13724_s0 + $0xc8] sm:$0xff]  ;;  %v9544_v63 = vld [vmem:[%s13724_s0 + $0x58] sm:$0xff]  ;;  %v393_v19 = vld [vmem:[%s13724_s0 + $0xa4] sm:$0xf] }
  0x10   :  { %v92_v47 = vld [vmem:[%s13724_s0 + $0x28] sm:$0xff]  ;;  %v400_v22 = vld [vmem:[%s13724_s0 + $0xdc] sm:$0xf]  ;;  %v379_v7 = vld [vmem:[%s13724_s0 + $0x34] sm:$0xf] }
  0x11   :  { %v386_v12 = vld [vmem:[%s13724_s0 + $0x6c] sm:$0xf] }
  0x12   :  { %173 = vrot.lane.b32.xlu1 %v102_v10, %s9178_s21  ;;  %171 = vrot.lane.b32.xlu0 %v9304_v11, %s9178_s21  ;;  %v9549_v10 = vld [vmem:[%s13724_s0 + $0x20] sm:$0xff] }
  0x16   :  { %187 = vrot.lane.b32.xlu1 %v109_v14, %s9178_s21  ;;  %185 = vrot.lane.b32.xlu0 %v9323_v15, %s9178_s21  ;;  %v9558_v14 = vld [vmem:[%s13724_s0 + $0xd4] sm:$0xff] }
  0x1a   :  { %145 = vrot.lane.b32.xlu1 %v88_v16, %s9178_s21  ;;  %143 = vrot.lane.b32.xlu0 %v9334_v17, %s9178_s21  ;;  %v9563_v16 = vld [vmem:[%s13724_s0 + $0x9c] sm:$0xff] }
  0x1e   :  { %159 = vrot.lane.b32.xlu1 %v95_v20, %s9178_s21  ;;  %157 = vrot.lane.b32.xlu0 %v9349_v21, %s9178_s21  ;;  %v9572_v20 = vld [vmem:[%s13724_s0 + $0x64] sm:$0xff] }
  0x1f   :  { %13952 = vst [vmem:[#allocation8_spill] sm:$0xff] %v9572_v20 }
  0x22   :  { %475 = vrot.lane.b32.xlu1 %v9361_v24, %s9178_s21  ;;  %461 = vrot.lane.b32.xlu0 %v9366_v25, %s9178_s21 }
  0x26   :  { %447 = vrot.lane.b32.xlu1 %v9383_v30, %s9178_s21  ;;  %433 = vrot.lane.b32.xlu0 %v9388_v31, %s9178_s21 }
  0x2a   :  { %189 = vrot.lane.b32.xlu1 %v110_v36, %s9178_s21  ;;  %175 = vrot.lane.b32.xlu0 %v103_v37, %s9178_s21  ;;  %v9577_v36 = vld [vmem:[%s13724_s0 + $0x2c] sm:$0xff] }
  0x2b   :  { %13953 = vst [vmem:[#allocation9_spill] sm:$0xff] %v9577_v36  ;;  %v113_v37 = vld [vmem:[%s13724_s0 + $0xd0] sm:$0xff] }
  0x2e   :  { %161 = vrot.lane.b32.xlu1 %v96_v39, %s9178_s21  ;;  %147 = vrot.lane.b32.xlu0 %v89_v40, %s9178_s21  ;;  %v106_v39 = vld [vmem:[%s13724_s0 + $0x98] sm:$0xff]  ;;  %v99_v40 = vld [vmem:[%s13724_s0 + $0x60] sm:$0xff] }
  0x32   :  { %477 = vrot.lane.b32.xlu1 %v9428_v41, %s9178_s21  ;;  %463 = vrot.lane.b32.xlu0 %v9433_v42, %s9178_s21 }
  0x36   :  { %449 = vrot.lane.b32.xlu1 %v9448_v45, %s9178_s21  ;;  %435 = vrot.lane.b32.xlu0 %v9453_v46, %s9178_s21 }
  0x3a   :  { %191 = vrot.lane.b32.xlu1 %v9466_v49, %s9178_s21  ;;  %177 = vrot.lane.b32.xlu0 %v9471_v50, %s9178_s21 }
  0x3e   :  { %163 = vrot.lane.b32.xlu1 %v9484_v53, %s9178_s21  ;;  %149 = vrot.lane.b32.xlu0 %v9489_v54, %s9178_s21 }
  0x42   :  { %479 = vrot.lane.b32.xlu1 %v9502_v57, %s9178_s21  ;;  %465 = vrot.lane.b32.xlu0 %v9507_v58, %s9178_s21 }
  0x46   :  { %451 = vrot.lane.b32.xlu1 %v9516_v59, %s9178_s21  ;;  %437 = vrot.lane.b32.xlu0 %v9521_v60, %s9178_s21 }
  0x4a   :  { %193 = vrot.lane.b32.xlu1 %v9530_v61, %s9178_s21  ;;  %179 = vrot.lane.b32.xlu0 %v9535_v62, %s9178_s21 }
  0x4e   :  { %165 = vrot.lane.b32.xlu1 %v9544_v63, %s9178_s21  ;;  %151 = vrot.lane.b32.xlu0 %v9549_v10, %s9178_s21 }
  0x52   :  { %481 = vrot.lane.b32.xlu1 %v9558_v14, %s9178_s21  ;;  %467 = vrot.lane.b32.xlu0 %v9563_v16, %s9178_s21 }
  0x56   :  { %453 = vrot.lane.b32.xlu1 %v9572_v20, %s9178_s21  ;;  %439 = vrot.lane.b32.xlu0 %v9577_v36, %s9178_s21  ;;  %v9179_v36 = vmov 0  }
  0x57   :  { %8921 = vset.pattern.permute.xlu1 %v9179_v36  ;;  %2458 = vst [vmem:[#allocation4 + $0xd8] sm:$0xff] %v9179_v36  ;;  %2459 = vst [vmem:[#allocation4 + $0xe0] sm:$0xff] %v9179_v36  ;;  %8920 = vset.pattern.permute.xlu0 %v9179_v36 }
  0x58   :  { %2460 = vst [vmem:[#allocation4 + $0xe8] sm:$0xff] %v9179_v36 }
  0x5a   :  { %195 = vrot.lane.b32.xlu1 %v113_v37, %s9178_s21  ;;  %181 = vrot.lane.b32.xlu0 %v106_v39, %s9178_s21 }
  0x5e   :  { %167 = vrot.lane.b32.xlu1 %v99_v40, %s9178_s21  ;;  %153 = vrot.lane.b32.xlu0 %v92_v47, %s9178_s21 }
  0x62   :  { %483 = vrot.lane.b32.xlu1 %v400_v22, %s9178_s21  ;;  %469 = vrot.lane.b32.xlu0 %v393_v19, %s9178_s21 }
  0x66   :  { %455 = vrot.lane.b32.xlu1 %v386_v12, %s9178_s21  ;;  %441 = vrot.lane.b32.xlu0 %v379_v7, %s9178_s21  ;;  %v114_v12 = vld [vmem:[%s13724_s0 + $0xd8] sm:$0xf] }
  0x6a   :  { %197 = vrot.lane.b32.xlu1 %v114_v12, %s9178_s21 }
  0x74   :  { %v472_v43 = vpop.permute.xlu1 %471  ;;  %v458_v39 = vpop.permute.xlu0 %457 }
  0x75   :  { %v506_v47 = vrot.slane %v472_v43, 4  ;;  %v499_v40 = vrot.slane %v458_v39, 4 }
  0x78   :  { %v9607_v33 = vpop.permute.xlu1 %473  ;;  %v9609_v28 = vpop.permute.xlu0 %459 }
  0x79   :  { %v13737_v48 = vrot.slane %v9607_v33, 4  ;;  %v13736_v37 = vrot.slane %v9609_v28, 4 }
  0x7b   :  { %v537_v27 = vsel %vm227_vm1, %v499_v40, %v13736_v37  ;;  %v549_v44 = vsel %vm227_vm1, %v506_v47, %v13737_v48 }
  0x7c   :  { %v9629_v18 = vpop.permute.xlu1 %431  ;;  %v430_v40 = vpop.permute.xlu0 %429  ;;  %v538_v37 = vsel %vm229_vm2, %v458_v39, %v537_v27  ;;  %v550_v47 = vsel %vm229_vm2, %v472_v43, %v549_v44 }
  0x7d   :  { %v13739_v34 = vrot.slane %v9629_v18, 4  ;;  %v485_v23 = vrot.slane %v430_v40, 4  ;;  %v8223_v48 = vcombine.high %v538_v37, %v550_v47  ;;  %v8222_v13 = vcombine.low %v538_v37, %v550_v47 }
  0x7f   :  { %1504 = vmatprep.subr.bf16.mxu0 %v8223_v48  ;;  %v513_v19 = vsel %vm227_vm1, %v485_v23, %v13739_v34  ;;  %v107_v23 = vld [vmem:[%s13724_s0 + $0xa0] sm:$0xf]  ;;  %v100_v34 = vld [vmem:[%s13724_s0 + $0x68] sm:$0xf] }
  0x80   :  { %1505 = vmatpush1.bf16.msra.mxu0 %v8222_v13  ;;  %v9642_v27 = vpop.permute.xlu1 %445  ;;  %v444_v22 = vpop.permute.xlu0 %443  ;;  %v514_v48 = vsel %vm229_vm2, %v430_v40, %v513_v19  ;;  %183 = vrot.lane.b32.xlu0 %v107_v23, %s9178_s21  ;;  %v93_v40 = vld [vmem:[%s13724_s0 + $0x30] sm:$0xf] }
  0x81   :  { %v13738_v43 = vrot.slane %v9642_v27, 4  ;;  %v492_v44 = vrot.slane %v444_v22, 4  ;;  %169 = vrot.lane.b32.xlu1 %v100_v34, %s9178_s21 }
  0x83   :  { %v525_v37 = vsel %vm227_vm1, %v492_v44, %v13738_v43 }
  0x84   :  { %v526_v39 = vsel %vm229_vm2, %v444_v22, %v525_v37  ;;  %v9663_v7 = vpop.permute.xlu1 %173  ;;  %v172_v47 = vpop.permute.xlu0 %171  ;;  %155 = vrot.lane.b32.xlu0 %v93_v40, %s9178_s21 }
  0x85   :  { %v8211_v13 = vcombine.high %v514_v48, %v526_v39  ;;  %v8210_v43 = vcombine.low %v514_v48, %v526_v39  ;;  %v13743_v22 = vrot.slane %v9663_v7, 4  ;;  %v213_v19 = vrot.slane %v172_v47, 4 }
  0x87   :  { %1506 = vmatprep.subr.bf16.mxu0 %v8211_v13  ;;  %v253_v13 = vsel %vm227_vm1, %v213_v19, %v13743_v22  ;;  %v2466_v19 = vld [vmem:[%s13726_s2 + $0x28] sm:$0xff] }
  0x88   :  { %1507 = vmatpush1.bf16.msra.mxu0 %v8210_v43  ;;  %v9676_v37 = vpop.permute.xlu1 %187  ;;  %v186_v12 = vpop.permute.xlu0 %185  ;;  %2497 = vperm.xlu1 %8921, %v2466_v19   ;;  %v2464_v19 = vld [vmem:[%s13726_s2 + $0x18] sm:$0xff] }
  0x89   :  { %v13742_v39 = vrot.slane %v9676_v37, 4  ;;  %v220_v44 = vrot.slane %v186_v12, 4  ;;  %1508 = vmatprep.subr.bf16.mxu0 %v8199_v6  ;;  %v13954_v6 = vcombine.low %v9250_v1, %v9245_v0  ;;  %v13955_v1 = vcombine.high %v9278_v5, %v9296_v9 }
  0x8b   :  { %v265_v23 = vsel %vm227_vm1, %v220_v44, %v13742_v39  ;;  %v2465_v44 = vld [vmem:[%s13726_s2 + $0x20] sm:$0xff]  ;;  %v13956_v39 = vcombine.low %v9278_v5, %v9296_v9 }
  0x8c   :  { %v266_v48 = vsel %vm229_vm2, %v186_v12, %v265_v23  ;;  %1509 = vmatpush1.bf16.msra.mxu0 %v13954_v6  ;;  %v9702_v40 = vpop.permute.xlu1 %145  ;;  %v144_v43 = vpop.permute.xlu0 %143  ;;  %v254_v23 = vsel %vm229_vm2, %v172_v47, %v253_v13  ;;  %v2463_v6 = vld [vmem:[%s13726_s2 + $0x10] sm:$0xff]  ;;  %2492 = vperm.xlu0 %8920, %v2465_v44   ;;  %v2461_v5 = vld [vmem:[%s13726_s2] sm:$0xff] }
  0x8d   :  { %v199_v0 = vrot.slane %v144_v43, 4  ;;  %1510 = vmatprep.subr.bf16.mxu0 %v13955_v1  ;;  %v8175_v34 = vcombine.high %v254_v23, %v266_v48  ;;  %v13957_v47 = vrot.slane %v9702_v40, 4  ;;  %2482 = vperm.xlu1 %8921, %v2463_v6   ;;  %v8174_v44 = vcombine.low %v254_v23, %v266_v48  ;;  %v2462_v48 = vld [vmem:[%s13726_s2 + $0x8] sm:$0xff] }
  0x8f   :  { %v228_v36 = vsel %vm227_vm1, %v199_v0, %v13957_v47 }
  0x90   :  { %1511 = vmatpush1.bf16.msra.mxu0 %v13956_v39  ;;  %v9721_v22 = vpop.permute.xlu1 %159  ;;  %v158_v12 = vpop.permute.xlu0 %157  ;;  %2487 = vperm.xlu0 %8920, %v2464_v19   ;;  %v230_v39 = vsel %vm229_vm2, %v144_v43, %v228_v36  ;;  %v2469_v43 = vld [vmem:[%s13726_s2 + $0x40] sm:$0xff]  ;;  %v13959_v36 = vrot.slane %v9607_v33, 4 }
  0x91   :  { %v207_v13 = vrot.slane %v9721_v22, 4  ;;  %v206_v1 = vrot.slane %v158_v12, 4  ;;  %1512 = vmatprep.subr.bf16.mxu0 %v8175_v34  ;;  %2472 = vperm.xlu1 %8921, %v2461_v5  }
  0x93   :  { %v241_v9 = vsel %vm227_vm1, %v206_v1, %v207_v13 }
  0x94   :  { %v242_v20 = vsel %vm229_vm2, %v158_v12, %v241_v9  ;;  %1513 = vmatpush1.bf16.msra.mxu0 %v8174_v44  ;;  %v9738_v0 = vpop.permute.xlu1 %475  ;;  %v9740_v47 = vpop.permute.xlu0 %461  ;;  %v13958_v12 = vrot.slane %v9609_v28, 4  ;;  %2477 = vperm.xlu0 %8920, %v2462_v48   ;;  %v13960_v48 = vcombine.high %v9304_v11, %v9323_v15 }
  0x95   :  { %v13746_v34 = vrot.slane %v9738_v0, 4  ;;  %v501_v23 = vrot.slane %v9740_v47, 4  ;;  %v8163_v6 = vcombine.high %v230_v39, %v242_v20  ;;  %v8162_v1 = vcombine.low %v230_v39, %v242_v20  ;;  %2512 = vperm.xlu1 %8921, %v2469_v43  }
  0x97   :  { %1514 = vmatprep.subr.bf16.mxu0 %v8163_v6  ;;  %v539_v19 = vsel %vm227_vm1, %v13958_v12, %v501_v23  ;;  %v551_v44 = vsel %vm227_vm1, %v13959_v36, %v13746_v34  ;;  %v2467_v6 = vld [vmem:[%s13726_s2 + $0x30] sm:$0xff] }
  0x98   :  { %v9760_v20 = vpop.permute.xlu1 %447  ;;  %1515 = vmatpush1.bf16.msra.mxu0 %v8162_v1  ;;  %v9762_v5 = vpop.permute.xlu0 %433  ;;  %v540_v9 = vsel %vm229_vm2, %v9609_v28, %v539_v19  ;;  %v552_v39 = vsel %vm229_vm2, %v9607_v33, %v551_v44  ;;  %v2468_v28 = vld [vmem:[%s13726_s2 + $0x38] sm:$0xff]  ;;  %v13961_v33 = vrot.slane %v9629_v18, 4  ;;  %v13962_v44 = vrot.slane %v9642_v27, 4  ;;  %2502 = vperm.xlu0 %8920, %v2467_v6  }
  0x99   :  { %v13748_v12 = vrot.slane %v9760_v20, 4  ;;  %v13747_v36 = vrot.slane %v9762_v5, 4  ;;  %1516 = vmatprep.subr.bf16.mxu0 %v13960_v48  ;;  %v8225_v1 = vcombine.high %v540_v9, %v552_v39  ;;  %v8224_v34 = vcombine.low %v540_v9, %v552_v39  ;;  %2507 = vperm.xlu1 %8921, %v2468_v28  }
  0x9a   :  { %v13963_v39 = vcombine.low %v9304_v11, %v9323_v15  ;;  %v13964_v6 = vcombine.high %v9334_v17, %v9349_v21 }
  0x9b   :  { %1627 = vmatprep.subr.bf16.mxu1 %v8225_v1  ;;  %v515_v19 = vsel %vm227_vm1, %v13961_v33, %v13747_v36  ;;  %v527_v48 = vsel %vm227_vm1, %v13962_v44, %v13748_v12 }
  0x9c   :  { %v9789_v9 = vpop.permute.xlu1 %189  ;;  %1628 = vmatpush1.bf16.msra.mxu1 %v8224_v34  ;;  %v9791_v43 = vpop.permute.xlu0 %175  ;;  %1517 = vmatpush1.bf16.msra.mxu0 %v13963_v39  ;;  %v516_v1 = vsel %vm229_vm2, %v9629_v18, %v515_v19  ;;  %v528_v33 = vsel %vm229_vm2, %v9642_v27, %v527_v48  ;;  %v13965_v18 = vcombine.low %v9334_v17, %v9349_v21  ;;  %v13968_v17 = vrot.slane %v9676_v37, 4 }
  0x9d   :  { %v222_v36 = vrot.slane %v9789_v9, 4  ;;  %v215_v44 = vrot.slane %v9791_v43, 4  ;;  %1518 = vmatprep.subr.bf16.mxu0 %v13964_v6  ;;  %v8213_v34 = vcombine.high %v516_v1, %v528_v33  ;;  %v8212_v12 = vcombine.low %v516_v1, %v528_v33 }
  0x9e   :  { %v13966_v48 = vcombine.high %v9264_v3, %v9259_v2  ;;  %v13969_v1 = vcombine.low %v9264_v3, %v9259_v2  ;;  %v13971_v3 = vcombine.high %v9273_v4, %v9291_v8 }
  0x9f   :  { %1629 = vmatprep.subr.bf16.mxu1 %v8213_v34  ;;  %v267_v21 = vsel %vm227_vm1, %v13968_v17, %v222_v36 }
  0xa0   :  { %v9805_v11 = vpop.permute.xlu1 %161  ;;  %1630 = vmatpush1.bf16.msra.mxu1 %v8212_v12  ;;  %v9807_v15 = vpop.permute.xlu0 %147  ;;  %1519 = vmatpush1.bf16.msra.mxu0 %v13965_v18  ;;  %v13967_v12 = vrot.slane %v9663_v7, 4  ;;  %v268_v34 = vsel %vm229_vm2, %v9676_v37, %v267_v21  ;;  %v13970_v18 = vrot.slane %v9702_v40, 4  ;;  %v13972_v21 = vrot.slane %v9738_v0, 4 }
  0xa1   :  { %v13749_v27 = vrot.slane %v9805_v11, 4  ;;  %v201_v19 = vrot.slane %v9807_v15, 4  ;;  %1532 = vmatprep.subr.bf16.mxu0 %v9368_v26  ;;  %1631 = vmatprep.subr.bf16.mxu1 %v13966_v48 }
  0xa2   :  { %v255_v28 = vsel %vm227_vm1, %v13967_v12, %v215_v44 }
  0xa3   :  { %v256_v6 = vsel %vm229_vm2, %v9663_v7, %v255_v28  ;;  %v231_v48 = vsel %vm227_vm1, %v13970_v18, %v201_v19  ;;  %v243_v7 = vsel %vm227_vm1, %v207_v13, %v13749_v27  ;;  %v9859_v28 = vld [vmem:[%s13725_s1] ss:$8 sps:$4 sm:$0xff]  }
  0xa4   :  { %v9828_v39 = vpop.permute.xlu1 %477  ;;  %1632 = vmatpush1.bf16.msra.mxu1 %v13969_v1  ;;  %v9833_v33 = vpop.permute.xlu0 %463  ;;  %1533 = vmatpush2.bf16.msra.mxu0 %v9378_v29  ;;  %v8177_v37 = vcombine.high %v256_v6, %v268_v34  ;;  %v232_v13 = vsel %vm229_vm2, %v9702_v40, %v231_v48 }
  0xa5   :  { %v13751_v12 = vrot.slane %v9828_v39, 4  ;;  %v13750_v2 = vrot.slane %v9833_v33, 4  ;;  %1534 = vmatprep.subr.bf16.mxu0 %v9390_v32  ;;  %1633 = vmatprep.subr.bf16.mxu1 %v13971_v3  ;;  %v13973_v3 = vcombine.low %v9273_v4, %v9291_v8 }
  0xa7   :  { %v541_v17 = vsel %vm227_vm1, %v501_v23, %v13750_v2  ;;  %v553_v1 = vsel %vm227_vm1, %v13972_v21, %v13751_v12  ;;  %v244_v21 = vsel %vm229_vm2, %v9721_v22, %v243_v7  ;;  %v8176_v12 = vcombine.low %v256_v6, %v268_v34 }
  0xa8   :  { %v9873_v18 = vpop.permute.xlu1 %449  ;;  %1634 = vmatpush1.bf16.msra.mxu1 %v13973_v3  ;;  %v9878_v27 = vpop.permute.xlu0 %435  ;;  %1535 = vmatpush2.bf16.msra.mxu0 %v9400_v35  ;;  %v542_v23 = vsel %vm229_vm2, %v9740_v47, %v541_v17  ;;  %v554_v2 = vsel %vm229_vm2, %v9738_v0, %v553_v1  ;;  %v9892_v3 = vld [vmem:[%s13725_s1 + $0x14] ss:$8 sps:$4 sm:$0xff]   ;;  %v8165_v0 = vcombine.high %v232_v13, %v244_v21  ;;  %v13974_v22 = vrot.slane %v9762_v5, 4 }
  0xa9   :  { %v495_v40 = vrot.slane %v9873_v18, 4  ;;  %v488_v48 = vrot.slane %v9878_v27, 4  ;;  %1635 = vmatprep.subr.bf16.mxu1 %v8177_v37  ;;  %v8226_v4 = vcombine.low %v542_v23, %v554_v2  ;;  %v8227_v8 = vcombine.high %v542_v23, %v554_v2 }
  0xaa   :  { %v13975_v2 = vrot.slane %v9760_v20, 4 }
  0xab   :  { %1537 = vmatmul.mubr.bf16.vlgmr.msra.gmra.mxu0 %v9859_v28  ;;  %1750 = vmatprep.subr.bf16.mxu0 %v8227_v8  ;;  %v517_v47 = vsel %vm227_vm1, %v13974_v22, %v488_v48 }
  0xac   :  { %v529_v7 = vsel %vm227_vm1, %v13975_v2, %v495_v40  ;;  %v9905_v37 = vpop.permute.xlu1 %191  ;;  %1636 = vmatpush1.bf16.msra.mxu1 %v8176_v12  ;;  %v9907_v6 = vpop.permute.xlu0 %177  ;;  %1751 = vmatpush1.bf16.msra.mxu0 %v8226_v4  ;;  %v518_v34 = vsel %vm229_vm2, %v9762_v5, %v517_v47  ;;  %v8164_v12 = vcombine.low %v232_v13, %v244_v21  ;;  %v9920_v4 = vld [vmem:[%s13725_s1 + $0x10] ss:$8 sps:$4 sm:$0xff]  }
  0xad   :  { %v530_v17 = vsel %vm229_vm2, %v9760_v20, %v529_v7  ;;  %v223_v1 = vrot.slane %v9905_v37, 4  ;;  %v216_v23 = vrot.slane %v9907_v6, 4  ;;  %1637 = vmatprep.subr.bf16.mxu1 %v8165_v0  ;;  %8259 = vmatprep.mubr.msk.bf16.mxu0 %vm1476_vm0, %v9892_v3  ;;  %v13976_v13 = vcombine.high %v9366_v25, %v9361_v24 }
  0xae   :  { %v8214_v8 = vcombine.low %v518_v34, %v530_v17  ;;  %v8215_v22 = vcombine.high %v518_v34, %v530_v17  ;;  %v13977_v7 = vcombine.low %v9366_v25, %v9361_v24  ;;  %v13979_v25 = vrot.slane %v9805_v11, 4 }
  0xaf   :  { %v257_v21 = vsel %vm227_vm1, %v215_v44, %v216_v23  ;;  %v269_v2 = vsel %vm227_vm1, %v222_v36, %v223_v1 }
  0xb0   :  { %1752 = vmatprep.subr.bf16.mxu0 %v8215_v22  ;;  %v9922_v5 = vpop.permute.xlu1 %163  ;;  %1638 = vmatpush1.bf16.msra.mxu1 %v8164_v12  ;;  %v9924_v20 = vpop.permute.xlu0 %149  ;;  %v258_v44 = vsel %vm229_vm2, %v9791_v43, %v257_v21  ;;  %v270_v34 = vsel %vm229_vm2, %v9789_v9, %v269_v2  ;;  %v9981_v22 = vld [vmem:[%s13725_s1 + $0x20] ss:$8 sps:$4 sm:$0xff]   ;;  %v13982_v2 = vcombine.low %v9388_v31, %v9383_v30 }
  0xb1   :  { %1753 = vmatpush1.bf16.msra.mxu0 %v8214_v8  ;;  %v13752_v0 = vrot.slane %v9922_v5, 4  ;;  %v202_v47 = vrot.slane %v9924_v20, 4  ;;  %1639 = vmatprep.subr.bf16.mxu1 %v9368_v26  ;;  %v9945_v26 = vld [vmem:[%s13725_s1 + $0x24] ss:$8 sps:$4 sm:$0xff]   ;;  %v13978_v8 = vcombine.high %v9388_v31, %v9383_v30  ;;  %v8179_v43 = vcombine.high %v258_v44, %v270_v34 }
  0xb2   :  { %1754 = vmatprep.subr.bf16.mxu0 %v13976_v13  ;;  %v13981_v13 = vrot.slane %v9828_v39, 4 }
  0xb3   :  { %1547 = vmatmul.mubr.bf16.gmra.mxu0 %v9920_v4  ;;  %v233_v24 = vsel %vm227_vm1, %v201_v19, %v202_v47  ;;  %v13980_v19 = vrot.slane %v9833_v33, 4 }
  0xb4   :  { %1640 = vmatpush1.bf16.msra.mxu1 %v9378_v29  ;;  %v9956_v36 = vpop.permute.xlu1 %479  ;;  %v9958_v17 = vpop.permute.xlu0 %465  ;;  %v245_v29 = vsel %vm227_vm1, %v13979_v25, %v13752_v0  ;;  %8260 = vmatprep.mubr.msk.bf16.mxu0 %vm1476_vm0, %v9945_v26  ;;  %v8178_v0 = vcombine.low %v258_v44, %v270_v34 }
  0xb5   :  { %1755 = vmatpush1.bf16.msra.mxu0 %v13977_v7  ;;  %1641 = vmatprep.subr.bf16.mxu1 %v9390_v32  ;;  %v510_v9 = vrot.slane %v9956_v36, 4  ;;  %v503_v32 = vrot.slane %v9958_v17, 4  ;;  %v234_v7 = vsel %vm229_vm2, %v9807_v15, %v233_v24 }
  0xb6   :  { %1756 = vmatprep.subr.bf16.mxu0 %v13978_v8  ;;  %v246_v8 = vsel %vm229_vm2, %v9805_v11, %v245_v29  ;;  %v10017_v11 = vld [vmem:[%s13725_s1 + $0x34] ss:$8 sps:$4 sm:$0xff]  }
  0xb7   :  { %v543_v12 = vsel %vm227_vm1, %v13980_v19, %v503_v32  ;;  %v555_v21 = vsel %vm227_vm1, %v13981_v13, %v510_v9  ;;  %v8167_v15 = vcombine.high %v234_v7, %v246_v8  ;;  %v8166_v24 = vcombine.low %v234_v7, %v246_v8 }
  0xb8   :  { %1642 = vmatpush1.bf16.msra.mxu1 %v9400_v35  ;;  %v10001_v25 = vpop.permute.xlu1 %451  ;;  %v10003_v19 = vpop.permute.xlu0 %437  ;;  %v544_v30 = vsel %vm229_vm2, %v9833_v33, %v543_v12  ;;  %v556_v31 = vsel %vm229_vm2, %v9828_v39, %v555_v21  ;;  %v10053_v21 = vld [vmem:[%s13725_s1 + $0x30] ss:$8 sps:$4 sm:$0xff]  }
  0xb9   :  { %1757 = vmatpush1.bf16.msra.mxu0 %v13982_v2  ;;  %1655 = vmatprep.subr.bf16.mxu1 %v9473_v51  ;;  %v496_v13 = vrot.slane %v10001_v25, 4  ;;  %v489_v35 = vrot.slane %v10003_v19, 4  ;;  %v8229_v34 = vcombine.high %v544_v30, %v556_v31 }
  0xba   :  { %1758 = vmatprep.subr.bf16.mxu0 %v8179_v43 }
  0xbb   :  { %1557 = vmatmul.mubr.bf16.gmra.mxu0 %v9981_v22  ;;  %v519_v33 = vsel %vm227_vm1, %v488_v48, %v489_v35  ;;  %v531_v39 = vsel %vm227_vm1, %v495_v40, %v496_v13  ;;  %v10044_v40 = vld [vmem:[%s13725_s1 + $0x44] ss:$8 sps:$4 sm:$0xff]  }
  0xbc   :  { %1656 = vmatpush2.bf16.msra.mxu1 %v9475_v52  ;;  %v10029_v44 = vpop.permute.xlu1 %193  ;;  %8261 = vmatprep.mubr.msk.bf16.mxu0 %vm1476_vm0, %v10017_v11  ;;  %v520_v48 = vsel %vm229_vm2, %v9878_v27, %v519_v33  ;;  %v532_v29 = vsel %vm229_vm2, %v9873_v18, %v531_v39  ;;  %v8228_v27 = vcombine.low %v544_v30, %v556_v31  ;;  %v10077_v39 = vld [vmem:[%s13725_s1 + $0x40] ss:$8 sps:$4 sm:$0xff]  }
  0xbd   :  { %1759 = vmatpush1.bf16.msra.mxu0 %v8178_v0  ;;  %v10031_v0 = vpop.permute.xlu0 %179  ;;  %1657 = vmatprep.subr.bf16.mxu1 %v9491_v55  ;;  %v8217_v18 = vcombine.high %v520_v48, %v532_v29  ;;  %v224_v2 = vrot.slane %v10029_v44, 4  ;;  %v8205_v33 = vcombine.high %v9433_v42, %v9428_v41 }
  0xbe   :  { %1760 = vmatprep.subr.bf16.mxu0 %v8167_v15  ;;  %v217_v7 = vrot.slane %v10031_v0, 4 }
  0xc0   :  { %1658 = vmatpush2.bf16.msra.mxu1 %v9493_v56  ;;  %v10046_v43 = vpop.permute.xlu1 %165 }
  0xc1   :  { %1761 = vmatpush1.bf16.msra.mxu0 %v8166_v24  ;;  %v10048_v12 = vpop.permute.xlu0 %151  ;;  %1873 = vmatprep.subr.bf16.mxu1 %v8229_v34  ;;  %v271_v34 = vsel %vm227_vm1, %v223_v1, %v224_v2  ;;  %v210_v24 = vrot.slane %v10046_v43, 4 }
  0xc2   :  { %1762 = vmatprep.subr.bf16.mxu0 %v9473_v51  ;;  %v8216_v51 = vcombine.low %v520_v48, %v532_v29  ;;  %v203_v48 = vrot.slane %v10048_v12, 4  ;;  %v8204_v29 = vcombine.low %v9433_v42, %v9428_v41 }
  0xc3   :  { %1660 = vmatmul.mubr.bf16.vlgmr.msra.gmra.mxu1 %v9859_v28  ;;  %1567 = vmatmul.mubr.bf16.gmra.mxu0 %v10053_v21 }
  0xc4   :  { %8268 = vmatprep.mubr.msk.bf16.mxu1 %vm1476_vm0, %v9892_v3  ;;  %8262 = vmatprep.mubr.msk.bf16.mxu0 %vm1476_vm0, %v10044_v40  ;;  %v10064_v8 = vpop.permute.xlu1 %481 }
  0xc5   :  { %v10066_v30 = vpop.permute.xlu0 %467  ;;  %1874 = vmatpush1.bf16.msra.mxu1 %v8228_v27  ;;  %1763 = vmatpush1.bf16.msra.mxu0 %v9475_v52  ;;  %v511_v31 = vrot.slane %v10064_v8, 4  ;;  %v259_v52 = vsel %vm227_vm1, %v216_v23, %v217_v7  ;;  %v13983_v27 = vcombine.high %v9471_v50, %v9466_v49 }
  0xc6   :  { %v504_v15 = vrot.slane %v10066_v30, 4  ;;  %1875 = vmatprep.subr.bf16.mxu1 %v8217_v18  ;;  %1764 = vmatprep.subr.bf16.mxu0 %v9491_v55  ;;  %v10092_v55 = vld [vmem:[%s13725_s1 + $0x54] ss:$8 sps:$4 sm:$0xff]  }
  0xc7   :  { %v557_v1 = vsel %vm227_vm1, %v510_v9, %v511_v31  ;;  %v272_v9 = vsel %vm229_vm2, %v9905_v37, %v271_v34  ;;  %v13984_v37 = vrot.slane %v9922_v5, 4  ;;  %v13988_v34 = vcombine.low %v9453_v46, %v9448_v45 }
  0xc8   :  { %v545_v23 = vsel %vm227_vm1, %v503_v32, %v504_v15  ;;  %v260_v32 = vsel %vm229_vm2, %v9907_v6, %v259_v52  ;;  %v10124_v42 = vsel %vm229_vm2, %v9956_v36, %v557_v1  ;;  %v13985_v36 = vcombine.low %v9471_v50, %v9466_v49  ;;  %v10163_v52 = vld [vmem:[%s13725_s1 + $0x64] ss:$8 sps:$4 sm:$0xff]  }
  0xc9   :  { %1876 = vmatpush1.bf16.msra.mxu1 %v8216_v51  ;;  %1765 = vmatpush1.bf16.msra.mxu0 %v9493_v56  ;;  %v10120_v41 = vsel %vm229_vm2, %v9958_v17, %v545_v23  ;;  %v235_v56 = vsel %vm227_vm1, %v202_v47, %v203_v48  ;;  %v247_v6 = vsel %vm227_vm1, %v13984_v37, %v210_v24  ;;  %v10224_v37 = vpop.permute.xlu1 %453 }
  0xca   :  { %1877 = vmatprep.subr.bf16.mxu1 %v8205_v33  ;;  %1778 = vmatprep.subr.bf16.mxu0 %v13983_v27  ;;  %v13986_v17 = vcombine.high %v9453_v46, %v9448_v45  ;;  %v8181_v18 = vcombine.high %v260_v32, %v272_v9  ;;  %v13987_v51 = vcombine.high %v9489_v54, %v9484_v53  ;;  %v10154_v33 = vld [vmem:[%s13725_s1 + $0x50] ss:$8 sps:$4 sm:$0xff]   ;;  %v8997_v46 = vld [vmem:[%s13724_s0 + $0x8c] ss:$56 sps:$4 sm:$0xff]  }
  0xcb   :  { %1670 = vmatmul.mubr.bf16.gmra.mxu1 %v9920_v4  ;;  %1577 = vmatmul.mubr.bf16.gmra.mxu0 %v10077_v39  ;;  %v8231_v47 = vcombine.high %v10120_v41, %v10124_v42  ;;  %v236_v49 = vsel %vm229_vm2, %v9924_v20, %v235_v56  ;;  %v248_v50 = vsel %vm229_vm2, %v9922_v5, %v247_v6  ;;  %v8995_v5 = vld [vmem:[%s13724_s0 + $0x88] ss:$56 sps:$4 sm:$0xff]   ;;  %v9000_v20 = vld [vmem:[%s13724_s0 + $0x1c] ss:$56 sps:$4 sm:$0xff]   ;;  %v8998_v27 = vld [vmem:[%s13724_s0 + $0x18] ss:$56 sps:$4 sm:$0xff]   ;;  %v10226_v6 = vpop.permute.xlu0 %439 }
  0xcc   :  { %8269 = vmatprep.mubr.msk.bf16.mxu1 %vm1476_vm0, %v9945_v26  ;;  %8263 = vmatprep.mubr.msk.bf16.mxu0 %vm1476_vm0, %v10092_v55  ;;  %v8180_v23 = vcombine.low %v260_v32, %v272_v9  ;;  %v13989_v1 = vcombine.low %v9489_v54, %v9484_v53  ;;  %v8168_v45 = vcombine.low %v236_v49, %v248_v50  ;;  %v10183_v53 = vld [vmem:[%s13725_s1 + $0x60] ss:$8 sps:$4 sm:$0xff]   ;;  %v10188_v54 = vld [vmem:[%s13725_s1 + $0x74] ss:$8 sps:$4 sm:$0xff]   ;;  %v10208_v32 = vld [vmem:[%s13725_s1 + $0x70] ss:$8 sps:$4 sm:$0xff]  }
  0xcd   :  { %1878 = vmatpush1.bf16.msra.mxu1 %v8204_v29  ;;  %1779 = vmatpush2.bf16.msra.mxu0 %v13985_v36  ;;  %v8169_v29 = vcombine.high %v236_v49, %v248_v50  ;;  %v10213_v9 = vld [vmem:[%s13725_s1 + $0x84] ss:$8 sps:$4 sm:$0xff]   ;;  %v13990_v56 = vcombine.high %v9535_v62, %v9530_v61  ;;  %v13991_v36 = vcombine.low %v9535_v62, %v9530_v61  ;;  %v10264_v50 = vpop.permute.xlu1 %195 }
  0xce   :  { %1879 = vmatprep.subr.bf16.mxu1 %v13986_v17  ;;  %1780 = vmatprep.subr.bf16.mxu0 %v13987_v51  ;;  %v13992_v17 = vcombine.high %v9549_v10, %v9544_v63  ;;  %v497_v51 = vrot.slane %v10224_v37, 4  ;;  %v13993_v49 = vcombine.low %v9549_v10, %v9544_v63 }
  0xd0   :  { %v533_v62 = vsel %vm227_vm1, %v496_v13, %v497_v51 }
  0xd1   :  { %1880 = vmatpush1.bf16.msra.mxu1 %v13988_v34  ;;  %1781 = vmatpush2.bf16.msra.mxu0 %v13989_v1  ;;  %v534_v10 = vsel %vm229_vm2, %v10001_v25, %v533_v62  ;;  %v8230_v34 = vcombine.low %v10120_v41, %v10124_v42  ;;  %v8207_v41 = vcombine.high %v9507_v58, %v9502_v57 }
  0xd2   :  { %1881 = vmatprep.subr.bf16.mxu1 %v8181_v18  ;;  %1996 = vmatprep.subr.bf16.mxu0 %v8231_v47  ;;  %v10237_v18 = vld [vmem:[%s13725_s1 + $0x80] ss:$8 sps:$4 sm:$0xff]   ;;  %v490_v47 = vrot.slane %v10226_v6, 4 }
  0xd3   :  { %1680 = vmatmul.mubr.bf16.gmra.mxu1 %v9981_v22  ;;  %1587 = vmatmul.mubr.bf16.gmra.mxu0 %v10154_v33 }
  0xd4   :  { %8270 = vmatprep.mubr.msk.bf16.mxu1 %vm1476_vm0, %v10017_v11  ;;  %8264 = vmatprep.mubr.msk.bf16.mxu0 %vm1476_vm0, %v10163_v52  ;;  %v521_v61 = vsel %vm227_vm1, %v489_v35, %v490_v47  ;;  %v10266_v35 = vpop.permute.xlu0 %181 }
  0xd5   :  { %1882 = vmatpush1.bf16.msra.mxu1 %v8180_v23  ;;  %v522_v63 = vsel %vm229_vm2, %v10003_v19, %v521_v61  ;;  %v225_v23 = vrot.slane %v10264_v50, 4  ;;  %v218_v1 = vrot.slane %v10266_v35, 4  ;;  %v10276_v19 = vpop.permute.xlu1 %167 }
  0xd6   :  { %1883 = vmatprep.subr.bf16.mxu1 %v8169_v29  ;;  %v8219_v13 = vcombine.high %v522_v63, %v534_v10  ;;  %v8218_v25 = vcombine.low %v522_v63, %v534_v10  ;;  %v211_v42 = vrot.slane %v10276_v19, 4 }
  0xd8   :  { %v10278_v29 = vpop.permute.xlu0 %153 }
  0xd9   :  { %1884 = vmatpush1.bf16.msra.mxu1 %v8168_v45  ;;  %v204_v45 = vrot.slane %v10278_v29, 4 }
  0xda   :  { %1885 = vmatprep.subr.bf16.mxu1 %v8997_v46  ;;  %v261_v46 = vsel %vm227_vm1, %v217_v7, %v218_v1 }
  0xdb   :  { %1690 = vmatmul.mubr.bf16.gmra.mxu1 %v10053_v21  ;;  %1597 = vmatmul.mubr.bf16.gmra.mxu0 %v10183_v53  ;;  %v237_v7 = vsel %vm227_vm1, %v203_v48, %v204_v45 }
  0xdc   :  { %8271 = vmatprep.mubr.msk.bf16.mxu1 %vm1476_vm0, %v10044_v40  ;;  %8265 = vmatprep.mubr.msk.bf16.mxu0 %vm1476_vm0, %v10188_v54 }
  0xdd   :  { %1886 = vmatpush1.bf16.msra.mxu1 %v8995_v5  ;;  %v273_v5 = vsel %vm227_vm1, %v224_v2, %v225_v23 }
  0xde   :  { %1887 = vmatprep.subr.bf16.mxu1 %v9000_v20  ;;  %v8206_v20 = vcombine.low %v9507_v58, %v9502_v57  ;;  %v249_v57 = vsel %vm227_vm1, %v210_v24, %v211_v42  ;;  %v13994_v58 = vcombine.high %v9521_v60, %v9516_v59  ;;  %v13995_v24 = vcombine.low %v9521_v60, %v9516_v59  ;;  %v470_v59 = vpop.permute.xlu0 %469 }
  0xdf   :  { %v250_v2 = vsel %vm229_vm2, %v10046_v43, %v249_v57  ;;  %v505_v43 = vrot.slane %v470_v59, 4  ;;  %v13996_v57 = vld [vmem:[#allocation8_spill] sm:$0xff] }
  0xe1   :  { %1888 = vmatpush1.bf16.msra.mxu1 %v8998_v27  ;;  %v262_v27 = vsel %vm229_vm2, %v10031_v0, %v261_v46  ;;  %v238_v0 = vsel %vm229_vm2, %v10048_v12, %v237_v7 }
  0xe2   :  { %1901 = vmatprep.subr.bf16.mxu1 %v13990_v56  ;;  %v274_v56 = vsel %vm229_vm2, %v10029_v44, %v273_v5  ;;  %v442_v62 = vpop.permute.xlu0 %441 }
  0xe3   :  { %1700 = vmatmul.mubr.bf16.gmra.mxu1 %v10077_v39  ;;  %1607 = vmatmul.mubr.bf16.gmra.mxu0 %v10208_v32  ;;  %v8183_v44 = vcombine.high %v262_v27, %v274_v56  ;;  %v8182_v48 = vcombine.low %v262_v27, %v274_v56  ;;  %v491_v10 = vrot.slane %v442_v62, 4 }
  0xe4   :  { %8272 = vmatprep.mubr.msk.bf16.mxu1 %vm1476_vm0, %v10092_v55  ;;  %8266 = vmatprep.mubr.msk.bf16.mxu0 %vm1476_vm0, %v10213_v9 }
  0xe5   :  { %1902 = vmatpush2.bf16.msra.mxu1 %v13991_v36  ;;  %v8171_v36 = vcombine.high %v238_v0, %v250_v2 }
  0xe6   :  { %1903 = vmatprep.subr.bf16.mxu1 %v13992_v17  ;;  %v8170_v17 = vcombine.low %v238_v0, %v250_v2 }
  0xe9   :  { %1904 = vmatpush2.bf16.msra.mxu1 %v13993_v49  ;;  %v547_v49 = vsel %vm227_vm1, %v504_v15, %v505_v43  ;;  %v9170_v43 = vld [vmem:[%s13724_s0 + $0xd0] sm:$0xff] }
  0xeb   :  { %1710 = vmatmul.mubr.bf16.gmra.mxu1 %v10154_v33  ;;  %1617 = vmatmul.mubr.bf16.gmra.mxu0 %v10237_v18 }
  0xec   :  { %8273 = vmatprep.mubr.msk.bf16.mxu1 %vm1476_vm0, %v10163_v52  ;;  %8276 = vmatprep.mubr.msk.bf16.mxu0 %vm1476_vm0, %v9411_v38 }
  0xf3   :  { %1720 = vmatmul.mubr.bf16.gmra.mxu1 %v10183_v53  ;;  %1783 = vmatmul.mubr.bf16.vlgmr.msra.gmra.mxu0 %v9859_v28 }
  0xf4   :  { %8274 = vmatprep.mubr.msk.bf16.mxu1 %vm1476_vm0, %v10188_v54  ;;  %1997 = vmatpush1.bf16.msra.mxu0 %v8230_v34  ;;  %v548_v34 = vsel %vm229_vm2, %v10066_v30, %v547_v49 }
  0xf5   :  { %1998 = vmatprep.subr.bf16.mxu0 %v8219_v13  ;;  %8277 = vmatprep.mubr.msk.bf16.mxu0 %vm1476_vm0, %v9892_v3  ;;  %v523_v13 = vsel %vm227_vm1, %v490_v47, %v491_v10  ;;  %v184_v47 = vpop.permute.xlu0 %183  ;;  %v9173_v10 = vld [vmem:[%s13724_s0 + $0x28] sm:$0xff] }
  0xf6   :  { %v524_v30 = vsel %vm229_vm2, %v10226_v6, %v523_v13  ;;  %v219_v27 = vrot.slane %v184_v47, 4  ;;  %v9019_v13 = vld [vmem:[%s13724_s0 + $0xa0] ss:$56 sps:$4 sm:$0xff]  }
  0xf8   :  { %1999 = vmatpush1.bf16.msra.mxu0 %v8218_v25  ;;  %v263_v7 = vsel %vm227_vm1, %v218_v1, %v219_v27 }
  0xf9   :  { %2000 = vmatprep.subr.bf16.mxu0 %v8207_v41  ;;  %v156_v0 = vpop.permute.xlu0 %155 }
  0xfb   :  { %1730 = vmatmul.mubr.bf16.gmra.mxu1 %v10208_v32  ;;  %1793 = vmatmul.mubr.bf16.gmra.mxu0 %v9920_v4 }
  0xfc   :  { %8275 = vmatprep.mubr.msk.bf16.mxu1 %vm1476_vm0, %v10213_v9  ;;  %2001 = vmatpush1.bf16.msra.mxu0 %v8206_v20 }
  0xfd   :  { %2002 = vmatprep.subr.bf16.mxu0 %v13994_v58  ;;  %8278 = vmatprep.mubr.msk.bf16.mxu0 %vm1476_vm0, %v9945_v26  ;;  %v13997_v58 = vld [vmem:[#allocation9_spill] sm:$0xff] }
 0x100   :  { %2003 = vmatpush1.bf16.msra.mxu0 %v13995_v24  ;;  %v205_v24 = vrot.slane %v156_v0, 4 }
 0x101   :  { %2004 = vmatprep.subr.bf16.mxu0 %v8183_v44  ;;  %v8197_v44 = vcombine.high %v13997_v58, %v13996_v57 }
 0x103   :  { %1740 = vmatmul.mubr.bf16.gmra.mxu1 %v10237_v18  ;;  %1803 = vmatmul.mubr.bf16.gmra.mxu0 %v9981_v22 }
 0x104   :  { %2005 = vmatpush1.bf16.msra.mxu0 %v8182_v48  ;;  %8285 = vmatprep.mubr.msk.bf16.mxu1 %vm1476_vm0, %v9411_v38  ;;  %v484_v38 = vpop.permute.xlu1 %483 }
 0x105   :  { %2006 = vmatprep.subr.bf16.mxu0 %v8171_v36  ;;  %8279 = vmatprep.mubr.msk.bf16.mxu0 %vm1476_vm0, %v10017_v11  ;;  %v512_v60 = vrot.slane %v484_v38, 4  ;;  %v239_v36 = vsel %vm227_vm1, %v204_v45, %v205_v24  ;;  %v9169_v45 = vld [vmem:[%s13725_s1 + $0x4] ss:$8 sps:$4 sm:$0xff]  }
 0x107   :  { %v559_v12 = vsel %vm227_vm1, %v511_v31, %v512_v60  ;;  %v9014_v60 = vld [vmem:[%s13724_s0 + $0x24] ss:$56 sps:$4 sm:$0xff]  }
 0x108   :  { %2007 = vmatpush1.bf16.msra.mxu0 %v8170_v17  ;;  %v456_v61 = vpop.permute.xlu1 %455  ;;  %v560_v31 = vsel %vm229_vm2, %v10064_v8, %v559_v12  ;;  %v9171_v12 = vld [vmem:[%s13724_s0 + $0x98] sm:$0xff] }
 0x109   :  { %v498_v63 = vrot.slane %v456_v61, 4  ;;  %v8233_v25 = vcombine.high %v548_v34, %v560_v31  ;;  %v8232_v41 = vcombine.low %v548_v34, %v560_v31  ;;  %v8161_v49 = vcombine.high %v9171_v12, %v9170_v43  ;;  %v9012_v61 = vld [vmem:[%s13724_s0 + $0x20] ss:$56 sps:$4 sm:$0xff]  }
 0x10a   :  { %v8160_v62 = vcombine.low %v9171_v12, %v9170_v43 }
 0x10b   :  { %1906 = vmatmul.mubr.bf16.vlgmr.msra.gmra.mxu1 %v9859_v28  ;;  %1813 = vmatmul.mubr.bf16.gmra.mxu0 %v10053_v21  ;;  %v535_v15 = vsel %vm227_vm1, %v497_v51, %v498_v63  ;;  %v8209_v51 = vcombine.high %v9563_v16, %v9558_v14  ;;  %v9172_v63 = vld [vmem:[%s13724_s0 + $0x60] sm:$0xff] }
 0x10c   :  { %8286 = vmatprep.mubr.msk.bf16.mxu1 %vm1476_vm0, %v9892_v3  ;;  %8280 = vmatprep.mubr.msk.bf16.mxu0 %vm1476_vm0, %v10044_v40  ;;  %v536_v8 = vsel %vm229_vm2, %v10224_v37, %v535_v15  ;;  %v8208_v37 = vcombine.low %v9563_v16, %v9558_v14  ;;  %v198_v6 = vpop.permute.xlu1 %197  ;;  %v8196_v14 = vcombine.low %v13997_v58, %v13996_v57  ;;  %v9021_v15 = vld [vmem:[%s13724_s0 + $0xa4] ss:$56 sps:$4 sm:$0xff]  }
 0x10d   :  { %2119 = vmatprep.subr.bf16.mxu1 %v8233_v25  ;;  %v8221_v46 = vcombine.high %v524_v30, %v536_v8  ;;  %v8220_v5 = vcombine.low %v524_v30, %v536_v8  ;;  %v226_v20 = vrot.slane %v198_v6, 4  ;;  %v8149_v34 = vcombine.high %v9173_v10, %v9172_v63  ;;  %v9024_v25 = vld [vmem:[%s13724_s0 + $0x34] ss:$56 sps:$4 sm:$0xff]  }
 0x10e   :  { %2120 = vmatpush1.bf16.msra.mxu1 %v8232_v41  ;;  %v8148_v31 = vcombine.low %v9173_v10, %v9172_v63  ;;  %v9022_v41 = vld [vmem:[%s13724_s0 + $0x30] ss:$56 sps:$4 sm:$0xff]  }
 0x10f   :  { %2121 = vmatprep.subr.bf16.mxu1 %v8221_v46  ;;  %v275_v56 = vsel %vm227_vm1, %v225_v23, %v226_v20  ;;  %v264_v23 = vsel %vm229_vm2, %v10266_v35, %v263_v7 }
 0x110   :  { %v170_v16 = vpop.permute.xlu1 %169  ;;  %v276_v1 = vsel %vm229_vm2, %v10264_v50, %v275_v56  ;;  %v240_v50 = vsel %vm229_vm2, %v10278_v29, %v239_v36  ;;  %v9009_v29 = vld [vmem:[%s13724_s0 + $0x90] ss:$56 sps:$4 sm:$0xff]  }
 0x111   :  { %v212_v2 = vrot.slane %v170_v16, 4  ;;  %v8185_v17 = vcombine.high %v264_v23, %v276_v1  ;;  %v8184_v38 = vcombine.low %v264_v23, %v276_v1 }
 0x112   :  { %2122 = vmatpush1.bf16.msra.mxu1 %v8220_v5 }
 0x113   :  { %1916 = vmatmul.mubr.bf16.gmra.mxu1 %v9920_v4  ;;  %1823 = vmatmul.mubr.bf16.gmra.mxu0 %v10077_v39  ;;  %v251_v48 = vsel %vm227_vm1, %v211_v42, %v212_v2 }
 0x114   :  { %8287 = vmatprep.mubr.msk.bf16.mxu1 %vm1476_vm0, %v9945_v26  ;;  %8281 = vmatprep.mubr.msk.bf16.mxu0 %vm1476_vm0, %v10092_v55  ;;  %v252_v35 = vsel %vm229_vm2, %v10276_v19, %v251_v48  ;;  %v9011_v19 = vld [vmem:[%s13724_s0 + $0x94] ss:$56 sps:$4 sm:$0xff]  }
 0x115   :  { %2123 = vmatprep.subr.bf16.mxu1 %v8209_v51  ;;  %v8173_v59 = vcombine.high %v240_v50, %v252_v35  ;;  %v8172_v42 = vcombine.low %v240_v50, %v252_v35  ;;  %2008 = vmatprep.subr.bf16.mxu0 %v9011_v19 }
 0x116   :  { %2124 = vmatpush1.bf16.msra.mxu1 %v8208_v37  ;;  %2009 = vmatpush1.bf16.msra.mxu0 %v9009_v29 }
 0x117   :  { %2125 = vmatprep.subr.bf16.mxu1 %v8197_v44  ;;  %2010 = vmatprep.subr.bf16.mxu0 %v9014_v60  ;;  %v10700_v60 = vpop.permute.xlu1 %2497 }
 0x11a   :  { %2126 = vmatpush1.bf16.msra.mxu1 %v8196_v14  ;;  %2011 = vmatpush1.bf16.msra.mxu0 %v9012_v61 }
 0x11b   :  { %1926 = vmatmul.mubr.bf16.gmra.mxu1 %v9981_v22  ;;  %1833 = vmatmul.mubr.bf16.gmra.mxu0 %v10154_v33 }
 0x11c   :  { %8288 = vmatprep.mubr.msk.bf16.mxu1 %vm1476_vm0, %v10017_v11  ;;  %8282 = vmatprep.mubr.msk.bf16.mxu0 %vm1476_vm0, %v10163_v52 }
 0x11d   :  { %2127 = vmatprep.subr.bf16.mxu1 %v8185_v17  ;;  %2024 = vmatprep.subr.bf16.mxu0 %v8161_v49 }
 0x11e   :  { %2128 = vmatpush1.bf16.msra.mxu1 %v8184_v38  ;;  %2025 = vmatpush2.bf16.msra.mxu0 %v8160_v62 }
 0x11f   :  { %2129 = vmatprep.subr.bf16.mxu1 %v8173_v59  ;;  %2026 = vmatprep.subr.bf16.mxu0 %v8149_v34 }
 0x122   :  { %2130 = vmatpush1.bf16.msra.mxu1 %v8172_v42  ;;  %2027 = vmatpush2.bf16.msra.mxu0 %v8148_v31 }
 0x123   :  { %1936 = vmatmul.mubr.bf16.gmra.mxu1 %v10053_v21  ;;  %1843 = vmatmul.mubr.bf16.gmra.mxu0 %v10183_v53 }
 0x124   :  { %8289 = vmatprep.mubr.msk.bf16.mxu1 %vm1476_vm0, %v10044_v40  ;;  %8283 = vmatprep.mubr.msk.bf16.mxu0 %vm1476_vm0, %v10188_v54 }
 0x125   :  { %2131 = vmatprep.subr.bf16.mxu1 %v8161_v49  ;;  %v10710_v49 = vpop.permute.xlu0 %2492 }
 0x126   :  { %2132 = vmatpush1.bf16.msra.mxu1 %v8160_v62  ;;  %v10716_v62 = vpop.permute.xlu1 %2482 }
 0x127   :  { %2133 = vmatprep.subr.bf16.mxu1 %v8149_v34 }
 0x129   :  { %v10726_v34 = vpop.permute.xlu0 %2487 }
 0x12a   :  { %2134 = vmatpush1.bf16.msra.mxu1 %v8148_v31 }
 0x12b   :  { %1946 = vmatmul.mubr.bf16.gmra.mxu1 %v10077_v39  ;;  %1853 = vmatmul.mubr.bf16.gmra.mxu0 %v10208_v32 }
 0x12c   :  { %8290 = vmatprep.mubr.msk.bf16.mxu1 %vm1476_vm0, %v10092_v55  ;;  %8284 = vmatprep.mubr.msk.bf16.mxu0 %vm1476_vm0, %v10213_v9 }
 0x12d   :  { %2147 = vmatprep.subr.bf16.mxu1 %v9021_v15 }
 0x12e   :  { %2148 = vmatpush2.bf16.msra.mxu1 %v9019_v13  ;;  %v10734_v13 = vpop.permute.xlu1 %2472 }
 0x12f   :  { %2149 = vmatprep.subr.bf16.mxu1 %v9024_v25 }
 0x132   :  { %2150 = vmatpush2.bf16.msra.mxu1 %v9022_v41  ;;  %v10742_v41 = vpop.permute.xlu0 %2477 }
 0x133   :  { %1956 = vmatmul.mubr.bf16.gmra.mxu1 %v10154_v33  ;;  %1863 = vmatmul.mubr.bf16.gmra.mxu0 %v10237_v18 }
 0x134   :  { %8291 = vmatprep.mubr.msk.bf16.mxu1 %vm1476_vm0, %v10163_v52  ;;  %8294 = vmatprep.mubr.msk.bf16.mxu0 %vm1476_vm0, %v9169_v45 }
 0x13b   :  { %1966 = vmatmul.mubr.bf16.gmra.mxu1 %v10183_v53  ;;  %2029 = vmatmul.mubr.bf16.vlgmr.msra.gmra.mxu0 %v9859_v28 }
 0x13c   :  { %8292 = vmatprep.mubr.msk.bf16.mxu1 %vm1476_vm0, %v10188_v54  ;;  %8295 = vmatprep.mubr.msk.bf16.mxu0 %vm1476_vm0, %v9892_v3 }
 0x143   :  { %1976 = vmatmul.mubr.bf16.gmra.mxu1 %v10208_v32  ;;  %2039 = vmatmul.mubr.bf16.gmra.mxu0 %v9920_v4 }
 0x144   :  { %8293 = vmatprep.mubr.msk.bf16.mxu1 %vm1476_vm0, %v10213_v9  ;;  %8296 = vmatprep.mubr.msk.bf16.mxu0 %vm1476_vm0, %v9945_v26 }
 0x14b   :  { %1986 = vmatmul.mubr.bf16.gmra.mxu1 %v10237_v18  ;;  %2049 = vmatmul.mubr.bf16.gmra.mxu0 %v9981_v22 }
 0x14c   :  { %8303 = vmatprep.mubr.msk.bf16.mxu1 %vm1476_vm0, %v9169_v45  ;;  %8297 = vmatprep.mubr.msk.bf16.mxu0 %vm1476_vm0, %v10017_v11 }
 0x153   :  { %2152 = vmatmul.mubr.bf16.vlgmr.msra.gmra.mxu1 %v9859_v28  ;;  %2059 = vmatmul.mubr.bf16.gmra.mxu0 %v10053_v21 }
 0x154   :  { %8304 = vmatprep.mubr.msk.bf16.mxu1 %vm1476_vm0, %v9892_v3  ;;  %8298 = vmatprep.mubr.msk.bf16.mxu0 %vm1476_vm0, %v10044_v40 }
 0x15b   :  { %2162 = vmatmul.mubr.bf16.gmra.mxu1 %v9920_v4  ;;  %2069 = vmatmul.mubr.bf16.gmra.mxu0 %v10077_v39 }
 0x15c   :  { %8305 = vmatprep.mubr.msk.bf16.mxu1 %vm1476_vm0, %v9945_v26  ;;  %8299 = vmatprep.mubr.msk.bf16.mxu0 %vm1476_vm0, %v10092_v55 }
 0x163   :  { %2172 = vmatmul.mubr.bf16.gmra.mxu1 %v9981_v22  ;;  %2079 = vmatmul.mubr.bf16.gmra.mxu0 %v10154_v33 }
 0x164   :  { %8306 = vmatprep.mubr.msk.bf16.mxu1 %vm1476_vm0, %v10017_v11  ;;  %8300 = vmatprep.mubr.msk.bf16.mxu0 %vm1476_vm0, %v10163_v52 }
 0x16b   :  { %v10479_v30 = vpop.f32.mrf.mxu0  ;;  %2182 = vmatmul.mubr.bf16.gmra.mxu1 %v10053_v21  ;;  %2089 = vmatmul.mubr.bf16.gmra.mxu0 %v10183_v53 }
 0x16c   :  { %2551 = vrot.lane.b32.xlu0 %v10479_v30, %s9178_s21  ;;  %8307 = vmatprep.mubr.msk.bf16.mxu1 %vm1476_vm0, %v10044_v40 }
 0x16d   :  { %v10483_v28 = vpop.f32.mrf.mxu0  ;;  %8301 = vmatprep.mubr.msk.bf16.mxu0 %vm1476_vm0, %v10188_v54 }
 0x16e   :  { %13998 = vst [vmem:[#allocation8_spill] sm:$0xff] %v10483_v28  ;;  %2733 = vrot.lane.b32.xlu1 %v10483_v28, %s9178_s21 }
 0x16f   :  { %v10505_v3 = vpop.f32.mrf.mxu0 }
 0x171   :  { %v10518_v22 = vpop.f32.mrf.mxu0 }
 0x172   :  { %14000 = vst [vmem:[#allocation10_spill] sm:$0xff] %v10518_v22 }
 0x173   :  { %2192 = vmatmul.mubr.bf16.gmra.mxu1 %v10077_v39  ;;  %v10529_v40 = vpop.f32.mrf.mxu0  ;;  %2099 = vmatmul.mubr.bf16.gmra.mxu0 %v10208_v32 }
 0x174   :  { %8308 = vmatprep.mubr.msk.bf16.mxu1 %vm1476_vm0, %v10092_v55  ;;  %8302 = vmatprep.mubr.msk.bf16.mxu0 %vm1476_vm0, %v10213_v9 }
 0x175   :  { %v10542_v55 = vpop.f32.mrf.mxu0 }
 0x176   :  { %14002 = vst [vmem:[#allocation12_spill] sm:$0xff] %v10542_v55 }
 0x17b   :  { %2202 = vmatmul.mubr.bf16.gmra.mxu1 %v10154_v33  ;;  %2109 = vmatmul.mubr.bf16.gmra.mxu0 %v10237_v18 }
 0x17c   :  { %8309 = vmatprep.mubr.msk.bf16.mxu1 %vm1476_vm0, %v10163_v52  ;;  %v10553_v52 = vpop.f32.mrf.mxu0 }
 0x183   :  { %v10507_v4 = vpop.f32.mrf.mxu1  ;;  %2212 = vmatmul.mubr.bf16.gmra.mxu1 %v10183_v53 }
 0x184   :  { %2933 = vrot.lane.b32.xlu0 %v10507_v4, %s9178_s21  ;;  %8310 = vmatprep.mubr.msk.bf16.mxu1 %vm1476_vm0, %v10188_v54  ;;  %v10564_v54 = vpop.f32.mrf.mxu0 }
 0x185   :  { %v10511_v26 = vpop.f32.mrf.mxu1  ;;  %14004 = vst [vmem:[#allocation14_spill] sm:$0xff] %v10564_v54 }
 0x186   :  { %13999 = vst [vmem:[#allocation9_spill] sm:$0xff] %v10511_v26  ;;  %3114 = vrot.lane.b32.xlu1 %v10511_v26, %s9178_s21  ;;  %v10570_v46 = vpop.f32.mrf.mxu0 }
 0x187   :  { %v10520_v11 = vpop.f32.mrf.mxu1 }
 0x188   :  { %2735 = vrot.lane.b32.xlu0 %v10518_v22, %s9178_s21 }
 0x189   :  { %v10531_v21 = vpop.f32.mrf.mxu1 }
 0x18a   :  { %2553 = vrot.lane.b32.xlu1 %v10505_v3, %s9178_s21  ;;  %14001 = vst [vmem:[#allocation11_spill] sm:$0xff] %v10531_v21 }
 0x18b   :  { %v10535_v39 = vpop.f32.mrf.mxu1  ;;  %2222 = vmatmul.mubr.bf16.gmra.mxu1 %v10208_v32 }
 0x18c   :  { %3116 = vrot.lane.b32.xlu0 %v10531_v21, %s9178_s21  ;;  %8311 = vmatprep.mubr.msk.bf16.mxu1 %vm1476_vm0, %v10213_v9  ;;  %v10579_v9 = vpop.f32.mrf.mxu0 }
 0x18d   :  { %v10546_v33 = vpop.f32.mrf.mxu1  ;;  %14006 = vst [vmem:[#allocation16_spill] sm:$0xff] %v10579_v9 }
 0x18e   :  { %2935 = vrot.lane.b32.xlu1 %v10520_v11, %s9178_s21  ;;  %14003 = vst [vmem:[#allocation13_spill] sm:$0xff] %v10546_v33  ;;  %v10588_v51 = vpop.f32.mrf.mxu0 }
 0x18f   :  { %v10557_v53 = vpop.f32.mrf.mxu1 }
 0x190   :  { %2555 = vrot.lane.b32.xlu0 %v10529_v40, %s9178_s21  ;;  %v10596_v6 = vpop.f32.mrf.mxu0 }
 0x191   :  { %v10568_v8 = vpop.f32.mrf.mxu1  ;;  %14008 = vst [vmem:[#allocation18_spill] sm:$0xff] %v10596_v6 }
 0x192   :  { %2737 = vrot.lane.b32.xlu1 %v10542_v55, %s9178_s21  ;;  %14005 = vst [vmem:[#allocation15_spill] sm:$0xff] %v10568_v8  ;;  %v10602_v47 = vpop.f32.mrf.mxu0 }
 0x193   :  { %v10575_v32 = vpop.f32.mrf.mxu1  ;;  %2232 = vmatmul.mubr.bf16.gmra.mxu1 %v10237_v18  ;;  %14010 = vst [vmem:[#allocation20_spill] sm:$0xff] %v10602_v47 }
 0x194   :  { %2937 = vrot.lane.b32.xlu0 %v10535_v39, %s9178_s21  ;;  %v10610_v27 = vpop.f32.mrf.mxu0 }
 0x195   :  { %v10584_v5 = vpop.f32.mrf.mxu1  ;;  %14011 = vst [vmem:[#allocation21_spill] sm:$0xff] %v10610_v27 }
 0x196   :  { %3118 = vrot.lane.b32.xlu1 %v10546_v33, %s9178_s21  ;;  %14007 = vst [vmem:[#allocation17_spill] sm:$0xff] %v10584_v5  ;;  %v10618_v7 = vpop.f32.mrf.mxu0 }
 0x197   :  { %v10592_v37 = vpop.f32.mrf.mxu1 }
 0x198   :  { %2739 = vrot.lane.b32.xlu0 %v10564_v54, %s9178_s21  ;;  %v10626_v58 = vpop.f32.mrf.mxu0 }
 0x199   :  { %v10600_v18 = vpop.f32.mrf.mxu1  ;;  %14013 = vst [vmem:[#allocation23_spill] sm:$0xff] %v10626_v58 }
 0x19a   :  { %2557 = vrot.lane.b32.xlu1 %v10553_v52, %s9178_s21  ;;  %14009 = vst [vmem:[#allocation19_spill] sm:$0xff] %v10600_v18  ;;  %v10632_v14 = vpop.f32.mrf.mxu0 }
 0x19b   :  { %v10606_v20 = vpop.f32.mrf.mxu1  ;;  %14015 = vst [vmem:[#allocation25_spill] sm:$0xff] %v10632_v14 }
 0x19c   :  { %3120 = vrot.lane.b32.xlu0 %v10568_v8, %s9178_s21  ;;  %v10640_v0 = vpop.f32.mrf.mxu0 }
 0x19d   :  { %v10614_v56 = vpop.f32.mrf.mxu1  ;;  %14017 = vst [vmem:[#allocation27_spill] sm:$0xff] %v10640_v0 }
 0x19e   :  { %2939 = vrot.lane.b32.xlu1 %v10557_v53, %s9178_s21  ;;  %14012 = vst [vmem:[#allocation22_spill] sm:$0xff] %v10614_v56  ;;  %v10648_v24 = vpop.f32.mrf.mxu0 }
 0x19f   :  { %v10622_v57 = vpop.f32.mrf.mxu1 }
 0x1a0   :  { %2559 = vrot.lane.b32.xlu0 %v10570_v46, %s9178_s21  ;;  %v10656_v1 = vpop.f32.mrf.mxu0 }
 0x1a1   :  { %v10630_v44 = vpop.f32.mrf.mxu1  ;;  %14019 = vst [vmem:[#allocation29_spill] sm:$0xff] %v10656_v1 }
 0x1a2   :  { %2741 = vrot.lane.b32.xlu1 %v10579_v9, %s9178_s21  ;;  %14014 = vst [vmem:[#allocation24_spill] sm:$0xff] %v10630_v44  ;;  %v10664_v36 = vpop.f32.mrf.mxu0 }
 0x1a3   :  { %v10636_v16 = vpop.f32.mrf.mxu1 }
 0x1a4   :  { %2941 = vrot.lane.b32.xlu0 %v10575_v32, %s9178_s21  ;;  %14016 = vst [vmem:[#allocation26_spill] sm:$0xff] %v10636_v16  ;;  %v10672_v38 = vpop.f32.mrf.mxu0 }
 0x1a5   :  { %v10644_v2 = vpop.f32.mrf.mxu1  ;;  %14021 = vst [vmem:[#allocation31_spill] sm:$0xff] %v10672_v38 }
 0x1a6   :  { %3122 = vrot.lane.b32.xlu1 %v10584_v5, %s9178_s21  ;;  %14018 = vst [vmem:[#allocation28_spill] sm:$0xff] %v10644_v2  ;;  %v10680_v35 = vpop.f32.mrf.mxu0 }
 0x1a7   :  { %v10652_v23 = vpop.f32.mrf.mxu1 }
 0x1a8   :  { %2743 = vrot.lane.b32.xlu0 %v10596_v6, %s9178_s21  ;;  %v10688_v42 = vpop.f32.mrf.mxu0 }
 0x1a9   :  { %v10660_v48 = vpop.f32.mrf.mxu1  ;;  %14023 = vst [vmem:[#allocation33_spill] sm:$0xff] %v10688_v42 }
 0x1aa   :  { %2561 = vrot.lane.b32.xlu1 %v10588_v51, %s9178_s21  ;;  %14020 = vst [vmem:[#allocation30_spill] sm:$0xff] %v10660_v48  ;;  %v10698_v29 = vpop.f32.mrf.mxu0 }
 0x1ab   :  { %v10666_v17 = vpop.f32.mrf.mxu1 }
 0x1ac   :  { %3124 = vrot.lane.b32.xlu0 %v10600_v18, %s9178_s21  ;;  %v10708_v12 = vpop.f32.mrf.mxu0 }
 0x1ad   :  { %v10674_v50 = vpop.f32.mrf.mxu1  ;;  %14026 = vst [vmem:[#allocation36_spill] sm:$0xff] %v10708_v12 }
 0x1ae   :  { %2943 = vrot.lane.b32.xlu1 %v10592_v37, %s9178_s21  ;;  %14022 = vst [vmem:[#allocation32_spill] sm:$0xff] %v10674_v50  ;;  %v10720_v63 = vpop.f32.mrf.mxu0 }
 0x1af   :  { %v10682_v59 = vpop.f32.mrf.mxu1 }
 0x1b0   :  { %2945 = vrot.lane.b32.xlu0 %v10606_v20, %s9178_s21  ;;  %v10730_v31 = vpop.f32.mrf.mxu0 }
 0x1b1   :  { %v10690_v45 = vpop.f32.mrf.mxu1  ;;  %14028 = vst [vmem:[#allocation38_spill] sm:$0xff] %v10730_v31 }
 0x1b2   :  { %2947 = vrot.lane.b32.xlu1 %v10622_v57, %s9178_s21  ;;  %14024 = vst [vmem:[#allocation34_spill] sm:$0xff] %v10690_v45 }
 0x1b3   :  { %v10694_v19 = vpop.f32.mrf.mxu1 }
 0x1b4   :  { %2563 = vrot.lane.b32.xlu0 %v10602_v47, %s9178_s21 }
 0x1b5   :  { %v10704_v43 = vpop.f32.mrf.mxu1 }
 0x1b6   :  { %2565 = vrot.lane.b32.xlu1 %v10618_v7, %s9178_s21  ;;  %14025 = vst [vmem:[#allocation35_spill] sm:$0xff] %v10704_v43 }
 0x1b7   :  { %v10714_v61 = vpop.f32.mrf.mxu1 }
 0x1b8   :  { %3126 = vrot.lane.b32.xlu0 %v10614_v56, %s9178_s21 }
 0x1b9   :  { %v10724_v10 = vpop.f32.mrf.mxu1 }
 0x1ba   :  { %3128 = vrot.lane.b32.xlu1 %v10630_v44, %s9178_s21  ;;  %14027 = vst [vmem:[#allocation37_spill] sm:$0xff] %v10724_v10  ;;  %v10758_v44 = vpop.permute.xlu0 %2502 }
 0x1bb   :  { %v10732_v15 = vpop.f32.mrf.mxu1  ;;  %14033 = vst [vmem:[#allocation43_spill] sm:$0xff] %v10758_v44 }
 0x1bc   :  { %2745 = vrot.lane.b32.xlu0 %v10610_v27, %s9178_s21 }
 0x1bd   :  { %v10740_v25 = vpop.f32.mrf.mxu1 }
 0x1be   :  { %2747 = vrot.lane.b32.xlu1 %v10626_v58, %s9178_s21  ;;  %14029 = vst [vmem:[#allocation39_spill] sm:$0xff] %v10740_v25  ;;  %v10746_v58 = vpop.f32.mrf.mxu0 }
 0x1c0   :  { %2949 = vrot.lane.b32.xlu0 %v10636_v16, %s9178_s21  ;;  %v10756_v56 = vpop.f32.mrf.mxu0 }
 0x1c1   :  { %14032 = vst [vmem:[#allocation42_spill] sm:$0xff] %v10756_v56 }
 0x1c2   :  { %2751 = vrot.lane.b32.xlu1 %v10656_v1, %s9178_s21 }
 0x1c4   :  { %2567 = vrot.lane.b32.xlu0 %v10632_v14, %s9178_s21 }
 0x1c6   :  { %3132 = vrot.lane.b32.xlu1 %v10660_v48, %s9178_s21 }
 0x1c8   :  { %3130 = vrot.lane.b32.xlu0 %v10644_v2, %s9178_s21  ;;  %v10752_v2 = vpop.f32.mrf.mxu1 }
 0x1c9   :  { %14031 = vst [vmem:[#allocation41_spill] sm:$0xff] %v10752_v2 }
 0x1ca   :  { %2571 = vrot.lane.b32.xlu1 %v10664_v36, %s9178_s21  ;;  %v10762_v27 = vpop.f32.mrf.mxu1 }
 0x1cb   :  { %14034 = vst [vmem:[#allocation44_spill] sm:$0xff] %v10762_v27 }
 0x1cc   :  { %2749 = vrot.lane.b32.xlu0 %v10640_v0, %s9178_s21  ;;  %v10748_v0 = vpop.permute.xlu1 %2512  ;;  %v10772_v9 = vpop.f32.mrf.mxu1 }
 0x1cd   :  { %14030 = vst [vmem:[#allocation40_spill] sm:$0xff] %v10748_v0 }
 0x1ce   :  { %2953 = vrot.lane.b32.xlu1 %v10666_v17, %s9178_s21 }
 0x1d0   :  { %2569 = vrot.lane.b32.xlu0 %v10648_v24, %s9178_s21  ;;  %v10764_v5 = vpop.permute.xlu1 %2507 }
 0x1d2   :  { %2755 = vrot.lane.b32.xlu1 %v10688_v42, %s9178_s21 }
 0x1d4   :  { %2951 = vrot.lane.b32.xlu0 %v10652_v23, %s9178_s21 }
 0x1d6   :  { %3136 = vrot.lane.b32.xlu1 %v10690_v45, %s9178_s21  ;;  %v10794_v45 = vpop.f32.mrf.mxu1 }
 0x1d7   :  { %14039 = vst [vmem:[#allocation49_spill] sm:$0xff] %v10794_v45 }
 0x1d8   :  { %2753 = vrot.lane.b32.xlu0 %v10672_v38, %s9178_s21  ;;  %v10814_v21 = vpop.f32.mrf.mxu1 }
 0x1d9   :  { %14043 = vst [vmem:[#allocation53_spill] sm:$0xff] %v10814_v21 }
 0x1da   :  { %2575 = vrot.lane.b32.xlu1 %v10698_v29, %s9178_s21  ;;  %v10834_v26 = vpop.f32.mrf.mxu1 }
 0x1db   :  { %14047 = vst [vmem:[#allocation57_spill] sm:$0xff] %v10834_v26 }
 0x1dc   :  { %3134 = vrot.lane.b32.xlu0 %v10674_v50, %s9178_s21 }
 0x1de   :  { %2957 = vrot.lane.b32.xlu1 %v10694_v19, %s9178_s21 }
 0x1e0   :  { %2573 = vrot.lane.b32.xlu0 %v10680_v35, %s9178_s21  ;;  %v10780_v6 = vpop.permute.xlu1 %2733 }
 0x1e1   :  { %14037 = vst [vmem:[#allocation47_spill] sm:$0xff] %v10780_v6 }
 0x1e2   :  { %2759 = vrot.lane.b32.xlu1 %v10730_v31, %s9178_s21  ;;  %v10774_v31 = vpop.permute.xlu0 %2551 }
 0x1e4   :  { %2955 = vrot.lane.b32.xlu0 %v10682_v59, %s9178_s21 }
 0x1e6   :  { %3140 = vrot.lane.b32.xlu1 %v10724_v10, %s9178_s21  ;;  %v10768_v10 = vpop.f32.mrf.mxu0 }
 0x1e7   :  { %14035 = vst [vmem:[#allocation45_spill] sm:$0xff] %v10768_v10 }
 0x1e8   :  { %2757 = vrot.lane.b32.xlu0 %v10708_v12, %s9178_s21  ;;  %v10778_v18 = vpop.f32.mrf.mxu0 }
 0x1e9   :  { %14036 = vst [vmem:[#allocation46_spill] sm:$0xff] %v10778_v18 }
 0x1ea   :  { %2579 = vrot.lane.b32.xlu1 %v10746_v58, %s9178_s21  ;;  %v10784_v8 = vpop.f32.mrf.mxu0 }
 0x1ec   :  { %3138 = vrot.lane.b32.xlu0 %v10704_v43, %s9178_s21  ;;  %v10804_v55 = vpop.f32.mrf.mxu0 }
 0x1ed   :  { %14041 = vst [vmem:[#allocation51_spill] sm:$0xff] %v10804_v55 }
 0x1ee   :  { %2961 = vrot.lane.b32.xlu1 %v10732_v15, %s9178_s21 }
 0x1f0   :  { %2577 = vrot.lane.b32.xlu0 %v10720_v63, %s9178_s21 }
 0x1f2   :  { %2965 = vrot.lane.b32.xlu1 %v10772_v9, %s9178_s21 }
 0x1f4   :  { %2959 = vrot.lane.b32.xlu0 %v10714_v61, %s9178_s21 }
 0x1f6   :  { %v10786_v43 = vpop.permute.xlu0 %2933  ;;  %2583 = vrot.lane.b32.xlu1 %v10784_v8, %s9178_s21 }
 0x1f8   :  { %v10790_v33 = vpop.permute.xlu1 %3114  ;;  %2761 = vrot.lane.b32.xlu0 %v10756_v56, %s9178_s21 }
 0x1f9   :  { %14038 = vst [vmem:[#allocation48_spill] sm:$0xff] %v10790_v33 }
 0x1fa   :  { %v10796_v54 = vpop.permute.xlu0 %2735  ;;  %3146 = vrot.lane.b32.xlu1 %v10794_v45, %s9178_s21 }
 0x1fb   :  { %14040 = vst [vmem:[#allocation50_spill] sm:$0xff] %v10796_v54  ;;  %v10854_v54 = vpop.f32.mrf.mxu1 }
 0x1fc   :  { %v10800_v12 = vpop.permute.xlu1 %2553  ;;  %3142 = vrot.lane.b32.xlu0 %v10740_v25, %s9178_s21  ;;  %14053 = vst [vmem:[#allocation63_spill] sm:$0xff] %v10854_v54 }
 0x1fe   :  { %v10806_v42 = vpop.permute.xlu0 %3116  ;;  %2765 = vrot.lane.b32.xlu1 %v10804_v55, %s9178_s21 }
 0x1ff   :  { %14042 = vst [vmem:[#allocation52_spill] sm:$0xff] %v10806_v42  ;;  %v10824_v42 = vpop.f32.mrf.mxu0 }
 0x200   :  { %v10810_v56 = vpop.permute.xlu1 %2935  ;;  %2963 = vrot.lane.b32.xlu0 %v10752_v2, %s9178_s21  ;;  %14045 = vst [vmem:[#allocation55_spill] sm:$0xff] %v10824_v42 }
 0x201   :  { %v10836_v33 = vpop.f32.mrf.mxu0 }
 0x202   :  { %v10816_v45 = vpop.permute.xlu0 %2555  ;;  %2967 = vrot.lane.b32.xlu1 %v10814_v21, %s9178_s21  ;;  %14048 = vst [vmem:[#allocation58_spill] sm:$0xff] %v10836_v33 }
 0x203   :  { %v10842_v48 = vpop.f32.mrf.mxu0 }
 0x204   :  { %v10820_v25 = vpop.permute.xlu1 %2737  ;;  %2581 = vrot.lane.b32.xlu0 %v10768_v10, %s9178_s21  ;;  %14050 = vst [vmem:[#allocation60_spill] sm:$0xff] %v10842_v48 }
 0x205   :  { %14044 = vst [vmem:[#allocation54_spill] sm:$0xff] %v10820_v25 }
 0x206   :  { %v10826_v55 = vpop.permute.xlu0 %2937  ;;  %2585 = vrot.lane.b32.xlu1 %v10824_v42, %s9178_s21 }
 0x208   :  { %v10830_v50 = vpop.permute.xlu1 %3118  ;;  %3144 = vrot.lane.b32.xlu0 %v10762_v27, %s9178_s21  ;;  %v10852_v27 = vpop.f32.mrf.mxu0 }
 0x209   :  { %14046 = vst [vmem:[#allocation56_spill] sm:$0xff] %v10830_v50  ;;  %14052 = vst [vmem:[#allocation62_spill] sm:$0xff] %v10852_v27 }
 0x20a   :  { %v10838_v25 = vpop.permute.xlu0 %2739  ;;  %3148 = vrot.lane.b32.xlu1 %v10834_v26, %s9178_s21 }
 0x20b   :  { %14049 = vst [vmem:[#allocation59_spill] sm:$0xff] %v10838_v25 }
 0x20c   :  { %v10844_v22 = vpop.permute.xlu1 %2557  ;;  %2763 = vrot.lane.b32.xlu0 %v10778_v18, %s9178_s21  ;;  %v10864_v18 = vpop.f32.mrf.mxu0 }
 0x20d   :  { %14054 = vst [vmem:[#allocation64_spill] sm:$0xff] %v10864_v18 }
 0x20e   :  { %v10848_v50 = vpop.permute.xlu0 %3120  ;;  %2767 = vrot.lane.b32.xlu1 %v10836_v33, %s9178_s21 }
 0x20f   :  { %14051 = vst [vmem:[#allocation61_spill] sm:$0xff] %v10848_v50  ;;  %v10866_v50 = vpop.f32.mrf.mxu1 }
 0x210   :  { %v10856_v25 = vpop.permute.xlu1 %2939  ;;  %3313 = vrot.lane.b32.xlu0 %v10842_v48, %s9178_s21  ;;  %14055 = vst [vmem:[#allocation65_spill] sm:$0xff] %v10866_v50  ;;  %v10876_v48 = vpop.f32.mrf.mxu0 }
 0x211   :  { %14057 = vst [vmem:[#allocation67_spill] sm:$0xff] %v10876_v48  ;;  %v10878_v28 = vpop.f32.mrf.mxu1 }
 0x212   :  { %v10860_v26 = vpop.permute.xlu0 %2559  ;;  %3494 = vrot.lane.b32.xlu1 %v10852_v27, %s9178_s21  ;;  %14058 = vst [vmem:[#allocation68_spill] sm:$0xff] %v10878_v28 }
 0x214   :  { %v10868_v38 = vpop.permute.xlu1 %2741  ;;  %3693 = vrot.lane.b32.xlu0 %v10854_v54, %s9178_s21  ;;  %v10890_v54 = vpop.f32.mrf.mxu0 }
 0x215   :  { %14056 = vst [vmem:[#allocation66_spill] sm:$0xff] %v10868_v38  ;;  %v10888_v38 = vpop.f32.mrf.mxu1  ;;  %14062 = vst [vmem:[#allocation72_spill] sm:$0xff] %v10890_v54 }
 0x216   :  { %v10872_v33 = vpop.permute.xlu0 %2941  ;;  %3874 = vrot.lane.b32.xlu1 %v10866_v50, %s9178_s21  ;;  %14061 = vst [vmem:[#allocation71_spill] sm:$0xff] %v10888_v38 }
 0x218   :  { %v10880_v6 = vpop.permute.xlu1 %3122  ;;  %3496 = vrot.lane.b32.xlu0 %v10876_v48, %s9178_s21  ;;  %v10900_v48 = vpop.f32.mrf.mxu0 }
 0x219   :  { %14059 = vst [vmem:[#allocation69_spill] sm:$0xff] %v10880_v6  ;;  %14064 = vst [vmem:[#allocation74_spill] sm:$0xff] %v10900_v48  ;;  %v10902_v6 = vpop.f32.mrf.mxu1 }
 0x21a   :  { %v10884_v27 = vpop.permute.xlu0 %2743  ;;  %3315 = vrot.lane.b32.xlu1 %v10864_v18, %s9178_s21  ;;  %14065 = vst [vmem:[#allocation75_spill] sm:$0xff] %v10902_v6 }
 0x21b   :  { %14060 = vst [vmem:[#allocation70_spill] sm:$0xff] %v10884_v27 }
 0x21c   :  { %v10892_v1 = vpop.permute.xlu1 %2561  ;;  %3876 = vrot.lane.b32.xlu0 %v10888_v38, %s9178_s21  ;;  %v10912_v38 = vpop.f32.mrf.mxu0 }
 0x21d   :  { %14066 = vst [vmem:[#allocation76_spill] sm:$0xff] %v10912_v38 }
 0x21e   :  { %v10896_v50 = vpop.permute.xlu0 %3124  ;;  %3695 = vrot.lane.b32.xlu1 %v10878_v28, %s9178_s21 }
 0x21f   :  { %14063 = vst [vmem:[#allocation73_spill] sm:$0xff] %v10896_v50  ;;  %v10914_v50 = vpop.f32.mrf.mxu1 }
 0x220   :  { %v10904_v27 = vpop.permute.xlu1 %2943  ;;  %3317 = vrot.lane.b32.xlu0 %v10890_v54, %s9178_s21  ;;  %14067 = vst [vmem:[#allocation77_spill] sm:$0xff] %v10914_v50  ;;  %v10924_v54 = vpop.f32.mrf.mxu0 }
 0x221   :  { %14069 = vst [vmem:[#allocation79_spill] sm:$0xff] %v10924_v54  ;;  %v10926_v0 = vpop.f32.mrf.mxu1 }
 0x222   :  { %v10908_v18 = vpop.permute.xlu0 %2945  ;;  %3498 = vrot.lane.b32.xlu1 %v10900_v48, %s9178_s21  ;;  %14070 = vst [vmem:[#allocation80_spill] sm:$0xff] %v10926_v0  ;;  %v10932_v48 = vpop.f32.mrf.mxu0 }
 0x223   :  { %14071 = vst [vmem:[#allocation81_spill] sm:$0xff] %v10932_v48 }
 0x224   :  { %v10916_v42 = vpop.permute.xlu1 %2947  ;;  %3697 = vrot.lane.b32.xlu0 %v10902_v6, %s9178_s21  ;;  %v10938_v6 = vpop.f32.mrf.mxu1 }
 0x225   :  { %14073 = vst [vmem:[#allocation83_spill] sm:$0xff] %v10938_v6 }
 0x226   :  { %v10920_v28 = vpop.permute.xlu0 %2563  ;;  %3878 = vrot.lane.b32.xlu1 %v10914_v50, %s9178_s21  ;;  %v10944_v50 = vpop.f32.mrf.mxu0 }
 0x227   :  { %14068 = vst [vmem:[#allocation78_spill] sm:$0xff] %v10920_v28  ;;  %14075 = vst [vmem:[#allocation85_spill] sm:$0xff] %v10944_v50  ;;  %v10946_v47 = vpop.f32.mrf.mxu1 }
 0x228   :  { %v10928_v14 = vpop.permute.xlu1 %2565  ;;  %3500 = vrot.lane.b32.xlu0 %v10924_v54, %s9178_s21  ;;  %14076 = vst [vmem:[#allocation86_spill] sm:$0xff] %v10946_v47 }
 0x22a   :  { %v10934_v44 = vpop.permute.xlu0 %3126  ;;  %3319 = vrot.lane.b32.xlu1 %v10912_v38, %s9178_s21 }
 0x22b   :  { %14072 = vst [vmem:[#allocation82_spill] sm:$0xff] %v10934_v44  ;;  %v10956_v44 = vpop.f32.mrf.mxu0 }
 0x22c   :  { %v10940_v10 = vpop.permute.xlu1 %3128  ;;  %3880 = vrot.lane.b32.xlu0 %v10938_v6, %s9178_s21  ;;  %14079 = vst [vmem:[#allocation89_spill] sm:$0xff] %v10956_v44 }
 0x22d   :  { %14074 = vst [vmem:[#allocation84_spill] sm:$0xff] %v10940_v10  ;;  %v10958_v10 = vpop.f32.mrf.mxu1 }
 0x22e   :  { %v10948_v28 = vpop.permute.xlu0 %2745  ;;  %3699 = vrot.lane.b32.xlu1 %v10926_v0, %s9178_s21  ;;  %14080 = vst [vmem:[#allocation90_spill] sm:$0xff] %v10958_v10 }
 0x22f   :  { %14077 = vst [vmem:[#allocation87_spill] sm:$0xff] %v10948_v28  ;;  %v10968_v28 = vpop.f32.mrf.mxu0 }
 0x230   :  { %v10952_v54 = vpop.permute.xlu1 %2747  ;;  %3321 = vrot.lane.b32.xlu0 %v10932_v48, %s9178_s21  ;;  %14083 = vst [vmem:[#allocation93_spill] sm:$0xff] %v10968_v28 }
 0x231   :  { %14078 = vst [vmem:[#allocation88_spill] sm:$0xff] %v10952_v54  ;;  %v10970_v54 = vpop.f32.mrf.mxu1  ;;  %v10976_v48 = vpop.f32.mrf.mxu0 }
 0x232   :  { %v10960_v38 = vpop.permute.xlu0 %2949  ;;  %3502 = vrot.lane.b32.xlu1 %v10944_v50, %s9178_s21  ;;  %14084 = vst [vmem:[#allocation94_spill] sm:$0xff] %v10970_v54  ;;  %14086 = vst [vmem:[#allocation96_spill] sm:$0xff] %v10976_v48 }
 0x233   :  { %14081 = vst [vmem:[#allocation91_spill] sm:$0xff] %v10960_v38  ;;  %v10982_v50 = vpop.f32.mrf.mxu1 }
 0x234   :  { %v10964_v6 = vpop.permute.xlu1 %2751  ;;  %3701 = vrot.lane.b32.xlu0 %v10946_v47, %s9178_s21  ;;  %14088 = vst [vmem:[#allocation98_spill] sm:$0xff] %v10982_v50  ;;  %v10988_v47 = vpop.f32.mrf.mxu0 }
 0x235   :  { %14082 = vst [vmem:[#allocation92_spill] sm:$0xff] %v10964_v6  ;;  %14090 = vst [vmem:[#allocation100_spill] sm:$0xff] %v10988_v47 }
 0x236   :  { %v10972_v0 = vpop.permute.xlu0 %2567  ;;  %3882 = vrot.lane.b32.xlu1 %v10958_v10, %s9178_s21  ;;  %v2606_v10 = vmax.f32 %v10505_v3, %v10800_v12 }
 0x237   :  { %14085 = vst [vmem:[#allocation95_spill] sm:$0xff] %v10972_v0  ;;  %v10990_v0 = vpop.f32.mrf.mxu1 }
 0x238   :  { %v10978_v21 = vpop.permute.xlu1 %3132  ;;  %3504 = vrot.lane.b32.xlu0 %v10968_v28, %s9178_s21  ;;  %14091 = vst [vmem:[#allocation101_spill] sm:$0xff] %v10990_v0 }
 0x239   :  { %14087 = vst [vmem:[#allocation97_spill] sm:$0xff] %v10978_v21  ;;  %v11003_v38 = vpop.f32.mrf.mxu1 }
 0x23a   :  { %v10984_v6 = vpop.permute.xlu0 %3130  ;;  %3323 = vrot.lane.b32.xlu1 %v10956_v44, %s9178_s21  ;;  %14094 = vst [vmem:[#allocation104_spill] sm:$0xff] %v11003_v38 }
 0x23b   :  { %14089 = vst [vmem:[#allocation99_spill] sm:$0xff] %v10984_v6  ;;  %v11001_v6 = vpop.f32.mrf.mxu0 }
 0x23c   :  { %v2572_v16 = vpop.permute.xlu1 %2571  ;;  %3884 = vrot.lane.b32.xlu0 %v10982_v50, %s9178_s21  ;;  %14093 = vst [vmem:[#allocation103_spill] sm:$0xff] %v11001_v6  ;;  %v2988_v50 = vmax.f32 %v10520_v11, %v10810_v56 }
 0x23d   :  { %v2615_v28 = vmax.f32 %v10664_v36, %v2572_v16 }
 0x23e   :  { %v10997_v21 = vpop.permute.xlu0 %2749  ;;  %3703 = vrot.lane.b32.xlu1 %v10970_v54, %s9178_s21 }
 0x23f   :  { %14092 = vst [vmem:[#allocation102_spill] sm:$0xff] %v10997_v21  ;;  %v2624_v44 = vmax.f32 %v2606_v10, %v2615_v28  ;;  %v2605_v28 = vmax.f32 %v10479_v30, %v10774_v31  ;;  %v11015_v10 = vpop.f32.mrf.mxu0  ;;  %v11017_v21 = vpop.f32.mrf.mxu1 }
 0x240   :  { %v2954_v2 = vpop.permute.xlu1 %2953  ;;  %3325 = vrot.lane.b32.xlu0 %v10976_v48, %s9178_s21  ;;  %14095 = vst [vmem:[#allocation105_spill] sm:$0xff] %v11015_v10  ;;  %14096 = vst [vmem:[#allocation106_spill] sm:$0xff] %v11017_v21 }
 0x241   :  { %v2633_v3 = vadd.f32 %v2624_v44, %v10742_v41  ;;  %v2997_v16 = vmax.f32 %v10666_v17, %v2954_v2  ;;  %v11025_v2 = vpop.f32.mrf.mxu0  ;;  %v11031_v31 = vpop.f32.mrf.mxu1 }
 0x242   :  { %v2570_v36 = vpop.permute.xlu0 %2569  ;;  %3327 = vrot.lane.b32.xlu1 %v11001_v6, %s9178_s21  ;;  %14097 = vst [vmem:[#allocation107_spill] sm:$0xff] %v11025_v2  ;;  %14098 = vst [vmem:[#allocation108_spill] sm:$0xff] %v11031_v31 }
 0x243   :  { %v2642_v12 = vmax.f32 %v2633_v3, 0.0  ;;  %v3006_v48 = vmax.f32 %v2988_v50, %v2997_v16  ;;  %v2614_v54 = vmax.f32 %v10648_v24, %v2570_v36  ;;  %v2987_v50 = vmax.f32 %v10507_v4, %v10786_v43 }
 0x244   :  { %v11020_v11 = vpop.permute.xlu1 %2755  ;;  %3705 = vrot.lane.b32.xlu0 %v10990_v0, %s9178_s21 }
 0x245   :  { %v3015_v56 = vadd.f32 %v3006_v48, %v10742_v41  ;;  %v2623_v44 = vmax.f32 %v2605_v28, %v2614_v54  ;;  %v8647_v30 = vpack.c.bf16 %v2642_v12, %v2642_v12  ;;  %v11040_v28 = vpop.f32.mrf.mxu0  ;;  %v11042_v12 = vpop.f32.mrf.mxu1 }
 0x246   :  { %v2952_v17 = vpop.permute.xlu0 %2951  ;;  %3707 = vrot.lane.b32.xlu1 %v11017_v21, %s9178_s21  ;;  %14099 = vst [vmem:[#allocation109_spill] sm:$0xff] %v11040_v28  ;;  %14100 = vst [vmem:[#allocation110_spill] sm:$0xff] %v11042_v12  ;;  %v14182_v21 = vld [vmem:[#allocation97_spill] sm:$0xff] }
 0x247   :  { %v3024_v24 = vmax.f32 %v3015_v56, 0.0  ;;  %v2632_v3 = vadd.f32 %v2623_v44, %v10734_v13  ;;  %v2996_v16 = vmax.f32 %v10652_v23, %v2952_v17  ;;  %2689 = vst.msk [vmem:[#allocation4 + $0x18] sm:$0xf] %vm2687_vm3, %v8647_v30  ;;  %v11052_v17 = vpop.f32.mrf.mxu0 }
 0x248   :  { %v11036_v54 = vpop.permute.xlu1 %3136  ;;  %3506 = vrot.lane.b32.xlu0 %v10988_v47, %s9178_s21  ;;  %v14121_v47 = vld [vmem:[#allocation45_spill] sm:$0xff] }
 0x249   :  { %v2641_v48 = vmax.f32 %v2632_v3, 0.0  ;;  %v3005_v36 = vmax.f32 %v2987_v50, %v2996_v16  ;;  %v8665_v43 = vpack.c.bf16 %v3024_v24, %v3024_v24  ;;  %v11054_v50 = vpop.f32.mrf.mxu1  ;;  %v2608_v3 = vmax.f32 %v10553_v52, %v10844_v22 }
 0x24a   :  { %v11044_v4 = vpop.permute.xlu0 %2753  ;;  %3508 = vrot.lane.b32.xlu1 %v11015_v10, %s9178_s21  ;;  %14101 = vst [vmem:[#allocation111_spill] sm:$0xff] %v11054_v50  ;;  %v14122_v10 = vld [vmem:[#allocation43_spill] sm:$0xff] }
 0x24b   :  { %v3014_v23 = vadd.f32 %v3005_v36, %v10734_v13  ;;  %v8646_v44 = vpack.c.bf16 %v2641_v48, %v2641_v48  ;;  %3070 = vst.msk [vmem:[#allocation4 + $0x1c] sm:$0xf] %vm2687_vm3, %v8665_v43  ;;  %v11070_v22 = vpop.f32.mrf.mxu1 }
 0x24c   :  { %v2576_v56 = vpop.permute.xlu1 %2575  ;;  %3886 = vrot.lane.b32.xlu0 %v11003_v38, %s9178_s21  ;;  %v11068_v38 = vpop.f32.mrf.mxu0 }
 0x24d   :  { %v3023_v30 = vmax.f32 %v3014_v23, 0.0  ;;  %v2617_v16 = vmax.f32 %v10698_v29, %v2576_v56  ;;  %2688 = vst.msk [vmem:[#allocation4] sm:$0xf] %vm2687_vm3, %v8646_v44  ;;  %v2990_v23 = vmax.f32 %v10557_v53, %v10856_v25  ;;  %14102 = vst [vmem:[#allocation112_spill] sm:$0xff] %v11068_v38  ;;  %v2607_v44 = vmax.f32 %v10529_v40, %v10816_v45 }
 0x24e   :  { %v11059_v24 = vpop.permute.xlu0 %3134  ;;  %3888 = vrot.lane.b32.xlu1 %v11031_v31, %s9178_s21 }
 0x24f   :  { %v8664_v48 = vpack.c.bf16 %v3023_v30, %v3023_v30  ;;  %v2626_v36 = vmax.f32 %v2608_v3, %v2617_v16 }
 0x250   :  { %v2958_v43 = vpop.permute.xlu1 %2957  ;;  %3329 = vrot.lane.b32.xlu0 %v11025_v2, %s9178_s21  ;;  %v14176_v2 = vld [vmem:[#allocation8_spill] sm:$0xff] }
 0x251   :  { %v2999_v52 = vmax.f32 %v10694_v19, %v2958_v43  ;;  %3069 = vst.msk [vmem:[#allocation4 + $0x4] sm:$0xf] %vm2687_vm3, %v8664_v48  ;;  %v2635_v29 = vadd.f32 %v2626_v36, %v10726_v34  ;;  %v11084_v19 = vpop.f32.mrf.mxu1  ;;  %v11087_v36 = vpop.f32.mrf.mxu0 }
 0x252   :  { %v2574_v56 = vpop.permute.xlu0 %2573  ;;  %3512 = vrot.lane.b32.xlu1 %v11068_v38, %s9178_s21  ;;  %14103 = vst [vmem:[#allocation113_spill] sm:$0xff] %v11084_v19 }
 0x253   :  { %v3008_v30 = vmax.f32 %v2990_v23, %v2999_v52  ;;  %v2616_v53 = vmax.f32 %v10680_v35, %v2574_v56  ;;  %v2644_v25 = vmax.f32 %v2635_v29, 0.0  ;;  %v2989_v23 = vmax.f32 %v10535_v39, %v10826_v55 }
 0x254   :  { %v11080_v3 = vpop.permute.xlu1 %2759  ;;  %3709 = vrot.lane.b32.xlu0 %v11042_v12, %s9178_s21 }
 0x255   :  { %v3017_v16 = vadd.f32 %v3008_v30, %v10726_v34  ;;  %v2625_v48 = vmax.f32 %v2607_v44, %v2616_v53  ;;  %v8649_v40 = vpack.c.bf16 %v2644_v25, %v2644_v25  ;;  %v11100_v44 = vpop.f32.mrf.mxu0  ;;  %v11102_v30 = vpop.f32.mrf.mxu1 }
 0x256   :  { %v2956_v43 = vpop.permute.xlu0 %2955  ;;  %3892 = vrot.lane.b32.xlu1 %v11084_v19, %s9178_s21  ;;  %14104 = vst [vmem:[#allocation114_spill] sm:$0xff] %v11100_v44 }
 0x257   :  { %v3026_v45 = vmax.f32 %v3017_v16, 0.0  ;;  %v2634_v35 = vadd.f32 %v2625_v48, %v10716_v62  ;;  %v2998_v52 = vmax.f32 %v10682_v59, %v2956_v43  ;;  %2691 = vst.msk [vmem:[#allocation4 + $0x48] sm:$0xf] %vm2687_vm3, %v8649_v40  ;;  %v2610_v48 = vmax.f32 %v10588_v51, %v10892_v1  ;;  %v11114_v43 = vpop.f32.mrf.mxu0  ;;  %v11116_v40 = vpop.f32.mrf.mxu1 }
 0x258   :  { %v11095_v29 = vpop.permute.xlu1 %3140  ;;  %3510 = vrot.lane.b32.xlu0 %v11040_v28, %s9178_s21  ;;  %14105 = vst [vmem:[#allocation115_spill] sm:$0xff] %v11116_v40 }
 0x259   :  { %v2643_v56 = vmax.f32 %v2634_v35, 0.0  ;;  %v8667_v53 = vpack.c.bf16 %v3026_v45, %v3026_v45  ;;  %v3007_v25 = vmax.f32 %v2989_v23, %v2998_v52  ;;  %v11126_v1 = vpop.f32.mrf.mxu0 }
 0x25a   :  { %v11104_v16 = vpop.permute.xlu0 %2757  ;;  %3333 = vrot.lane.b32.xlu1 %v11087_v36, %s9178_s21  ;;  %14106 = vst [vmem:[#allocation116_spill] sm:$0xff] %v11126_v1 }
 0x25b   :  { %v8648_v39 = vpack.c.bf16 %v2643_v56, %v2643_v56  ;;  %3072 = vst.msk [vmem:[#allocation4 + $0x4c] sm:$0xf] %vm2687_vm3, %v8667_v53  ;;  %v3016_v55 = vadd.f32 %v3007_v25, %v10716_v62  ;;  %v11128_v53 = vpop.f32.mrf.mxu1  ;;  %v2992_v25 = vmax.f32 %v10592_v37, %v10904_v27  ;;  %v2994_v37 = vmax.f32 %v10622_v57, %v10916_v42 }
 0x25c   :  { %v2580_v59 = vpop.permute.xlu1 %2579  ;;  %3890 = vrot.lane.b32.xlu0 %v11054_v50, %s9178_s21 }
 0x25d   :  { %v2619_v45 = vmax.f32 %v10746_v58, %v2580_v59  ;;  %2690 = vst.msk [vmem:[#allocation4 + $0x30] sm:$0xf] %vm2687_vm3, %v8648_v39  ;;  %v3025_v35 = vmax.f32 %v3016_v55, 0.0  ;;  %v2609_v59 = vmax.f32 %v10570_v46, %v10860_v26  ;;  %v11146_v27 = vpop.f32.mrf.mxu1 }
 0x25e   :  { %v11120_v23 = vpop.permute.xlu0 %3138  ;;  %3713 = vrot.lane.b32.xlu1 %v11102_v30, %s9178_s21  ;;  %14107 = vst [vmem:[#allocation117_spill] sm:$0xff] %v11146_v27 }
 0x25f   :  { %v2628_v52 = vmax.f32 %v2610_v48, %v2619_v45  ;;  %v8666_v51 = vpack.c.bf16 %v3025_v35, %v3025_v35  ;;  %v11140_v35 = vpop.f32.mrf.mxu0  ;;  %v11158_v42 = vpop.f32.mrf.mxu1 }
 0x260   :  { %v2962_v56 = vpop.permute.xlu1 %2961  ;;  %3331 = vrot.lane.b32.xlu0 %v11052_v17, %s9178_s21 }
 0x261   :  { %v2637_v58 = vadd.f32 %v2628_v52, %v10700_v60  ;;  %v3001_v39 = vmax.f32 %v10732_v15, %v2962_v56  ;;  %3071 = vst.msk [vmem:[#allocation4 + $0x34] sm:$0xf] %vm2687_vm3, %v8666_v51 }
 0x262   :  { %v2578_v55 = vpop.permute.xlu0 %2577  ;;  %3516 = vrot.lane.b32.xlu1 %v11126_v1, %s9178_s21 }
 0x263   :  { %v2646_v48 = vmax.f32 %v2637_v58, 0.0  ;;  %v2618_v45 = vmax.f32 %v10720_v63, %v2578_v55  ;;  %v3010_v52 = vmax.f32 %v2992_v25, %v3001_v39  ;;  %v2991_v63 = vmax.f32 %v10575_v32, %v10872_v33  ;;  %v11155_v39 = vpop.f32.mrf.mxu0 }
 0x264   :  { %v2966_v50 = vpop.permute.xlu1 %2965  ;;  %3711 = vrot.lane.b32.xlu0 %v11070_v22, %s9178_s21  ;;  %14108 = vst [vmem:[#allocation118_spill] sm:$0xff] %v11155_v39 }
 0x265   :  { %v2627_v15 = vmax.f32 %v2609_v59, %v2618_v45  ;;  %v3003_v56 = vmax.f32 %v10772_v9, %v2966_v50  ;;  %v8651_v51 = vpack.c.bf16 %v2646_v48, %v2646_v48  ;;  %v3019_v26 = vadd.f32 %v3010_v52, %v10700_v60 }
 0x266   :  { %v2960_v46 = vpop.permute.xlu0 %2959  ;;  %3896 = vrot.lane.b32.xlu1 %v11146_v27, %s9178_s21  ;;  %v2612_v9 = vmax.f32 %v10618_v7, %v10928_v14  ;;  %v11172_v14 = vpop.f32.mrf.mxu0 }
 0x267   :  { %v2636_v58 = vadd.f32 %v2627_v15, %v10710_v49  ;;  %v3012_v25 = vmax.f32 %v2994_v37, %v3003_v56  ;;  %v3000_v57 = vmax.f32 %v10714_v61, %v2960_v46  ;;  %2693 = vst.msk [vmem:[#allocation4 + $0x78] sm:$0xf] %vm2687_vm3, %v8651_v51  ;;  %v3028_v50 = vmax.f32 %v3019_v26, 0.0  ;;  %v11174_v15 = vpop.f32.mrf.mxu1 }
 0x268   :  { %v2584_v55 = vpop.permute.xlu1 %2583  ;;  %3514 = vrot.lane.b32.xlu0 %v11100_v44, %s9178_s21  ;;  %14109 = vst [vmem:[#allocation119_spill] sm:$0xff] %v11174_v15 }
 0x269   :  { %v2645_v33 = vmax.f32 %v2636_v58, 0.0  ;;  %v3021_v32 = vadd.f32 %v3012_v25, %v10764_v5  ;;  %v3009_v59 = vmax.f32 %v2991_v63, %v3000_v57  ;;  %v2621_v48 = vmax.f32 %v10784_v8, %v2584_v55  ;;  %v11187_v25 = vpop.f32.mrf.mxu0  ;;  %v11189_v57 = vpop.f32.mrf.mxu1 }
 0x26a   :  { %v11167_v45 = vpop.permute.xlu0 %2761  ;;  %3337 = vrot.lane.b32.xlu1 %v11140_v35, %s9178_s21  ;;  %v8669_v61 = vpack.c.bf16 %v3028_v50, %v3028_v50  ;;  %14110 = vst [vmem:[#allocation120_spill] sm:$0xff] %v11187_v25  ;;  %14111 = vst [vmem:[#allocation121_spill] sm:$0xff] %v11189_v57 }
 0x26b   :  { %v3030_v52 = vmax.f32 %v3021_v32, 0.0  ;;  %v3018_v7 = vadd.f32 %v3009_v59, %v10710_v49  ;;  %v2630_v37 = vmax.f32 %v2612_v9, %v2621_v48  ;;  %v8650_v8 = vpack.c.bf16 %v2645_v33, %v2645_v33  ;;  %v11196_v55 = vpop.f32.mrf.mxu0  ;;  %v11201_v59 = vpop.f32.mrf.mxu1 }
 0x26c   :  { %v11176_v56 = vpop.permute.xlu1 %3146  ;;  %3894 = vrot.lane.b32.xlu0 %v11116_v40, %s9178_s21  ;;  %3074 = vst.msk [vmem:[#allocation4 + $0x7c] sm:$0xf] %vm2687_vm3, %v8669_v61  ;;  %14113 = vst [vmem:[#allocation123_spill] sm:$0xff] %v11201_v59  ;;  %v2993_v48 = vmax.f32 %v10606_v20, %v10908_v18  ;;  %v14114_v61 = vld [vmem:[#allocation41_spill] sm:$0xff]  ;;  %v14119_v18 = vld [vmem:[#allocation78_spill] sm:$0xff] }
 0x26d   :  { %v3027_v51 = vmax.f32 %v3018_v7, 0.0  ;;  %v2639_v26 = vadd.f32 %v2630_v37, %v10764_v5  ;;  %2692 = vst.msk [vmem:[#allocation4 + $0x60] sm:$0xf] %vm2687_vm3, %v8650_v8  ;;  %v8671_v63 = vpack.c.bf16 %v3030_v52, %v3030_v52  ;;  %v14115_v37 = vld [vmem:[#allocation91_spill] sm:$0xff]  ;;  %v14116_v8 = vld [vmem:[#allocation26_spill] sm:$0xff]  ;;  %v14120_v20 = vld [vmem:[#allocation20_spill] sm:$0xff] }
 0x26e   :  { %v11182_v46 = vpop.permute.xlu0 %3142  ;;  %3717 = vrot.lane.b32.xlu1 %v11158_v42, %s9178_s21 }
 0x26f   :  { %v2648_v58 = vmax.f32 %v2639_v26, 0.0  ;;  %v8668_v50 = vpack.c.bf16 %v3027_v51, %v3027_v51  ;;  %3076 = vst.msk [vmem:[#allocation4 + $0xac] sm:$0xf] %vm2687_vm3, %v8671_v63  ;;  %v2995_v51 = vmax.f32 %v14116_v8, %v14115_v37  ;;  %v14117_v26 = vld [vmem:[#allocation53_spill] sm:$0xff] }
 0x270   :  { %v11191_v9 = vpop.permute.xlu1 %2765  ;;  %3335 = vrot.lane.b32.xlu0 %v11114_v43, %s9178_s21  ;;  %v14124_v8 = vld [vmem:[#allocation25_spill] sm:$0xff] }
 0x271   :  { %14112 = vst [vmem:[#allocation122_spill] sm:$0xff] %v11191_v9  ;;  %3073 = vst.msk [vmem:[#allocation4 + $0x64] sm:$0xf] %vm2687_vm3, %v8668_v50  ;;  %v8653_v32 = vpack.c.bf16 %v2648_v58, %v2648_v58  ;;  %v11212_v50 = vpop.f32.mrf.mxu0  ;;  %v11214_v58 = vpop.f32.mrf.mxu1 }
 0x272   :  { %v2964_v33 = vpop.permute.xlu0 %2963  ;;  %3520 = vrot.lane.b32.xlu1 %v11187_v25, %s9178_s21  ;;  %14118 = vst [vmem:[#allocation41_spill] sm:$0xff] %v11212_v50 }
 0x273   :  { %v3002_v52 = vmax.f32 %v14114_v61, %v2964_v33  ;;  %2695 = vst.msk [vmem:[#allocation4 + $0xa8] sm:$0xf] %vm2687_vm3, %v8653_v32  ;;  %v2611_v33 = vmax.f32 %v14120_v20, %v14119_v18  ;;  %v11227_v1 = vpop.f32.mrf.mxu0  ;;  %v11230_v18 = vpop.f32.mrf.mxu1 }
 0x274   :  { %v2968_v7 = vpop.permute.xlu1 %2967  ;;  %3715 = vrot.lane.b32.xlu0 %v11128_v53, %s9178_s21  ;;  %14126 = vst [vmem:[#allocation91_spill] sm:$0xff] %v11227_v1  ;;  %14128 = vst [vmem:[#allocation26_spill] sm:$0xff] %v11230_v18 }
 0x275   :  { %v3004_v63 = vmax.f32 %v14117_v26, %v2968_v7  ;;  %v3011_v28 = vmax.f32 %v2993_v48, %v3002_v52  ;;  %v14123_v7 = vld [vmem:[#allocation95_spill] sm:$0xff]  ;;  %v14125_v48 = vld [vmem:[#allocation40_spill] sm:$0xff] }
 0x276   :  { %v2582_v31 = vpop.permute.xlu0 %2581  ;;  %3900 = vrot.lane.b32.xlu1 %v11201_v59, %s9178_s21  ;;  %v2613_v26 = vmax.f32 %v14124_v8, %v14123_v7  ;;  %v14127_v59 = vld [vmem:[#allocation55_spill] sm:$0xff] }
 0x277   :  { %v3013_v61 = vmax.f32 %v2995_v51, %v3004_v63  ;;  %v2620_v32 = vmax.f32 %v14121_v47, %v2582_v31  ;;  %v3020_v25 = vadd.f32 %v3011_v28, %v14122_v10 }
 0x278   :  { %v2586_v37 = vpop.permute.xlu1 %2585  ;;  %3518 = vrot.lane.b32.xlu0 %v11155_v39, %s9178_s21 }
 0x279   :  { %v3022_v52 = vadd.f32 %v3013_v61, %v14125_v48  ;;  %v2629_v27 = vmax.f32 %v2611_v33, %v2620_v32  ;;  %v2622_v19 = vmax.f32 %v14127_v59, %v2586_v37  ;;  %v3029_v51 = vmax.f32 %v3020_v25, 0.0  ;;  %v11242_v32 = vpop.f32.mrf.mxu0  ;;  %v11244_v25 = vpop.f32.mrf.mxu1 }
 0x27a   :  { %v11232_v47 = vpop.permute.xlu0 %3144  ;;  %3341 = vrot.lane.b32.xlu1 %v11196_v55, %s9178_s21  ;;  %14130 = vst [vmem:[#allocation78_spill] sm:$0xff] %v11242_v32  ;;  %14131 = vst [vmem:[#allocation20_spill] sm:$0xff] %v11244_v25 }
 0x27b   :  { %v3031_v31 = vmax.f32 %v3022_v52, 0.0  ;;  %v2638_v28 = vadd.f32 %v2629_v27, %v14122_v10  ;;  %v2631_v63 = vmax.f32 %v2613_v26, %v2622_v19  ;;  %v8670_v33 = vpack.c.bf16 %v3029_v51, %v3029_v51  ;;  %v11256_v26 = vpop.f32.mrf.mxu0  ;;  %v11258_v52 = vpop.f32.mrf.mxu1 }
 0x27c   :  { %v11237_v20 = vpop.permute.xlu1 %3148  ;;  %3898 = vrot.lane.b32.xlu0 %v11174_v15, %s9178_s21  ;;  %14133 = vst [vmem:[#allocation43_spill] sm:$0xff] %v11256_v26  ;;  %14134 = vst [vmem:[#allocation95_spill] sm:$0xff] %v11258_v52 }
 0x27d   :  { %14129 = vst [vmem:[#allocation53_spill] sm:$0xff] %v11237_v20  ;;  %v2647_v61 = vmax.f32 %v2638_v28, 0.0  ;;  %v2640_v59 = vadd.f32 %v2631_v63, %v14125_v48  ;;  %3075 = vst.msk [vmem:[#allocation4 + $0x94] sm:$0xf] %vm2687_vm3, %v8670_v33  ;;  %v8672_v19 = vpack.c.bf16 %v3031_v31, %v3031_v31  ;;  %v11270_v63 = vpop.f32.mrf.mxu1  ;;  %v14172_v48 = vld [vmem:[#allocation29_spill] sm:$0xff] }
 0x27e   :  { %v11246_v37 = vpop.permute.xlu0 %2763  ;;  %3721 = vrot.lane.b32.xlu1 %v11214_v58, %s9178_s21  ;;  %14136 = vst [vmem:[#allocation55_spill] sm:$0xff] %v11270_v63 }
 0x27f   :  { %v2649_v27 = vmax.f32 %v2640_v59, 0.0  ;;  %v8652_v8 = vpack.c.bf16 %v2647_v61, %v2647_v61  ;;  %3077 = vst.msk [vmem:[#allocation4 + $0xc4] sm:$0xf] %vm2687_vm3, %v8672_v19  ;;  %v11280_v59 = vpop.f32.mrf.mxu0 }
 0x280   :  { %v11251_v7 = vpop.permute.xlu1 %2767  ;;  %3339 = vrot.lane.b32.xlu0 %v11172_v14, %s9178_s21  ;;  %14138 = vst [vmem:[#allocation125_spill] sm:$0xff] %v11280_v59 }
 0x281   :  { %14132 = vst [vmem:[#allocation45_spill] sm:$0xff] %v11251_v7  ;;  %2694 = vst.msk [vmem:[#allocation4 + $0x90] sm:$0xf] %vm2687_vm3, %v8652_v8  ;;  %v8654_v31 = vpack.c.bf16 %v2649_v27, %v2649_v27  ;;  %v11290_v8 = vpop.f32.mrf.mxu1 }
 0x282   :  { %v11260_v51 = vpop.permute.xlu0 %3313  ;;  %3345 = vrot.lane.b32.xlu1 %v11256_v26, %s9178_s21  ;;  %14140 = vst [vmem:[#allocation127_spill] sm:$0xff] %v11290_v8  ;;  %v14186_v26 = vld [vmem:[#allocation32_spill] sm:$0xff] }
 0x283   :  { %2696 = vst.msk [vmem:[#allocation4 + $0xc0] sm:$0xf] %vm2687_vm3, %v8654_v31  ;;  %v11308_v39 = vpop.f32.mrf.mxu1  ;;  %v3178_v6 = vmax.f32 %v14186_v26, %v11059_v24 }
 0x284   :  { %v11265_v28 = vpop.permute.xlu1 %3494  ;;  %3719 = vrot.lane.b32.xlu0 %v11189_v57, %s9178_s21  ;;  %14144 = vst [vmem:[#allocation131_spill] sm:$0xff] %v11308_v39  ;;  %v14183_v57 = vld [vmem:[#allocation30_spill] sm:$0xff] }
 0x285   :  { %14135 = vst [vmem:[#allocation25_spill] sm:$0xff] %v11265_v28  ;;  %v11320_v28 = vpop.f32.mrf.mxu1 }
 0x286   :  { %v11272_v33 = vpop.permute.xlu0 %3693  ;;  %3725 = vrot.lane.b32.xlu1 %v11270_v63, %s9178_s21  ;;  %14147 = vst [vmem:[#allocation134_spill] sm:$0xff] %v11320_v28 }
 0x288   :  { %v11276_v61 = vpop.permute.xlu1 %3874  ;;  %3522 = vrot.lane.b32.xlu0 %v11212_v50, %s9178_s21  ;;  %v11296_v50 = vpop.f32.mrf.mxu0 }
 0x289   :  { %14137 = vst [vmem:[#allocation124_spill] sm:$0xff] %v11276_v61  ;;  %14142 = vst [vmem:[#allocation129_spill] sm:$0xff] %v11296_v50 }
 0x28a   :  { %v11282_v19 = vpop.permute.xlu0 %3496  ;;  %3526 = vrot.lane.b32.xlu1 %v11280_v59, %s9178_s21 }
 0x28b   :  { %14139 = vst [vmem:[#allocation126_spill] sm:$0xff] %v11282_v19 }
 0x28c   :  { %v11286_v27 = vpop.permute.xlu1 %3315  ;;  %3902 = vrot.lane.b32.xlu0 %v11230_v18, %s9178_s21  ;;  %v11306_v18 = vpop.f32.mrf.mxu0 }
 0x28d   :  { %14143 = vst [vmem:[#allocation130_spill] sm:$0xff] %v11306_v18 }
 0x28e   :  { %v11292_v31 = vpop.permute.xlu0 %3876  ;;  %3906 = vrot.lane.b32.xlu1 %v11290_v8, %s9178_s21  ;;  %v11314_v8 = vpop.f32.mrf.mxu0 }
 0x28f   :  { %14141 = vst [vmem:[#allocation128_spill] sm:$0xff] %v11292_v31  ;;  %14146 = vst [vmem:[#allocation133_spill] sm:$0xff] %v11314_v8 }
 0x290   :  { %v11298_v15 = vpop.permute.xlu1 %3695  ;;  %3343 = vrot.lane.b32.xlu0 %v11227_v1, %s9178_s21  ;;  %v11326_v38 = vpop.f32.mrf.mxu0  ;;  %v14177_v1 = vld [vmem:[#allocation31_spill] sm:$0xff] }
 0x291   :  { %14149 = vst [vmem:[#allocation136_spill] sm:$0xff] %v11326_v38  ;;  %v2797_v7 = vmax.f32 %v14177_v1, %v11044_v4  ;;  %v14184_v4 = vld [vmem:[#allocation48_spill] sm:$0xff]  ;;  %v14185_v1 = vld [vmem:[#allocation9_spill] sm:$0xff] }
 0x292   :  { %v11302_v59 = vpop.permute.xlu0 %3317  ;;  %3347 = vrot.lane.b32.xlu1 %v11296_v50, %s9178_s21  ;;  %v11338_v9 = vpop.f32.mrf.mxu0 }
 0x293   :  { %14152 = vst [vmem:[#allocation139_spill] sm:$0xff] %v11338_v9 }
 0x294   :  { %v11310_v61 = vpop.permute.xlu1 %3498  ;;  %3723 = vrot.lane.b32.xlu0 %v11244_v25, %s9178_s21 }
 0x295   :  { %14145 = vst [vmem:[#allocation132_spill] sm:$0xff] %v11310_v61  ;;  %v11328_v61 = vpop.f32.mrf.mxu1 }
 0x296   :  { %v11316_v31 = vpop.permute.xlu0 %3697  ;;  %3727 = vrot.lane.b32.xlu1 %v11308_v39, %s9178_s21  ;;  %14150 = vst [vmem:[#allocation137_spill] sm:$0xff] %v11328_v61 }
 0x298   :  { %v11322_v40 = vpop.permute.xlu1 %3878  ;;  %3524 = vrot.lane.b32.xlu0 %v11242_v32, %s9178_s21 }
 0x299   :  { %14148 = vst [vmem:[#allocation135_spill] sm:$0xff] %v11322_v40  ;;  %v11340_v40 = vpop.f32.mrf.mxu1 }
 0x29a   :  { %v11330_v19 = vpop.permute.xlu0 %3500  ;;  %3528 = vrot.lane.b32.xlu1 %v11306_v18, %s9178_s21  ;;  %14153 = vst [vmem:[#allocation140_spill] sm:$0xff] %v11340_v40  ;;  %v11350_v18 = vpop.f32.mrf.mxu0 }
 0x29b   :  { %14151 = vst [vmem:[#allocation138_spill] sm:$0xff] %v11330_v19  ;;  %14155 = vst [vmem:[#allocation142_spill] sm:$0xff] %v11350_v18  ;;  %v11352_v19 = vpop.f32.mrf.mxu1 }
 0x29c   :  { %v11334_v44 = vpop.permute.xlu1 %3319  ;;  %3904 = vrot.lane.b32.xlu0 %v11258_v52, %s9178_s21  ;;  %14156 = vst [vmem:[#allocation143_spill] sm:$0xff] %v11352_v19  ;;  %v11358_v52 = vpop.f32.mrf.mxu0 }
 0x29d   :  { %14157 = vst [vmem:[#allocation144_spill] sm:$0xff] %v11358_v52 }
 0x29e   :  { %v11342_v39 = vpop.permute.xlu0 %3880  ;;  %3908 = vrot.lane.b32.xlu1 %v11320_v28, %s9178_s21  ;;  %v11364_v28 = vpop.f32.mrf.mxu1 }
 0x29f   :  { %14154 = vst [vmem:[#allocation141_spill] sm:$0xff] %v11342_v39  ;;  %14159 = vst [vmem:[#allocation146_spill] sm:$0xff] %v11364_v28 }
 0x2a0   :  { %v11346_v32 = vpop.permute.xlu1 %3699  ;;  %4073 = vrot.lane.b32.xlu0 %v11314_v8, %s9178_s21  ;;  %v11370_v8 = vpop.f32.mrf.mxu0 }
 0x2a1   :  { %14161 = vst [vmem:[#allocation148_spill] sm:$0xff] %v11370_v8  ;;  %v11372_v19 = vpop.f32.mrf.mxu1 }
 0x2a2   :  { %v11354_v61 = vpop.permute.xlu0 %3321  ;;  %4254 = vrot.lane.b32.xlu1 %v11326_v38, %s9178_s21  ;;  %14162 = vst [vmem:[#allocation149_spill] sm:$0xff] %v11372_v19 }
 0x2a4   :  { %v11360_v39 = vpop.permute.xlu1 %3502  ;;  %4634 = vrot.lane.b32.xlu0 %v11340_v40, %s9178_s21  ;;  %v11382_v40 = vpop.f32.mrf.mxu0 }
 0x2a5   :  { %14158 = vst [vmem:[#allocation145_spill] sm:$0xff] %v11360_v39  ;;  %14165 = vst [vmem:[#allocation152_spill] sm:$0xff] %v11382_v40  ;;  %v11384_v39 = vpop.f32.mrf.mxu1 }
 0x2a6   :  { %v11366_v12 = vpop.permute.xlu0 %3701  ;;  %4075 = vrot.lane.b32.xlu1 %v11338_v9, %s9178_s21  ;;  %14166 = vst [vmem:[#allocation153_spill] sm:$0xff] %v11384_v39 }
 0x2a7   :  { %14160 = vst [vmem:[#allocation147_spill] sm:$0xff] %v11366_v12  ;;  %v11396_v9 = vpop.f32.mrf.mxu1  ;;  %v3177_v12 = vmax.f32 %v14183_v57, %v14182_v21  ;;  %v14189_v57 = vld [vmem:[#allocation52_spill] sm:$0xff] }
 0x2a8   :  { %v11374_v25 = vpop.permute.xlu1 %3882  ;;  %4256 = vrot.lane.b32.xlu0 %v11350_v18, %s9178_s21  ;;  %v11394_v18 = vpop.f32.mrf.mxu0  ;;  %14169 = vst [vmem:[#allocation156_spill] sm:$0xff] %v11396_v9 }
 0x2a9   :  { %14163 = vst [vmem:[#allocation150_spill] sm:$0xff] %v11374_v25  ;;  %14168 = vst [vmem:[#allocation155_spill] sm:$0xff] %v11394_v18 }
 0x2aa   :  { %v11378_v38 = vpop.permute.xlu0 %3504  ;;  %4636 = vrot.lane.b32.xlu1 %v11364_v28, %s9178_s21  ;;  %v11402_v28 = vpop.f32.mrf.mxu0 }
 0x2ab   :  { %14164 = vst [vmem:[#allocation151_spill] sm:$0xff] %v11378_v38  ;;  %14170 = vst [vmem:[#allocation157_spill] sm:$0xff] %v11402_v28  ;;  %v14171_v38 = vld [vmem:[#allocation92_spill] sm:$0xff] }
 0x2ac   :  { %v11386_v0 = vpop.permute.xlu1 %3323  ;;  %4077 = vrot.lane.b32.xlu0 %v11358_v52, %s9178_s21  ;;  %v2796_v50 = vmax.f32 %v14172_v48, %v14171_v38  ;;  %v14180_v48 = vld [vmem:[#allocation50_spill] sm:$0xff] }
 0x2ae   :  { %v11390_v19 = vpop.permute.xlu0 %3884  ;;  %4079 = vrot.lane.b32.xlu1 %v11382_v40, %s9178_s21  ;;  %v11410_v40 = vpop.f32.mrf.mxu1 }
 0x2af   :  { %14167 = vst [vmem:[#allocation154_spill] sm:$0xff] %v11390_v19  ;;  %14174 = vst [vmem:[#allocation29_spill] sm:$0xff] %v11410_v40  ;;  %v14175_v19 = vld [vmem:[#allocation47_spill] sm:$0xff] }
 0x2b0   :  { %v11398_v25 = vpop.permute.xlu1 %3703  ;;  %4258 = vrot.lane.b32.xlu0 %v11370_v8, %s9178_s21  ;;  %v2787_v9 = vmax.f32 %v14176_v2, %v14175_v19  ;;  %v11420_v8 = vpop.f32.mrf.mxu0  ;;  %v3168_v19 = vmax.f32 %v14185_v1, %v14184_v4 }
 0x2b1   :  { %14178 = vst [vmem:[#allocation47_spill] sm:$0xff] %v11420_v8  ;;  %v11422_v38 = vpop.f32.mrf.mxu1 }
 0x2b2   :  { %v11406_v52 = vpop.permute.xlu0 %3325  ;;  %4260 = vrot.lane.b32.xlu1 %v11394_v18, %s9178_s21  ;;  %14179 = vst [vmem:[#allocation8_spill] sm:$0xff] %v11422_v38  ;;  %v2805_v63 = vmax.f32 %v2787_v9, %v2796_v50  ;;  %v11440_v9 = vpop.f32.mrf.mxu0  ;;  %v14190_v50 = vld [vmem:[#allocation11_spill] sm:$0xff] }
 0x2b3   :  { %14173 = vst [vmem:[#allocation92_spill] sm:$0xff] %v11406_v52  ;;  %v14181_v52 = vld [vmem:[#allocation10_spill] sm:$0xff]  ;;  %14187 = vst [vmem:[#allocation31_spill] sm:$0xff] %v11440_v9  ;;  %v11442_v21 = vpop.f32.mrf.mxu1 }
 0x2b4   :  { %v11416_v20 = vpop.permute.xlu1 %3327  ;;  %4638 = vrot.lane.b32.xlu0 %v11384_v39, %s9178_s21  ;;  %v2788_v18 = vmax.f32 %v14181_v52, %v14180_v48  ;;  %14188 = vst [vmem:[#allocation50_spill] sm:$0xff] %v11442_v21  ;;  %v3169_v52 = vmax.f32 %v14190_v50, %v14189_v57  ;;  %v2814_v48 = vadd.f32 %v2805_v63, %v10734_v13  ;;  %v11456_v26 = vpop.f32.mrf.mxu0 }
 0x2b5   :  { %14193 = vst [vmem:[#allocation30_spill] sm:$0xff] %v11456_v26  ;;  %v11458_v1 = vpop.f32.mrf.mxu1 }
 0x2b6   :  { %v11428_v2 = vpop.permute.xlu0 %3705  ;;  %4640 = vrot.lane.b32.xlu1 %v11410_v40, %s9178_s21  ;;  %v2806_v39 = vmax.f32 %v2788_v18, %v2797_v7  ;;  %v3186_v40 = vmax.f32 %v3168_v19, %v3177_v12  ;;  %v3187_v18 = vmax.f32 %v3169_v52, %v3178_v6  ;;  %14194 = vst [vmem:[#allocation48_spill] sm:$0xff] %v11458_v1  ;;  %v2823_v57 = vmax.f32 %v2814_v48, 0.0 }
 0x2b7   :  { %v11470_v50 = vpop.f32.mrf.mxu1 }
 0x2b8   :  { %v11436_v38 = vpop.permute.xlu1 %3707  ;;  %4081 = vrot.lane.b32.xlu0 %v11402_v28, %s9178_s21  ;;  %v2815_v24 = vadd.f32 %v2806_v39, %v10742_v41  ;;  %v3195_v12 = vadd.f32 %v3186_v40, %v10734_v13  ;;  %v3196_v6 = vadd.f32 %v3187_v18, %v10742_v41  ;;  %14197 = vst [vmem:[#allocation52_spill] sm:$0xff] %v11470_v50 }
 0x2b9   :  { %v8655_v52 = vpack.c.bf16 %v2823_v57, %v2823_v57  ;;  %v14202_v57 = vld [vmem:[#allocation54_spill] sm:$0xff] }
 0x2ba   :  { %v11447_v4 = vpop.permute.xlu0 %3506  ;;  %4083 = vrot.lane.b32.xlu1 %v11440_v9, %s9178_s21  ;;  %v2824_v19 = vmax.f32 %v2815_v24, 0.0  ;;  %v3204_v1 = vmax.f32 %v3195_v12, 0.0  ;;  %v11479_v24 = vpop.f32.mrf.mxu0  ;;  %v14203_v12 = vld [vmem:[#allocation12_spill] sm:$0xff] }
 0x2bb   :  { %14191 = vst [vmem:[#allocation10_spill] sm:$0xff] %v11447_v4  ;;  %14199 = vst [vmem:[#allocation158_spill] sm:$0xff] %v11479_v24 }
 0x2bc   :  { %v11452_v7 = vpop.permute.xlu1 %3508  ;;  %4262 = vrot.lane.b32.xlu0 %v11420_v8, %s9178_s21  ;;  %v8656_v40 = vpack.c.bf16 %v2824_v19, %v2824_v19  ;;  %v3205_v8 = vmax.f32 %v3196_v6, 0.0  ;;  %v8673_v18 = vpack.c.bf16 %v3204_v1, %v3204_v1  ;;  %v14204_v19 = vld [vmem:[#allocation36_spill] sm:$0xff]  ;;  %v11495_v1 = vpop.f32.mrf.mxu1 }
 0x2bd   :  { %14192 = vst [vmem:[#allocation97_spill] sm:$0xff] %v11452_v7  ;;  %v2799_v6 = vmax.f32 %v14204_v19, %v11104_v16  ;;  %14207 = vst [vmem:[#allocation36_spill] sm:$0xff] %v11495_v1  ;;  %v14211_v16 = vld [vmem:[#allocation56_spill] sm:$0xff] }
 0x2be   :  { %v11461_v63 = vpop.permute.xlu0 %3886  ;;  %4264 = vrot.lane.b32.xlu1 %v11456_v26, %s9178_s21 }
 0x2bf   :  { %14195 = vst [vmem:[#allocation9_spill] sm:$0xff] %v11461_v63  ;;  %v2789_v63 = vmax.f32 %v14203_v12, %v14202_v57 }
 0x2c0   :  { %v11466_v39 = vpop.permute.xlu1 %3888  ;;  %4642 = vrot.lane.b32.xlu0 %v11442_v21, %s9178_s21  ;;  %v14200_v21 = vld [vmem:[#allocation33_spill] sm:$0xff] }
 0x2c1   :  { %14196 = vst [vmem:[#allocation32_spill] sm:$0xff] %v11466_v39  ;;  %v2798_v26 = vmax.f32 %v14200_v21, %v11020_v11  ;;  %v14208_v11 = vld [vmem:[#allocation59_spill] sm:$0xff]  ;;  %v14209_v21 = vld [vmem:[#allocation14_spill] sm:$0xff] }
 0x2c2   :  { %v11472_v48 = vpop.permute.xlu0 %3329  ;;  %4644 = vrot.lane.b32.xlu1 %v11470_v50, %s9178_s21  ;;  %v8674_v50 = vpack.c.bf16 %v3205_v8, %v3205_v8  ;;  %v2790_v4 = vmax.f32 %v14209_v21, %v14208_v11  ;;  %v14212_v8 = vld [vmem:[#allocation13_spill] sm:$0xff] }
 0x2c3   :  { %v2807_v7 = vmax.f32 %v2789_v63, %v2798_v26  ;;  %v3170_v12 = vmax.f32 %v14212_v8, %v14211_v16  ;;  %v14214_v26 = vld [vmem:[#allocation64_spill] sm:$0xff]  ;;  %v14217_v21 = vld [vmem:[#allocation61_spill] sm:$0xff] }
 0x2c4   :  { %v11476_v28 = vpop.permute.xlu1 %3512  ;;  %2860 = vrot.lane.b32.xlu0 %v8655_v52, %s9178_s21  ;;  %v11493_v52 = vpop.f32.mrf.mxu0  ;;  %v2808_v19 = vmax.f32 %v2790_v4, %v2799_v6  ;;  %v3368_v63 = vmax.f32 %v14214_v26, %v11286_v27 }
 0x2c5   :  { %14198 = vst [vmem:[#allocation11_spill] sm:$0xff] %v11476_v28  ;;  %14206 = vst [vmem:[#allocation12_spill] sm:$0xff] %v11493_v52  ;;  %v2816_v4 = vadd.f32 %v2807_v7, %v10716_v62 }
 0x2c6   :  { %v11483_v9 = vpop.permute.xlu0 %3709  ;;  %2862 = vrot.lane.b32.xlu1 %v8656_v40, %s9178_s21  ;;  %v14210_v40 = vld [vmem:[#allocation34_spill] sm:$0xff]  ;;  %v11512_v11 = vpop.f32.mrf.mxu0  ;;  %v2817_v27 = vadd.f32 %v2808_v19, %v10726_v34 }
 0x2c7   :  { %14201 = vst [vmem:[#allocation33_spill] sm:$0xff] %v11483_v9  ;;  %v3179_v28 = vmax.f32 %v14210_v40, %v11036_v54  ;;  %14215 = vst [vmem:[#allocation59_spill] sm:$0xff] %v11512_v11  ;;  %v11514_v54 = vpop.f32.mrf.mxu1  ;;  %v14218_v40 = vld [vmem:[#allocation15_spill] sm:$0xff] }
 0x2c8   :  { %v11490_v39 = vpop.permute.xlu1 %3892  ;;  %3241 = vrot.lane.b32.xlu0 %v8673_v18, %s9178_s21  ;;  %v14213_v18 = vld [vmem:[#allocation35_spill] sm:$0xff]  ;;  %14216 = vst [vmem:[#allocation14_spill] sm:$0xff] %v11514_v54  ;;  %v3171_v16 = vmax.f32 %v14218_v40, %v14217_v21  ;;  %v11529_v21 = vpop.f32.mrf.mxu0  ;;  %v2825_v40 = vmax.f32 %v2816_v4, 0.0 }
 0x2c9   :  { %14205 = vst [vmem:[#allocation54_spill] sm:$0xff] %v11490_v39  ;;  %v3180_v39 = vmax.f32 %v14213_v18, %v11120_v23  ;;  %v3188_v6 = vmax.f32 %v3170_v12, %v3179_v28  ;;  %14220 = vst [vmem:[#allocation34_spill] sm:$0xff] %v11529_v21  ;;  %v11532_v7 = vpop.f32.mrf.mxu1 }
 0x2ca   :  { %v11501_v57 = vpop.permute.xlu0 %3510  ;;  %3243 = vrot.lane.b32.xlu1 %v8674_v50, %s9178_s21  ;;  %14221 = vst [vmem:[#allocation56_spill] sm:$0xff] %v11532_v7 }
 0x2cb   :  { %v3189_v18 = vmax.f32 %v3171_v16, %v3180_v39  ;;  %v14222_v39 = vld [vmem:[#allocation60_spill] sm:$0xff] }
 0x2cc   :  { %v3334_v9 = vpop.permute.xlu1 %3333  ;;  %4085 = vrot.lane.b32.xlu0 %v11479_v24, %s9178_s21  ;;  %v14223_v24 = vld [vmem:[#allocation42_spill] sm:$0xff] }
 0x2cd   :  { %v3377_v50 = vmax.f32 %v11087_v36, %v3334_v9  ;;  %v14219_v36 = vld [vmem:[#allocation68_spill] sm:$0xff] }
 0x2ce   :  { %v11520_v23 = vpop.permute.xlu0 %3890  ;;  %4087 = vrot.lane.b32.xlu1 %v11512_v11, %s9178_s21  ;;  %v3748_v9 = vmax.f32 %v14219_v36, %v11298_v15 }
 0x2cf   :  { %v3386_v8 = vmax.f32 %v3368_v63, %v3377_v50  ;;  %v3197_v63 = vadd.f32 %v3188_v6, %v10716_v62  ;;  %v3367_v50 = vmax.f32 %v14222_v39, %v11260_v51  ;;  %v11548_v6 = vpop.f32.mrf.mxu1 }
 0x2d0   :  { %v3714_v26 = vpop.permute.xlu1 %3713  ;;  %4266 = vrot.lane.b32.xlu0 %v11493_v52, %s9178_s21  ;;  %v2826_v52 = vmax.f32 %v2817_v27, 0.0  ;;  %14224 = vst [vmem:[#allocation13_spill] sm:$0xff] %v11548_v6  ;;  %v14227_v27 = vld [vmem:[#allocation18_spill] sm:$0xff] }
 0x2d1   :  { %v3395_v28 = vadd.f32 %v3386_v8, %v10742_v41  ;;  %v3757_v12 = vmax.f32 %v11102_v30, %v3714_v26  ;;  %v3198_v8 = vadd.f32 %v3189_v18, %v10726_v34  ;;  %v2801_v30 = vmax.f32 %v14223_v24, %v11167_v45  ;;  %v14228_v45 = vld [vmem:[#allocation63_spill] sm:$0xff] }
 0x2d2   :  { %v3332_v19 = vpop.permute.xlu0 %3331  ;;  %4268 = vrot.lane.b32.xlu1 %v11529_v21, %s9178_s21  ;;  %v8657_v18 = vpack.c.bf16 %v2825_v40, %v2825_v40  ;;  %v3747_v24 = vmax.f32 %v14228_v45, %v11272_v33  ;;  %v14229_v40 = vld [vmem:[#allocation39_spill] sm:$0xff] }
 0x2d3   :  { %v3404_v16 = vmax.f32 %v3395_v28, 0.0  ;;  %v3766_v15 = vmax.f32 %v3748_v9, %v3757_v12  ;;  %v3376_v36 = vmax.f32 %v11052_v17, %v3332_v19  ;;  %v11551_v28 = vpop.f32.mrf.mxu0  ;;  %v14226_v17 = vld [vmem:[#allocation70_spill] sm:$0xff]  ;;  %v3206_v19 = vmax.f32 %v3197_v63, 0.0 }
 0x2d4   :  { %v11544_v4 = vpop.permute.xlu1 %3516  ;;  %4646 = vrot.lane.b32.xlu0 %v11514_v54, %s9178_s21  ;;  %14225 = vst [vmem:[#allocation35_spill] sm:$0xff] %v11551_v28  ;;  %v2792_v12 = vmax.f32 %v14227_v27, %v14226_v17  ;;  %v3182_v63 = vmax.f32 %v14229_v40, %v11182_v46 }
 0x2d5   :  { %v3775_v26 = vadd.f32 %v3766_v15, %v10742_v41  ;;  %v3385_v51 = vmax.f32 %v3367_v50, %v3376_v36  ;;  %v8683_v9 = vpack.c.bf16 %v3404_v16, %v3404_v16  ;;  %v8658_v16 = vpack.c.bf16 %v2826_v52, %v2826_v52  ;;  %v11567_v33 = vpop.f32.mrf.mxu0 }
 0x2d6   :  { %v3712_v39 = vpop.permute.xlu0 %3711  ;;  %4648 = vrot.lane.b32.xlu1 %v11548_v6, %s9178_s21  ;;  %v3207_v15 = vmax.f32 %v3198_v8, 0.0  ;;  %v2810_v36 = vmax.f32 %v2792_v12, %v2801_v30  ;;  %14230 = vst [vmem:[#allocation64_spill] sm:$0xff] %v11567_v33  ;;  %v14234_v30 = vld [vmem:[#allocation66_spill] sm:$0xff]  ;;  %v14235_v12 = vld [vmem:[#allocation16_spill] sm:$0xff] }
 0x2d7   :  { %v3784_v54 = vmax.f32 %v3775_v26, 0.0  ;;  %v3394_v21 = vadd.f32 %v3385_v51, %v10734_v13  ;;  %v3756_v50 = vmax.f32 %v11070_v22, %v3712_v39  ;;  %3450 = vst.msk [vmem:[#allocation4 + $0x20] sm:$0xf] %vm2687_vm3, %v8683_v9  ;;  %v14231_v26 = vld [vmem:[#allocation73_spill] sm:$0xff]  ;;  %v14232_v51 = vld [vmem:[#allocation19_spill] sm:$0xff]  ;;  %v8675_v22 = vpack.c.bf16 %v3206_v19, %v3206_v19  ;;  %v14233_v9 = vld [vmem:[#allocation38_spill] sm:$0xff] }
 0x2d8   :  { %v11564_v17 = vpop.permute.xlu1 %3896  ;;  %2864 = vrot.lane.b32.xlu0 %v8657_v18, %s9178_s21  ;;  %v3173_v45 = vmax.f32 %v14232_v51, %v14231_v26  ;;  %v2800_v52 = vmax.f32 %v14233_v9, %v11080_v3  ;;  %v2791_v39 = vmax.f32 %v14235_v12, %v14234_v30  ;;  %v8676_v18 = vpack.c.bf16 %v3207_v15, %v3207_v15  ;;  %v11582_v26 = vpop.f32.mrf.mxu0  ;;  %v14237_v51 = vld [vmem:[#allocation37_spill] sm:$0xff] }
 0x2d9   :  { %v3403_v27 = vmax.f32 %v3394_v21, 0.0  ;;  %v3765_v6 = vmax.f32 %v3747_v24, %v3756_v50  ;;  %v8701_v46 = vpack.c.bf16 %v3784_v54, %v3784_v54  ;;  %v2819_v24 = vadd.f32 %v2810_v36, %v10700_v60 }
 0x2da   :  { %v11573_v8 = vpop.permute.xlu0 %3514  ;;  %2866 = vrot.lane.b32.xlu1 %v8658_v16, %s9178_s21  ;;  %v3191_v50 = vmax.f32 %v3173_v45, %v3182_v63  ;;  %v11584_v16 = vpop.f32.mrf.mxu1  ;;  %v2809_v54 = vmax.f32 %v2791_v39, %v2800_v52  ;;  %v3181_v9 = vmax.f32 %v14237_v51, %v11095_v29  ;;  %v14239_v45 = vld [vmem:[#allocation69_spill] sm:$0xff] }
 0x2db   :  { %v3774_v21 = vadd.f32 %v3765_v6, %v10734_v13  ;;  %v8682_v19 = vpack.c.bf16 %v3403_v27, %v3403_v27  ;;  %3830 = vst.msk [vmem:[#allocation4 + $0x24] sm:$0xf] %vm2687_vm3, %v8701_v46  ;;  %14236 = vst [vmem:[#allocation61_spill] sm:$0xff] %v11584_v16  ;;  %v14238_v6 = vld [vmem:[#allocation76_spill] sm:$0xff]  ;;  %v2828_v30 = vmax.f32 %v2819_v24, 0.0  ;;  %v11602_v39 = vpop.f32.mrf.mxu0 }
 0x2dc   :  { %v3338_v40 = vpop.permute.xlu1 %3337  ;;  %3245 = vrot.lane.b32.xlu0 %v8675_v22, %s9178_s21  ;;  %v3370_v15 = vmax.f32 %v14238_v6, %v11334_v44  ;;  %v14240_v22 = vld [vmem:[#allocation17_spill] sm:$0xff]  ;;  %v3200_v52 = vadd.f32 %v3191_v50, %v10700_v60  ;;  %v14241_v44 = vld [vmem:[#allocation80_spill] sm:$0xff]  ;;  %v2818_v24 = vadd.f32 %v2809_v54, %v10710_v49 }
 0x2dd   :  { %v3783_v3 = vmax.f32 %v3774_v21, 0.0  ;;  %v3379_v36 = vmax.f32 %v11140_v35, %v3338_v40  ;;  %3449 = vst.msk [vmem:[#allocation4 + $0x8] sm:$0xf] %vm2687_vm3, %v8682_v19  ;;  %v3172_v46 = vmax.f32 %v14240_v22, %v14239_v45  ;;  %v3750_v35 = vmax.f32 %v14241_v44, %v11346_v32  ;;  %v14248_v44 = vld [vmem:[#allocation49_spill] sm:$0xff] }
 0x2de   :  { %v11591_v63 = vpop.permute.xlu0 %3894  ;;  %3247 = vrot.lane.b32.xlu1 %v8676_v18, %s9178_s21  ;;  %v11605_v18 = vpop.f32.mrf.mxu1 }
 0x2df   :  { %v8700_v27 = vpack.c.bf16 %v3783_v3, %v3783_v3  ;;  %v3388_v12 = vmax.f32 %v3370_v15, %v3379_v36  ;;  %14242 = vst [vmem:[#allocation15_spill] sm:$0xff] %v11605_v18  ;;  %v3190_v40 = vmax.f32 %v3172_v46, %v3181_v9  ;;  %v14243_v3 = vld [vmem:[#allocation72_spill] sm:$0xff]  ;;  %v3209_v15 = vmax.f32 %v3200_v52, 0.0  ;;  %v14244_v36 = vld [vmem:[#allocation46_spill] sm:$0xff] }
 0x2e0   :  { %v3718_v29 = vpop.permute.xlu1 %3717  ;;  %4089 = vrot.lane.b32.xlu0 %v11551_v28, %s9178_s21  ;;  %v3369_v32 = vmax.f32 %v14243_v3, %v11302_v59  ;;  %v11622_v46 = vpop.f32.mrf.mxu1  ;;  %v14246_v59 = vld [vmem:[#allocation87_spill] sm:$0xff]  ;;  %v14290_v28 = vld [vmem:[#allocation20_spill] sm:$0xff] }
 0x2e1   :  { %v3759_v21 = vmax.f32 %v11158_v42, %v3718_v29  ;;  %3829 = vst.msk [vmem:[#allocation4 + $0xc] sm:$0xf] %vm2687_vm3, %v8700_v27  ;;  %v3397_v50 = vadd.f32 %v3388_v12, %v10726_v34  ;;  %v8660_v42 = vpack.c.bf16 %v2828_v30, %v2828_v30  ;;  %v2802_v27 = vmax.f32 %v14244_v36, %v11246_v37  ;;  %v14247_v12 = vld [vmem:[#allocation21_spill] sm:$0xff]  ;;  %v14250_v36 = vld [vmem:[#allocation84_spill] sm:$0xff] }
 0x2e2   :  { %v3336_v19 = vpop.permute.xlu0 %3335  ;;  %4272 = vrot.lane.b32.xlu1 %v11602_v39, %s9178_s21  ;;  %14245 = vst [vmem:[#allocation68_spill] sm:$0xff] %v11622_v46  ;;  %v2793_v29 = vmax.f32 %v14247_v12, %v14246_v59  ;;  %v3199_v30 = vadd.f32 %v3190_v40, %v10710_v49 }
 0x2e3   :  { %v3768_v51 = vmax.f32 %v3750_v35, %v3759_v21  ;;  %v3378_v6 = vmax.f32 %v11114_v43, %v3336_v19  ;;  %v3406_v45 = vmax.f32 %v3397_v50, 0.0  ;;  %v2827_v43 = vmax.f32 %v2818_v24, 0.0 }
 0x2e4   :  { %v11617_v54 = vpop.permute.xlu1 %3520  ;;  %4270 = vrot.lane.b32.xlu0 %v11567_v33, %s9178_s21  ;;  %v3184_v35 = vmax.f32 %v14248_v44, %v11176_v56  ;;  %v8678_v19 = vpack.c.bf16 %v3209_v15, %v3209_v15  ;;  %v2811_v3 = vmax.f32 %v2793_v29, %v2802_v27 }
 0x2e5   :  { %v3777_v9 = vadd.f32 %v3768_v51, %v10726_v34  ;;  %v3387_v22 = vmax.f32 %v3369_v32, %v3378_v6  ;;  %v8685_v37 = vpack.c.bf16 %v3406_v45, %v3406_v45  ;;  %v14249_v32 = vld [vmem:[#allocation75_spill] sm:$0xff]  ;;  %v14251_v45 = vld [vmem:[#allocation24_spill] sm:$0xff]  ;;  %v8659_v27 = vpack.c.bf16 %v2827_v43, %v2827_v43 }
 0x2e6   :  { %v3716_v52 = vpop.permute.xlu0 %3715  ;;  %2870 = vrot.lane.b32.xlu1 %v8660_v42, %s9178_s21  ;;  %v3749_v51 = vmax.f32 %v14249_v32, %v11316_v31  ;;  %v11639_v42 = vpop.f32.mrf.mxu1  ;;  %v3175_v15 = vmax.f32 %v14251_v45, %v14250_v36  ;;  %v2820_v12 = vadd.f32 %v2811_v3, %v14122_v10 }
 0x2e7   :  { %v3786_v21 = vmax.f32 %v3777_v9, 0.0  ;;  %v3396_v50 = vadd.f32 %v3387_v22, %v10716_v62  ;;  %v3758_v6 = vmax.f32 %v11128_v53, %v3716_v52  ;;  %3452 = vst.msk [vmem:[#allocation4 + $0x50] sm:$0xf] %vm2687_vm3, %v8685_v37  ;;  %v3208_v9 = vmax.f32 %v3199_v30, 0.0  ;;  %v14252_v37 = vld [vmem:[#allocation89_spill] sm:$0xff]  ;;  %v11652_v30 = vpop.f32.mrf.mxu0 }
 0x2e8   :  { %v11634_v24 = vpop.permute.xlu1 %3900  ;;  %4650 = vrot.lane.b32.xlu0 %v11605_v18, %s9178_s21  ;;  %v3193_v59 = vmax.f32 %v3175_v15, %v3184_v35  ;;  %v3372_v43 = vmax.f32 %v14252_v37, %v11386_v0  ;;  %v11654_v44 = vpop.f32.mrf.mxu1  ;;  %v14253_v35 = vld [vmem:[#allocation44_spill] sm:$0xff]  ;;  %v14254_v0 = vld [vmem:[#allocation82_spill] sm:$0xff]  ;;  %v2829_v36 = vmax.f32 %v2820_v12, 0.0 }
 0x2e9   :  { %v3405_v40 = vmax.f32 %v3396_v50, 0.0  ;;  %v8703_v56 = vpack.c.bf16 %v3786_v21, %v3786_v21  ;;  %v3767_v22 = vmax.f32 %v3749_v51, %v3758_v6  ;;  %v8677_v50 = vpack.c.bf16 %v3208_v9, %v3208_v9  ;;  %v14255_v6 = vld [vmem:[#allocation22_spill] sm:$0xff]  ;;  %v11668_v15 = vpop.f32.mrf.mxu0  ;;  %v14286_v18 = vld [vmem:[#allocation40_spill] sm:$0xff] }
 0x2ea   :  { %v11643_v31 = vpop.permute.xlu0 %3518  ;;  %3251 = vrot.lane.b32.xlu1 %v8678_v19, %s9178_s21  ;;  %v3183_v19 = vmax.f32 %v14253_v35, %v11232_v47  ;;  %v11670_v47 = vpop.f32.mrf.mxu1 }
 0x2eb   :  { %v8684_v53 = vpack.c.bf16 %v3405_v40, %v3405_v40  ;;  %3832 = vst.msk [vmem:[#allocation4 + $0x54] sm:$0xf] %vm2687_vm3, %v8703_v56  ;;  %v3776_v29 = vadd.f32 %v3767_v22, %v10716_v62  ;;  %v3174_v40 = vmax.f32 %v14255_v6, %v14254_v0  ;;  %v3202_v56 = vadd.f32 %v3193_v59, %v10764_v5  ;;  %v14256_v22 = vld [vmem:[#allocation94_spill] sm:$0xff]  ;;  %v14257_v59 = vld [vmem:[#allocation81_spill] sm:$0xff]  ;;  %v14260_v0 = vld [vmem:[#allocation43_spill] sm:$0xff] }
 0x2ec   :  { %v3342_v52 = vpop.permute.xlu1 %3341  ;;  %2868 = vrot.lane.b32.xlu0 %v8659_v27, %s9178_s21  ;;  %v3371_v12 = vmax.f32 %v14257_v59, %v11354_v61 }
 0x2ed   :  { %v3381_v21 = vmax.f32 %v11196_v55, %v3342_v52  ;;  %3451 = vst.msk [vmem:[#allocation4 + $0x38] sm:$0xf] %vm2687_vm3, %v8684_v53  ;;  %v3785_v3 = vmax.f32 %v3776_v29, 0.0  ;;  %v3192_v9 = vmax.f32 %v3174_v40, %v3183_v19  ;;  %v3752_v53 = vmax.f32 %v14256_v22, %v11398_v25 }
 0x2ee   :  { %v11660_v32 = vpop.permute.xlu0 %3898  ;;  %4093 = vrot.lane.b32.xlu1 %v11652_v30, %s9178_s21 }
 0x2ef   :  { %v3390_v51 = vmax.f32 %v3372_v43, %v3381_v21  ;;  %v8702_v45 = vpack.c.bf16 %v3785_v3, %v3785_v3  ;;  %v3211_v21 = vmax.f32 %v3202_v56, 0.0  ;;  %v11686_v3 = vpop.f32.mrf.mxu0  ;;  %v3201_v61 = vadd.f32 %v3192_v9, %v14122_v10 }
 0x2f0   :  { %v3722_v55 = vpop.permute.xlu1 %3721  ;;  %3249 = vrot.lane.b32.xlu0 %v8677_v50, %s9178_s21  ;;  %v8661_v50 = vpack.c.bf16 %v2829_v36, %v2829_v36  ;;  %14259 = vst [vmem:[#allocation60_spill] sm:$0xff] %v11686_v3  ;;  %v14261_v36 = vld [vmem:[#allocation147_spill] sm:$0xff] }
 0x2f1   :  { %v3399_v27 = vadd.f32 %v3390_v51, %v10700_v60  ;;  %v3761_v29 = vmax.f32 %v11214_v58, %v3722_v55  ;;  %3831 = vst.msk [vmem:[#allocation4 + $0x3c] sm:$0xf] %vm2687_vm3, %v8702_v45  ;;  %v14258_v58 = vld [vmem:[#allocation103_spill] sm:$0xff]  ;;  %v14262_v55 = vld [vmem:[#allocation86_spill] sm:$0xff] }
 0x2f2   :  { %v3340_v52 = vpop.permute.xlu0 %3339  ;;  %4654 = vrot.lane.b32.xlu1 %v11670_v47, %s9178_s21  ;;  %v3374_v25 = vmax.f32 %v14258_v58, %v11416_v20  ;;  %v3751_v45 = vmax.f32 %v14262_v55, %v14261_v36  ;;  %v14263_v20 = vld [vmem:[#allocation121_spill] sm:$0xff]  ;;  %v14267_v58 = vld [vmem:[#allocation55_spill] sm:$0xff] }
 0x2f3   :  { %v3408_v37 = vmax.f32 %v3399_v27, 0.0  ;;  %v3380_v43 = vmax.f32 %v11172_v14, %v3340_v52  ;;  %v3770_v35 = vmax.f32 %v3752_v53, %v3761_v29  ;;  %v8680_v29 = vpack.c.bf16 %v3211_v21, %v3211_v21  ;;  %v14264_v52 = vld [vmem:[#allocation106_spill] sm:$0xff] }
 0x2f4   :  { %v3346_v19 = vpop.permute.xlu1 %3345  ;;  %4091 = vrot.lane.b32.xlu0 %v11582_v26, %s9178_s21  ;;  %v3754_v59 = vmax.f32 %v14264_v52, %v11436_v38 }
 0x2f5   :  { %v3389_v51 = vmax.f32 %v3371_v12, %v3380_v43  ;;  %v3383_v6 = vmax.f32 %v14260_v0, %v3346_v19  ;;  %v8687_v40 = vpack.c.bf16 %v3408_v37, %v3408_v37  ;;  %v3779_v14 = vadd.f32 %v3770_v35, %v10700_v60  ;;  %v11701_v37 = vpop.f32.mrf.mxu0  ;;  %v11703_v43 = vpop.f32.mrf.mxu1 }
 0x2f6   :  { %v3720_v56 = vpop.permute.xlu0 %3719  ;;  %2872 = vrot.lane.b32.xlu1 %v8661_v50, %s9178_s21  ;;  %14265 = vst [vmem:[#allocation42_spill] sm:$0xff] %v11701_v37  ;;  %14266 = vst [vmem:[#allocation70_spill] sm:$0xff] %v11703_v43 }
 0x2f7   :  { %v3398_v27 = vadd.f32 %v3389_v51, %v10710_v49  ;;  %v3392_v22 = vmax.f32 %v3374_v25, %v3383_v6  ;;  %v3760_v53 = vmax.f32 %v14263_v20, %v3720_v56  ;;  %3454 = vst.msk [vmem:[#allocation4 + $0x80] sm:$0xf] %vm2687_vm3, %v8687_v40  ;;  %v3788_v9 = vmax.f32 %v3779_v14, 0.0  ;;  %v11711_v40 = vpop.f32.mrf.mxu0  ;;  %v14270_v20 = vld [vmem:[#allocation57_spill] sm:$0xff] }
 0x2f8   :  { %v3726_v12 = vpop.permute.xlu1 %3725  ;;  %4652 = vrot.lane.b32.xlu0 %v11639_v42, %s9178_s21  ;;  %v3210_v51 = vmax.f32 %v3201_v61, 0.0  ;;  %v11718_v61 = vpop.f32.mrf.mxu1 }
 0x2f9   :  { %v3407_v50 = vmax.f32 %v3398_v27, 0.0  ;;  %v3401_v35 = vadd.f32 %v3392_v22, %v10764_v5  ;;  %v3769_v19 = vmax.f32 %v3751_v45, %v3760_v53  ;;  %v3763_v25 = vmax.f32 %v14267_v58, %v3726_v12  ;;  %14268 = vst [vmem:[#allocation18_spill] sm:$0xff] %v11718_v61  ;;  %v14269_v22 = vld [vmem:[#allocation53_spill] sm:$0xff] }
 0x2fa   :  { %v11707_v21 = vpop.permute.xlu0 %3522  ;;  %3255 = vrot.lane.b32.xlu1 %v8680_v29, %s9178_s21  ;;  %v8705_v38 = vpack.c.bf16 %v3788_v9, %v3788_v9  ;;  %v8679_v27 = vpack.c.bf16 %v3210_v51, %v3210_v51  ;;  %v3185_v53 = vmax.f32 %v14270_v20, %v14269_v22  ;;  %v11728_v9 = vpop.f32.mrf.mxu0  ;;  %v14279_v20 = vld [vmem:[#allocation102_spill] sm:$0xff] }
 0x2fb   :  { %v3410_v0 = vmax.f32 %v3401_v35, 0.0  ;;  %v3778_v6 = vadd.f32 %v3769_v19, %v10710_v49  ;;  %v3772_v14 = vmax.f32 %v3754_v59, %v3763_v25  ;;  %v8686_v36 = vpack.c.bf16 %v3407_v50, %v3407_v50  ;;  %14271 = vst [vmem:[#allocation63_spill] sm:$0xff] %v11728_v9  ;;  %v11730_v12 = vpop.f32.mrf.mxu1  ;;  %v14273_v50 = vld [vmem:[#allocation99_spill] sm:$0xff]  ;;  %v14274_v35 = vld [vmem:[#allocation28_spill] sm:$0xff] }
 0x2fc   :  { %v11713_v56 = vpop.permute.xlu1 %3526  ;;  %4274 = vrot.lane.b32.xlu0 %v11668_v15, %s9178_s21  ;;  %3834 = vst.msk [vmem:[#allocation4 + $0x84] sm:$0xf] %vm2687_vm3, %v8705_v38  ;;  %14272 = vst [vmem:[#allocation39_spill] sm:$0xff] %v11730_v12  ;;  %v3176_v19 = vmax.f32 %v14274_v35, %v14273_v50  ;;  %v14275_v38 = vld [vmem:[#allocation45_spill] sm:$0xff]  ;;  %v14281_v50 = vld [vmem:[#allocation92_spill] sm:$0xff] }
 0x2fd   :  { %v3787_v55 = vmax.f32 %v3778_v6, 0.0  ;;  %v3781_v45 = vadd.f32 %v3772_v14, %v10764_v5  ;;  %3453 = vst.msk [vmem:[#allocation4 + $0x68] sm:$0xf] %vm2687_vm3, %v8686_v36  ;;  %v8689_v52 = vpack.c.bf16 %v3410_v0, %v3410_v0  ;;  %v14276_v6 = vld [vmem:[#allocation58_spill] sm:$0xff]  ;;  %v11745_v22 = vpop.f32.mrf.mxu1  ;;  %v14283_v35 = vld [vmem:[#allocation91_spill] sm:$0xff] }
 0x2fe   :  { %v11723_v29 = vpop.permute.xlu0 %3902  ;;  %4097 = vrot.lane.b32.xlu1 %v11711_v40, %s9178_s21  ;;  %v3194_v51 = vmax.f32 %v3176_v19, %v3185_v53  ;;  %v2804_v14 = vmax.f32 %v14276_v6, %v14275_v38  ;;  %14278 = vst [vmem:[#allocation19_spill] sm:$0xff] %v11745_v22  ;;  %v14285_v6 = vld [vmem:[#allocation129_spill] sm:$0xff] }
 0x2ff   :  { %v3790_v59 = vmax.f32 %v3781_v45, 0.0  ;;  %v8704_v25 = vpack.c.bf16 %v3787_v55, %v3787_v55  ;;  %3456 = vst.msk [vmem:[#allocation4 + $0xb0] sm:$0xf] %vm2687_vm3, %v8689_v52  ;;  %v11743_v45 = vpop.f32.mrf.mxu0  ;;  %v14282_v52 = vld [vmem:[#allocation96_spill] sm:$0xff] }
 0x300   :  { %v11734_v58 = vpop.permute.xlu1 %3906  ;;  %3253 = vrot.lane.b32.xlu0 %v8679_v27, %s9178_s21  ;;  %14277 = vst [vmem:[#allocation73_spill] sm:$0xff] %v11743_v45  ;;  %v14280_v27 = vld [vmem:[#allocation27_spill] sm:$0xff]  ;;  %v3373_v53 = vmax.f32 %v14282_v52, %v14281_v50  ;;  %v3203_v43 = vadd.f32 %v3194_v51, %v14286_v18  ;;  %v14291_v51 = vld [vmem:[#allocation33_spill] sm:$0xff] }
 0x301   :  { %3833 = vst.msk [vmem:[#allocation4 + $0x6c] sm:$0xf] %vm2687_vm3, %v8704_v25  ;;  %v8707_v36 = vpack.c.bf16 %v3790_v59, %v3790_v59  ;;  %v2795_v55 = vmax.f32 %v14280_v27, %v14279_v20  ;;  %v14284_v59 = vld [vmem:[#allocation107_spill] sm:$0xff]  ;;  %v11763_v52 = vpop.f32.mrf.mxu0 }
 0x302   :  { %v3344_v0 = vpop.permute.xlu0 %3343  ;;  %4278 = vrot.lane.b32.xlu1 %v11728_v9, %s9178_s21  ;;  %v3375_v25 = vmax.f32 %v14284_v59, %v11472_v48  ;;  %14288 = vst [vmem:[#allocation38_spill] sm:$0xff] %v11763_v52  ;;  %v14334_v9 = vld [vmem:[#allocation143_spill] sm:$0xff] }
 0x303   :  { %v3382_v19 = vmax.f32 %v14283_v35, %v3344_v0  ;;  %3836 = vst.msk [vmem:[#allocation4 + $0xb4] sm:$0xf] %vm2687_vm3, %v8707_v36  ;;  %v2813_v33 = vmax.f32 %v2795_v55, %v2804_v14  ;;  %v14287_v0 = vld [vmem:[#allocation101_spill] sm:$0xff]  ;;  %v11765_v35 = vpop.f32.mrf.mxu1  ;;  %v14292_v14 = vld [vmem:[#allocation110_spill] sm:$0xff] }
 0x304   :  { %v3348_v38 = vpop.permute.xlu1 %3347  ;;  %4095 = vrot.lane.b32.xlu0 %v11686_v3, %s9178_s21  ;;  %v3753_v50 = vmax.f32 %v14287_v0, %v11428_v2  ;;  %14289 = vst [vmem:[#allocation66_spill] sm:$0xff] %v11765_v35  ;;  %v3755_v55 = vmax.f32 %v14292_v14, %v14291_v51 }
 0x305   :  { %v3384_v12 = vmax.f32 %v14285_v6, %v3348_v38  ;;  %v3391_v20 = vmax.f32 %v3373_v53, %v3382_v19  ;;  %v11773_v53 = vpop.f32.mrf.mxu0  ;;  %v14294_v6 = vld [vmem:[#allocation131_spill] sm:$0xff] }
 0x306   :  { %v3724_v27 = vpop.permute.xlu0 %3723  ;;  %4658 = vrot.lane.b32.xlu1 %v11745_v22, %s9178_s21  ;;  %14293 = vst [vmem:[#allocation16_spill] sm:$0xff] %v11773_v53  ;;  %v3212_v22 = vmax.f32 %v3203_v43, 0.0 }
 0x307   :  { %v3393_v36 = vmax.f32 %v3375_v25, %v3384_v12  ;;  %v3762_v48 = vmax.f32 %v14290_v28, %v3724_v27  ;;  %v3400_v38 = vadd.f32 %v3391_v20, %v14122_v10  ;;  %v2822_v12 = vadd.f32 %v2813_v33, %v14286_v18  ;;  %v11782_v20 = vpop.f32.mrf.mxu1 }
 0x308   :  { %v3728_v59 = vpop.permute.xlu1 %3727  ;;  %4276 = vrot.lane.b32.xlu0 %v11701_v37, %s9178_s21  ;;  %14295 = vst [vmem:[#allocation37_spill] sm:$0xff] %v11782_v20  ;;  %v14328_v37 = vld [vmem:[#allocation112_spill] sm:$0xff] }
 0x309   :  { %v3402_v2 = vadd.f32 %v3393_v36, %v14286_v18  ;;  %v3771_v19 = vmax.f32 %v3753_v50, %v3762_v48  ;;  %v3764_v0 = vmax.f32 %v14294_v6, %v3728_v59  ;;  %v3409_v28 = vmax.f32 %v3400_v38, 0.0  ;;  %v11789_v50 = vpop.f32.mrf.mxu0  ;;  %v11792_v48 = vpop.f32.mrf.mxu1 }
 0x30a   :  { %v11778_v25 = vpop.permute.xlu0 %3524  ;;  %4101 = vrot.lane.b32.xlu1 %v11773_v53, %s9178_s21  ;;  %14296 = vst [vmem:[#allocation76_spill] sm:$0xff] %v11789_v50  ;;  %14297 = vst [vmem:[#allocation69_spill] sm:$0xff] %v11792_v48  ;;  %v8681_v38 = vpack.c.bf16 %v3212_v22, %v3212_v22  ;;  %v2831_v59 = vmax.f32 %v2822_v12, 0.0  ;;  %v14308_v48 = vld [vmem:[#allocation23_spill] sm:$0xff] }
 0x30b   :  { %v3411_v27 = vmax.f32 %v3402_v2, 0.0  ;;  %v3780_v51 = vadd.f32 %v3771_v19, %v14122_v10  ;;  %v3773_v14 = vmax.f32 %v3755_v55, %v3764_v0  ;;  %v8688_v43 = vpack.c.bf16 %v3409_v28, %v3409_v28  ;;  %v11803_v28 = vpop.f32.mrf.mxu1  ;;  %v14326_v53 = vld [vmem:[#allocation67_spill] sm:$0xff] }
 0x30c   :  { %v11785_v35 = vpop.permute.xlu1 %3528  ;;  %4656 = vrot.lane.b32.xlu0 %v11718_v61, %s9178_s21  ;;  %14298 = vst [vmem:[#allocation17_spill] sm:$0xff] %v11803_v28  ;;  %v8663_v22 = vpack.c.bf16 %v2831_v59, %v2831_v59  ;;  %v14307_v61 = vld [vmem:[#allocation88_spill] sm:$0xff] }
 0x30d   :  { %v3789_v33 = vmax.f32 %v3780_v51, 0.0  ;;  %v3782_v36 = vadd.f32 %v3773_v14, %v14286_v18  ;;  %3455 = vst.msk [vmem:[#allocation4 + $0x98] sm:$0xf] %vm2687_vm3, %v8688_v43  ;;  %v8690_v55 = vpack.c.bf16 %v3411_v27, %v3411_v27  ;;  %v14299_v43 = vld [vmem:[#allocation137_spill] sm:$0xff]  ;;  %v2794_v11 = vmax.f32 %v14308_v48, %v14307_v61 }
 0x30e   :  { %v11794_v6 = vpop.permute.xlu0 %3904  ;;  %4282 = vrot.lane.b32.xlu1 %v11789_v50, %s9178_s21 }
 0x30f   :  { %v3791_v2 = vmax.f32 %v3782_v36, 0.0  ;;  %v8706_v0 = vpack.c.bf16 %v3789_v33, %v3789_v33  ;;  %3457 = vst.msk [vmem:[#allocation4 + $0xc8] sm:$0xf] %vm2687_vm3, %v8690_v55  ;;  %v14302_v55 = vld [vmem:[#allocation122_spill] sm:$0xff] }
 0x310   :  { %v11799_v19 = vpop.permute.xlu1 %3908  ;;  %3257 = vrot.lane.b32.xlu0 %v8681_v38, %s9178_s21  ;;  %v11826_v38 = vpop.f32.mrf.mxu0 }
 0x311   :  { %3835 = vst.msk [vmem:[#allocation4 + $0x9c] sm:$0xf] %vm2687_vm3, %v8706_v0  ;;  %v8708_v51 = vpack.c.bf16 %v3791_v2, %v3791_v2  ;;  %14301 = vst [vmem:[#allocation72_spill] sm:$0xff] %v11826_v38  ;;  %v14303_v2 = vld [vmem:[#allocation51_spill] sm:$0xff] }
 0x312   :  { %v11805_v12 = vpop.permute.xlu0 %4073  ;;  %4662 = vrot.lane.b32.xlu1 %v11803_v28, %s9178_s21  ;;  %v2803_v0 = vmax.f32 %v14303_v2, %v14302_v55  ;;  %v11840_v28 = vpop.f32.mrf.mxu1 }
 0x313   :  { %3837 = vst.msk [vmem:[#allocation4 + $0xcc] sm:$0xf] %vm2687_vm3, %v8708_v51  ;;  %v11838_v51 = vpop.f32.mrf.mxu0  ;;  %14306 = vst [vmem:[#allocation21_spill] sm:$0xff] %v11840_v28 }
 0x314   :  { %v11810_v27 = vpop.permute.xlu1 %4254  ;;  %2876 = vrot.lane.b32.xlu0 %v8663_v22, %s9178_s21  ;;  %14305 = vst [vmem:[#allocation87_spill] sm:$0xff] %v11838_v51  ;;  %v2812_v55 = vmax.f32 %v2794_v11, %v2803_v0 }
 0x316   :  { %v11814_v14 = vpop.permute.xlu0 %4634  ;;  %4453 = vrot.lane.b32.xlu1 %v14299_v43, %s9178_s21 }
 0x318   :  { %v11818_v33 = vpop.permute.xlu1 %4075  ;;  %4099 = vrot.lane.b32.xlu0 %v11743_v45, %s9178_s21 }
 0x31a   :  { %v11822_v36 = vpop.permute.xlu0 %4256  ;;  %4471 = vrot.lane.b32.xlu1 %v11622_v46, %s9178_s21 }
 0x31b   :  { %14300 = vst [vmem:[#allocation80_spill] sm:$0xff] %v11822_v36 }
 0x31c   :  { %v11828_v59 = vpop.permute.xlu1 %4636  ;;  %4280 = vrot.lane.b32.xlu0 %v11763_v52, %s9178_s21  ;;  %v11848_v52 = vpop.f32.mrf.mxu0 }
 0x31d   :  { %14309 = vst [vmem:[#allocation49_spill] sm:$0xff] %v11848_v52 }
 0x31e   :  { %v11834_v22 = vpop.permute.xlu0 %4077  ;;  %4469 = vrot.lane.b32.xlu1 %v11584_v16, %s9178_s21  ;;  %v11854_v16 = vpop.f32.mrf.mxu1 }
 0x31f   :  { %14304 = vst [vmem:[#allocation46_spill] sm:$0xff] %v11834_v22  ;;  %14311 = vst [vmem:[#allocation84_spill] sm:$0xff] %v11854_v16  ;;  %v11860_v61 = vpop.f32.mrf.mxu0 }
 0x320   :  { %v11844_v46 = vpop.permute.xlu1 %4079  ;;  %4660 = vrot.lane.b32.xlu0 %v11782_v20, %s9178_s21  ;;  %14313 = vst [vmem:[#allocation89_spill] sm:$0xff] %v11860_v61  ;;  %v11862_v48 = vpop.f32.mrf.mxu1  ;;  %v2821_v20 = vadd.f32 %v2812_v55, %v10764_v5 }
 0x321   :  { %v11883_v55 = vpop.f32.mrf.mxu0 }
 0x322   :  { %v11850_v2 = vpop.permute.xlu0 %4258  ;;  %4105 = vrot.lane.b32.xlu1 %v11848_v52, %s9178_s21  ;;  %v11873_v0 = vpop.f32.mrf.mxu1  ;;  %v2830_v52 = vmax.f32 %v2821_v20, 0.0  ;;  %14319 = vst [vmem:[#allocation103_spill] sm:$0xff] %v11883_v55  ;;  %v14321_v20 = vld [vmem:[#allocation114_spill] sm:$0xff] }
 0x323   :  { %14310 = vst [vmem:[#allocation75_spill] sm:$0xff] %v11850_v2  ;;  %14316 = vst [vmem:[#allocation22_spill] sm:$0xff] %v11873_v0 }
 0x324   :  { %v11856_v43 = vpop.permute.xlu1 %4260  ;;  %4103 = vrot.lane.b32.xlu0 %v11826_v38, %s9178_s21 }
 0x325   :  { %14312 = vst [vmem:[#allocation24_spill] sm:$0xff] %v11856_v43  ;;  %v14339_v43 = vld [vmem:[#allocation113_spill] sm:$0xff] }
 0x326   :  { %v11865_v45 = vpop.permute.xlu0 %4638  ;;  %4286 = vrot.lane.b32.xlu1 %v11860_v61, %s9178_s21 }
 0x327   :  { %14314 = vst [vmem:[#allocation44_spill] sm:$0xff] %v11865_v45  ;;  %v8662_v45 = vpack.c.bf16 %v2830_v52, %v2830_v52  ;;  %v14327_v52 = vld [vmem:[#allocation11_spill] sm:$0xff] }
 0x328   :  { %v11869_v11 = vpop.permute.xlu1 %4640  ;;  %4284 = vrot.lane.b32.xlu0 %v11838_v51, %s9178_s21  ;;  %v3558_v51 = vmax.f32 %v14321_v20, %v11573_v8  ;;  %v14330_v8 = vld [vmem:[#allocation115_spill] sm:$0xff] }
 0x329   :  { %14315 = vst [vmem:[#allocation82_spill] sm:$0xff] %v11869_v11  ;;  %v3938_v20 = vmax.f32 %v14330_v8, %v11591_v63 }
 0x32a   :  { %v11875_v38 = vpop.permute.xlu0 %4081  ;;  %4666 = vrot.lane.b32.xlu1 %v11873_v0, %s9178_s21  ;;  %v11894_v0 = vpop.f32.mrf.mxu0 }
 0x32b   :  { %14317 = vst [vmem:[#allocation94_spill] sm:$0xff] %v11875_v38  ;;  %14323 = vst [vmem:[#allocation86_spill] sm:$0xff] %v11894_v0  ;;  %v11896_v38 = vpop.f32.mrf.mxu1 }
 0x32c   :  { %v11879_v50 = vpop.permute.xlu1 %4083  ;;  %4664 = vrot.lane.b32.xlu0 %v11854_v16, %s9178_s21  ;;  %14324 = vst [vmem:[#allocation121_spill] sm:$0xff] %v11896_v38  ;;  %v14325_v16 = vld [vmem:[#allocation126_spill] sm:$0xff] }
 0x32d   :  { %14318 = vst [vmem:[#allocation81_spill] sm:$0xff] %v11879_v50  ;;  %v3549_v50 = vmax.f32 %v14326_v53, %v14325_v16  ;;  %v14335_v16 = vld [vmem:[#allocation128_spill] sm:$0xff] }
 0x32e   :  { %v11885_v11 = vpop.permute.xlu0 %4262  ;;  %4107 = vrot.lane.b32.xlu1 %v11883_v55, %s9178_s21  ;;  %v14331_v55 = vld [vmem:[#allocation25_spill] sm:$0xff] }
 0x32f   :  { %14320 = vst [vmem:[#allocation43_spill] sm:$0xff] %v11885_v11  ;;  %v3557_v11 = vmax.f32 %v14328_v37, %v14327_v52  ;;  %v3567_v3 = vmax.f32 %v3549_v50, %v3558_v51  ;;  %v14336_v37 = vld [vmem:[#allocation71_spill] sm:$0xff]  ;;  %v11916_v52 = vpop.f32.mrf.mxu1  ;;  %v14340_v51 = vld [vmem:[#allocation124_spill] sm:$0xff] }
 0x330   :  { %v11891_v61 = vpop.permute.xlu1 %4264  ;;  %2874 = vrot.lane.b32.xlu0 %v8662_v45, %s9178_s21  ;;  %v14332_v45 = vld [vmem:[#allocation62_spill] sm:$0xff]  ;;  %v3929_v53 = vmax.f32 %v14336_v37, %v14335_v16  ;;  %14337 = vst [vmem:[#allocation53_spill] sm:$0xff] %v11916_v52 }
 0x331   :  { %14322 = vst [vmem:[#allocation147_spill] sm:$0xff] %v11891_v61  ;;  %v3548_v61 = vmax.f32 %v14332_v45, %v14331_v55  ;;  %v14341_v55 = vld [vmem:[#allocation65_spill] sm:$0xff]  ;;  %v3576_v45 = vadd.f32 %v3567_v3, %v10742_v41  ;;  %v14342_v16 = vld [vmem:[#allocation118_spill] sm:$0xff]  ;;  %v14346_v3 = vld [vmem:[#allocation132_spill] sm:$0xff] }
 0x332   :  { %v11902_v2 = vpop.permute.xlu0 %4642  ;;  %4288 = vrot.lane.b32.xlu1 %v11894_v0, %s9178_s21  ;;  %v14338_v0 = vld [vmem:[#allocation54_spill] sm:$0xff]  ;;  %v3947_v50 = vmax.f32 %v3929_v53, %v3938_v20  ;;  %v3928_v8 = vmax.f32 %v14341_v55, %v14340_v51  ;;  %v3560_v37 = vmax.f32 %v14342_v16, %v11643_v31  ;;  %v14345_v53 = vld [vmem:[#allocation116_spill] sm:$0xff] }
 0x333   :  { %14329 = vst [vmem:[#allocation106_spill] sm:$0xff] %v11902_v2  ;;  %v3566_v2 = vmax.f32 %v3548_v61, %v3557_v11  ;;  %v3937_v36 = vmax.f32 %v14339_v43, %v14338_v0  ;;  %v14343_v43 = vld [vmem:[#allocation138_spill] sm:$0xff]  ;;  %v14344_v61 = vld [vmem:[#allocation79_spill] sm:$0xff]  ;;  %v3585_v16 = vmax.f32 %v3576_v45, 0.0 }
 0x334   :  { %v11910_v22 = vpop.permute.xlu1 %4644  ;;  %4455 = vrot.lane.b32.xlu0 %v14334_v9, %s9178_s21  ;;  %v3551_v11 = vmax.f32 %v14344_v61, %v14343_v43  ;;  %v3956_v31 = vadd.f32 %v3947_v50, %v10742_v41  ;;  %v14347_v55 = vld [vmem:[#allocation74_spill] sm:$0xff]  ;;  %v14348_v43 = vld [vmem:[#allocation119_spill] sm:$0xff]  ;;  %v14350_v50 = vld [vmem:[#allocation141_spill] sm:$0xff] }
 0x335   :  { %14333 = vst [vmem:[#allocation55_spill] sm:$0xff] %v11910_v22  ;;  %v3575_v0 = vadd.f32 %v3566_v2, %v10734_v13  ;;  %v3946_v20 = vmax.f32 %v3928_v8, %v3937_v36  ;;  %v3940_v2 = vmax.f32 %v14348_v43, %v11660_v32  ;;  %v14351_v61 = vld [vmem:[#allocation83_spill] sm:$0xff] }
 0x336   :  { %v2861_v63 = vpop.permute.xlu0 %2860  ;;  %4668 = vrot.lane.b32.xlu1 %v11916_v52, %s9178_s21  ;;  %v3569_v52 = vmax.f32 %v3551_v11, %v3560_v37  ;;  %v14352_v32 = vld [vmem:[#allocation135_spill] sm:$0xff]  ;;  %v14353_v11 = vld [vmem:[#allocation77_spill] sm:$0xff]  ;;  %v3965_v43 = vmax.f32 %v3956_v31, 0.0 }
 0x337   :  { %2888 = vst.msk [vmem:[#allocation4] sm:$0xf] %vm2887_vm4, %v2861_v63  ;;  %v3559_v63 = vmax.f32 %v14345_v53, %v11544_v4  ;;  %v14349_v4 = vld [vmem:[#allocation117_spill] sm:$0xff]  ;;  %v3931_v53 = vmax.f32 %v14351_v61, %v14350_v50 }
 0x338   :  { %v2863_v22 = vpop.permute.xlu1 %2862  ;;  %4473 = vrot.lane.b32.xlu0 %v11654_v44, %s9178_s21  ;;  %v3939_v8 = vmax.f32 %v14349_v4, %v11564_v17  ;;  %v3578_v17 = vadd.f32 %v3569_v52, %v10726_v34  ;;  %v14354_v4 = vld [vmem:[#allocation41_spill] sm:$0xff] }
 0x339   :  { %2889 = vst.msk [vmem:[#allocation4 + $0x18] sm:$0xf] %vm2887_vm4, %v2863_v22  ;;  %v3550_v22 = vmax.f32 %v14347_v55, %v14346_v3  ;;  %v3955_v3 = vadd.f32 %v3946_v20, %v10734_v13  ;;  %v3930_v55 = vmax.f32 %v14353_v11, %v14352_v32  ;;  %v3562_v50 = vmax.f32 %v14354_v4, %v11707_v21  ;;  %v14355_v20 = vld [vmem:[#allocation151_spill] sm:$0xff]  ;;  %v14358_v21 = vld [vmem:[#allocation145_spill] sm:$0xff] }
 0x33a   :  { %v3242_v51 = vpop.permute.xlu0 %3241  ;;  %4465 = vrot.lane.b32.xlu1 %v11495_v1, %s9178_s21  ;;  %v8692_v1 = vpack.c.bf16 %v3585_v16, %v3585_v16  ;;  %v14357_v16 = vld [vmem:[#allocation120_spill] sm:$0xff]  ;;  %v8710_v11 = vpack.c.bf16 %v3965_v43, %v3965_v43  ;;  %v3587_v4 = vmax.f32 %v3578_v17, 0.0  ;;  %v14363_v43 = vld [vmem:[#allocation123_spill] sm:$0xff] }
 0x33b   :  { %3268 = vst.msk [vmem:[#allocation4 + $0x4] sm:$0xf] %vm2887_vm4, %v3242_v51  ;;  %v3584_v51 = vmax.f32 %v3575_v0, 0.0  ;;  %v3568_v45 = vmax.f32 %v3550_v22, %v3559_v63  ;;  %v14356_v63 = vld [vmem:[#allocation93_spill] sm:$0xff]  ;;  %v3948_v61 = vmax.f32 %v3930_v55, %v3939_v8  ;;  %v3561_v52 = vmax.f32 %v14357_v16, %v11617_v54  ;;  %v14360_v8 = vld [vmem:[#allocation26_spill] sm:$0xff] }
 0x33c   :  { %v3244_v36 = vpop.permute.xlu1 %3243  ;;  %4487 = vrot.lane.b32.xlu0 %v11896_v38, %s9178_s21  ;;  %v3553_v22 = vmax.f32 %v14356_v63, %v14355_v20  ;;  %v3964_v38 = vmax.f32 %v3955_v3, 0.0  ;;  %v14361_v54 = vld [vmem:[#allocation154_spill] sm:$0xff]  ;;  %v3941_v17 = vmax.f32 %v14363_v43, %v11634_v24  ;;  %v14367_v24 = vld [vmem:[#allocation97_spill] sm:$0xff] }
 0x33d   :  { %3269 = vst.msk [vmem:[#allocation4 + $0x1c] sm:$0xf] %vm2887_vm4, %v3244_v36  ;;  %v3949_v36 = vmax.f32 %v3931_v53, %v3940_v2  ;;  %v3577_v31 = vadd.f32 %v3568_v45, %v10716_v62  ;;  %v14359_v53 = vld [vmem:[#allocation85_spill] sm:$0xff]  ;;  %v14362_v45 = vld [vmem:[#allocation98_spill] sm:$0xff] }
 0x33e   :  { %v11952_v37 = vpop.permute.xlu0 %4085  ;;  %4483 = vrot.lane.b32.xlu1 %v11840_v28, %s9178_s21  ;;  %v8691_v28 = vpack.c.bf16 %v3584_v51, %v3584_v51  ;;  %v3552_v32 = vmax.f32 %v14359_v53, %v14358_v21  ;;  %v3571_v20 = vmax.f32 %v3553_v22, %v3562_v50  ;;  %v3942_v51 = vmax.f32 %v14360_v8, %v11723_v29  ;;  %v14364_v29 = vld [vmem:[#allocation150_spill] sm:$0xff] }
 0x33f   :  { %v3933_v55 = vmax.f32 %v14362_v45, %v14361_v54  ;;  %v8709_v63 = vpack.c.bf16 %v3964_v38, %v3964_v38  ;;  %v3586_v16 = vmax.f32 %v3577_v31, 0.0  ;;  %v14365_v50 = vld [vmem:[#allocation90_spill] sm:$0xff]  ;;  %v8694_v8 = vpack.c.bf16 %v3587_v4, %v3587_v4 }
 0x340   :  { %v11961_v0 = vpop.permute.xlu1 %4087  ;;  %4467 = vrot.lane.b32.xlu0 %v11532_v7, %s9178_s21  ;;  %v3958_v7 = vadd.f32 %v3949_v36, %v10726_v34  ;;  %v3570_v21 = vmax.f32 %v3552_v32, %v3561_v52  ;;  %v3932_v22 = vmax.f32 %v14365_v50, %v14364_v29  ;;  %v14368_v52 = vld [vmem:[#allocation105_spill] sm:$0xff]  ;;  %v14369_v50 = vld [vmem:[#allocation78_spill] sm:$0xff] }
 0x341   :  { %v3951_v38 = vmax.f32 %v3933_v55, %v3942_v51  ;;  %v3555_v32 = vmax.f32 %v14368_v52, %v14367_v24 }
 0x342   :  { %v11970_v2 = vpop.permute.xlu0 %4266  ;;  %3623 = vrot.lane.b32.xlu1 %v8692_v1, %s9178_s21  ;;  %v3957_v1 = vadd.f32 %v3948_v61, %v10716_v62  ;;  %v3967_v54 = vmax.f32 %v3958_v7, 0.0  ;;  %v3580_v61 = vadd.f32 %v3571_v20, %v10700_v60  ;;  %v3579_v43 = vadd.f32 %v3570_v21, %v10710_v49  ;;  %v14370_v7 = vld [vmem:[#allocation10_spill] sm:$0xff]  ;;  %v14371_v20 = vld [vmem:[#allocation100_spill] sm:$0xff] }
 0x343   :  { %v3950_v29 = vmax.f32 %v3932_v22, %v3941_v17  ;;  %v3554_v51 = vmax.f32 %v14371_v20, %v14370_v7  ;;  %v14374_v22 = vld [vmem:[#allocation108_spill] sm:$0xff] }
 0x344   :  { %v11978_v3 = vpop.permute.xlu1 %4268  ;;  %3621 = vrot.lane.b32.xlu0 %v8691_v28, %s9178_s21  ;;  %v14366_v28 = vld [vmem:[#allocation125_spill] sm:$0xff]  ;;  %v3966_v45 = vmax.f32 %v3957_v1, 0.0  ;;  %v3960_v1 = vadd.f32 %v3951_v38, %v10700_v60  ;;  %v3588_v52 = vmax.f32 %v3579_v43, 0.0  ;;  %v14378_v43 = vld [vmem:[#allocation130_spill] sm:$0xff] }
 0x345   :  { %v3564_v53 = vmax.f32 %v14366_v28, %v11713_v56  ;;  %v3563_v56 = vmax.f32 %v14369_v50, %v11778_v25  ;;  %v3589_v28 = vmax.f32 %v3580_v61, 0.0  ;;  %v14373_v25 = vld [vmem:[#allocation32_spill] sm:$0xff] }
 0x346   :  { %v11986_v36 = vpop.permute.xlu0 %4646  ;;  %4003 = vrot.lane.b32.xlu1 %v8710_v11, %s9178_s21  ;;  %v8693_v11 = vpack.c.bf16 %v3586_v16, %v3586_v16  ;;  %v14372_v16 = vld [vmem:[#allocation127_spill] sm:$0xff]  ;;  %v3935_v24 = vmax.f32 %v14374_v22, %v14373_v25  ;;  %v14377_v50 = vld [vmem:[#allocation104_spill] sm:$0xff]  ;;  %v3969_v7 = vmax.f32 %v3960_v1, 0.0 }
 0x347   :  { %v3573_v55 = vmax.f32 %v3555_v32, %v3564_v53  ;;  %v3944_v21 = vmax.f32 %v14372_v16, %v11734_v58  ;;  %v3959_v53 = vadd.f32 %v3950_v29, %v10710_v49  ;;  %v3572_v32 = vmax.f32 %v3554_v51, %v3563_v56  ;;  %v14376_v58 = vld [vmem:[#allocation9_spill] sm:$0xff] }
 0x348   :  { %v11994_v31 = vpop.permute.xlu1 %4648  ;;  %4001 = vrot.lane.b32.xlu0 %v8709_v63, %s9178_s21  ;;  %v8712_v63 = vpack.c.bf16 %v3967_v54, %v3967_v54  ;;  %v14375_v54 = vld [vmem:[#allocation95_spill] sm:$0xff]  ;;  %v3565_v29 = vmax.f32 %v14378_v43, %v11785_v35  ;;  %v8714_v1 = vpack.c.bf16 %v3969_v7, %v3969_v7 }
 0x349   :  { %v3943_v61 = vmax.f32 %v14375_v54, %v11794_v6  ;;  %v3953_v20 = vmax.f32 %v3935_v24, %v3944_v21  ;;  %v14379_v6 = vld [vmem:[#allocation109_spill] sm:$0xff]  ;;  %v3968_v16 = vmax.f32 %v3959_v53, 0.0  ;;  %v14381_v54 = vld [vmem:[#allocation111_spill] sm:$0xff] }
 0x34a   :  { %v2865_v4 = vpop.permute.xlu0 %2864  ;;  %3627 = vrot.lane.b32.xlu1 %v8694_v8, %s9178_s21  ;;  %v8711_v8 = vpack.c.bf16 %v3966_v45, %v3966_v45  ;;  %v8696_v45 = vpack.c.bf16 %v3589_v28, %v3589_v28  ;;  %v3556_v51 = vmax.f32 %v14379_v6, %v11501_v57 }
 0x34b   :  { %2890 = vst.msk [vmem:[#allocation4 + $0x30] sm:$0xf] %vm2887_vm4, %v2865_v4  ;;  %v3934_v4 = vmax.f32 %v14377_v50, %v14376_v58  ;;  %v3962_v35 = vadd.f32 %v3953_v20, %v10764_v5  ;;  %v8713_v57 = vpack.c.bf16 %v3968_v16, %v3968_v16 }
 0x34c   :  { %v2867_v17 = vpop.permute.xlu1 %2866  ;;  %3625 = vrot.lane.b32.xlu0 %v8693_v11, %s9178_s21  ;;  %v3582_v11 = vadd.f32 %v3573_v55, %v10764_v5  ;;  %v3581_v55 = vadd.f32 %v3572_v32, %v14122_v10  ;;  %v3574_v21 = vmax.f32 %v3556_v51, %v3565_v29  ;;  %v14382_v29 = vld [vmem:[#allocation136_spill] sm:$0xff] }
 0x34d   :  { %2891 = vst.msk [vmem:[#allocation4 + $0x48] sm:$0xf] %vm2887_vm4, %v2867_v17  ;;  %v3952_v17 = vmax.f32 %v3934_v4, %v3943_v61  ;;  %v3936_v61 = vmax.f32 %v14381_v54, %v11520_v23  ;;  %v3971_v58 = vmax.f32 %v3962_v35, 0.0 }
 0x34e   :  { %v3246_v38 = vpop.permute.xlu0 %3245  ;;  %4007 = vrot.lane.b32.xlu1 %v8712_v63, %s9178_s21  ;;  %v8695_v63 = vpack.c.bf16 %v3588_v52, %v3588_v52  ;;  %v3591_v28 = vmax.f32 %v3582_v11, 0.0  ;;  %v3590_v24 = vmax.f32 %v3581_v55, 0.0  ;;  %v14380_v52 = vld [vmem:[#allocation134_spill] sm:$0xff]  ;;  %v3583_v50 = vadd.f32 %v3574_v21, %v14286_v18 }
 0x34f   :  { %3270 = vst.msk [vmem:[#allocation4 + $0x34] sm:$0xf] %vm2887_vm4, %v3246_v38  ;;  %v3945_v53 = vmax.f32 %v14380_v52, %v11799_v19  ;;  %v8716_v43 = vpack.c.bf16 %v3971_v58, %v3971_v58  ;;  %v14385_v58 = vld [vmem:[#allocation133_spill] sm:$0xff] }
 0x350   :  { %v3248_v56 = vpop.permute.xlu1 %3247  ;;  %4005 = vrot.lane.b32.xlu0 %v8711_v8, %s9178_s21  ;;  %v3961_v8 = vadd.f32 %v3952_v17, %v14122_v10  ;;  %v8698_v38 = vpack.c.bf16 %v3591_v28, %v3591_v28  ;;  %v8697_v11 = vpack.c.bf16 %v3590_v24, %v3590_v24  ;;  %v3592_v23 = vmax.f32 %v3583_v50, 0.0 }
 0x351   :  { %3271 = vst.msk [vmem:[#allocation4 + $0x4c] sm:$0xf] %vm2887_vm4, %v3248_v56  ;;  %v3954_v7 = vmax.f32 %v3936_v61, %v3945_v53  ;;  %v4308_v56 = vmax.f32 %v14382_v29, %v11810_v27  ;;  %v14383_v27 = vld [vmem:[#allocation139_spill] sm:$0xff]  ;;  %v4837_v53 = vld [vmem:[#allocation4] sm:$0xff]  ;;  %v4127_v50 = vmax.f32 %v14385_v58, %v11805_v12 }
 0x352   :  { %v12028_v25 = vpop.permute.xlu0 %4089  ;;  %3631 = vrot.lane.b32.xlu1 %v8696_v45, %s9178_s21  ;;  %v3970_v45 = vmax.f32 %v3961_v8, 0.0  ;;  %v4128_v28 = vmax.f32 %v14383_v27, %v11818_v33  ;;  %v14384_v8 = vld [vmem:[#allocation146_spill] sm:$0xff] }
 0x353   :  { %v4689_v52 = vmax.f32 %v14384_v8, %v11828_v59 }
 0x354   :  { %v4273_v22 = vpop.permute.xlu1 %4272  ;;  %3629 = vrot.lane.b32.xlu0 %v8695_v63, %s9178_s21  ;;  %v8715_v51 = vpack.c.bf16 %v3970_v45, %v3970_v45  ;;  %v3963_v63 = vadd.f32 %v3954_v7, %v14286_v18 }
 0x355   :  { %v4317_v19 = vmax.f32 %v11602_v39, %v4273_v22  ;;  %v8699_v39 = vpack.c.bf16 %v3592_v23, %v3592_v23 }
 0x356   :  { %v12036_v32 = vpop.permute.xlu0 %4270  ;;  %4011 = vrot.lane.b32.xlu1 %v8714_v1, %s9178_s21  ;;  %v3972_v35 = vmax.f32 %v3963_v63, 0.0 }
 0x357   :  { %v4326_v16 = vmax.f32 %v4308_v56, %v4317_v19 }
 0x358   :  { %v2871_v4 = vpop.permute.xlu1 %2870  ;;  %4009 = vrot.lane.b32.xlu0 %v8713_v57, %s9178_s21  ;;  %v8717_v54 = vpack.c.bf16 %v3972_v35, %v3972_v35 }
 0x359   :  { %2893 = vst.msk [vmem:[#allocation4 + $0x78] sm:$0xf] %vm2887_vm4, %v2871_v4  ;;  %v4335_v21 = vadd.f32 %v4326_v16, %v10734_v13  ;;  %v4843_v16 = vld [vmem:[#allocation4 + $0x30] sm:$0xff] }
 0x35a   :  { %v12045_v20 = vpop.permute.xlu0 %4650  ;;  %3635 = vrot.lane.b32.xlu1 %v8698_v38, %s9178_s21 }
 0x35b   :  { %v4344_v61 = vmax.f32 %v4335_v21, 0.0 }
 0x35c   :  { %v3252_v6 = vpop.permute.xlu1 %3251  ;;  %3633 = vrot.lane.b32.xlu0 %v8697_v11, %s9178_s21 }
 0x35d   :  { %3273 = vst.msk [vmem:[#allocation4 + $0x7c] sm:$0xf] %vm2887_vm4, %v3252_v6  ;;  %v8727_v23 = vpack.c.bf16 %v4344_v61, %v4344_v61 }
 0x35e   :  { %v2869_v55 = vpop.permute.xlu0 %2868  ;;  %4015 = vrot.lane.b32.xlu1 %v8716_v43, %s9178_s21 }
 0x35f   :  { %2892 = vst.msk [vmem:[#allocation4 + $0x60] sm:$0xf] %vm2887_vm4, %v2869_v55  ;;  %v14386_v55 = vld [vmem:[#allocation140_spill] sm:$0xff] }
 0x360   :  { %v4094_v17 = vpop.permute.xlu1 %4093  ;;  %4013 = vrot.lane.b32.xlu0 %v8715_v51, %s9178_s21 }
 0x361   :  { %v4137_v1 = vmax.f32 %v11652_v30, %v4094_v17 }
 0x362   :  { %v3250_v22 = vpop.permute.xlu0 %3249  ;;  %3637 = vrot.lane.b32.xlu1 %v8699_v39, %s9178_s21  ;;  %v4688_v39 = vmax.f32 %v14386_v55, %v11814_v14  ;;  %v14389_v14 = vld [vmem:[#allocation142_spill] sm:$0xff]  ;;  %v14397_v55 = vld [vmem:[#allocation148_spill] sm:$0xff] }
 0x363   :  { %v4146_v57 = vmax.f32 %v4128_v28, %v4137_v1  ;;  %3272 = vst.msk [vmem:[#allocation4 + $0x64] sm:$0xf] %vm2887_vm4, %v3250_v22 }
 0x364   :  { %v4655_v24 = vpop.permute.xlu1 %4654  ;;  %4485 = vrot.lane.b32.xlu0 %v11862_v48, %s9178_s21 }
 0x365   :  { %v4155_v33 = vadd.f32 %v4146_v57, %v10742_v41  ;;  %v4698_v30 = vmax.f32 %v11670_v47, %v4655_v24  ;;  %v4840_v47 = vld [vmem:[#allocation4 + $0x18] sm:$0xff]  ;;  %v4846_v57 = vld [vmem:[#allocation4 + $0x48] sm:$0xff]  ;;  %v14388_v24 = vld [vmem:[#allocation80_spill] sm:$0xff] }
 0x366   :  { %v4092_v38 = vpop.permute.xlu0 %4091  ;;  %4897 = vrot.lane.b32.xlu1 %v4837_v53, %s9178_s21  ;;  %v4309_v8 = vmax.f32 %v14389_v14, %v14388_v24  ;;  %v14399_v14 = vld [vmem:[#allocation81_spill] sm:$0xff] }
 0x367   :  { %v4164_v4 = vmax.f32 %v4155_v33, 0.0  ;;  %v4707_v11 = vmax.f32 %v4689_v52, %v4698_v30  ;;  %v4136_v45 = vmax.f32 %v11582_v26, %v4092_v38  ;;  %v14392_v38 = vld [vmem:[#allocation63_spill] sm:$0xff] }
 0x368   :  { %v2873_v7 = vpop.permute.xlu1 %2872  ;;  %4017 = vrot.lane.b32.xlu0 %v8717_v54, %s9178_s21  ;;  %v14390_v54 = vld [vmem:[#allocation24_spill] sm:$0xff] }
 0x369   :  { %v4716_v59 = vadd.f32 %v4707_v11, %v10742_v41  ;;  %v4145_v19 = vmax.f32 %v4127_v50, %v4136_v45  ;;  %2894 = vst.msk [vmem:[#allocation4 + $0x90] sm:$0xf] %vm2887_vm4, %v2873_v7  ;;  %v8719_v43 = vpack.c.bf16 %v4164_v4, %v4164_v4  ;;  %v14393_v11 = vld [vmem:[#allocation46_spill] sm:$0xff]  ;;  %v14394_v45 = vld [vmem:[#allocation144_spill] sm:$0xff] }
 0x36a   :  { %v4653_v29 = vpop.permute.xlu0 %4652  ;;  %4903 = vrot.lane.b32.xlu1 %v4840_v47, %s9178_s21  ;;  %v4849_v50 = vld [vmem:[#allocation4 + $0x60] sm:$0xff]  ;;  %v4129_v7 = vmax.f32 %v14394_v45, %v14393_v11  ;;  %v14395_v47 = vld [vmem:[#allocation60_spill] sm:$0xff] }
 0x36b   :  { %v4725_v56 = vmax.f32 %v4716_v59, 0.0  ;;  %v4154_v12 = vadd.f32 %v4145_v19, %v10734_v13  ;;  %4210 = vst.msk [vmem:[#allocation4 + $0x28] sm:$0xf] %vm2687_vm3, %v8719_v43  ;;  %v4697_v26 = vmax.f32 %v11639_v42, %v4653_v29  ;;  %v14387_v42 = vld [vmem:[#allocation152_spill] sm:$0xff] }
 0x36c   :  { %v3256_v6 = vpop.permute.xlu1 %3255  ;;  %4381 = vrot.lane.b32.xlu0 %v8727_v23, %s9178_s21  ;;  %v4130_v21 = vmax.f32 %v14387_v42, %v11844_v46  ;;  %v14391_v46 = vld [vmem:[#allocation155_spill] sm:$0xff]  ;;  %v14404_v11 = vld [vmem:[#allocation76_spill] sm:$0xff] }
 0x36d   :  { %v8746_v51 = vpack.c.bf16 %v4725_v56, %v4725_v56  ;;  %v4163_v63 = vmax.f32 %v4154_v12, 0.0  ;;  %3275 = vst.msk [vmem:[#allocation4 + $0xac] sm:$0xf] %vm2887_vm4, %v3256_v6  ;;  %v4706_v28 = vmax.f32 %v4688_v39, %v4697_v26  ;;  %v4311_v61 = vmax.f32 %v14391_v46, %v14390_v54  ;;  %v4852_v6 = vld [vmem:[#allocation4 + $0x78] sm:$0xff] }
 0x36e   :  { %v4275_v17 = vpop.permute.xlu0 %4274  ;;  %4909 = vrot.lane.b32.xlu1 %v4843_v16, %s9178_s21  ;;  %v14396_v16 = vld [vmem:[#allocation75_spill] sm:$0xff] }
 0x36f   :  { %v8718_v27 = vpack.c.bf16 %v4163_v63, %v4163_v63  ;;  %v4318_v1 = vmax.f32 %v11668_v15, %v4275_v17  ;;  %v4715_v15 = vadd.f32 %v4706_v28, %v10734_v13  ;;  %v4310_v39 = vmax.f32 %v14397_v55, %v14396_v16  ;;  %v14398_v28 = vld [vmem:[#allocation42_spill] sm:$0xff] }
 0x370   :  { %v4098_v35 = vpop.permute.xlu1 %4097  ;;  %4763 = vrot.lane.b32.xlu0 %v8746_v51, %s9178_s21  ;;  %v14405_v55 = vld [vmem:[#allocation94_spill] sm:$0xff] }
 0x371   :  { %v4139_v22 = vmax.f32 %v11711_v40, %v4098_v35  ;;  %4209 = vst.msk [vmem:[#allocation4 + $0x10] sm:$0xf] %vm2687_vm3, %v8718_v27  ;;  %v4327_v30 = vmax.f32 %v4309_v8, %v4318_v1  ;;  %v4724_v23 = vmax.f32 %v4715_v15, 0.0  ;;  %v14400_v8 = vld [vmem:[#allocation31_spill] sm:$0xff] }
 0x372   :  { %v3254_v52 = vpop.permute.xlu0 %3253  ;;  %4915 = vrot.lane.b32.xlu1 %v4846_v57, %s9178_s21 }
 0x373   :  { %v4148_v33 = vmax.f32 %v4130_v21, %v4139_v22  ;;  %3274 = vst.msk [vmem:[#allocation4 + $0x94] sm:$0xf] %vm2887_vm4, %v3254_v52  ;;  %v4336_v29 = vadd.f32 %v4327_v30, %v10742_v41  ;;  %v8745_v35 = vpack.c.bf16 %v4724_v23, %v4724_v23  ;;  %v4132_v52 = vmax.f32 %v14400_v8, %v14399_v14  ;;  %v14410_v14 = vld [vmem:[#allocation43_spill] sm:$0xff] }
 0x374   :  { %v4279_v53 = vpop.permute.xlu1 %4278  ;;  %v14411_v8 = vld [vmem:[#allocation47_spill] sm:$0xff] }
 0x375   :  { %v4157_v40 = vadd.f32 %v4148_v33, %v10726_v34  ;;  %v4320_v58 = vmax.f32 %v14392_v38, %v4279_v53  ;;  %v4345_v42 = vmax.f32 %v4336_v29, 0.0  ;;  %v14401_v33 = vld [vmem:[#allocation16_spill] sm:$0xff]  ;;  %v14402_v38 = vld [vmem:[#allocation147_spill] sm:$0xff] }
 0x376   :  { %v4096_v4 = vpop.permute.xlu0 %4095  ;;  %4921 = vrot.lane.b32.xlu1 %v4849_v50, %s9178_s21 }
 0x377   :  { %v4166_v59 = vmax.f32 %v4157_v40, 0.0  ;;  %v4329_v19 = vmax.f32 %v4311_v61, %v4320_v58  ;;  %v4138_v43 = vmax.f32 %v14395_v47, %v4096_v4  ;;  %v8728_v46 = vpack.c.bf16 %v4345_v42, %v4345_v42  ;;  %v14403_v58 = vld [vmem:[#allocation30_spill] sm:$0xff] }
 0x378   :  { %v12104_v56 = vpop.permute.xlu1 %4658  ;;  %v4313_v50 = vmax.f32 %v14403_v58, %v14402_v38 }
 0x379   :  { %v4338_v12 = vadd.f32 %v4329_v19, %v10726_v34  ;;  %v4147_v26 = vmax.f32 %v4129_v7, %v4138_v43  ;;  %v8721_v51 = vpack.c.bf16 %v4166_v59, %v4166_v59 }
 0x37a   :  { %v4277_v63 = vpop.permute.xlu0 %4276  ;;  %4927 = vrot.lane.b32.xlu1 %v4852_v6, %s9178_s21 }
 0x37b   :  { %v4347_v17 = vmax.f32 %v4338_v12, 0.0  ;;  %v4156_v27 = vadd.f32 %v4147_v26, %v10716_v62  ;;  %v4319_v1 = vmax.f32 %v14398_v28, %v4277_v63  ;;  %4212 = vst.msk [vmem:[#allocation4 + $0x58] sm:$0xf] %vm2687_vm3, %v8721_v51 }
 0x37c   :  { %v4102_v21 = vpop.permute.xlu1 %4101 }
 0x37d   :  { %v8730_v22 = vpack.c.bf16 %v4347_v17, %v4347_v17  ;;  %v4165_v57 = vmax.f32 %v4156_v27, 0.0  ;;  %v4328_v24 = vmax.f32 %v4310_v39, %v4319_v1  ;;  %v4141_v15 = vmax.f32 %v14401_v33, %v4102_v21  ;;  %v14406_v39 = vld [vmem:[#allocation157_spill] sm:$0xff] }
 0x37e   :  { %v12116_v30 = vpop.permute.xlu0 %4656  ;;  %4761 = vrot.lane.b32.xlu1 %v8745_v35, %s9178_s21  ;;  %v4131_v17 = vmax.f32 %v14406_v39, %v14405_v55  ;;  %v14407_v27 = vld [vmem:[#allocation73_spill] sm:$0xff]  ;;  %v14417_v39 = vld [vmem:[#allocation34_spill] sm:$0xff] }
 0x37f   :  { %v4337_v53 = vadd.f32 %v4328_v24, %v10716_v62  ;;  %4387 = vrot.lane.b32.xlu0 %v8730_v22, %s9178_s21  ;;  %v8720_v54 = vpack.c.bf16 %v4165_v57, %v4165_v57  ;;  %v4150_v61 = vmax.f32 %v4132_v52, %v4141_v15  ;;  %v14408_v35 = vld [vmem:[#allocation137_spill] sm:$0xff]  ;;  %v14409_v22 = vld [vmem:[#allocation68_spill] sm:$0xff]  ;;  %v4312_v52 = vmax.f32 %v14411_v8, %v14410_v14 }
 0x380   :  { %v4283_v40 = vpop.permute.xlu1 %4282 }
 0x381   :  { %v4346_v4 = vmax.f32 %v4337_v53, 0.0  ;;  %v4322_v45 = vmax.f32 %v14404_v11, %v4283_v40  ;;  %4211 = vst.msk [vmem:[#allocation4 + $0x40] sm:$0xf] %vm2687_vm3, %v8720_v54  ;;  %v4159_v7 = vadd.f32 %v4150_v61, %v10700_v60  ;;  %v14412_v53 = vld [vmem:[#allocation38_spill] sm:$0xff] }
 0x382   :  { %v3258_v59 = vpop.permute.xlu0 %3257  ;;  %4383 = vrot.lane.b32.xlu1 %v8728_v46, %s9178_s21 }
 0x383   :  { %v8729_v19 = vpack.c.bf16 %v4346_v4, %v4346_v4  ;;  %v4331_v47 = vmax.f32 %v4313_v50, %v4322_v45  ;;  %3276 = vst.msk [vmem:[#allocation4 + $0xc4] sm:$0xf] %vm2887_vm4, %v3258_v59  ;;  %v4168_v43 = vmax.f32 %v4159_v7, 0.0  ;;  %v14413_v7 = vld [vmem:[#allocation59_spill] sm:$0xff] }
 0x384   :  { %v12128_v23 = vpop.permute.xlu1 %4662  ;;  %v4134_v59 = vmax.f32 %v14413_v7, %v11961_v0  ;;  %v4315_v0 = vmax.f32 %v14417_v39, %v11978_v3 }
 0x385   :  { %v4340_v29 = vadd.f32 %v4331_v47, %v10700_v60  ;;  %v8723_v26 = vpack.c.bf16 %v4168_v43, %v4168_v43  ;;  %v14414_v47 = vld [vmem:[#allocation49_spill] sm:$0xff] }
 0x386   :  { %v2877_v12 = vpop.permute.xlu0 %2876  ;;  %4385 = vrot.lane.b32.xlu1 %v8729_v19, %s9178_s21 }
 0x387   :  { %v4349_v6 = vmax.f32 %v4340_v29, 0.0  ;;  %2896 = vst.msk [vmem:[#allocation4 + $0xc0] sm:$0xf] %vm2887_vm4, %v2877_v12 }
 0x388   :  { %v4454_v51 = vpop.permute.xlu1 %4453  ;;  %4214 = vst.msk [vmem:[#allocation4 + $0x88] sm:$0xf] %vm2687_vm3, %v8723_v26 }
 0x389   :  { %v8732_v63 = vpack.c.bf16 %v4349_v6, %v4349_v6  ;;  %v4507_v42 = vmax.f32 %v14408_v35, %v4454_v51 }
 0x38a   :  { %v4100_v16 = vpop.permute.xlu0 %4099 }
 0x38b   :  { %v4140_v28 = vmax.f32 %v14407_v27, %v4100_v16  ;;  %4391 = vrot.lane.b32.xlu1 %v8732_v63, %s9178_s21  ;;  %v14416_v63 = vld [vmem:[#allocation72_spill] sm:$0xff] }
 0x38c   :  { %v4472_v1 = vpop.permute.xlu1 %4471 }
 0x38d   :  { %v4149_v21 = vmax.f32 %v4131_v17, %v4140_v28  ;;  %v4516_v57 = vmax.f32 %v14409_v22, %v4472_v1  ;;  %v14418_v28 = vld [vmem:[#allocation89_spill] sm:$0xff]  ;;  %v14419_v22 = vld [vmem:[#allocation12_spill] sm:$0xff] }
 0x38e   :  { %v4281_v24 = vpop.permute.xlu0 %4280 }
 0x38f   :  { %v4158_v33 = vadd.f32 %v4149_v21, %v10710_v49  ;;  %v4525_v15 = vmax.f32 %v4507_v42, %v4516_v57  ;;  %v4321_v54 = vmax.f32 %v14412_v53, %v4281_v24  ;;  %v4314_v57 = vmax.f32 %v14419_v22, %v11970_v2  ;;  %v14420_v24 = vld [vmem:[#allocation87_spill] sm:$0xff]  ;;  %v14427_v22 = vld [vmem:[#allocation61_spill] sm:$0xff] }
 0x390   :  { %v12144_v46 = vpop.permute.xlu1 %4469 }
 0x391   :  { %v4167_v61 = vmax.f32 %v4158_v33, 0.0  ;;  %v4534_v40 = vadd.f32 %v4525_v15, %v10734_v13  ;;  %v4330_v38 = vmax.f32 %v4312_v52, %v4321_v54  ;;  %v14415_v13 = vld [vmem:[#allocation158_spill] sm:$0xff] }
 0x392   :  { %v12147_v58 = vpop.permute.xlu0 %4660  ;;  %v4133_v26 = vmax.f32 %v14415_v13, %v11952_v37 }
 0x393   :  { %v4543_v50 = vmax.f32 %v4534_v40, 0.0  ;;  %v4339_v4 = vadd.f32 %v4330_v38, %v10710_v49  ;;  %v8722_v11 = vpack.c.bf16 %v4167_v61, %v4167_v61 }
 0x394   :  { %v4106_v45 = vpop.permute.xlu1 %4105 }
 0x395   :  { %v4348_v19 = vmax.f32 %v4339_v4, 0.0  ;;  %v4143_v43 = vmax.f32 %v14414_v47, %v4106_v45  ;;  %v8736_v29 = vpack.c.bf16 %v4543_v50, %v4543_v50  ;;  %4213 = vst.msk [vmem:[#allocation4 + $0x70] sm:$0xf] %vm2687_vm3, %v8722_v11  ;;  %v14421_v50 = vld [vmem:[#allocation35_spill] sm:$0xff] }
 0x396   :  { %v4104_v12 = vpop.permute.xlu0 %4103  ;;  %v4135_v2 = vmax.f32 %v14421_v50, %v12028_v25  ;;  %v14422_v11 = vld [vmem:[#allocation103_spill] sm:$0xff]  ;;  %v14424_v25 = vld [vmem:[#allocation86_spill] sm:$0xff]  ;;  %v14432_v50 = vld [vmem:[#allocation149_spill] sm:$0xff] }
 0x397   :  { %v8731_v6 = vpack.c.bf16 %v4348_v19, %v4348_v19  ;;  %v4152_v51 = vmax.f32 %v4134_v59, %v4143_v43  ;;  %v4142_v16 = vmax.f32 %v14416_v63, %v4104_v12  ;;  %4589 = vst.msk [vmem:[#allocation4 + $0x14] sm:$0xf] %vm2687_vm3, %v8736_v29  ;;  %v14423_v29 = vld [vmem:[#allocation64_spill] sm:$0xff] }
 0x398   :  { %v4287_v55 = vpop.permute.xlu1 %4286  ;;  %v4316_v12 = vmax.f32 %v14423_v29, %v12036_v32 }
 0x399   :  { %v4161_v17 = vadd.f32 %v4152_v51, %v10764_v5  ;;  %v4151_v27 = vmax.f32 %v4133_v26, %v4142_v16  ;;  %v4324_v1 = vmax.f32 %v14418_v28, %v4287_v55  ;;  %4389 = vrot.lane.b32.xlu0 %v8731_v6, %s9178_s21 }
 0x39a   :  { %v4285_v35 = vpop.permute.xlu0 %4284 }
 0x39b   :  { %v4170_v42 = vmax.f32 %v4161_v17, 0.0  ;;  %v4160_v37 = vadd.f32 %v4151_v27, %v14122_v10  ;;  %v4333_v21 = vmax.f32 %v4315_v0, %v4324_v1  ;;  %v4323_v14 = vmax.f32 %v14420_v24, %v4285_v35  ;;  %v14425_v0 = vld [vmem:[#allocation48_spill] sm:$0xff] }
 0x39c   :  { %v12167_v8 = vpop.permute.xlu1 %4666 }
 0x39d   :  { %v4169_v3 = vmax.f32 %v4160_v37, 0.0  ;;  %v4342_v52 = vadd.f32 %v4333_v21, %v10764_v5  ;;  %v8725_v33 = vpack.c.bf16 %v4170_v42, %v4170_v42  ;;  %v4332_v15 = vmax.f32 %v4314_v57, %v4323_v14  ;;  %v14426_v37 = vld [vmem:[#allocation69_spill] sm:$0xff] }
 0x39e   :  { %v4665_v53 = vpop.permute.xlu0 %4664  ;;  %v4515_v57 = vmax.f32 %v14427_v22, %v12144_v46  ;;  %v14428_v14 = vld [vmem:[#allocation121_spill] sm:$0xff] }
 0x39f   :  { %v4351_v54 = vmax.f32 %v4342_v52, 0.0  ;;  %4216 = vst.msk [vmem:[#allocation4 + $0xb8] sm:$0xf] %vm2687_vm3, %v8725_v33  ;;  %v8724_v61 = vpack.c.bf16 %v4169_v3, %v4169_v3  ;;  %v4341_v40 = vadd.f32 %v4332_v15, %v14122_v10  ;;  %v14430_v15 = vld [vmem:[#allocation36_spill] sm:$0xff] }
 0x3a0   :  { %v4108_v38 = vpop.permute.xlu1 %4107 }
 0x3a1   :  { %v8734_v4 = vpack.c.bf16 %v4351_v54, %v4351_v54  ;;  %v4144_v45 = vmax.f32 %v14422_v11, %v4108_v38  ;;  %4215 = vst.msk [vmem:[#allocation4 + $0xa0] sm:$0xf] %vm2687_vm3, %v8724_v61  ;;  %v4350_v7 = vmax.f32 %v4341_v40, 0.0  ;;  %v14431_v40 = vld [vmem:[#allocation21_spill] sm:$0xff] }
 0x3a2   :  { %v2875_v59 = vpop.permute.xlu0 %2874 }
 0x3a3   :  { %v4153_v19 = vmax.f32 %v4135_v2, %v4144_v45  ;;  %2895 = vst.msk [vmem:[#allocation4 + $0xa8] sm:$0xf] %vm2887_vm4, %v2875_v59  ;;  %4395 = vrot.lane.b32.xlu1 %v8734_v4, %s9178_s21  ;;  %v8733_v47 = vpack.c.bf16 %v4350_v7, %v4350_v7  ;;  %v12208_v45 = vld [vmem:[#allocation4 + $0xdc] sm:$0xff]  ;;  %v5135_v7 = vld [vmem:[#allocation4 + $0xe4] sm:$0xff] }
 0x3a4   :  { %v4289_v43 = vpop.permute.xlu1 %4288 }
 0x3a5   :  { %v4162_v13 = vadd.f32 %v4153_v19, %v14286_v18  ;;  %v4325_v26 = vmax.f32 %v14424_v25, %v4289_v43  ;;  %4393 = vrot.lane.b32.xlu0 %v8733_v47, %s9178_s21  ;;  %v14435_v43 = vld [vmem:[#allocation53_spill] sm:$0xff] }
 0x3a6   :  { %v4456_v6 = vpop.permute.xlu0 %4455 }
 0x3a7   :  { %v4171_v51 = vmax.f32 %v4162_v13, 0.0  ;;  %v4334_v63 = vmax.f32 %v4316_v12, %v4325_v26  ;;  %v4508_v32 = vmax.f32 %v14334_v9, %v4456_v6  ;;  %v14429_v9 = vld [vmem:[#allocation84_spill] sm:$0xff]  ;;  %v8922_v26 = vpack.i.bf16 %v5135_v7, %v12208_v45  ;;  %v14437_v6 = vld [vmem:[#allocation15_spill] sm:$0xff]  ;;  %v14444_v7 = vld [vmem:[#allocation18_spill] sm:$0xff] }
 0x3a8   :  { %v4669_v16 = vpop.permute.xlu1 %4668 }
 0x3a9   :  { %v4343_v55 = vadd.f32 %v4334_v63, %v14286_v18  ;;  %v8726_v39 = vpack.c.bf16 %v4171_v51, %v4171_v51  ;;  %4463 = vrot.lane.b32.xlu0 %v14425_v0, %s9178_s21  ;;  %v4705_v29 = vmax.f32 %v14435_v43, %v4669_v16  ;;  %v4696_v51 = vmax.f32 %v14437_v6, %v12045_v20  ;;  %v14438_v16 = vld [vmem:[#allocation66_spill] sm:$0xff]  ;;  %v14439_v20 = vld [vmem:[#allocation156_spill] sm:$0xff]  ;;  %v14448_v6 = vld [vmem:[#allocation13_spill] sm:$0xff] }
 0x3aa   :  { %v4474_v17 = vpop.permute.xlu0 %4473 }
 0x3ab   :  { %v4352_v27 = vmax.f32 %v4343_v55, 0.0  ;;  %v4517_v28 = vmax.f32 %v11654_v44, %v4474_v17  ;;  %4217 = vst.msk [vmem:[#allocation4 + $0xd0] sm:$0xf] %vm2687_vm3, %v8726_v39  ;;  %v4703_v44 = vmax.f32 %v14429_v9, %v4665_v53  ;;  %v14434_v53 = vld [vmem:[#allocation8_spill] sm:$0xff] }
 0x3ac   :  { %v4466_v1 = vpop.permute.xlu1 %4465 }
 0x3ad   :  { %v8735_v35 = vpack.c.bf16 %v4352_v27, %v4352_v27  ;;  %v4526_v42 = vmax.f32 %v4508_v32, %v4517_v28  ;;  %4481 = vrot.lane.b32.xlu0 %v14426_v37, %s9178_s21  ;;  %v4513_v54 = vmax.f32 %v14430_v15, %v4466_v1  ;;  %v4714_v27 = vmax.f32 %v4696_v51, %v4705_v29 }
 0x3ae   :  { %v4488_v21 = vpop.permute.xlu0 %4487  ;;  %v4695_v51 = vmax.f32 %v14448_v6, %v11994_v31 }
 0x3af   :  { %v4535_v24 = vadd.f32 %v4526_v42, %v10742_v41  ;;  %v4524_v3 = vmax.f32 %v14428_v14, %v4488_v21  ;;  %4397 = vrot.lane.b32.xlu1 %v8735_v35, %s9178_s21  ;;  %v14433_v41 = vld [vmem:[#allocation14_spill] sm:$0xff] }
 0x3b0   :  { %v4484_v52 = vpop.permute.xlu1 %4483  ;;  %v4694_v46 = vmax.f32 %v14433_v41, %v11986_v36  ;;  %v14436_v36 = vld [vmem:[#allocation70_spill] sm:$0xff] }
 0x3b1   :  { %v4544_v33 = vmax.f32 %v4535_v24, 0.0  ;;  %v4533_v61 = vmax.f32 %v4515_v57, %v4524_v3  ;;  %v4522_v38 = vmax.f32 %v14431_v40, %v4484_v52  ;;  %4457 = vrot.lane.b32.xlu0 %v14432_v50, %s9178_s21  ;;  %v14440_v57 = vld [vmem:[#allocation39_spill] sm:$0xff] }
 0x3b2   :  { %v12201_v2 = vpop.permute.xlu0 %4467  ;;  %v4712_v47 = vmax.f32 %v4694_v46, %v4703_v44 }
 0x3b3   :  { %v4542_v4 = vadd.f32 %v4533_v61, %v14286_v18  ;;  %v4531_v11 = vmax.f32 %v4513_v54, %v4522_v38  ;;  %4461 = vrot.lane.b32.xlu1 %v14434_v53, %s9178_s21  ;;  %v8737_v59 = vpack.c.bf16 %v4544_v33, %v4544_v33  ;;  %v14442_v54 = vld [vmem:[#allocation106_spill] sm:$0xff] }
 0x3b4   :  { %v3624_v19 = vpop.permute.xlu1 %3623  ;;  %v4721_v17 = vadd.f32 %v4712_v47, %v14122_v10  ;;  %v14443_v61 = vld [vmem:[#allocation50_spill] sm:$0xff] }
 0x3b5   :  { %v4551_v12 = vmax.f32 %v4542_v4, 0.0  ;;  %v4540_v13 = vadd.f32 %v4531_v11, %v14122_v10  ;;  %3649 = vst.msk [vmem:[#allocation4 + $0x20] sm:$0xf] %vm2887_vm4, %v3624_v19  ;;  %4475 = vrot.lane.b32.xlu0 %v14436_v36, %s9178_s21  ;;  %v4723_v10 = vadd.f32 %v4714_v27, %v14286_v18  ;;  %v14441_v18 = vld [vmem:[#allocation37_spill] sm:$0xff]  ;;  %v4692_v40 = vmax.f32 %v14443_v61, %v14442_v54  ;;  %v14445_v47 = vld [vmem:[#allocation22_spill] sm:$0xff] }
 0x3b6   :  { %4590 = vst.msk [vmem:[#allocation4 + $0x2c] sm:$0xf] %vm2687_vm3, %v8737_v59  ;;  %v3622_v25 = vpop.permute.xlu0 %3621  ;;  %v4730_v35 = vmax.f32 %v4721_v17, 0.0  ;;  %v4701_v9 = vmax.f32 %v14441_v18, %v12147_v58  ;;  %v4699_v59 = vmax.f32 %v14444_v7, %v12116_v30  ;;  %v4704_v43 = vmax.f32 %v14445_v47, %v12167_v8  ;;  %v14453_v61 = vld [vmem:[#allocation82_spill] sm:$0xff] }
 0x3b7   :  { %v4549_v63 = vmax.f32 %v4540_v13, 0.0  ;;  %3648 = vst.msk [vmem:[#allocation4 + $0x8] sm:$0xf] %vm2887_vm4, %v3622_v25  ;;  %4479 = vrot.lane.b32.xlu1 %v14438_v16, %s9178_s21  ;;  %v8744_v55 = vpack.c.bf16 %v4551_v12, %v4551_v12  ;;  %v4732_v52 = vmax.f32 %v4723_v10, 0.0  ;;  %v14446_v13 = vld [vmem:[#allocation44_spill] sm:$0xff]  ;;  %v14447_v25 = vld [vmem:[#allocation153_spill] sm:$0xff] }
 0x3b8   :  { %v4004_v39 = vpop.permute.xlu1 %4003  ;;  %v8751_v44 = vpack.c.bf16 %v4730_v35, %v4730_v35  ;;  %v4710_v41 = vmax.f32 %v4692_v40, %v4701_v9  ;;  %v4713_v17 = vmax.f32 %v4695_v51, %v4704_v43  ;;  %v14451_v35 = vld [vmem:[#allocation52_spill] sm:$0xff]  ;;  %v14454_v40 = vld [vmem:[#allocation29_spill] sm:$0xff] }
 0x3b9   :  { %4029 = vst.msk [vmem:[#allocation4 + $0x24] sm:$0xf] %vm2887_vm4, %v4004_v39  ;;  %v8742_v32 = vpack.c.bf16 %v4549_v63, %v4549_v63  ;;  %8923 = vrot.lane.b32.xlu0 %v8922_v26, %s9178_s21  ;;  %v8753_v58 = vpack.c.bf16 %v4732_v52, %v4732_v52  ;;  %v4690_v26 = vmax.f32 %v14447_v25, %v14446_v13  ;;  %v14449_v63 = vld [vmem:[#allocation17_spill] sm:$0xff] }
 0x3ba   :  { %4597 = vst.msk [vmem:[#allocation4 + $0xd4] sm:$0xf] %vm2687_vm3, %v8744_v55  ;;  %v4002_v28 = vpop.permute.xlu0 %4001  ;;  %v4719_v19 = vadd.f32 %v4710_v41, %v10710_v49  ;;  %v4702_v55 = vmax.f32 %v14449_v63, %v12128_v23  ;;  %v4722_v54 = vadd.f32 %v4713_v17, %v10764_v5 }
 0x3bb   :  { %4028 = vst.msk [vmem:[#allocation4 + $0xc] sm:$0xf] %vm2887_vm4, %v4002_v28  ;;  %4459 = vrot.lane.b32.xlu1 %v14439_v20, %s9178_s21  ;;  %v4708_v8 = vmax.f32 %v4690_v26, %v4699_v59 }
 0x3bc   :  { %4595 = vst.msk [vmem:[#allocation4 + $0xa4] sm:$0xf] %vm2687_vm3, %v8742_v32  ;;  %v3628_v1 = vpop.permute.xlu1 %3627  ;;  %v12234_v22 = vld [vmem:[#allocation4 + $0x1c] sm:$0xff]  ;;  %v4728_v39 = vmax.f32 %v4719_v19, 0.0  ;;  %v4731_v59 = vmax.f32 %v4722_v54, 0.0  ;;  %v14455_v19 = vld [vmem:[#allocation56_spill] sm:$0xff] }
 0x3bd   :  { %3651 = vst.msk [vmem:[#allocation4 + $0x50] sm:$0xf] %vm2887_vm4, %v3628_v1  ;;  %v14450_v1 = vld [vmem:[#allocation55_spill] sm:$0xff]  ;;  %v4514_v47 = vmax.f32 %v14455_v19, %v12201_v2  ;;  %v12347_v54 = vld [vmem:[#allocation4 + $0xd8] sm:$0xff] }
 0x3be   :  { %v3626_v42 = vpop.permute.xlu0 %3625  ;;  %v12232_v21 = vld [vmem:[#allocation4 + $0x4] sm:$0xff]  ;;  %v4693_v10 = vmax.f32 %v14451_v35, %v14450_v1 }
 0x3bf   :  { %3650 = vst.msk [vmem:[#allocation4 + $0x38] sm:$0xf] %vm2887_vm4, %v3626_v42  ;;  %4477 = vrot.lane.b32.xlu1 %v14440_v57, %s9178_s21  ;;  %v8492_v24 = vcombine.low %v12232_v21, %v12234_v22  ;;  %v8493_v14 = vcombine.high %v12232_v21, %v12234_v22 }
 0x3c0   :  { %v4008_v3 = vpop.permute.xlu1 %4007  ;;  %v12255_v4 = vld [vmem:[#allocation4 + $0x20] sm:$0xff]  ;;  %v4711_v52 = vmax.f32 %v4693_v10, %v4702_v55  ;;  %v8752_v55 = vpack.c.bf16 %v4731_v59, %v4731_v59 }
 0x3c1   :  { %4031 = vst.msk [vmem:[#allocation4 + $0x54] sm:$0xf] %vm2887_vm4, %v4008_v3  ;;  %v14452_v3 = vld [vmem:[#allocation19_spill] sm:$0xff] }
 0x3c2   :  { %v4006_v33 = vpop.permute.xlu0 %4005  ;;  %v12246_v15 = vld [vmem:[#allocation4 + $0x8] sm:$0xff]  ;;  %v4700_v18 = vmax.f32 %v14452_v3, %v12104_v56  ;;  %v4720_v7 = vadd.f32 %v4711_v52, %v10700_v60 }
 0x3c3   :  { %4030 = vst.msk [vmem:[#allocation4 + $0x3c] sm:$0xf] %vm2887_vm4, %v4006_v33  ;;  %4899 = vrot.lane.b32.xlu0 %v12246_v15, %s9178_s21  ;;  %4773 = vrot.lane.b32.xlu1 %v8751_v44, %s9178_s21  ;;  %v4717_v44 = vadd.f32 %v4708_v8, %v10716_v62  ;;  %v8749_v33 = vpack.c.bf16 %v4728_v39, %v4728_v39 }
 0x3c4   :  { %v3632_v38 = vpop.permute.xlu1 %3631  ;;  %v4729_v63 = vmax.f32 %v4720_v7, 0.0  ;;  %v8533_v19 = vcombine.high %v12246_v15, %v12255_v4 }
 0x3c5   :  { %3653 = vst.msk [vmem:[#allocation4 + $0x80] sm:$0xf] %vm2887_vm4, %v3632_v38  ;;  %v4691_v38 = vmax.f32 %v14454_v40, %v14453_v61  ;;  %v8927_v61 = vpack.i.bf16 %v12347_v54, %v12347_v54 }
 0x3c6   :  { %v3630_v46 = vpop.permute.xlu0 %3629  ;;  %v12363_v59 = vld [vmem:[#allocation4 + $0x34] sm:$0xff] }
 0x3c7   :  { %3652 = vst.msk [vmem:[#allocation4 + $0x68] sm:$0xf] %vm2887_vm4, %v3630_v46  ;;  %4777 = vrot.lane.b32.xlu1 %v8753_v58, %s9178_s21  ;;  %4905 = vrot.lane.b32.xlu0 %v12255_v4, %s9178_s21  ;;  %v4709_v56 = vmax.f32 %v4691_v38, %v4700_v18 }
 0x3c8   :  { %v4012_v11 = vpop.permute.xlu1 %4011  ;;  %v12281_v32 = vld [vmem:[#allocation4 + $0x50] sm:$0xff] }
 0x3c9   :  { %4033 = vst.msk [vmem:[#allocation4 + $0x84] sm:$0xf] %vm2887_vm4, %v4012_v11  ;;  %v4726_v11 = vmax.f32 %v4717_v44, 0.0  ;;  %v4718_v2 = vadd.f32 %v4709_v56, %v10726_v34 }
 0x3ca   :  { %v4010_v29 = vpop.permute.xlu0 %4009  ;;  %v12267_v12 = vld [vmem:[#allocation4 + $0x38] sm:$0xff] }
 0x3cb   :  { %4032 = vst.msk [vmem:[#allocation4 + $0x6c] sm:$0xf] %vm2887_vm4, %v4010_v29  ;;  %5167 = vrot.lane.b32.xlu1 %v12232_v21, %s9178_s21  ;;  %4911 = vrot.lane.b32.xlu0 %v12267_v12, %s9178_s21  ;;  %v8747_v8 = vpack.c.bf16 %v4726_v11, %v4726_v11  ;;  %v4727_v18 = vmax.f32 %v4718_v2, 0.0  ;;  %v8537_v11 = vcombine.high %v12267_v12, %v12281_v32 }
 0x3cc   :  { %v3636_v30 = vpop.permute.xlu1 %3635  ;;  %v12285_v28 = vld [vmem:[#allocation4 + $0x7c] sm:$0xff] }
 0x3cd   :  { %3655 = vst.msk [vmem:[#allocation4 + $0xb0] sm:$0xf] %vm2887_vm4, %v3636_v30  ;;  %v8748_v56 = vpack.c.bf16 %v4727_v18, %v4727_v18 }
 0x3ce   :  { %v3634_v27 = vpop.permute.xlu0 %3633  ;;  %v12283_v31 = vld [vmem:[#allocation4 + $0x64] sm:$0xff] }
 0x3cf   :  { %3654 = vst.msk [vmem:[#allocation4 + $0x98] sm:$0xf] %vm2887_vm4, %v3634_v27  ;;  %5173 = vrot.lane.b32.xlu1 %v12234_v22, %s9178_s21  ;;  %4917 = vrot.lane.b32.xlu0 %v12281_v32, %s9178_s21  ;;  %v8500_v23 = vcombine.low %v12283_v31, %v12285_v28  ;;  %v8501_v42 = vcombine.high %v12283_v31, %v12285_v28 }
 0x3d0   :  { %v4016_v9 = vpop.permute.xlu1 %4015  ;;  %v4853_v29 = vld [vmem:[#allocation4 + $0x80] sm:$0xff] }
 0x3d1   :  { %4035 = vst.msk [vmem:[#allocation4 + $0xb4] sm:$0xf] %vm2887_vm4, %v4016_v9  ;;  %v8750_v9 = vpack.c.bf16 %v4729_v63, %v4729_v63 }
 0x3d2   :  { %v4014_v41 = vpop.permute.xlu0 %4013  ;;  %v4850_v58 = vld [vmem:[#allocation4 + $0x68] sm:$0xff] }
 0x3d3   :  { %4034 = vst.msk [vmem:[#allocation4 + $0x9c] sm:$0xf] %vm2887_vm4, %v4014_v41  ;;  %4769 = vrot.lane.b32.xlu1 %v8749_v33, %s9178_s21  ;;  %4923 = vrot.lane.b32.xlu0 %v4850_v58, %s9178_s21  ;;  %v8541_v33 = vcombine.high %v4850_v58, %v4853_v29  ;;  %v8540_v38 = vcombine.low %v4850_v58, %v4853_v29 }
 0x3d4   :  { %v3638_v46 = vpop.permute.xlu1 %3637  ;;  %v12314_v25 = vld [vmem:[#allocation4 + $0xac] sm:$0xff]  ;;  %v8536_v58 = vcombine.low %v12267_v12, %v12281_v32 }
 0x3d5   :  { %3656 = vst.msk [vmem:[#allocation4 + $0xc8] sm:$0xf] %vm2887_vm4, %v3638_v46 }
 0x3d6   :  { %v4486_v43 = vpop.permute.xlu0 %4485  ;;  %v12312_v13 = vld [vmem:[#allocation4 + $0x94] sm:$0xff] }
 0x3d7   :  { %v4523_v26 = vmax.f32 %v11862_v48, %v4486_v43  ;;  %5191 = vrot.lane.b32.xlu1 %v12283_v31, %s9178_s21  ;;  %4929 = vrot.lane.b32.xlu0 %v4853_v29, %s9178_s21  ;;  %v8504_v6 = vcombine.low %v12312_v13, %v12314_v25  ;;  %v8505_v51 = vcombine.high %v12312_v13, %v12314_v25 }
 0x3d8   :  { %v12325_v30 = vpop.permute.xlu1 %4897  ;;  %v12329_v27 = vld [vmem:[#allocation4 + $0xb0] sm:$0xff] }
 0x3d9   :  { %v4532_v39 = vmax.f32 %v4514_v47, %v4523_v26  ;;  %v8532_v47 = vcombine.low %v12246_v15, %v12255_v4 }
 0x3da   :  { %v4018_v48 = vpop.permute.xlu0 %4017  ;;  %v12327_v17 = vld [vmem:[#allocation4 + $0x98] sm:$0xff] }
 0x3db   :  { %v4541_v1 = vadd.f32 %v4532_v39, %v10764_v5  ;;  %4036 = vst.msk [vmem:[#allocation4 + $0xcc] sm:$0xf] %vm2887_vm4, %v4018_v48  ;;  %4765 = vrot.lane.b32.xlu1 %v8747_v8, %s9178_s21  ;;  %4775 = vrot.lane.b32.xlu0 %v8752_v55, %s9178_s21  ;;  %v8544_v35 = vcombine.low %v12327_v17, %v12329_v27  ;;  %v12341_v5 = vld [vmem:[#allocation4 + $0xc0] sm:$0xff] }
 0x3dc   :  { %v8545_v10 = vcombine.high %v12327_v17, %v12329_v27  ;;  %v12339_v3 = vpop.permute.xlu1 %4903  ;;  %v12375_v32 = vld [vmem:[#allocation4 + $0xc4] sm:$0xff] }
 0x3dd   :  { %v4550_v44 = vmax.f32 %v4541_v1, 0.0 }
 0x3de   :  { %6299 = vmatprep.subr.bf16.mxu1 %v8545_v10  ;;  %v4382_v52 = vpop.permute.xlu0 %4381 }
 0x3df   :  { %6300 = vmatpush1.bf16.msra.mxu1 %v8544_v35  ;;  %4408 = vst.msk [vmem:[#allocation4 + $0x10] sm:$0xf] %vm2887_vm4, %v4382_v52  ;;  %4945 = vrot.lane.b32.xlu1 %v12341_v5, %s9178_s21  ;;  %v8743_v40 = vpack.c.bf16 %v4550_v44, %v4550_v44 }
 0x3e0   :  { %4771 = vrot.lane.b32.xlu0 %v8750_v9, %s9178_s21  ;;  %6301 = vmatprep.subr.bf16.mxu1 %v8541_v33  ;;  %v12351_v41 = vpop.permute.xlu1 %4909 }
 0x3e1   :  { %4596 = vst.msk [vmem:[#allocation4 + $0xbc] sm:$0xf] %vm2687_vm3, %v8743_v40 }
 0x3e2   :  { %v4764_v46 = vpop.permute.xlu0 %4763  ;;  %v12383_v29 = vld [vmem:[#allocation4 + $0xc8] sm:$0xff] }
 0x3e3   :  { %6302 = vmatpush1.bf16.msra.mxu1 %v8540_v38  ;;  %4789 = vst.msk [vmem:[#allocation4 + $0x2c] sm:$0xf] %vm2887_vm4, %v4764_v46  ;;  %8928 = vrot.lane.b32.xlu1 %v8927_v61, %s9178_s21 }
 0x3e4   :  { %4767 = vrot.lane.b32.xlu0 %v8748_v56, %s9178_s21  ;;  %6303 = vmatprep.subr.bf16.mxu1 %v8537_v11  ;;  %v12361_v7 = vpop.permute.xlu1 %4915 }
 0x3e6   :  { %v5108_v26 = vld [vmem:[#allocation4 + $0xc] sm:$0xff] }
 0x3e7   :  { %6304 = vmatpush1.bf16.msra.mxu1 %v8536_v58  ;;  %5197 = vrot.lane.b32.xlu1 %v12285_v28, %s9178_s21 }
 0x3e8   :  { %5179 = vrot.lane.b32.xlu0 %v12363_v59, %s9178_s21  ;;  %6305 = vmatprep.subr.bf16.mxu1 %v8533_v19  ;;  %v12373_v12 = vpop.permute.xlu1 %4921 }
 0x3eb   :  { %6306 = vmatpush1.bf16.msra.mxu1 %v8532_v47  ;;  %5203 = vrot.lane.b32.xlu1 %v12312_v13, %s9178_s21  ;;  %v12407_v47 = vld [vmem:[#allocation4 + $0x4c] sm:$0xff] }
 0x3ec   :  { %5215 = vrot.lane.b32.xlu0 %v12375_v32, %s9178_s21  ;;  %v12381_v43 = vpop.permute.xlu1 %4927 }
 0x3ef   :  { %5209 = vrot.lane.b32.xlu1 %v12314_v25, %s9178_s21 }
 0x3f0   :  { %4947 = vrot.lane.b32.xlu0 %v12383_v29, %s9178_s21  ;;  %v4762_v15 = vpop.permute.xlu1 %4761 }
 0x3f1   :  { %4788 = vst.msk [vmem:[#allocation4 + $0x14] sm:$0xf] %vm2887_vm4, %v4762_v15  ;;  %v4388_v4 = vpop.permute.xlu0 %4387 }
 0x3f2   :  { %4411 = vst.msk [vmem:[#allocation4 + $0x58] sm:$0xf] %vm2887_vm4, %v4388_v4 }
 0x3f4   :  { %5169 = vrot.lane.b32.xlu0 %v5108_v26, %s9178_s21  ;;  %v4384_v2 = vpop.permute.xlu1 %4383 }
 0x3f5   :  { %4409 = vst.msk [vmem:[#allocation4 + $0x28] sm:$0xf] %vm2887_vm4, %v4384_v2 }
 0x3f8   :  { %v4386_v8 = vpop.permute.xlu1 %4385 }
 0x3f9   :  { %4410 = vst.msk [vmem:[#allocation4 + $0x40] sm:$0xf] %vm2887_vm4, %v4386_v8 }
 0x3fc   :  { %v5111_v63 = vld [vmem:[#allocation4 + $0x24] sm:$0xff] }
 0x3fd   :  { %5175 = vrot.lane.b32.xlu0 %v5111_v63, %s9178_s21  ;;  %v4392_v55 = vpop.permute.xlu1 %4391 }
 0x3fe   :  { %4413 = vst.msk [vmem:[#allocation4 + $0x88] sm:$0xf] %vm2887_vm4, %v4392_v55  ;;  %v12417_v55 = vld [vmem:[#allocation4 + $0x90] sm:$0xff] }
 0x405   :  { %v5123_v35 = vld [vmem:[#allocation4 + $0x84] sm:$0xff] }
 0x40b   :  { %v4390_v39 = vpop.permute.xlu0 %4389 }
 0x40c   :  { %4412 = vst.msk [vmem:[#allocation4 + $0x70] sm:$0xf] %vm2887_vm4, %v4390_v39  ;;  %v5114_v39 = vld [vmem:[#allocation4 + $0x3c] sm:$0xff] }
 0x413   :  { %v5120_v48 = vld [vmem:[#allocation4 + $0x6c] sm:$0xff] }
 0x414   :  { %5193 = vrot.lane.b32.xlu0 %v5120_v48, %s9178_s21 }
 0x415   :  { %v4396_v1 = vpop.permute.xlu1 %4395 }
 0x416   :  { %4415 = vst.msk [vmem:[#allocation4 + $0xb8] sm:$0xf] %vm2887_vm4, %v4396_v1 }
 0x417   :  { %v4394_v10 = vpop.permute.xlu0 %4393 }
 0x418   :  { %5199 = vrot.lane.b32.xlu0 %v5123_v35, %s9178_s21  ;;  %4414 = vst.msk [vmem:[#allocation4 + $0xa0] sm:$0xf] %vm2887_vm4, %v4394_v10  ;;  %v12426_v35 = vld [vmem:[#allocation4 + $0xa8] sm:$0xff] }
 0x41b   :  { %v4464_v18 = vpop.permute.xlu0 %4463 }
 0x41c   :  { %v4512_v52 = vmax.f32 %v14425_v0, %v4464_v18 }
 0x41d   :  { %v5129_v56 = vld [vmem:[#allocation4 + $0xb4] sm:$0xff] }
 0x41f   :  { %v4482_v9 = vpop.permute.xlu0 %4481  ;;  %v5126_v44 = vld [vmem:[#allocation4 + $0x9c] sm:$0xff] }
 0x420   :  { %v4521_v33 = vmax.f32 %v14426_v37, %v4482_v9  ;;  %5205 = vrot.lane.b32.xlu0 %v5126_v44, %s9178_s21 }
 0x421   :  { %v4398_v61 = vpop.permute.xlu1 %4397 }
 0x422   :  { %4416 = vst.msk [vmem:[#allocation4 + $0xd0] sm:$0xf] %vm2887_vm4, %v4398_v61  ;;  %v4530_v40 = vmax.f32 %v4512_v52, %v4521_v33  ;;  %v4851_v33 = vld [vmem:[#allocation4 + $0x70] sm:$0xf] }
 0x423   :  { %v4458_v38 = vpop.permute.xlu0 %4457 }
 0x424   :  { %v4539_v46 = vadd.f32 %v4530_v40, %v10700_v60  ;;  %5211 = vrot.lane.b32.xlu0 %v5129_v56, %s9178_s21  ;;  %v4509_v0 = vmax.f32 %v14432_v50, %v4458_v38  ;;  %v4845_v38 = vld [vmem:[#allocation4 + $0x40] sm:$0xf]  ;;  %v9044_v56 = vld [vmem:[%s13727_s3 + $0xc] ss:$16 sps:$4 sm:$0xff]  }
 0x425   :  { %v4462_v11 = vpop.permute.xlu1 %4461  ;;  %8552 = vmatprep.mubr.msk.bf16.mxu1 %vm6161_vm5, %v9044_v56 }
 0x426   :  { %v4548_v58 = vmax.f32 %v4539_v46, 0.0  ;;  %v4511_v2 = vmax.f32 %v14434_v53, %v4462_v11 }
 0x427   :  { %v4476_v19 = vpop.permute.xlu0 %4475 }
 0x428   :  { %v4518_v37 = vmax.f32 %v14436_v36, %v4476_v19  ;;  %5185 = vrot.lane.b32.xlu0 %v12407_v47, %s9178_s21  ;;  %v8741_v26 = vpack.c.bf16 %v4548_v58, %v4548_v58 }
 0x429   :  { %v4480_v15 = vpop.permute.xlu1 %4479  ;;  %v5132_v4 = vld [vmem:[#allocation4 + $0xcc] sm:$0xff] }
 0x42a   :  { %v4520_v60 = vmax.f32 %v14438_v16, %v4480_v15  ;;  %5217 = vrot.lane.b32.xlu1 %v5132_v4, %s9178_s21  ;;  %v4527_v8 = vmax.f32 %v4509_v0, %v4518_v37  ;;  %4594 = vst.msk [vmem:[#allocation4 + $0x8c] sm:$0xf] %vm2687_vm3, %v8741_v26  ;;  %v4854_v37 = vld [vmem:[#allocation4 + $0x88] sm:$0xf]  ;;  %v5109_v15 = vld [vmem:[#allocation4 + $0x14] sm:$0xf] }
 0x42b   :  { %v12424_v16 = vpop.permute.xlu0 %8923 }
 0x42c   :  { %v4529_v63 = vmax.f32 %v4511_v2, %v4520_v60  ;;  %v4536_v50 = vadd.f32 %v4527_v8, %v10716_v62  ;;  %4933 = vrot.lane.b32.xlu0 %v12417_v55, %s9178_s21  ;;  %v5117_v62 = vld [vmem:[#allocation4 + $0x54] sm:$0xff] }
 0x42d   :  { %v4460_v36 = vpop.permute.xlu1 %4459 }
 0x42e   :  { %v4538_v48 = vadd.f32 %v4529_v63, %v10710_v49  ;;  %5181 = vrot.lane.b32.xlu1 %v5114_v39, %s9178_s21  ;;  %v4545_v53 = vmax.f32 %v4536_v50, 0.0  ;;  %v4510_v9 = vmax.f32 %v14439_v20, %v4460_v36  ;;  %v9041_v20 = vld [vmem:[%s13727_s3 + $0x4] ss:$16 sps:$4 sm:$0xff]   ;;  %v4842_v63 = vld [vmem:[#allocation4 + $0x28] sm:$0xf]  ;;  %v4966_v39 = vrot.slane %v12361_v7, 4 }
 0x42f   :  { %6218 = vmatprep.mubr.bf16.mxu0 %v9041_v20  ;;  %v5136_v20 = vld [vmem:[#allocation4 + $0xec] sm:$0xf] }
 0x430   :  { %v4547_v1 = vmax.f32 %v4538_v48, 0.0  ;;  %4939 = vrot.lane.b32.xlu0 %v12426_v35, %s9178_s21  ;;  %v8738_v18 = vpack.c.bf16 %v4545_v53, %v4545_v53  ;;  %v4969_v48 = vrot.slane %v12373_v12, 4 }
 0x431   :  { %v4478_v10 = vpop.permute.xlu1 %4477 }
 0x432   :  { %v4519_v44 = vmax.f32 %v14440_v57, %v4478_v10  ;;  %5187 = vrot.lane.b32.xlu1 %v5117_v62, %s9178_s21  ;;  %v8740_v49 = vpack.c.bf16 %v4547_v1, %v4547_v1  ;;  %4591 = vst.msk [vmem:[#allocation4 + $0x44] sm:$0xf] %vm2687_vm3, %v8738_v18  ;;  %v4963_v10 = vrot.slane %v12351_v41, 4  ;;  %v4972_v62 = vrot.slane %v12381_v43, 4 }
 0x434   :  { %v4528_v52 = vmax.f32 %v4510_v9, %v4519_v44  ;;  %4593 = vst.msk [vmem:[#allocation4 + $0x74] sm:$0xf] %vm2687_vm3, %v8740_v49  ;;  %4925 = vrot.lane.b32.xlu0 %v4851_v33, %s9178_s21  ;;  %v5112_v44 = vld [vmem:[#allocation4 + $0x2c] sm:$0xf] }
 0x435   :  { %v12436_v61 = vpop.permute.xlu0 %4899  ;;  %v4774_v40 = vpop.permute.xlu1 %4773 }
 0x436   :  { %v4537_v57 = vadd.f32 %v4528_v52, %v10726_v34  ;;  %4794 = vst.msk [vmem:[#allocation4 + $0xa4] sm:$0xf] %vm2887_vm4, %v4774_v40  ;;  %4935 = vrot.lane.b32.xlu1 %v12327_v17, %s9178_s21  ;;  %v4839_v34 = vld [vmem:[#allocation4 + $0x10] sm:$0xf] }
 0x438   :  { %v4546_v46 = vmax.f32 %v4537_v57, 0.0  ;;  %4913 = vrot.lane.b32.xlu0 %v4845_v38, %s9178_s21  ;;  %v4960_v57 = vrot.slane %v12339_v3, 4  ;;  %v4958_v38 = vrot.slane %v12436_v61, 4 }
 0x439   :  { %v12449_v11 = vpop.permute.xlu0 %4905  ;;  %v4778_v58 = vpop.permute.xlu1 %4777 }
 0x43a   :  { %4796 = vst.msk [vmem:[#allocation4 + $0xd4] sm:$0xf] %vm2887_vm4, %v4778_v58  ;;  %4941 = vrot.lane.b32.xlu1 %v12329_v27, %s9178_s21  ;;  %v8739_v17 = vpack.c.bf16 %v4546_v46, %v4546_v46  ;;  %v4848_v27 = vld [vmem:[#allocation4 + $0x58] sm:$0xf]  ;;  %v4961_v49 = vrot.slane %v12449_v11, 4 }
 0x43c   :  { %4592 = vst.msk [vmem:[#allocation4 + $0x5c] sm:$0xf] %vm2687_vm3, %v8739_v17  ;;  %4901 = vrot.lane.b32.xlu0 %v4839_v34, %s9178_s21 }
 0x43d   :  { %v12457_v19 = vpop.permute.xlu0 %4911  ;;  %v12459_v0 = vpop.permute.xlu1 %5167  ;;  %v5127_v2 = vld [vmem:[#allocation4 + $0xa4] sm:$0xf] }
 0x43e   :  { %4931 = vrot.lane.b32.xlu1 %v4854_v37, %s9178_s21  ;;  %v4964_v53 = vrot.slane %v12457_v19, 4 }
 0x440   :  { %5171 = vrot.lane.b32.xlu0 %v5109_v15, %s9178_s21  ;;  %v4995_v46 = vsel %vm227_vm1, %v4963_v10, %v4964_v53 }
 0x441   :  { %v12463_v4 = vpop.permute.xlu0 %4917  ;;  %v12465_v26 = vpop.permute.xlu1 %5173  ;;  %v5133_v1 = vld [vmem:[#allocation4 + $0xd4] sm:$0xf] }
 0x442   :  { %4919 = vrot.lane.b32.xlu1 %v4848_v27, %s9178_s21  ;;  %v4967_v50 = vrot.slane %v12463_v4, 4 }
 0x444   :  { %5207 = vrot.lane.b32.xlu0 %v5127_v2, %s9178_s21  ;;  %v4999_v40 = vsel %vm227_vm1, %v4966_v39, %v4967_v50  ;;  %v4957_v2 = vrot.slane %v12325_v30, 4 }
 0x445   :  { %v12469_v60 = vpop.permute.xlu0 %4923  ;;  %v4770_v8 = vpop.permute.xlu1 %4769  ;;  %v5000_v27 = vsel %vm229_vm2, %v12361_v7, %v4999_v40 }
 0x446   :  { %v4970_v36 = vrot.slane %v12469_v60, 4  ;;  %4792 = vst.msk [vmem:[#allocation4 + $0x74] sm:$0xf] %vm2887_vm4, %v4770_v8  ;;  %4907 = vrot.lane.b32.xlu1 %v4842_v63, %s9178_s21  ;;  %v4987_v39 = vsel %vm227_vm1, %v4957_v2, %v4958_v38 }
 0x448   :  { %5219 = vrot.lane.b32.xlu0 %v5133_v1, %s9178_s21  ;;  %v5003_v33 = vsel %vm227_vm1, %v4969_v48, %v4970_v36 }
 0x449   :  { %v12481_v18 = vpop.permute.xlu0 %4929  ;;  %v12483_v9 = vpop.permute.xlu1 %5191  ;;  %v5004_v37 = vsel %vm229_vm2, %v12373_v12, %v5003_v33  ;;  %v4991_v12 = vsel %vm227_vm1, %v4960_v57, %v4961_v49 }
 0x44a   :  { %v4973_v52 = vrot.slane %v12481_v18, 4  ;;  %5177 = vrot.lane.b32.xlu1 %v5112_v44, %s9178_s21  ;;  %v4992_v1 = vsel %vm229_vm2, %v12339_v3, %v4991_v12  ;;  %v8469_v3 = vcombine.high %v12341_v5, %v12347_v54  ;;  %v9032_v12 = vld [vmem:[#allocation4 + $0x34] ss:$24 sps:$4 sm:$0xff]  }
 0x44c   :  { %v5007_v56 = vsel %vm227_vm1, %v4972_v62, %v4973_v52  ;;  %v4988_v62 = vsel %vm229_vm2, %v12325_v30, %v4987_v39  ;;  %v9035_v39 = vld [vmem:[#allocation4 + $0x4] ss:$24 sps:$4 sm:$0xff]  }
 0x44d   :  { %v4776_v58 = vpop.permute.xlu0 %4775  ;;  %v4766_v34 = vpop.permute.xlu1 %4765  ;;  %v5121_v17 = vld [vmem:[#allocation4 + $0x74] sm:$0xf]  ;;  %v5008_v15 = vsel %vm229_vm2, %v12381_v43, %v5007_v56  ;;  %v4996_v43 = vsel %vm229_vm2, %v12351_v41, %v4995_v46  ;;  %v8473_v44 = vcombine.high %v4988_v62, %v4992_v1  ;;  %v4863_v56 = vld [vmem:[#allocation4 + $0xd0] sm:$0xf]  ;;  %v8468_v46 = vcombine.low %v12341_v5, %v12347_v54 }
 0x44e   :  { %4795 = vst.msk [vmem:[#allocation4 + $0xbc] sm:$0xf] %vm2887_vm4, %v4776_v58  ;;  %4790 = vst.msk [vmem:[#allocation4 + $0x44] sm:$0xf] %vm2887_vm4, %v4766_v34  ;;  %5225 = vrot.lane.b32.xlu1 %v5136_v20, %s9178_s21  ;;  %5195 = vrot.lane.b32.xlu0 %v5121_v17, %s9178_s21  ;;  %v8480_v8 = vcombine.low %v5004_v37, %v5008_v15  ;;  %v8481_v63 = vcombine.high %v5004_v37, %v5008_v15  ;;  %v4866_v58 = vld [vmem:[#allocation4 + $0xe8] sm:$0xf] }
 0x44f   :  { %v8477_v7 = vcombine.high %v4996_v43, %v5000_v27  ;;  %v8476_v10 = vcombine.low %v4996_v43, %v5000_v27  ;;  %v8472_v20 = vcombine.low %v4988_v62, %v4992_v1  ;;  %v8465_v34 = vcombine.high %v12417_v55, %v12426_v35  ;;  %v4857_v37 = vld [vmem:[#allocation4 + $0xa0] sm:$0xf]  ;;  %v9029_v27 = vld [vmem:[#allocation4 + $0x64] ss:$24 sps:$4 sm:$0xff]   ;;  %v6708_v5 = vld [vmem:[%s13728_s4 + $0x30] sm:$0xff] }
 0x450   :  { %6186 = vmatprep.subr.bf16.mxu0 %v8481_v63  ;;  %v8464_v15 = vcombine.low %v12417_v55, %v12426_v35  ;;  %v9027_v63 = vld [vmem:[#allocation4 + $0x60] ss:$24 sps:$4 sm:$0xff]   ;;  %v9030_v43 = vld [vmem:[#allocation4 + $0x30] ss:$24 sps:$4 sm:$0xff]  }
 0x451   :  { %6187 = vmatpush1.bf16.msra.mxu0 %v8480_v8  ;;  %v6706_v55 = vld [vmem:[%s13728_s4 + $0x20] sm:$0xff]  ;;  %v4860_v35 = vld [vmem:[#allocation4 + $0xb8] sm:$0xf]  ;;  %v6707_v62 = vld [vmem:[%s13728_s4 + $0x28] sm:$0xff] }
 0x452   :  { %v4772_v48 = vpop.permute.xlu0 %4771  ;;  %6188 = vmatprep.subr.bf16.mxu0 %v8477_v7  ;;  %v6709_v7 = vld [vmem:[%s13728_s4 + $0x38] sm:$0xff] }
 0x453   :  { %4793 = vst.msk [vmem:[#allocation4 + $0x8c] sm:$0xf] %vm2887_vm4, %v4772_v48  ;;  %v6704_v48 = vld [vmem:[%s13728_s4 + $0x10] sm:$0xff] }
 0x455   :  { %6189 = vmatpush1.bf16.msra.mxu0 %v8476_v10  ;;  %v5130_v33 = vld [vmem:[#allocation4 + $0xbc] sm:$0xf]  ;;  %v5115_v40 = vld [vmem:[#allocation4 + $0x44] sm:$0xf]  ;;  %v9033_v10 = vld [vmem:[#allocation4] ss:$24 sps:$4 sm:$0xff]  }
 0x456   :  { %v4768_v41 = vpop.permute.xlu0 %4767  ;;  %6190 = vmatprep.subr.bf16.mxu0 %v8473_v44  ;;  %5213 = vrot.lane.b32.xlu1 %v5130_v33, %s9178_s21  ;;  %v5227_v33 = vrot.slane %v12459_v0, 4 }
 0x457   :  { %4791 = vst.msk [vmem:[#allocation4 + $0x5c] sm:$0xf] %vm2887_vm4, %v4768_v41  ;;  %5183 = vrot.lane.b32.xlu0 %v5115_v40, %s9178_s21  ;;  %v6702_v41 = vld [vmem:[%s13728_s4] sm:$0xff] }
 0x459   :  { %6191 = vmatpush1.bf16.msra.mxu0 %v8472_v20  ;;  %v6705_v20 = vld [vmem:[%s13728_s4 + $0x18] sm:$0xff] }
 0x45a   :  { %v12531_v57 = vpop.permute.xlu0 %5179  ;;  %v5124_v30 = vld [vmem:[#allocation4 + $0x8c] sm:$0xf]  ;;  %6192 = vmatprep.subr.bf16.mxu0 %v8469_v3  ;;  %v5230_v3 = vrot.slane %v12465_v26, 4 }
 0x45b   :  { %5201 = vrot.lane.b32.xlu1 %v5124_v30, %s9178_s21  ;;  %4949 = vrot.lane.b32.xlu0 %v4863_v56, %s9178_s21 }
 0x45d   :  { %6193 = vmatpush1.bf16.msra.mxu0 %v8468_v46 }
 0x45e   :  { %v12539_v17 = vpop.permute.xlu0 %5215  ;;  %6194 = vmatprep.subr.bf16.mxu0 %v8465_v34  ;;  %v5118_v2 = vld [vmem:[#allocation4 + $0x5c] sm:$0xf] }
 0x45f   :  { %4955 = vrot.lane.b32.xlu1 %v4866_v58, %s9178_s21  ;;  %4937 = vrot.lane.b32.xlu0 %v4857_v37, %s9178_s21  ;;  %v6703_v58 = vld [vmem:[%s13728_s4 + $0x8] sm:$0xff] }
 0x461   :  { %6195 = vmatpush1.bf16.msra.mxu0 %v8464_v15 }
 0x462   :  { %6196 = vmatprep.subr.bf16.mxu0 %v9029_v27  ;;  %v12549_v8 = vpop.permute.xlu0 %4947 }
 0x463   :  { %5189 = vrot.lane.b32.xlu1 %v5118_v2, %s9178_s21  ;;  %6742 = vperm.xlu0 %8920, %v6708_v5   ;;  %v4946_v5 = vpop.permute.xlu1 %4945  ;;  %v8509_v2 = vcombine.high %v12375_v32, %v12208_v45 }
 0x465   :  { %6197 = vmatpush1.bf16.msra.mxu0 %v9027_v63  ;;  %v8508_v63 = vcombine.low %v12375_v32, %v12208_v45  ;;  %v4982_v32 = vrot.slane %v12549_v8, 4 }
 0x466   :  { %6198 = vmatprep.subr.bf16.mxu0 %v9032_v12  ;;  %v12561_v1 = vpop.permute.xlu0 %5169 }
 0x467   :  { %4943 = vrot.lane.b32.xlu1 %v4860_v35, %s9178_s21  ;;  %6732 = vperm.xlu0 %8920, %v6706_v55   ;;  %v5228_v44 = vrot.slane %v12561_v1, 4  ;;  %v12595_v12 = vpop.permute.xlu1 %8928  ;;  %v4981_v35 = vrot.slane %v4946_v5, 4 }
 0x469   :  { %6199 = vmatpush1.bf16.msra.mxu0 %v9030_v43  ;;  %v5257_v56 = vsel %vm227_vm1, %v5227_v33, %v5228_v44  ;;  %v8497_v43 = vcombine.high %v12363_v59, %v12407_v47  ;;  %v5019_v13 = vsel %vm227_vm1, %v4981_v35, %v4982_v32 }
 0x46a   :  { %6200 = vmatprep.subr.bf16.mxu0 %v9035_v39  ;;  %v5258_v34 = vsel %vm229_vm2, %v12459_v0, %v5257_v56  ;;  %v8931_v0 = vunpack.i.h.bf16 %v12595_v12 }
 0x46b   :  { %6747 = vperm.xlu1 %8921, %v6709_v7   ;;  %6722 = vperm.xlu0 %8920, %v6704_v48   ;;  %v8926_v48 = vunpack.i.h.bf16 %v12424_v16 }
 0x46c   :  { %v12607_v55 = vrot.slane %v8931_v0, 4 }
 0x46d   :  { %6201 = vmatpush1.bf16.msra.mxu0 %v9033_v10 }
 0x46f   :  { %6737 = vperm.xlu1 %8921, %v6707_v62   ;;  %6712 = vperm.xlu0 %8920, %v6702_v41   ;;  %v12571_v40 = vpop.permute.xlu0 %5175  ;;  %v12645_v62 = vrot.slane %v8926_v48, 4 }
 0x470   :  { %v5231_v30 = vrot.slane %v12571_v40, 4 }
 0x472   :  { %v5261_v46 = vsel %vm227_vm1, %v5230_v3, %v5231_v30  ;;  %v5251_v3 = vrot.slane %v12539_v17, 4 }
 0x473   :  { %6727 = vperm.xlu1 %8921, %v6705_v20   ;;  %v5262_v37 = vsel %vm229_vm2, %v12465_v26, %v5261_v46  ;;  %v8930_v26 = vunpack.i.l.bf16 %v12595_v12  ;;  %v9176_v12 = vld [vmem:[%s13727_s3 + $0x4] ss:$16 sps:$4 sm:$0xff]  }
 0x474   :  { %v8512_v15 = vcombine.low %v5258_v34, %v5262_v37  ;;  %v8513_v27 = vcombine.high %v5258_v34, %v5262_v37 }
 0x475   :  { %v4984_v45 = vrot.slane %v8930_v26, 4 }
 0x476   :  { %6202 = vmatprep.subr.bf16.mxu0 %v8513_v27 }
 0x477   :  { %6717 = vperm.xlu1 %8921, %v6703_v58   ;;  %6203 = vmatpush2.bf16.msra.mxu0 %v8512_v15  ;;  %v5023_v25 = vsel %vm227_vm1, %v4984_v45, %v12607_v55 }
 0x478   :  { %6204 = vmatprep.subr.bf16.mxu0 %v8509_v2 }
 0x47b   :  { %6205 = vmatpush2.bf16.msra.mxu0 %v8508_v63 }
 0x47c   :  { %6206 = vmatprep.subr.bf16.mxu0 %v8505_v51  ;;  %v5024_v51 = vsel %vm229_vm2, %v8930_v26, %v5023_v25  ;;  %v5239_v25 = vrot.slane %v12483_v9, 4 }
 0x47f   :  { %6207 = vmatpush2.bf16.msra.mxu0 %v8504_v6  ;;  %v8496_v6 = vcombine.low %v12363_v59, %v12407_v47 }
 0x480   :  { %6208 = vmatprep.subr.bf16.mxu0 %v8501_v42  ;;  %v5020_v42 = vsel %vm229_vm2, %v4946_v5, %v5019_v13 }
 0x481   :  { %v8489_v28 = vcombine.high %v5020_v42, %v5024_v51  ;;  %v8488_v7 = vcombine.low %v5020_v42, %v5024_v51 }
 0x483   :  { %6209 = vmatpush2.bf16.msra.mxu0 %v8500_v23  ;;  %v5198_v23 = vpop.permute.xlu1 %5197 }
 0x484   :  { %6210 = vmatprep.subr.bf16.mxu0 %v8497_v43  ;;  %v5242_v27 = vrot.slane %v5198_v23, 4 }
 0x486   :  { %v12630_v31 = vpop.permute.xlu0 %5193 }
 0x487   :  { %6211 = vmatpush2.bf16.msra.mxu0 %v8496_v6  ;;  %v5204_v47 = vpop.permute.xlu1 %5203  ;;  %v5240_v5 = vrot.slane %v12630_v31, 4 }
 0x488   :  { %6212 = vmatprep.subr.bf16.mxu0 %v8493_v14  ;;  %v8925_v14 = vunpack.i.l.bf16 %v12424_v16  ;;  %v5245_v58 = vrot.slane %v5204_v47, 4  ;;  %v9060_v16 = vld [vmem:[#allocation4 + $0x98] ss:$24 sps:$4 sm:$0xff]  }
 0x48a   :  { %v12635_v59 = vpop.permute.xlu0 %5199  ;;  %v5254_v21 = vrot.slane %v8925_v14, 4 }
 0x48b   :  { %6213 = vmatpush2.bf16.msra.mxu0 %v8492_v24  ;;  %v5210_v22 = vpop.permute.xlu1 %5209  ;;  %v5243_v34 = vrot.slane %v12635_v59, 4 }
 0x48c   :  { %6214 = vmatprep.subr.bf16.mxu0 %v8489_v28  ;;  %v5248_v41 = vrot.slane %v5210_v22, 4  ;;  %v5293_v46 = vsel %vm227_vm1, %v5254_v21, %v12645_v62 }
 0x48d   :  { %v5294_v43 = vsel %vm229_vm2, %v8925_v14, %v5293_v46  ;;  %v5277_v51 = vsel %vm227_vm1, %v5242_v27, %v5243_v34 }
 0x48f   :  { %6215 = vmatpush2.bf16.msra.mxu0 %v8488_v7 }
 0x492   :  { %v12637_v39 = vpop.permute.xlu0 %5205 }
 0x493   :  { %v5246_v33 = vrot.slane %v12637_v39, 4 }
 0x495   :  { %v5281_v26 = vsel %vm227_vm1, %v5245_v58, %v5246_v33 }
 0x496   :  { %v12641_v10 = vpop.permute.xlu0 %5211  ;;  %v5282_v28 = vsel %vm229_vm2, %v5204_v47, %v5281_v26 }
 0x497   :  { %v5249_v24 = vrot.slane %v12641_v10, 4 }
 0x499   :  { %v5285_v15 = vsel %vm227_vm1, %v5248_v41, %v5249_v24 }
 0x49a   :  { %v5186_v20 = vpop.permute.xlu0 %5185  ;;  %v5286_v13 = vsel %vm229_vm2, %v5210_v22, %v5285_v15  ;;  %v5278_v22 = vsel %vm229_vm2, %v5198_v23, %v5277_v51 }
 0x49b   :  { %v8525_v41 = vcombine.high %v5282_v28, %v5286_v13  ;;  %v5236_v46 = vrot.slane %v5186_v20, 4  ;;  %v8524_v47 = vcombine.low %v5282_v28, %v5286_v13 }
 0x49c   :  { %v12650_v56 = vpop.permute.xlu1 %5217 }
 0x49d   :  { %v5252_v37 = vrot.slane %v12650_v56, 4 }
 0x49e   :  { %v4934_v2 = vpop.permute.xlu0 %4933 }
 0x49f   :  { %v5289_v63 = vsel %vm227_vm1, %v5251_v3, %v5252_v37  ;;  %v5233_v3 = vrot.slane %v12531_v57, 4 }
 0x4a0   :  { %v12666_v45 = vpop.permute.xlu1 %5181  ;;  %v5290_v35 = vsel %vm229_vm2, %v12539_v17, %v5289_v63  ;;  %v5273_v17 = vsel %vm227_vm1, %v5239_v25, %v5240_v5 }
 0x4a1   :  { %v8528_v6 = vcombine.low %v5290_v35, %v5294_v43  ;;  %v8529_v42 = vcombine.high %v5290_v35, %v5294_v43  ;;  %v5234_v7 = vrot.slane %v12666_v45, 4  ;;  %v5274_v15 = vsel %vm229_vm2, %v12483_v9, %v5273_v17 }
 0x4a2   :  { %v4940_v21 = vpop.permute.xlu0 %4939  ;;  %v8521_v63 = vcombine.high %v5274_v15, %v5278_v22  ;;  %v8520_v25 = vcombine.low %v5274_v15, %v5278_v22 }
 0x4a3   :  { %6307 = vmatprep.subr.bf16.mxu1 %v8529_v42  ;;  %v5265_v26 = vsel %vm227_vm1, %v5233_v3, %v5234_v7 }
 0x4a4   :  { %6308 = vmatpush1.bf16.msra.mxu1 %v8528_v6  ;;  %v12681_v14 = vpop.permute.xlu1 %5187  ;;  %v5266_v9 = vsel %vm229_vm2, %v12531_v57, %v5265_v26  ;;  %v4975_v6 = vrot.slane %v4934_v2, 4  ;;  %v12708_v57 = vcombine.high %v12383_v29, %v12347_v54 }
 0x4a5   :  { %v5237_v58 = vrot.slane %v12681_v14, 4  ;;  %6309 = vmatprep.subr.bf16.mxu1 %v8525_v41  ;;  %v4978_v41 = vrot.slane %v4940_v21, 4 }
 0x4a6   :  { %v4926_v27 = vpop.permute.xlu0 %4925 }
 0x4a7   :  { %v5269_v23 = vsel %vm227_vm1, %v5236_v46, %v5237_v58  ;;  %v4971_v17 = vrot.slane %v4926_v27, 4 }
 0x4a8   :  { %6310 = vmatpush1.bf16.msra.mxu1 %v8524_v47  ;;  %v12694_v35 = vpop.permute.xlu1 %4935  ;;  %v5270_v43 = vsel %vm229_vm2, %v5186_v20, %v5269_v23 }
 0x4a9   :  { %v4976_v13 = vrot.slane %v12694_v35, 4  ;;  %6311 = vmatprep.subr.bf16.mxu1 %v8521_v63  ;;  %v8517_v51 = vcombine.high %v5266_v9, %v5270_v43  ;;  %v8516_v46 = vcombine.low %v5266_v9, %v5270_v43  ;;  %v5005_v23 = vsel %vm227_vm1, %v4970_v36, %v4971_v17  ;;  %v12731_v36 = vld [vmem:[%s13727_s3] ss:$16 sps:$4 sm:$0xff]  }
 0x4aa   :  { %v4914_v42 = vpop.permute.xlu0 %4913 }
 0x4ab   :  { %v5011_v20 = vsel %vm227_vm1, %v4975_v6, %v4976_v13  ;;  %v4965_v15 = vrot.slane %v4914_v42, 4  ;;  %v12721_v6 = vcombine.low %v12383_v29, %v12347_v54 }
 0x4ac   :  { %6312 = vmatpush1.bf16.msra.mxu1 %v8520_v25  ;;  %v12700_v28 = vpop.permute.xlu1 %4941  ;;  %v5012_v63 = vsel %vm229_vm2, %v4934_v2, %v5011_v20 }
 0x4ad   :  { %v4979_v3 = vrot.slane %v12700_v28, 4  ;;  %6313 = vmatprep.subr.bf16.mxu1 %v8517_v51  ;;  %v12736_v51 = vld [vmem:[%s13727_s3 + $0x8] ss:$16 sps:$4 sm:$0xff]   ;;  %v4997_v54 = vsel %vm227_vm1, %v4964_v53, %v4965_v15  ;;  %v12749_v53 = vld [vmem:[%s13727_s3 + $0x24] ss:$16 sps:$4 sm:$0xff]  }
 0x4ae   :  { %v4902_v22 = vpop.permute.xlu0 %4901  ;;  %v12754_v15 = vld [vmem:[%s13727_s3 + $0x2c] ss:$16 sps:$4 sm:$0xff]  }
 0x4af   :  { %v5015_v47 = vsel %vm227_vm1, %v4978_v41, %v4979_v3  ;;  %v4959_v17 = vrot.slane %v4902_v22, 4  ;;  %v9047_v22 = vld [vmem:[#allocation4 + $0x74] ss:$24 sps:$4 sm:$0xff]  }
 0x4b0   :  { %6314 = vmatpush1.bf16.msra.mxu1 %v8516_v46  ;;  %v4932_v27 = vpop.permute.xlu1 %4931  ;;  %v5016_v26 = vsel %vm229_vm2, %v4940_v21, %v5015_v47  ;;  %v9038_v21 = vld [vmem:[#allocation4 + $0xa4] ss:$24 sps:$4 sm:$0xff]  }
 0x4b1   :  { %v4974_v43 = vrot.slane %v4932_v27, 4  ;;  %6329 = vmatprep.subr.bf16.mxu1 %v12708_v57  ;;  %v8484_v25 = vcombine.low %v5012_v63, %v5016_v26  ;;  %v8485_v9 = vcombine.high %v5012_v63, %v5016_v26  ;;  %v9036_v27 = vld [vmem:[#allocation4 + $0xa0] ss:$24 sps:$4 sm:$0xff]   ;;  %v4998_v26 = vsel %vm229_vm2, %v12457_v19, %v4997_v54 }
 0x4b2   :  { %v12726_v2 = vpop.permute.xlu0 %5171  ;;  %v12784_v54 = vld [vmem:[%s13727_s3 + $0x28] ss:$16 sps:$4 sm:$0xff]  }
 0x4b3   :  { %v5009_v42 = vsel %vm227_vm1, %v4973_v52, %v4974_v43  ;;  %6216 = vmatprep.subr.bf16.mxu0 %v8485_v9  ;;  %v5006_v52 = vsel %vm229_vm2, %v12469_v60, %v5005_v23 }
 0x4b4   :  { %6330 = vmatpush2.bf16.msra.mxu1 %v12721_v6  ;;  %v4920_v29 = vpop.permute.xlu1 %4919  ;;  %6217 = vmatpush2.bf16.msra.mxu0 %v8484_v25  ;;  %v5010_v41 = vsel %vm229_vm2, %v12481_v18, %v5009_v42  ;;  %v9045_v42 = vld [vmem:[#allocation4 + $0x70] ss:$24 sps:$4 sm:$0xff]  }
 0x4b5   :  { %v4968_v20 = vrot.slane %v4920_v29, 4  ;;  %6525 = vmatprep.subr.bf16.mxu1 %v9038_v21  ;;  %v8482_v46 = vcombine.low %v5006_v52, %v5010_v41  ;;  %v8483_v47 = vcombine.high %v5006_v52, %v5010_v41  ;;  %v9050_v21 = vld [vmem:[#allocation4 + $0x44] ss:$24 sps:$4 sm:$0xff]  }
 0x4b6   :  { %v12759_v18 = vpop.permute.xlu0 %5207 }
 0x4b7   :  { %v5001_v60 = vsel %vm227_vm1, %v4967_v50, %v4968_v20  ;;  %6219 = vmatmul.mubr.bf16.vlgmr.msra.gmra.mxu0 %v12731_v36  ;;  %6332 = vmatmul.mubr.bf16.vlgmr.msra.gmra.mxu1 %v12736_v51  ;;  %v4989_v50 = vsel %vm227_vm1, %v4958_v38, %v4959_v17  ;;  %v12779_v38 = vld [vmem:[%s13727_s3 + $0x20] ss:$16 sps:$4 sm:$0xff]  }
 0x4b8   :  { %6412 = vmatprep.subr.bf16.mxu0 %v8483_v47  ;;  %6526 = vmatpush1.bf16.msra.mxu1 %v9036_v27  ;;  %v4908_v63 = vpop.permute.xlu1 %4907  ;;  %v5002_v23 = vsel %vm229_vm2, %v12463_v4, %v5001_v60  ;;  %v4990_v52 = vsel %vm229_vm2, %v12436_v61, %v4989_v50  ;;  %v12795_v47 = vld [vmem:[%s13727_s3 + $0x44] ss:$16 sps:$4 sm:$0xff]   ;;  %v12802_v61 = vld [vmem:[%s13727_s3 + $0x4c] ss:$16 sps:$4 sm:$0xff]  }
 0x4b9   :  { %v4962_v43 = vrot.slane %v4908_v63, 4  ;;  %6413 = vmatpush1.bf16.msra.mxu0 %v8482_v46  ;;  %6527 = vmatprep.subr.bf16.mxu1 %v9047_v22  ;;  %v8478_v25 = vcombine.low %v4998_v26, %v5002_v23  ;;  %v8479_v9 = vcombine.high %v4998_v26, %v5002_v23  ;;  %v9048_v46 = vld [vmem:[#allocation4 + $0x40] ss:$24 sps:$4 sm:$0xff]   ;;  %v9059_v27 = vld [vmem:[#allocation4 + $0x14] ss:$24 sps:$4 sm:$0xff]  }
 0x4ba   :  { %6228 = vmatprep.mubr.bf16.mxu0 %v12749_v53  ;;  %8553 = vmatprep.mubr.msk.bf16.mxu1 %vm6161_vm5, %v12754_v15  ;;  %v5220_v4 = vpop.permute.xlu0 %5219  ;;  %v9057_v63 = vld [vmem:[#allocation4 + $0x10] ss:$24 sps:$4 sm:$0xff]  }
 0x4bb   :  { %v4993_v19 = vsel %vm227_vm1, %v4961_v49, %v4962_v43  ;;  %6414 = vmatprep.subr.bf16.mxu0 %v8479_v9  ;;  %v5253_v41 = vrot.slane %v5220_v4, 4  ;;  %v12814_v23 = vld [vmem:[%s13727_s3 + $0x40] ss:$16 sps:$4 sm:$0xff]   ;;  %v12831_v43 = vld [vmem:[%s13727_s3 + $0x64] ss:$16 sps:$4 sm:$0xff]  }
 0x4bc   :  { %6528 = vmatpush1.bf16.msra.mxu1 %v9045_v42  ;;  %v12786_v29 = vpop.permute.xlu1 %5177  ;;  %v4994_v49 = vsel %vm229_vm2, %v12449_v11, %v4993_v19  ;;  %v9071_v4 = vld [vmem:[#allocation4 + $0x6c] ss:$24 sps:$4 sm:$0xff]  }
 0x4bd   :  { %6415 = vmatpush1.bf16.msra.mxu0 %v8478_v25  ;;  %6529 = vmatprep.subr.bf16.mxu1 %v9050_v21  ;;  %v8474_v17 = vcombine.low %v4990_v52, %v4994_v49  ;;  %v8475_v20 = vcombine.high %v4990_v52, %v4994_v49  ;;  %v5291_v60 = vsel %vm227_vm1, %v5252_v37, %v5253_v41  ;;  %v12821_v37 = vld [vmem:[%s13727_s3 + $0x48] ss:$16 sps:$4 sm:$0xff]   ;;  %v5247_v25 = vrot.slane %v12759_v18, 4 }
 0x4be   :  { %v5292_v50 = vsel %vm229_vm2, %v12650_v56, %v5291_v60  ;;  %v12838_v56 = vld [vmem:[%s13727_s3 + $0x6c] ss:$16 sps:$4 sm:$0xff]   ;;  %v5232_v49 = vrot.slane %v12786_v29, 4  ;;  %v5229_v29 = vrot.slane %v12726_v2, 4  ;;  %v12870_v60 = vld [vmem:[%s13727_s3 + $0x84] ss:$16 sps:$4 sm:$0xff]  }
 0x4bf   :  { %6229 = vmatmul.mubr.bf16.gmra.mxu0 %v12779_v38  ;;  %6342 = vmatmul.mubr.bf16.gmra.mxu1 %v12784_v54 }
 0x4c0   :  { %6416 = vmatprep.subr.bf16.mxu0 %v8475_v20  ;;  %6530 = vmatpush1.bf16.msra.mxu1 %v9048_v46  ;;  %v5226_v11 = vpop.permute.xlu1 %5225  ;;  %v5196_v9 = vpop.permute.xlu0 %5195  ;;  %v12860_v20 = vld [vmem:[%s13727_s3 + $0x68] ss:$16 sps:$4 sm:$0xff]  }
 0x4c1   :  { %v5256_v22 = vrot.slane %v5226_v11, 4  ;;  %6417 = vmatpush1.bf16.msra.mxu0 %v8474_v17  ;;  %6531 = vmatprep.subr.bf16.mxu1 %v9059_v27  ;;  %v5241_v18 = vrot.slane %v5196_v9, 4  ;;  %v9069_v17 = vld [vmem:[#allocation4 + $0x68] ss:$24 sps:$4 sm:$0xff]   ;;  %v9074_v27 = vld [vmem:[#allocation4 + $0x3c] ss:$24 sps:$4 sm:$0xff]  }
 0x4c2   :  { %6418 = vmatprep.subr.bf16.mxu0 %v12708_v57  ;;  %6238 = vmatprep.mubr.bf16.mxu0 %v12795_v47  ;;  %v9062_v57 = vld [vmem:[#allocation4 + $0x9c] ss:$24 sps:$4 sm:$0xff]  }
 0x4c3   :  { %v5295_v26 = vsel %vm227_vm1, %v12645_v62, %v5256_v22  ;;  %8554 = vmatprep.mubr.msk.bf16.mxu1 %vm6161_vm5, %v12802_v61  ;;  %v5275_v22 = vsel %vm227_vm1, %v5240_v5, %v5241_v18 }
 0x4c4   :  { %6532 = vmatpush1.bf16.msra.mxu1 %v9057_v63  ;;  %v5296_v62 = vsel %vm229_vm2, %v8926_v48, %v5295_v26  ;;  %v5276_v9 = vsel %vm229_vm2, %v12630_v31, %v5275_v22 }
 0x4c5   :  { %6419 = vmatpush1.bf16.msra.mxu0 %v12721_v6  ;;  %v8530_v42 = vcombine.low %v5292_v50, %v5296_v62  ;;  %v8531_v19 = vcombine.high %v5292_v50, %v5296_v62  ;;  %v5283_v6 = vsel %vm227_vm1, %v5246_v33, %v5247_v25  ;;  %v12855_v33 = vld [vmem:[%s13727_s3 + $0x60] ss:$16 sps:$4 sm:$0xff]   ;;  %v5259_v62 = vsel %vm227_vm1, %v5228_v44, %v5229_v29  ;;  %v9083_v25 = vld [vmem:[#allocation4 + $0xc] ss:$24 sps:$4 sm:$0xff]  }
 0x4c6   :  { %6420 = vmatprep.subr.bf16.mxu0 %v9062_v57  ;;  %v5284_v11 = vsel %vm229_vm2, %v12637_v39, %v5283_v6  ;;  %v5263_v39 = vsel %vm227_vm1, %v5231_v30, %v5232_v49  ;;  %v9072_v50 = vld [vmem:[#allocation4 + $0x38] ss:$24 sps:$4 sm:$0xff]   ;;  %v5260_v31 = vsel %vm229_vm2, %v12561_v1, %v5259_v62  ;;  %v12924_v1 = vld [vmem:[%s13727_s3 + $0xac] ss:$16 sps:$4 sm:$0xff]  }
 0x4c7   :  { %6239 = vmatmul.mubr.bf16.gmra.mxu0 %v12814_v23  ;;  %6352 = vmatmul.mubr.bf16.gmra.mxu1 %v12821_v37  ;;  %v5264_v44 = vsel %vm229_vm2, %v12571_v40, %v5263_v39  ;;  %v12914_v6 = vld [vmem:[%s13727_s3 + $0x88] ss:$16 sps:$4 sm:$0xff]  }
 0x4c8   :  { %6533 = vmatprep.subr.bf16.mxu1 %v8531_v19  ;;  %v5214_v48 = vpop.permute.xlu1 %5213  ;;  %6248 = vmatprep.mubr.bf16.mxu0 %v12831_v43  ;;  %v8515_v18 = vcombine.high %v5260_v31, %v5264_v44  ;;  %v8514_v29 = vcombine.low %v5260_v31, %v5264_v44  ;;  %v9107_v44 = vld [vmem:[#allocation4 + $0x40] ss:$24 sps:$4 sm:$0xff]  }
 0x4c9   :  { %v5184_v21 = vpop.permute.xlu0 %5183  ;;  %6534 = vmatpush1.bf16.msra.mxu1 %v8530_v42  ;;  %v5250_v52 = vrot.slane %v5214_v48, 4  ;;  %6421 = vmatpush1.bf16.msra.mxu0 %v9060_v16  ;;  %v9113_v31 = vld [vmem:[%s13727_s3 + $0xc8] ss:$16 sps:$4 sm:$0xff]  }
 0x4ca   :  { %6422 = vmatprep.subr.bf16.mxu0 %v9071_v4  ;;  %8555 = vmatprep.mubr.msk.bf16.mxu1 %vm6161_vm5, %v12838_v56  ;;  %v9081_v4 = vld [vmem:[#allocation4 + $0x8] ss:$24 sps:$4 sm:$0xff]  }
 0x4cb   :  { %v5287_v41 = vsel %vm227_vm1, %v5249_v24, %v5250_v52 }
 0x4cc   :  { %v5288_v24 = vsel %vm229_vm2, %v12641_v10, %v5287_v41  ;;  %v12883_v10 = vld [vmem:[%s13727_s3 + $0x8c] ss:$16 sps:$4 sm:$0xff]  }
 0x4cd   :  { %v5202_v46 = vpop.permute.xlu1 %5201  ;;  %v12875_v63 = vpop.permute.xlu0 %4949  ;;  %6423 = vmatpush1.bf16.msra.mxu0 %v9069_v17  ;;  %v8526_v26 = vcombine.low %v5284_v11, %v5288_v24  ;;  %v8527_v57 = vcombine.high %v5284_v11, %v5288_v24  ;;  %v5354_v24 = vld [vmem:[#allocation4 + $0xd0] sm:$0xff] }
 0x4ce   :  { %v5244_v2 = vrot.slane %v5202_v46, 4  ;;  %6424 = vmatprep.subr.bf16.mxu0 %v9074_v27  ;;  %v9092_v27 = vld [vmem:[#allocation4 + $0xd0] ss:$24 sps:$4 sm:$0xff]  }
 0x4cf   :  { %6249 = vmatmul.mubr.bf16.gmra.mxu0 %v12855_v33  ;;  %6362 = vmatmul.mubr.bf16.gmra.mxu1 %v12860_v20 }
 0x4d0   :  { %v5279_v5 = vsel %vm227_vm1, %v5243_v34, %v5244_v2  ;;  %6535 = vmatprep.subr.bf16.mxu1 %v8527_v57  ;;  %6258 = vmatprep.mubr.bf16.mxu0 %v12870_v60  ;;  %v5235_v34 = vrot.slane %v5184_v21, 4  ;;  %v12919_v21 = vld [vmem:[%s13727_s3 + $0xa4] ss:$16 sps:$4 sm:$0xff]   ;;  %v9175_v57 = vld [vmem:[#allocation4 + $0xd8] sm:$0xff] }
 0x4d1   :  { %v12893_v30 = vpop.permute.xlu1 %4955  ;;  %v5280_v42 = vsel %vm229_vm2, %v12635_v59, %v5279_v5  ;;  %6536 = vmatpush1.bf16.msra.mxu1 %v8526_v26  ;;  %6425 = vmatpush1.bf16.msra.mxu0 %v9072_v50  ;;  %v4938_v48 = vpop.permute.xlu0 %4937  ;;  %v12909_v59 = vld [vmem:[%s13727_s3 + $0x80] ss:$16 sps:$4 sm:$0xff]   ;;  %v8551_v39 = vcombine.high %v5354_v24, %v9175_v57 }
 0x4d2   :  { %v8522_v19 = vcombine.low %v5276_v9, %v5280_v42  ;;  %v8523_v16 = vcombine.high %v5276_v9, %v5280_v42  ;;  %6426 = vmatprep.subr.bf16.mxu0 %v9083_v25  ;;  %8556 = vmatprep.mubr.msk.bf16.mxu1 %vm6161_vm5, %v12883_v10  ;;  %v5267_v52 = vsel %vm227_vm1, %v5234_v7, %v5235_v34  ;;  %v4977_v49 = vrot.slane %v4938_v48, 4  ;;  %v12950_v5 = vld [vmem:[%s13727_s3 + $0xa0] ss:$16 sps:$4 sm:$0xff]   ;;  %v12969_v9 = vld [vmem:[%s13727_s3 + $0xcc] ss:$16 sps:$4 sm:$0xff]  }
 0x4d3   :  { %v5268_v11 = vsel %vm229_vm2, %v12666_v45, %v5267_v52  ;;  %v9095_v50 = vld [vmem:[#allocation4 + $0xa0] ss:$24 sps:$4 sm:$0xff]   ;;  %v9102_v48 = vld [vmem:[#allocation4 + $0x6c] ss:$24 sps:$4 sm:$0xff]  }
 0x4d4   :  { %6537 = vmatprep.subr.bf16.mxu1 %v8523_v16  ;;  %v9093_v16 = vld [vmem:[#allocation4 + $0x9c] ss:$24 sps:$4 sm:$0xff]  }
 0x4d5   :  { %v5190_v40 = vpop.permute.xlu1 %5189  ;;  %6538 = vmatpush1.bf16.msra.mxu1 %v8522_v19  ;;  %6427 = vmatpush1.bf16.msra.mxu0 %v9081_v4  ;;  %v8550_v19 = vcombine.low %v5354_v24, %v9175_v57  ;;  %v9108_v4 = vld [vmem:[%s13727_s3 + $0xc0] ss:$16 sps:$4 sm:$0xff]  }
 0x4d6   :  { %v5238_v41 = vrot.slane %v5190_v40, 4  ;;  %6428 = vmatprep.subr.bf16.mxu0 %v8515_v18  ;;  %v4983_v40 = vrot.slane %v12875_v63, 4  ;;  %v9119_v18 = vld [vmem:[%s13727_s3 + $0xe4] ss:$16 sps:$4 sm:$0xff]  }
 0x4d7   :  { %6259 = vmatmul.mubr.bf16.gmra.mxu0 %v12909_v59  ;;  %6372 = vmatmul.mubr.bf16.gmra.mxu1 %v12914_v6 }
 0x4d8   :  { %v5271_v17 = vsel %vm227_vm1, %v5237_v58, %v5238_v41  ;;  %6268 = vmatprep.mubr.bf16.mxu0 %v12919_v21  ;;  %8557 = vmatprep.mubr.msk.bf16.mxu1 %vm6161_vm5, %v12924_v1  ;;  %v5013_v58 = vsel %vm227_vm1, %v4976_v13, %v4977_v49  ;;  %v12955_v13 = vld [vmem:[%s13727_s3 + $0xa8] ss:$16 sps:$4 sm:$0xff]   ;;  %v9105_v49 = vld [vmem:[#allocation4 + $0x3c] ss:$24 sps:$4 sm:$0xff]   ;;  %v5021_v63 = vsel %vm227_vm1, %v4982_v32, %v4983_v40 }
 0x4d9   :  { %v4944_v46 = vpop.permute.xlu1 %4943  ;;  %v5272_v7 = vsel %vm229_vm2, %v12681_v14, %v5271_v17  ;;  %6429 = vmatpush2.bf16.msra.mxu0 %v8514_v29  ;;  %v9090_v14 = vld [vmem:[#allocation4 + $0xcc] ss:$24 sps:$4 sm:$0xff]   ;;  %v5014_v62 = vsel %vm229_vm2, %v12694_v35, %v5013_v58  ;;  %v9104_v35 = vld [vmem:[#allocation4 + $0x70] ss:$24 sps:$4 sm:$0xff]  }
 0x4da   :  { %v4980_v22 = vrot.slane %v4944_v46, 4  ;;  %v8518_v2 = vcombine.low %v5268_v11, %v5272_v7  ;;  %v8519_v26 = vcombine.high %v5268_v11, %v5272_v7  ;;  %6430 = vmatprep.subr.bf16.mxu0 %v9092_v27  ;;  %v9116_v41 = vld [vmem:[#allocation4 + $0x10] ss:$24 sps:$4 sm:$0xff]   ;;  %v9114_v29 = vld [vmem:[#allocation4 + $0xc] ss:$24 sps:$4 sm:$0xff]  }
 0x4db   :  { %v9117_v46 = vld [vmem:[%s13727_s3 + $0xe0] ss:$16 sps:$4 sm:$0xff]   ;;  %v9122_v32 = vld [vmem:[%s13727_s3 + $0xe8] ss:$16 sps:$4 sm:$0xff]  }
 0x4dc   :  { %v5017_v45 = vsel %vm227_vm1, %v4979_v3, %v4980_v22  ;;  %6539 = vmatprep.subr.bf16.mxu1 %v8519_v26  ;;  %v12960_v3 = vld [vmem:[%s13727_s3 + $0xc4] ss:$16 sps:$4 sm:$0xff]  }
 0x4dd   :  { %6540 = vmatpush1.bf16.msra.mxu1 %v8518_v2  ;;  %v5018_v25 = vsel %vm229_vm2, %v12700_v28, %v5017_v45  ;;  %6431 = vmatpush2.bf16.msra.mxu0 %v9090_v14  ;;  %v4986_v28 = vrot.slane %v12893_v30, 4  ;;  %v9120_v30 = vld [vmem:[%s13727_s3 + $0xec] ss:$16 sps:$4 sm:$0xff]  }
 0x4de   :  { %6555 = vmatprep.subr.bf16.mxu1 %v8551_v39  ;;  %v8486_v42 = vcombine.low %v5014_v62, %v5018_v25  ;;  %v8487_v34 = vcombine.high %v5014_v62, %v5018_v25  ;;  %6432 = vmatprep.subr.bf16.mxu0 %v9095_v50 }
 0x4df   :  { %6269 = vmatmul.mubr.bf16.gmra.mxu0 %v12950_v5  ;;  %6382 = vmatmul.mubr.bf16.gmra.mxu1 %v12955_v13  ;;  %v5025_v52 = vsel %vm227_vm1, %v12607_v55, %v4986_v28  ;;  %v5022_v55 = vsel %vm229_vm2, %v12549_v8, %v5021_v63  ;;  %v9177_v8 = vld [vmem:[%s13727_s3 + $0xc] ss:$16 sps:$4 sm:$0xff]  }
 0x4e0   :  { %6278 = vmatprep.mubr.bf16.mxu0 %v12960_v3  ;;  %8558 = vmatprep.mubr.msk.bf16.mxu1 %vm6161_vm5, %v12969_v9  ;;  %v5026_v17 = vsel %vm229_vm2, %v8931_v0, %v5025_v52 }
 0x4e1   :  { %6556 = vmatpush2.bf16.msra.mxu1 %v8550_v19  ;;  %6433 = vmatpush2.bf16.msra.mxu0 %v9093_v16  ;;  %v8491_v27 = vcombine.high %v5022_v55, %v5026_v17  ;;  %v8490_v11 = vcombine.low %v5022_v55, %v5026_v17 }
 0x4e2   :  { %6434 = vmatprep.subr.bf16.mxu0 %v9104_v35 }
 0x4e5   :  { %6435 = vmatpush2.bf16.msra.mxu0 %v9102_v48 }
 0x4e6   :  { %6436 = vmatprep.subr.bf16.mxu0 %v9107_v44 }
 0x4e7   :  { %6279 = vmatmul.mubr.bf16.gmra.mxu0 %v9108_v4  ;;  %6392 = vmatmul.mubr.bf16.gmra.mxu1 %v9113_v31 }
 0x4e8   :  { %6288 = vmatprep.mubr.bf16.mxu0 %v9119_v18  ;;  %8559 = vmatprep.mubr.msk.bf16.mxu1 %vm6161_vm5, %v9120_v30 }
 0x4e9   :  { %6437 = vmatpush2.bf16.msra.mxu0 %v9105_v49 }
 0x4ea   :  { %6438 = vmatprep.subr.bf16.mxu0 %v9116_v41 }
 0x4ed   :  { %6439 = vmatpush2.bf16.msra.mxu0 %v9114_v29 }
 0x4ee   :  { %6440 = vmatprep.subr.bf16.mxu0 %v8491_v27 }
 0x4ef   :  { %6289 = vmatmul.mubr.bf16.gmra.mxu0 %v9117_v46  ;;  %6402 = vmatmul.mubr.bf16.gmra.mxu1 %v9122_v32 }
 0x4f0   :  { %6444 = vmatprep.mubr.bf16.mxu0 %v9176_v12  ;;  %8560 = vmatprep.mubr.msk.bf16.mxu1 %vm6161_vm5, %v9177_v8 }
 0x4f1   :  { %6441 = vmatpush2.bf16.msra.mxu0 %v8490_v11 }
 0x4f2   :  { %6442 = vmatprep.subr.bf16.mxu0 %v8487_v34 }
 0x4f5   :  { %6443 = vmatpush2.bf16.msra.mxu0 %v8486_v42 }
 0x4f7   :  { %6558 = vmatmul.mubr.bf16.vlgmr.msra.gmra.mxu1 %v12736_v51 }
 0x4f8   :  { %6445 = vmatmul.mubr.bf16.vlgmr.msra.gmra.mxu0 %v12731_v36  ;;  %8561 = vmatprep.mubr.msk.bf16.mxu1 %vm6161_vm5, %v12754_v15 }
 0x4f9   :  { %6454 = vmatprep.mubr.bf16.mxu0 %v12749_v53 }
 0x4ff   :  { %6568 = vmatmul.mubr.bf16.gmra.mxu1 %v12784_v54 }
 0x500   :  { %6455 = vmatmul.mubr.bf16.gmra.mxu0 %v12779_v38  ;;  %8562 = vmatprep.mubr.msk.bf16.mxu1 %vm6161_vm5, %v12802_v61 }
 0x501   :  { %6464 = vmatprep.mubr.bf16.mxu0 %v12795_v47 }
 0x507   :  { %6578 = vmatmul.mubr.bf16.gmra.mxu1 %v12821_v37 }
 0x508   :  { %6465 = vmatmul.mubr.bf16.gmra.mxu0 %v12814_v23  ;;  %8563 = vmatprep.mubr.msk.bf16.mxu1 %vm6161_vm5, %v12838_v56 }
 0x509   :  { %6474 = vmatprep.mubr.bf16.mxu0 %v12831_v43 }
 0x50f   :  { %6588 = vmatmul.mubr.bf16.gmra.mxu1 %v12860_v20 }
 0x510   :  { %6475 = vmatmul.mubr.bf16.gmra.mxu0 %v12855_v33  ;;  %8564 = vmatprep.mubr.msk.bf16.mxu1 %vm6161_vm5, %v12883_v10 }
 0x511   :  { %6484 = vmatprep.mubr.bf16.mxu0 %v12870_v60 }
 0x517   :  { %6598 = vmatmul.mubr.bf16.gmra.mxu1 %v12914_v6 }
 0x518   :  { %6485 = vmatmul.mubr.bf16.gmra.mxu0 %v12909_v59  ;;  %8565 = vmatprep.mubr.msk.bf16.mxu1 %vm6161_vm5, %v12924_v1 }
 0x519   :  { %6494 = vmatprep.mubr.bf16.mxu0 %v12919_v21 }
 0x51f   :  { %6608 = vmatmul.mubr.bf16.gmra.mxu1 %v12955_v13 }
 0x520   :  { %6495 = vmatmul.mubr.bf16.gmra.mxu0 %v12950_v5  ;;  %8566 = vmatprep.mubr.msk.bf16.mxu1 %vm6161_vm5, %v12969_v9 }
 0x521   :  { %6504 = vmatprep.mubr.bf16.mxu0 %v12960_v3 }
 0x527   :  { %6618 = vmatmul.mubr.bf16.gmra.mxu1 %v9113_v31 }
 0x528   :  { %6505 = vmatmul.mubr.bf16.gmra.mxu0 %v9108_v4  ;;  %8567 = vmatprep.mubr.msk.bf16.mxu1 %vm6161_vm5, %v9120_v30 }
 0x529   :  { %6514 = vmatprep.mubr.bf16.mxu0 %v9119_v18 }
 0x52f   :  { %6628 = vmatmul.mubr.bf16.gmra.mxu1 %v9122_v32 }
 0x530   :  { %6515 = vmatmul.mubr.bf16.gmra.mxu0 %v9117_v46 }
 0x577   :  { %v6220_v0 = vpop.f32.mrf.mxu0  ;;  %v6333_v36 = vpop.f32.mrf.mxu1 }
 0x578   :  { %v13045_v51 = vadd.f32 %v6333_v36, %v6220_v0 }
 0x579   :  { %v6222_v53 = vpop.f32.mrf.mxu0  ;;  %v6335_v15 = vpop.f32.mrf.mxu1 }
 0x57a   :  { %v13047_v38 = vadd.f32 %v6335_v15, %v6222_v53 }
 0x57b   :  { %v6224_v54 = vpop.f32.mrf.mxu0  ;;  %v6337_v47 = vpop.f32.mrf.mxu1 }
 0x57c   :  { %v13049_v61 = vadd.f32 %v6337_v47, %v6224_v54  ;;  %6942 = vrot.lane.b32.xlu0 %v13047_v38, %s9178_s21 }
 0x57d   :  { %v6226_v23 = vpop.f32.mrf.mxu0  ;;  %v6339_v37 = vpop.f32.mrf.mxu1 }
 0x57e   :  { %v13053_v43 = vadd.f32 %v6339_v37, %v6226_v23 }
 0x57f   :  { %v6230_v56 = vpop.f32.mrf.mxu0  ;;  %v6343_v33 = vpop.f32.mrf.mxu1 }
 0x580   :  { %v13055_v20 = vadd.f32 %v6343_v33, %v6230_v56  ;;  %6944 = vrot.lane.b32.xlu1 %v13053_v43, %s9178_s21 }
 0x581   :  { %v6232_v60 = vpop.f32.mrf.mxu0  ;;  %v6345_v10 = vpop.f32.mrf.mxu1 }
 0x582   :  { %14456 = vst [vmem:[#allocation57_spill] sm:$0xff] %v13055_v20  ;;  %v13059_v59 = vadd.f32 %v6345_v10, %v6232_v60 }
 0x583   :  { %v6234_v6 = vpop.f32.mrf.mxu0  ;;  %v6347_v21 = vpop.f32.mrf.mxu1 }
 0x584   :  { %v13061_v1 = vadd.f32 %v6347_v21, %v6234_v6  ;;  %6946 = vrot.lane.b32.xlu0 %v13059_v59, %s9178_s21 }
 0x585   :  { %v6236_v7 = vpop.f32.mrf.mxu0  ;;  %v6349_v24 = vpop.f32.mrf.mxu1 }
 0x586   :  { %14457 = vst [vmem:[#allocation99_spill] sm:$0xff] %v13061_v1  ;;  %v13065_v58 = vadd.f32 %v6349_v24, %v6236_v7 }
 0x587   :  { %v6240_v22 = vpop.f32.mrf.mxu0  ;;  %v6353_v2 = vpop.f32.mrf.mxu1 }
 0x588   :  { %v13067_v26 = vadd.f32 %v6353_v2, %v6240_v22  ;;  %6948 = vrot.lane.b32.xlu1 %v13065_v58, %s9178_s21 }
 0x589   :  { %v6242_v45 = vpop.f32.mrf.mxu0  ;;  %v6355_v14 = vpop.f32.mrf.mxu1 }
 0x58a   :  { %6790 = vrot.lane.b32.xlu0 %v13067_v26, %s9178_s21  ;;  %v13073_v5 = vadd.f32 %v6355_v14, %v6242_v45 }
 0x58b   :  { %v6244_v57 = vpop.f32.mrf.mxu0  ;;  %v6357_v39 = vpop.f32.mrf.mxu1 }
 0x58c   :  { %v13075_v13 = vadd.f32 %v6357_v39, %v6244_v57 }
 0x58d   :  { %v6246_v50 = vpop.f32.mrf.mxu0  ;;  %v6359_v3 = vpop.f32.mrf.mxu1 }
 0x58e   :  { %6950 = vrot.lane.b32.xlu0 %v13073_v5, %s9178_s21  ;;  %6792 = vrot.lane.b32.xlu1 %v13075_v13, %s9178_s21  ;;  %v13081_v9 = vadd.f32 %v6359_v3, %v6246_v50 }
 0x58f   :  { %v6250_v62 = vpop.f32.mrf.mxu0  ;;  %v6363_v25 = vpop.f32.mrf.mxu1 }
 0x590   :  { %v13083_v42 = vadd.f32 %v6363_v25, %v6250_v62 }
 0x591   :  { %v6252_v34 = vpop.f32.mrf.mxu0  ;;  %v6365_v19 = vpop.f32.mrf.mxu1 }
 0x592   :  { %6952 = vrot.lane.b32.xlu1 %v13081_v9, %s9178_s21  ;;  %6794 = vrot.lane.b32.xlu0 %v13083_v42, %s9178_s21  ;;  %v13089_v28 = vadd.f32 %v6365_v19, %v6252_v34 }
 0x593   :  { %v6254_v16 = vpop.f32.mrf.mxu0  ;;  %v6367_v35 = vpop.f32.mrf.mxu1 }
 0x594   :  { %v13091_v44 = vadd.f32 %v6367_v35, %v6254_v16 }
 0x595   :  { %v6256_v48 = vpop.f32.mrf.mxu0  ;;  %v6369_v4 = vpop.f32.mrf.mxu1 }
 0x596   :  { %6954 = vrot.lane.b32.xlu0 %v13089_v28, %s9178_s21  ;;  %6796 = vrot.lane.b32.xlu1 %v13091_v44, %s9178_s21  ;;  %v13097_v18 = vadd.f32 %v6369_v4, %v6256_v48 }
 0x597   :  { %v6260_v31 = vpop.f32.mrf.mxu0  ;;  %v6373_v40 = vpop.f32.mrf.mxu1 }
 0x598   :  { %14458 = vst [vmem:[#allocation28_spill] sm:$0xff] %v13097_v18  ;;  %v13099_v30 = vadd.f32 %v6373_v40, %v6260_v31 }
 0x599   :  { %v6262_v52 = vpop.f32.mrf.mxu0  ;;  %v6375_v49 = vpop.f32.mrf.mxu1 }
 0x59a   :  { %v13101_v63 = vadd.f32 %v6375_v49, %v6262_v52  ;;  %6956 = vrot.lane.b32.xlu1 %v13097_v18, %s9178_s21 }
 0x59b   :  { %v6264_v41 = vpop.f32.mrf.mxu0  ;;  %v6377_v17 = vpop.f32.mrf.mxu1 }
 0x59c   :  { %v13105_v29 = vadd.f32 %v6377_v17, %v6264_v41  ;;  %6958 = vrot.lane.b32.xlu0 %v13101_v63, %s9178_s21 }
 0x59d   :  { %v6266_v55 = vpop.f32.mrf.mxu0  ;;  %v6379_v46 = vpop.f32.mrf.mxu1 }
 0x59e   :  { %v13109_v32 = vadd.f32 %v6379_v46, %v6266_v55 }
 0x59f   :  { %v6270_v27 = vpop.f32.mrf.mxu0  ;;  %v6383_v11 = vpop.f32.mrf.mxu1 }
 0x5a0   :  { %v13111_v12 = vadd.f32 %v6383_v11, %v6270_v27  ;;  %6960 = vrot.lane.b32.xlu1 %v13109_v32, %s9178_s21 }
 0x5a1   :  { %v6272_v8 = vpop.f32.mrf.mxu0  ;;  %v6385_v0 = vpop.f32.mrf.mxu1 }
 0x5a2   :  { %14459 = vst [vmem:[#allocation45_spill] sm:$0xff] %v13111_v12  ;;  %v13115_v36 = vadd.f32 %v6385_v0, %v6272_v8 }
 0x5a3   :  { %v6274_v53 = vpop.f32.mrf.mxu0  ;;  %v6387_v15 = vpop.f32.mrf.mxu1 }
 0x5a4   :  { %v13117_v54 = vadd.f32 %v6387_v15, %v6274_v53  ;;  %6962 = vrot.lane.b32.xlu0 %v13115_v36, %s9178_s21 }
 0x5a5   :  { %v6276_v47 = vpop.f32.mrf.mxu0  ;;  %v6389_v23 = vpop.f32.mrf.mxu1 }
 0x5a6   :  { %14460 = vst [vmem:[#allocation58_spill] sm:$0xff] %v13117_v54  ;;  %v13121_v37 = vadd.f32 %v6389_v23, %v6276_v47 }
 0x5a7   :  { %v6280_v56 = vpop.f32.mrf.mxu0  ;;  %v6393_v33 = vpop.f32.mrf.mxu1 }
 0x5a8   :  { %v13123_v60 = vadd.f32 %v6393_v33, %v6280_v56  ;;  %6964 = vrot.lane.b32.xlu1 %v13121_v37, %s9178_s21 }
 0x5a9   :  { %v6282_v10 = vpop.f32.mrf.mxu0  ;;  %v6395_v6 = vpop.f32.mrf.mxu1 }
 0x5aa   :  { %6806 = vrot.lane.b32.xlu0 %v13123_v60, %s9178_s21  ;;  %v13129_v24 = vadd.f32 %v6395_v6, %v6282_v10 }
 0x5ab   :  { %v6284_v21 = vpop.f32.mrf.mxu0  ;;  %v6397_v7 = vpop.f32.mrf.mxu1 }
 0x5ac   :  { %v13131_v22 = vadd.f32 %v6397_v7, %v6284_v21 }
 0x5ad   :  { %v6286_v2 = vpop.f32.mrf.mxu0  ;;  %v6399_v45 = vpop.f32.mrf.mxu1 }
 0x5ae   :  { %6966 = vrot.lane.b32.xlu0 %v13129_v24, %s9178_s21  ;;  %6808 = vrot.lane.b32.xlu1 %v13131_v22, %s9178_s21  ;;  %v13137_v39 = vadd.f32 %v6399_v45, %v6286_v2 }
 0x5af   :  { %v6290_v14 = vpop.f32.mrf.mxu0  ;;  %v6403_v57 = vpop.f32.mrf.mxu1 }
 0x5b0   :  { %v13139_v50 = vadd.f32 %v6403_v57, %v6290_v14 }
 0x5b1   :  { %v6292_v3 = vpop.f32.mrf.mxu0  ;;  %v6405_v62 = vpop.f32.mrf.mxu1 }
 0x5b2   :  { %6968 = vrot.lane.b32.xlu1 %v13137_v39, %s9178_s21  ;;  %6810 = vrot.lane.b32.xlu0 %v13139_v50, %s9178_s21  ;;  %v13145_v19 = vadd.f32 %v6405_v62, %v6292_v3 }
 0x5b3   :  { %v6294_v25 = vpop.f32.mrf.mxu0  ;;  %v6407_v34 = vpop.f32.mrf.mxu1 }
 0x5b4   :  { %v13147_v16 = vadd.f32 %v6407_v34, %v6294_v25 }
 0x5b5   :  { %v6296_v35 = vpop.f32.mrf.mxu0  ;;  %v6409_v48 = vpop.f32.mrf.mxu1 }
 0x5b6   :  { %6970 = vrot.lane.b32.xlu0 %v13145_v19, %s9178_s21  ;;  %6812 = vrot.lane.b32.xlu1 %v13147_v16, %s9178_s21  ;;  %v13153_v31 = vadd.f32 %v6409_v48, %v6296_v35 }
 0x5b7   :  { %v6559_v4 = vpop.f32.mrf.mxu1 }
 0x5b8   :  { %14461 = vst [vmem:[#allocation102_spill] sm:$0xff] %v13153_v31  ;;  %v6446_v40 = vpop.f32.mrf.mxu0 }
 0x5b9   :  { %v13155_v52 = vadd.f32 %v6559_v4, %v6446_v40  ;;  %v6561_v49 = vpop.f32.mrf.mxu1 }
 0x5ba   :  { %v6448_v41 = vpop.f32.mrf.mxu0  ;;  %6972 = vrot.lane.b32.xlu1 %v13153_v31, %s9178_s21 }
 0x5bb   :  { %14462 = vst [vmem:[#allocation27_spill] sm:$0xff] %v13155_v52  ;;  %v13159_v17 = vadd.f32 %v6561_v49, %v6448_v41  ;;  %v6563_v55 = vpop.f32.mrf.mxu1 }
 0x5bc   :  { %v6450_v46 = vpop.f32.mrf.mxu0 }
 0x5bd   :  { %14463 = vst [vmem:[#allocation92_spill] sm:$0xff] %v13159_v17  ;;  %v13161_v27 = vadd.f32 %v6563_v55, %v6450_v46  ;;  %7262 = vrot.lane.b32.xlu0 %v13159_v17, %s9178_s21  ;;  %v6565_v11 = vpop.f32.mrf.mxu1 }
 0x5be   :  { %v6452_v8 = vpop.f32.mrf.mxu0 }
 0x5bf   :  { %v13165_v0 = vadd.f32 %v6565_v11, %v6452_v8  ;;  %v13167_v53 = vpop.f32.mrf.mxu1 }
 0x5c0   :  { %v13169_v15 = vpop.f32.mrf.mxu0 }
 0x5c1   :  { %14464 = vst [vmem:[#allocation96_spill] sm:$0xff] %v13165_v0  ;;  %7264 = vrot.lane.b32.xlu1 %v13165_v0, %s9178_s21  ;;  %v6571_v47 = vpop.f32.mrf.mxu1 }
 0x5c2   :  { %v6458_v23 = vpop.f32.mrf.mxu0 }
 0x5c3   :  { %v13173_v56 = vadd.f32 %v6571_v47, %v6458_v23  ;;  %v13175_v33 = vpop.f32.mrf.mxu1 }
 0x5c4   :  { %v13177_v10 = vpop.f32.mrf.mxu0 }
 0x5c5   :  { %14465 = vst [vmem:[#allocation91_spill] sm:$0xff] %v13173_v56  ;;  %7266 = vrot.lane.b32.xlu0 %v13173_v56, %s9178_s21  ;;  %v6575_v6 = vpop.f32.mrf.mxu1 }
 0x5c6   :  { %v6462_v21 = vpop.f32.mrf.mxu0 }
 0x5c7   :  { %v13181_v7 = vadd.f32 %v6575_v6, %v6462_v21  ;;  %v6579_v2 = vpop.f32.mrf.mxu1 }
 0x5c8   :  { %v6466_v45 = vpop.f32.mrf.mxu0 }
 0x5c9   :  { %14466 = vst [vmem:[#allocation107_spill] sm:$0xff] %v13181_v7  ;;  %v13183_v14 = vadd.f32 %v6579_v2, %v6466_v45  ;;  %7268 = vrot.lane.b32.xlu1 %v13181_v7, %s9178_s21  ;;  %v6581_v57 = vpop.f32.mrf.mxu1 }
 0x5ca   :  { %v6468_v3 = vpop.f32.mrf.mxu0 }
 0x5cb   :  { %14467 = vst [vmem:[#allocation129_spill] sm:$0xff] %v13183_v14  ;;  %7110 = vrot.lane.b32.xlu0 %v13183_v14, %s9178_s21  ;;  %v6583_v62 = vpop.f32.mrf.mxu1  ;;  %v13189_v34 = vadd.f32 %v6581_v57, %v6468_v3 }
 0x5cc   :  { %v6470_v25 = vpop.f32.mrf.mxu0 }
 0x5cd   :  { %14468 = vst [vmem:[#allocation40_spill] sm:$0xff] %v13189_v34  ;;  %v13191_v35 = vadd.f32 %v6583_v62, %v6470_v25  ;;  %v6585_v48 = vpop.f32.mrf.mxu1 }
 0x5ce   :  { %v6472_v4 = vpop.f32.mrf.mxu0 }
 0x5cf   :  { %14469 = vst [vmem:[#allocation101_spill] sm:$0xff] %v13191_v35  ;;  %7270 = vrot.lane.b32.xlu0 %v13189_v34, %s9178_s21  ;;  %7112 = vrot.lane.b32.xlu1 %v13191_v35, %s9178_s21  ;;  %v6589_v40 = vpop.f32.mrf.mxu1  ;;  %v13197_v41 = vadd.f32 %v6585_v48, %v6472_v4 }
 0x5d0   :  { %v6476_v49 = vpop.f32.mrf.mxu0 }
 0x5d1   :  { %14470 = vst [vmem:[#allocation20_spill] sm:$0xff] %v13197_v41  ;;  %v13199_v55 = vadd.f32 %v6589_v40, %v6476_v49  ;;  %v6591_v46 = vpop.f32.mrf.mxu1 }
 0x5d2   :  { %v6478_v11 = vpop.f32.mrf.mxu0 }
 0x5d3   :  { %14471 = vst [vmem:[#allocation33_spill] sm:$0xff] %v13199_v55  ;;  %7114 = vrot.lane.b32.xlu0 %v13199_v55, %s9178_s21  ;;  %7272 = vrot.lane.b32.xlu1 %v13197_v41, %s9178_s21  ;;  %v6593_v8 = vpop.f32.mrf.mxu1  ;;  %v13205_v23 = vadd.f32 %v6591_v46, %v6478_v11  ;;  %v13229_v46 = vpop.permute.xlu0 %6742 }
 0x5d4   :  { %v6480_v47 = vpop.f32.mrf.mxu0 }
 0x5d5   :  { %14472 = vst [vmem:[#allocation110_spill] sm:$0xff] %v13205_v23  ;;  %v13207_v6 = vadd.f32 %v6593_v8, %v6480_v47  ;;  %v6595_v21 = vpop.f32.mrf.mxu1 }
 0x5d6   :  { %v6482_v2 = vpop.f32.mrf.mxu0 }
 0x5d7   :  { %14473 = vst [vmem:[#allocation131_spill] sm:$0xff] %v13207_v6  ;;  %7274 = vrot.lane.b32.xlu0 %v13205_v23, %s9178_s21  ;;  %7116 = vrot.lane.b32.xlu1 %v13207_v6, %s9178_s21  ;;  %v13213_v45 = vpop.f32.mrf.mxu1  ;;  %v13217_v3 = vadd.f32 %v6595_v21, %v6482_v2  ;;  %v13233_v2 = vpop.permute.xlu1 %6747 }
 0x5d8   :  { %v13215_v57 = vpop.f32.mrf.mxu0  ;;  %14477 = vst [vmem:[#allocation23_spill] sm:$0xff] %v13233_v2  ;;  %v13239_v23 = vpop.permute.xlu0 %6732 }
 0x5d9   :  { %14474 = vst [vmem:[#allocation122_spill] sm:$0xff] %v13217_v3  ;;  %v6601_v62 = vpop.f32.mrf.mxu1 }
 0x5da   :  { %v6488_v25 = vpop.f32.mrf.mxu0 }
 0x5db   :  { %v13219_v48 = vadd.f32 %v6601_v62, %v6488_v25  ;;  %7276 = vrot.lane.b32.xlu1 %v13217_v3, %s9178_s21  ;;  %v13223_v4 = vpop.f32.mrf.mxu1  ;;  %v13243_v55 = vpop.permute.xlu1 %6737 }
 0x5dc   :  { %v13225_v40 = vpop.f32.mrf.mxu0 }
 0x5dd   :  { %14475 = vst [vmem:[#allocation51_spill] sm:$0xff] %v13219_v48  ;;  %7278 = vrot.lane.b32.xlu0 %v13219_v48, %s9178_s21  ;;  %v6605_v49 = vpop.f32.mrf.mxu1 }
 0x5de   :  { %v6492_v11 = vpop.f32.mrf.mxu0 }
 0x5df   :  { %v13231_v8 = vadd.f32 %v6605_v49, %v6492_v11  ;;  %v6609_v47 = vpop.f32.mrf.mxu1  ;;  %v13255_v0 = vpop.permute.xlu1 %6727 }
 0x5e0   :  { %v6496_v21 = vpop.f32.mrf.mxu0 }
 0x5e1   :  { %14476 = vst [vmem:[#allocation88_spill] sm:$0xff] %v13231_v8  ;;  %7280 = vrot.lane.b32.xlu1 %v13231_v8, %s9178_s21  ;;  %v6611_v62 = vpop.f32.mrf.mxu1 }
 0x5e2   :  { %v6498_v25 = vpop.f32.mrf.mxu0 }
 0x5e3   :  { %v13237_v3 = vadd.f32 %v6611_v62, %v6498_v25  ;;  %v6613_v6 = vpop.f32.mrf.mxu1  ;;  %v13251_v25 = vpop.permute.xlu0 %6722 }
 0x5e4   :  { %v6500_v41 = vpop.f32.mrf.mxu0 }
 0x5e5   :  { %14478 = vst [vmem:[#allocation114_spill] sm:$0xff] %v13237_v3  ;;  %7282 = vrot.lane.b32.xlu0 %v13237_v3, %s9178_s21  ;;  %v6615_v49 = vpop.f32.mrf.mxu1 }
 0x5e6   :  { %v6502_v11 = vpop.f32.mrf.mxu0 }
 0x5e7   :  { %v13245_v35 = vadd.f32 %v6615_v49, %v6502_v11  ;;  %v6619_v34 = vpop.f32.mrf.mxu1  ;;  %v13265_v48 = vpop.permute.xlu0 %6712 }
 0x5e8   :  { %v6506_v14 = vpop.f32.mrf.mxu0 }
 0x5e9   :  { %14479 = vst [vmem:[#allocation126_spill] sm:$0xff] %v13245_v35  ;;  %v13247_v7 = vadd.f32 %v6619_v34, %v6506_v14  ;;  %7284 = vrot.lane.b32.xlu1 %v13245_v35, %s9178_s21  ;;  %v6621_v62 = vpop.f32.mrf.mxu1 }
 0x5ea   :  { %v6508_v56 = vpop.f32.mrf.mxu0 }
 0x5eb   :  { %14480 = vst [vmem:[#allocation67_spill] sm:$0xff] %v13247_v7  ;;  %7126 = vrot.lane.b32.xlu0 %v13247_v7, %s9178_s21  ;;  %v6623_v3 = vpop.f32.mrf.mxu1  ;;  %v13257_v49 = vadd.f32 %v6621_v62, %v6508_v56 }
 0x5ec   :  { %v6510_v8 = vpop.f32.mrf.mxu0 }
 0x5ed   :  { %14481 = vst [vmem:[#allocation11_spill] sm:$0xff] %v13257_v49  ;;  %v13259_v11 = vadd.f32 %v6623_v3, %v6510_v8  ;;  %v6625_v14 = vpop.f32.mrf.mxu1  ;;  %v13271_v3 = vpop.permute.xlu1 %6717 }
 0x5ee   :  { %v6512_v34 = vpop.f32.mrf.mxu0 }
 0x5ef   :  { %14482 = vst [vmem:[#allocation112_spill] sm:$0xff] %v13259_v11  ;;  %7286 = vrot.lane.b32.xlu0 %v13257_v49, %s9178_s21  ;;  %7128 = vrot.lane.b32.xlu1 %v13259_v11, %s9178_s21  ;;  %v6629_v35 = vpop.f32.mrf.mxu1  ;;  %v13267_v17 = vadd.f32 %v6625_v14, %v6512_v34  ;;  %v6943_v11 = vpop.permute.xlu0 %6942 }
 0x5f0   :  { %v6516_v7 = vpop.f32.mrf.mxu0 }
 0x5f1   :  { %14483 = vst [vmem:[#allocation115_spill] sm:$0xff] %v13267_v17  ;;  %v13269_v2 = vadd.f32 %v6629_v35, %v6516_v7  ;;  %v6631_v56 = vpop.f32.mrf.mxu1 }
 0x5f2   :  { %v6518_v62 = vpop.f32.mrf.mxu0  ;;  %v6945_v35 = vpop.permute.xlu1 %6944 }
 0x5f3   :  { %14484 = vst [vmem:[#allocation25_spill] sm:$0xff] %v13269_v2  ;;  %7130 = vrot.lane.b32.xlu0 %v13269_v2, %s9178_s21  ;;  %7288 = vrot.lane.b32.xlu1 %v13267_v17, %s9178_s21  ;;  %v6633_v8 = vpop.f32.mrf.mxu1  ;;  %v13277_v31 = vadd.f32 %v6631_v56, %v6518_v62  ;;  %v13287_v17 = vadd.f32 %v13167_v53, %v13169_v15 }
 0x5f4   :  { %v6520_v49 = vpop.f32.mrf.mxu0  ;;  %v13299_v62 = vadd.f32 %v13175_v33, %v13177_v10 }
 0x5f5   :  { %v13279_v18 = vadd.f32 %v6633_v8, %v6520_v49  ;;  %v6635_v7 = vpop.f32.mrf.mxu1  ;;  %v13301_v8 = vadd.f32 %v6609_v47, %v6496_v21 }
 0x5f6   :  { %v6522_v14 = vpop.f32.mrf.mxu0  ;;  %v6947_v34 = vpop.permute.xlu0 %6946 }
 0x5f7   :  { %7290 = vrot.lane.b32.xlu0 %v13277_v31, %s9178_s21  ;;  %7132 = vrot.lane.b32.xlu1 %v13279_v18, %s9178_s21  ;;  %v13289_v2 = vadd.f32 %v6635_v7, %v6522_v14  ;;  %v13311_v14 = vadd.f32 %v6613_v6, %v6500_v41  ;;  %v13335_v6 = vadd.f32 %v13213_v45, %v13215_v57 }
 0x5f8   :  { %v6991_v57 = vmax.f32 %v13053_v43, %v6945_v35 }
 0x5fa   :  { %v6949_v49 = vpop.permute.xlu1 %6948 }
 0x5fb   :  { %7106 = vrot.lane.b32.xlu0 %v13287_v17, %s9178_s21  ;;  %7292 = vrot.lane.b32.xlu1 %v13289_v2, %s9178_s21 }
 0x5fc   :  { %v13295_v56 = vpop.permute.xlu0 %6790 }
 0x5ff   :  { %7122 = vrot.lane.b32.xlu0 %v13301_v8, %s9178_s21  ;;  %7108 = vrot.lane.b32.xlu1 %v13299_v62, %s9178_s21 }
 0x600   :  { %v13307_v53 = vpop.permute.xlu0 %6950  ;;  %v13309_v15 = vpop.permute.xlu1 %6792 }
 0x603   :  { %6786 = vrot.lane.b32.xlu0 %v13055_v20, %s9178_s21  ;;  %7124 = vrot.lane.b32.xlu1 %v13311_v14, %s9178_s21 }
 0x604   :  { %v13317_v33 = vpop.permute.xlu1 %6952  ;;  %v13319_v10 = vpop.permute.xlu0 %6794 }
 0x607   :  { %6802 = vrot.lane.b32.xlu0 %v13111_v12, %s9178_s21  ;;  %6788 = vrot.lane.b32.xlu1 %v13061_v1, %s9178_s21  ;;  %v6990_v12 = vmax.f32 %v13047_v38, %v6943_v11 }
 0x608   :  { %v13325_v47 = vpop.permute.xlu1 %6796  ;;  %v13327_v41 = vpop.permute.xlu0 %6954 }
 0x60b   :  { %7102 = vrot.lane.b32.xlu0 %v13155_v52, %s9178_s21  ;;  %6804 = vrot.lane.b32.xlu1 %v13117_v54, %s9178_s21  ;;  %v13347_v52 = vadd.f32 %v13223_v4, %v13225_v40 }
 0x60c   :  { %v13337_v21 = vpop.permute.xlu1 %6956 }
 0x60e   :  { %v6959_v7 = vpop.permute.xlu0 %6958 }
 0x60f   :  { %v6998_v1 = vmax.f32 %v13101_v63, %v6959_v7  ;;  %7118 = vrot.lane.b32.xlu0 %v13335_v6, %s9178_s21  ;;  %7104 = vrot.lane.b32.xlu1 %v13161_v27, %s9178_s21  ;;  %v6992_v7 = vmax.f32 %v13059_v59, %v6947_v34 }
 0x611   :  { %v7006_v54 = vmax.f32 %v6990_v12, %v6998_v1  ;;  %v6993_v12 = vmax.f32 %v13065_v58, %v6949_v49  ;;  %v6834_v58 = vmax.f32 %v13067_v26, %v13295_v56  ;;  %v7448_v56 = vld [vmem:[%s13729_s6 + $0x58] sm:$0xff] }
 0x612   :  { %v6961_v45 = vpop.permute.xlu1 %6960 }
 0x613   :  { %v7014_v20 = vadd.f32 %v7006_v54, %v13265_v48  ;;  %v6999_v38 = vmax.f32 %v13109_v32, %v6961_v45  ;;  %6782 = vrot.lane.b32.xlu0 %v13045_v51, %s9178_s21  ;;  %7120 = vrot.lane.b32.xlu1 %v13347_v52, %s9178_s21  ;;  %v7451_v32 = vld [vmem:[%s13729_s6 + $0x70] sm:$0xff] }
 0x615   :  { %v7022_v63 = vmax.f32 %v7014_v20, 0.0  ;;  %v7007_v11 = vmax.f32 %v6991_v57, %v6999_v38  ;;  %v7450_v57 = vld [vmem:[%s13729_s6 + $0x68] sm:$0xff]  ;;  %v7449_v38 = vld [vmem:[%s13729_s6 + $0x60] sm:$0xff] }
 0x616   :  { %v6963_v4 = vpop.permute.xlu0 %6962 }
 0x617   :  { %v8762_v40 = vpack.c.bf16 %v7022_v63, %v7022_v63  ;;  %v7015_v1 = vadd.f32 %v7007_v11, %v13271_v3  ;;  %v7000_v43 = vmax.f32 %v13115_v36, %v6963_v4  ;;  %6798 = vrot.lane.b32.xlu0 %v13099_v30, %s9178_s21  ;;  %6784 = vrot.lane.b32.xlu1 %v13049_v61, %s9178_s21 }
 0x619   :  { %7062 = vst.msk [vmem:[#allocation7 + $0x20] sm:$0xf] %vm2687_vm3, %v8762_v40  ;;  %v7023_v20 = vmax.f32 %v7015_v1, 0.0  ;;  %v7008_v59 = vmax.f32 %v6992_v7, %v7000_v43  ;;  %v6994_v40 = vmax.f32 %v13073_v5, %v13307_v53  ;;  %v6835_v1 = vmax.f32 %v13075_v13, %v13309_v15  ;;  %v7446_v13 = vld [vmem:[%s13729_s6 + $0x48] sm:$0xff] }
 0x61a   :  { %v6965_v54 = vpop.permute.xlu1 %6964 }
 0x61b   :  { %v8763_v35 = vpack.c.bf16 %v7023_v20, %v7023_v20  ;;  %v7016_v36 = vadd.f32 %v7008_v59, %v13251_v25  ;;  %v7001_v34 = vmax.f32 %v13121_v37, %v6965_v54  ;;  %7524 = vperm.xlu0 %8920, %v7451_v32   ;;  %6800 = vrot.lane.b32.xlu1 %v13105_v29, %s9178_s21 }
 0x61c   :  { %v6807_v45 = vpop.permute.xlu0 %6806 }
 0x61d   :  { %7063 = vst.msk [vmem:[#allocation7 + $0x24] sm:$0xf] %vm2687_vm3, %v8763_v35  ;;  %v7024_v49 = vmax.f32 %v7016_v36, 0.0  ;;  %v7009_v37 = vmax.f32 %v6993_v12, %v7001_v34  ;;  %v6842_v63 = vmax.f32 %v13123_v60, %v6807_v45  ;;  %v7447_v60 = vld [vmem:[%s13729_s6 + $0x50] sm:$0xff]  ;;  %v9141_v35 = vld [vmem:[%s13730_s5 + $0x4] ss:$8 sps:$4 sm:$0xff]   ;;  %v6995_v36 = vmax.f32 %v13081_v9, %v13317_v33 }
 0x61e   :  { %7732 = vmatprep.mubr.bf16.mxu0 %v9141_v35 }
 0x61f   :  { %v8764_v11 = vpack.c.bf16 %v7024_v49, %v7024_v49  ;;  %v7017_v7 = vadd.f32 %v7009_v37, %v13255_v0  ;;  %v6850_v4 = vmax.f32 %v6834_v58, %v6842_v63  ;;  %7519 = vperm.xlu0 %8920, %v7450_v57   ;;  %7514 = vperm.xlu1 %8921, %v7449_v38  }
 0x620   :  { %v6967_v43 = vpop.permute.xlu0 %6966  ;;  %v6809_v26 = vpop.permute.xlu1 %6808  ;;  %v6836_v49 = vmax.f32 %v13083_v42, %v13319_v10  ;;  %v7443_v42 = vld [vmem:[%s13729_s6 + $0x30] sm:$0xff] }
 0x621   :  { %7064 = vst.msk [vmem:[#allocation7 + $0x28] sm:$0xf] %vm2687_vm3, %v8764_v11  ;;  %v7025_v32 = vmax.f32 %v7017_v7, 0.0  ;;  %v6858_v20 = vadd.f32 %v6850_v4, %v13239_v23  ;;  %v7002_v5 = vmax.f32 %v13129_v24, %v6967_v43  ;;  %v6843_v53 = vmax.f32 %v13131_v22, %v6809_v26  ;;  %v7445_v22 = vld [vmem:[%s13729_s6 + $0x40] sm:$0xff] }
 0x622   :  { %v6996_v11 = vmax.f32 %v13089_v28, %v13327_v41  ;;  %v6837_v28 = vmax.f32 %v13091_v44, %v13325_v47  ;;  %v7441_v44 = vld [vmem:[%s13729_s6 + $0x20] sm:$0xff] }
 0x623   :  { %v8765_v15 = vpack.c.bf16 %v7025_v32, %v7025_v32  ;;  %v6866_v59 = vmax.f32 %v6858_v20, 0.0  ;;  %v7010_v12 = vmax.f32 %v6994_v40, %v7002_v5  ;;  %v6851_v54 = vmax.f32 %v6835_v1, %v6843_v53  ;;  %7509 = vperm.xlu0 %8920, %v7448_v56   ;;  %7504 = vperm.xlu1 %8921, %v7447_v60  }
 0x624   :  { %v6969_v24 = vpop.permute.xlu1 %6968  ;;  %v6811_v34 = vpop.permute.xlu0 %6810 }
 0x625   :  { %7065 = vst.msk [vmem:[#allocation7 + $0x2c] sm:$0xf] %vm2687_vm3, %v8765_v15  ;;  %v8758_v45 = vpack.c.bf16 %v6866_v59, %v6866_v59  ;;  %v7018_v57 = vadd.f32 %v7010_v12, %v13239_v23  ;;  %v6859_v38 = vadd.f32 %v6851_v54, %v13243_v55  ;;  %v7003_v58 = vmax.f32 %v13137_v39, %v6969_v24  ;;  %v7444_v39 = vld [vmem:[%s13729_s6 + $0x38] sm:$0xff]  ;;  %v14486_v15 = vld [vmem:[#allocation102_spill] sm:$0xff]  ;;  %v14487_v54 = vld [vmem:[#allocation23_spill] sm:$0xff] }
 0x626   :  { %v6844_v9 = vmax.f32 %v13139_v50, %v6811_v34 }
 0x627   :  { %6906 = vst.msk [vmem:[#allocation7 + $0x10] sm:$0xf] %vm2687_vm3, %v8758_v45  ;;  %v7026_v33 = vmax.f32 %v7018_v57, 0.0  ;;  %v6867_v37 = vmax.f32 %v6859_v38, 0.0  ;;  %v7011_v63 = vmax.f32 %v6995_v36, %v7003_v58  ;;  %7499 = vperm.xlu0 %8920, %v7446_v13   ;;  %7494 = vperm.xlu1 %8921, %v7445_v22   ;;  %v7439_v22 = vld [vmem:[%s13729_s6 + $0x10] sm:$0xff] }
 0x628   :  { %v6852_v7 = vmax.f32 %v6836_v49, %v6844_v9  ;;  %v6971_v4 = vpop.permute.xlu0 %6970  ;;  %v6813_v40 = vpop.permute.xlu1 %6812  ;;  %v7438_v49 = vld [vmem:[%s13729_s6 + $0x8] sm:$0xff]  ;;  %v7437_v9 = vld [vmem:[%s13729_s6] sm:$0xff] }
 0x629   :  { %v8766_v50 = vpack.c.bf16 %v7026_v33, %v7026_v33  ;;  %v8759_v10 = vpack.c.bf16 %v6867_v37, %v6867_v37  ;;  %v7019_v1 = vadd.f32 %v7011_v63, %v13243_v55  ;;  %v7004_v43 = vmax.f32 %v13145_v19, %v6971_v4  ;;  %v7442_v19 = vld [vmem:[%s13729_s6 + $0x28] sm:$0xff]  ;;  %v7838_v63 = vld [vmem:[%s13731_s8 + $0x40] sm:$0xff] }
 0x62a   :  { %v6860_v41 = vadd.f32 %v6852_v7, %v13229_v46  ;;  %v6845_v26 = vmax.f32 %v13147_v16, %v6813_v40  ;;  %v14485_v16 = vld [vmem:[#allocation28_spill] sm:$0xff] }
 0x62b   :  { %7066 = vst.msk [vmem:[#allocation7 + $0x30] sm:$0xf] %vm2687_vm3, %v8766_v50  ;;  %6907 = vst.msk [vmem:[#allocation7 + $0x14] sm:$0xf] %vm2687_vm3, %v8759_v10  ;;  %v7027_v56 = vmax.f32 %v7019_v1, 0.0  ;;  %v7012_v60 = vmax.f32 %v6996_v11, %v7004_v43  ;;  %7489 = vperm.xlu0 %8920, %v7444_v39   ;;  %7484 = vperm.xlu1 %8921, %v7443_v42   ;;  %v6997_v47 = vmax.f32 %v14485_v16, %v13337_v21  ;;  %v7440_v21 = vld [vmem:[%s13729_s6 + $0x18] sm:$0xff] }
 0x62c   :  { %v6868_v32 = vmax.f32 %v6860_v41, 0.0  ;;  %v6853_v20 = vmax.f32 %v6837_v28, %v6845_v26  ;;  %v6973_v5 = vpop.permute.xlu1 %6972  ;;  %v7840_v11 = vld [vmem:[%s13731_s8 + $0x50] sm:$0xf]  ;;  %v7839_v39 = vld [vmem:[%s13731_s8 + $0x48] sm:$0xff]  ;;  %v7834_v10 = vld [vmem:[%s13731_s8 + $0x20] sm:$0xff] }
 0x62d   :  { %v8767_v53 = vpack.c.bf16 %v7027_v56, %v7027_v56  ;;  %v7020_v13 = vadd.f32 %v7012_v60, %v13229_v46  ;;  %v7005_v59 = vmax.f32 %v14486_v15, %v6973_v5  ;;  %v7836_v40 = vld [vmem:[%s13731_s8 + $0x30] sm:$0xff]  ;;  %v7837_v1 = vld [vmem:[%s13731_s8 + $0x38] sm:$0xff]  ;;  %v7835_v26 = vld [vmem:[%s13731_s8 + $0x28] sm:$0xff] }
 0x62e   :  { %v8760_v12 = vpack.c.bf16 %v6868_v32, %v6868_v32  ;;  %v6861_v35 = vadd.f32 %v6853_v20, %v14487_v54  ;;  %v7832_v41 = vld [vmem:[%s13731_s8 + $0x10] sm:$0xff]  ;;  %v7830_v32 = vld [vmem:[%s13731_s8] sm:$0xff]  ;;  %v7833_v20 = vld [vmem:[%s13731_s8 + $0x18] sm:$0xff] }
 0x62f   :  { %7067 = vst.msk [vmem:[#allocation7 + $0x34] sm:$0xf] %vm2687_vm3, %v8767_v53  ;;  %v7028_v36 = vmax.f32 %v7020_v13, 0.0  ;;  %v7013_v24 = vmax.f32 %v6997_v47, %v7005_v59  ;;  %7479 = vperm.xlu0 %8920, %v7442_v19   ;;  %7474 = vperm.xlu1 %8921, %v7441_v44   ;;  %v7263_v37 = vpop.permute.xlu0 %7262  ;;  %v8046_v44 = vld [vmem:[%s13732_s10] sm:$0xff]  ;;  %v7831_v16 = vld [vmem:[%s13731_s8 + $0x8] sm:$0xff]  ;;  %v14488_v13 = vld [vmem:[#allocation92_spill] sm:$0xff] }
 0x630   :  { %6908 = vst.msk [vmem:[#allocation7 + $0x18] sm:$0xf] %vm2687_vm3, %v8760_v12  ;;  %v6869_v34 = vmax.f32 %v6861_v35, 0.0  ;;  %v7310_v15 = vmax.f32 %v14488_v13, %v7263_v37  ;;  %v14489_v59 = vld [vmem:[#allocation51_spill] sm:$0xff] }
 0x631   :  { %v8768_v45 = vpack.c.bf16 %v7028_v36, %v7028_v36  ;;  %v7021_v57 = vadd.f32 %v7013_v24, %v14487_v54  ;;  %v8047_v35 = vld [vmem:[%s13732_s10 + $0x8] sm:$0x3] }
 0x632   :  { %v8761_v38 = vpack.c.bf16 %v6869_v34, %v6869_v34  ;;  %v14490_v34 = vld [vmem:[#allocation96_spill] sm:$0xff] }
 0x633   :  { %7068 = vst.msk [vmem:[#allocation7 + $0x38] sm:$0xf] %vm2687_vm3, %v8768_v45  ;;  %v7029_v58 = vmax.f32 %v7021_v57, 0.0  ;;  %7469 = vperm.xlu0 %8920, %v7440_v21   ;;  %7464 = vperm.xlu1 %8921, %v7439_v22   ;;  %v7265_v7 = vpop.permute.xlu1 %7264  ;;  %v14491_v45 = vld [vmem:[#allocation88_spill] sm:$0xff] }
 0x634   :  { %6909 = vst.msk [vmem:[#allocation7 + $0x1c] sm:$0xf] %vm2687_vm3, %v8761_v38  ;;  %v7311_v21 = vmax.f32 %v14490_v34, %v7265_v7  ;;  %v14494_v7 = vld [vmem:[#allocation107_spill] sm:$0xff] }
 0x635   :  { %v8769_v33 = vpack.c.bf16 %v7029_v58, %v7029_v58 }
 0x637   :  { %7069 = vst.msk [vmem:[#allocation7 + $0x3c] sm:$0xf] %vm2687_vm3, %v8769_v33  ;;  %7459 = vperm.xlu0 %8920, %v7438_v49   ;;  %7454 = vperm.xlu1 %8921, %v7437_v9   ;;  %v7267_v4 = vpop.permute.xlu0 %7266  ;;  %v14492_v9 = vld [vmem:[#allocation91_spill] sm:$0xff] }
 0x638   :  { %v7312_v33 = vmax.f32 %v14492_v9, %v7267_v4  ;;  %v14501_v9 = vld [vmem:[#allocation112_spill] sm:$0xff] }
 0x63b   :  { %7883 = vperm.xlu0 %8920, %v7838_v63   ;;  %7893 = vperm.xlu1 %8921, %v7840_v11   ;;  %v7269_v42 = vpop.permute.xlu1 %7268  ;;  %v14493_v11 = vld [vmem:[#allocation114_spill] sm:$0xff] }
 0x63d   :  { %v7111_v50 = vpop.permute.xlu0 %7110 }
 0x63f   :  { %7873 = vperm.xlu0 %8920, %v7836_v40   ;;  %7888 = vperm.xlu1 %8921, %v7839_v39  }
 0x641   :  { %v13479_v43 = vpop.permute.xlu0 %7270  ;;  %v13481_v28 = vpop.permute.xlu1 %7112 }
 0x643   :  { %7863 = vperm.xlu0 %8920, %v7834_v10   ;;  %7878 = vperm.xlu1 %8921, %v7837_v1  }
 0x645   :  { %v13489_v56 = vpop.permute.xlu0 %7114  ;;  %v13491_v60 = vpop.permute.xlu1 %7272 }
 0x647   :  { %7853 = vperm.xlu0 %8920, %v7832_v41   ;;  %7868 = vperm.xlu1 %8921, %v7835_v26   ;;  %v7313_v41 = vmax.f32 %v14494_v7, %v7269_v42  ;;  %v14498_v42 = vld [vmem:[#allocation40_spill] sm:$0xff] }
 0x648   :  { %v7314_v34 = vmax.f32 %v14498_v42, %v13479_v43  ;;  %v14502_v43 = vld [vmem:[#allocation33_spill] sm:$0xff] }
 0x649   :  { %v13499_v5 = vpop.permute.xlu1 %7116  ;;  %v13501_v19 = vpop.permute.xlu0 %7274 }
 0x64b   :  { %7843 = vperm.xlu0 %8920, %v7830_v32   ;;  %7858 = vperm.xlu1 %8921, %v7833_v20   ;;  %v14495_v20 = vld [vmem:[#allocation126_spill] sm:$0xff] }
 0x64d   :  { %v13509_v47 = vpop.permute.xlu1 %7276 }
 0x64f   :  { %v7279_v53 = vpop.permute.xlu0 %7278  ;;  %8050 = vperm.xlu0 %8920, %v8046_v44   ;;  %7848 = vperm.xlu1 %8921, %v7831_v16  }
 0x650   :  { %v7318_v12 = vmax.f32 %v14489_v59, %v7279_v53  ;;  %v14496_v53 = vld [vmem:[#allocation129_spill] sm:$0xff]  ;;  %v14497_v59 = vld [vmem:[#allocation67_spill] sm:$0xff] }
 0x651   :  { %v7154_v4 = vmax.f32 %v14496_v53, %v7111_v50 }
 0x652   :  { %v7326_v36 = vmax.f32 %v7310_v15, %v7318_v12 }
 0x653   :  { %8055 = vperm.xlu1 %8921, %v8047_v35   ;;  %v7281_v24 = vpop.permute.xlu1 %7280 }
 0x654   :  { %v7334_v22 = vadd.f32 %v7326_v36, %v13265_v48  ;;  %v7319_v57 = vmax.f32 %v14491_v45, %v7281_v24 }
 0x656   :  { %v7342_v38 = vmax.f32 %v7334_v22, 0.0  ;;  %v7327_v58 = vmax.f32 %v7311_v21, %v7319_v57  ;;  %v14499_v21 = vld [vmem:[#allocation101_spill] sm:$0xff] }
 0x657   :  { %v7283_v49 = vpop.permute.xlu0 %7282  ;;  %v7155_v22 = vmax.f32 %v14499_v21, %v13481_v28 }
 0x658   :  { %v8778_v37 = vpack.c.bf16 %v7342_v38, %v7342_v38  ;;  %v7335_v63 = vadd.f32 %v7327_v58, %v13271_v3  ;;  %v7320_v40 = vmax.f32 %v14493_v11, %v7283_v49  ;;  %v14500_v58 = vld [vmem:[#allocation11_spill] sm:$0xff] }
 0x65a   :  { %7382 = vst.msk [vmem:[#allocation7 + $0x60] sm:$0xf] %vm2687_vm3, %v8778_v37  ;;  %v7343_v39 = vmax.f32 %v7335_v63, 0.0  ;;  %v7328_v10 = vmax.f32 %v7312_v33, %v7320_v40 }
 0x65b   :  { %v7285_v1 = vpop.permute.xlu1 %7284 }
 0x65c   :  { %v8779_v26 = vpack.c.bf16 %v7343_v39, %v7343_v39  ;;  %v7336_v32 = vadd.f32 %v7328_v10, %v13251_v25  ;;  %v7321_v44 = vmax.f32 %v14495_v20, %v7285_v1  ;;  %v7156_v39 = vmax.f32 %v14502_v43, %v13489_v56  ;;  %v14504_v20 = vld [vmem:[#allocation20_spill] sm:$0xff] }
 0x65d   :  { %v7127_v16 = vpop.permute.xlu0 %7126 }
 0x65e   :  { %7383 = vst.msk [vmem:[#allocation7 + $0x64] sm:$0xf] %vm2687_vm3, %v8779_v26  ;;  %v7344_v13 = vmax.f32 %v7336_v32, 0.0  ;;  %v7329_v15 = vmax.f32 %v7313_v41, %v7321_v44  ;;  %v7162_v12 = vmax.f32 %v14497_v59, %v7127_v16  ;;  %v14503_v26 = vld [vmem:[#allocation25_spill] sm:$0xff]  ;;  %v7315_v44 = vmax.f32 %v14504_v20, %v13491_v60  ;;  %v14505_v16 = vld [vmem:[#allocation115_spill] sm:$0xff] }
 0x65f   :  { %v14507_v60 = vld [vmem:[#allocation131_spill] sm:$0xff] }
 0x660   :  { %v8780_v35 = vpack.c.bf16 %v7344_v13, %v7344_v13  ;;  %v7337_v36 = vadd.f32 %v7329_v15, %v13255_v0  ;;  %v7170_v24 = vmax.f32 %v7154_v4, %v7162_v12  ;;  %v14506_v15 = vld [vmem:[#allocation110_spill] sm:$0xff]  ;;  %v7157_v21 = vmax.f32 %v14507_v60, %v13499_v5 }
 0x661   :  { %v7287_v45 = vpop.permute.xlu0 %7286  ;;  %v7129_v57 = vpop.permute.xlu1 %7128  ;;  %v7316_v59 = vmax.f32 %v14506_v15, %v13501_v19  ;;  %v14512_v60 = vld [vmem:[#allocation58_spill] sm:$0xff] }
 0x662   :  { %7384 = vst.msk [vmem:[#allocation7 + $0x68] sm:$0xf] %vm2687_vm3, %v8780_v35  ;;  %v7345_v50 = vmax.f32 %v7337_v36, 0.0  ;;  %v7178_v38 = vadd.f32 %v7170_v24, %v13239_v23  ;;  %v7322_v49 = vmax.f32 %v14500_v58, %v7287_v45  ;;  %v7163_v33 = vmax.f32 %v14501_v9, %v7129_v57  ;;  %v14508_v9 = vld [vmem:[#allocation122_spill] sm:$0xff] }
 0x664   :  { %v8781_v37 = vpack.c.bf16 %v7345_v50, %v7345_v50  ;;  %v7186_v63 = vmax.f32 %v7178_v38, 0.0  ;;  %v7330_v11 = vmax.f32 %v7314_v34, %v7322_v49  ;;  %v7171_v40 = vmax.f32 %v7155_v22, %v7163_v33 }
 0x665   :  { %v7131_v10 = vpop.permute.xlu0 %7130  ;;  %v7289_v28 = vpop.permute.xlu1 %7288 }
 0x666   :  { %7385 = vst.msk [vmem:[#allocation7 + $0x6c] sm:$0xf] %vm2687_vm3, %v8781_v37  ;;  %v8774_v1 = vpack.c.bf16 %v7186_v63, %v7186_v63  ;;  %v7338_v7 = vadd.f32 %v7330_v11, %v13239_v23  ;;  %v7179_v41 = vadd.f32 %v7171_v40, %v13243_v55  ;;  %v7164_v32 = vmax.f32 %v14503_v26, %v7131_v10 }
 0x667   :  { %v7323_v53 = vmax.f32 %v14505_v16, %v7289_v28 }
 0x668   :  { %7226 = vst.msk [vmem:[#allocation7 + $0x50] sm:$0xf] %vm2687_vm3, %v8774_v1  ;;  %v7346_v4 = vmax.f32 %v7338_v7, 0.0  ;;  %v7187_v56 = vmax.f32 %v7179_v41, 0.0  ;;  %v7172_v13 = vmax.f32 %v7156_v39, %v7164_v32 }
 0x669   :  { %v7331_v12 = vmax.f32 %v7315_v44, %v7323_v53  ;;  %v7291_v35 = vpop.permute.xlu0 %7290  ;;  %v7133_v23 = vpop.permute.xlu1 %7132 }
 0x66a   :  { %v8782_v36 = vpack.c.bf16 %v7346_v4, %v7346_v4  ;;  %v8775_v24 = vpack.c.bf16 %v7187_v56, %v7187_v56  ;;  %v7180_v42 = vadd.f32 %v7172_v13, %v13229_v46  ;;  %v7324_v34 = vmax.f32 %v13277_v31, %v7291_v35  ;;  %v14509_v56 = vld [vmem:[#allocation57_spill] sm:$0xff] }
 0x66b   :  { %v7339_v22 = vadd.f32 %v7331_v12, %v13243_v55  ;;  %v7165_v45 = vmax.f32 %v13279_v18, %v7133_v23  ;;  %v7317_v31 = vmax.f32 %v14508_v9, %v13509_v47  ;;  %v14513_v9 = vld [vmem:[#allocation27_spill] sm:$0xff] }
 0x66c   :  { %7386 = vst.msk [vmem:[#allocation7 + $0x70] sm:$0xf] %vm2687_vm3, %v8782_v36  ;;  %7227 = vst.msk [vmem:[#allocation7 + $0x54] sm:$0xf] %vm2687_vm3, %v8775_v24  ;;  %v7188_v19 = vmax.f32 %v7180_v42, 0.0  ;;  %v7332_v57 = vmax.f32 %v7316_v59, %v7324_v34  ;;  %v14510_v59 = vld [vmem:[#allocation45_spill] sm:$0xff] }
 0x66d   :  { %v7347_v50 = vmax.f32 %v7339_v22, 0.0  ;;  %v7173_v38 = vmax.f32 %v7157_v21, %v7165_v45  ;;  %v7107_v58 = vpop.permute.xlu0 %7106  ;;  %v7293_v49 = vpop.permute.xlu1 %7292  ;;  %v14511_v42 = vld [vmem:[#allocation99_spill] sm:$0xff] }
 0x66e   :  { %v8776_v33 = vpack.c.bf16 %v7188_v19, %v7188_v19  ;;  %v7340_v5 = vadd.f32 %v7332_v57, %v13229_v46  ;;  %v7325_v55 = vmax.f32 %v13289_v2, %v7293_v49  ;;  %v7152_v47 = vmax.f32 %v13287_v17, %v7107_v58  ;;  %v9124_v57 = vld [vmem:[#allocation7 + $0x38] sm:$0xff]  }
 0x66f   :  { %v8783_v37 = vpack.c.bf16 %v7347_v50, %v7347_v50  ;;  %v7181_v18 = vadd.f32 %v7173_v38, %v14487_v54 }
 0x670   :  { %7228 = vst.msk [vmem:[#allocation7 + $0x58] sm:$0xf] %vm2687_vm3, %v8776_v33  ;;  %v7348_v63 = vmax.f32 %v7340_v5, 0.0  ;;  %v7333_v11 = vmax.f32 %v7317_v31, %v7325_v55 }
 0x671   :  { %7387 = vst.msk [vmem:[#allocation7 + $0x74] sm:$0xf] %vm2687_vm3, %v8783_v37  ;;  %v7189_v40 = vmax.f32 %v7181_v18, 0.0  ;;  %v7123_v43 = vpop.permute.xlu0 %7122  ;;  %v7109_v39 = vpop.permute.xlu1 %7108  ;;  %v9126_v37 = vld [vmem:[#allocation7 + $0x30] sm:$0xff]  }
 0x672   :  { %v8784_v10 = vpack.c.bf16 %v7348_v63, %v7348_v63  ;;  %v7341_v28 = vadd.f32 %v7333_v11, %v14487_v54  ;;  %v7160_v46 = vmax.f32 %v13301_v8, %v7123_v43  ;;  %v7153_v44 = vmax.f32 %v13299_v62, %v7109_v39  ;;  %v9127_v11 = vld [vmem:[#allocation7 + $0x68] sm:$0xff]  }
 0x673   :  { %v8777_v2 = vpack.c.bf16 %v7189_v40, %v7189_v40 }
 0x674   :  { %7388 = vst.msk [vmem:[#allocation7 + $0x78] sm:$0xf] %vm2687_vm3, %v8784_v10  ;;  %v7349_v1 = vmax.f32 %v7341_v28, 0.0  ;;  %v7168_v7 = vmax.f32 %v7152_v47, %v7160_v46  ;;  %v9128_v47 = vld [vmem:[#allocation7 + $0x28] sm:$0xff]  }
 0x675   :  { %7229 = vst.msk [vmem:[#allocation7 + $0x5c] sm:$0xf] %vm2687_vm3, %v8777_v2  ;;  %v6787_v41 = vpop.permute.xlu0 %6786  ;;  %v7125_v26 = vpop.permute.xlu1 %7124  ;;  %v9129_v2 = vld [vmem:[#allocation7 + $0x60] sm:$0xff]  }
 0x676   :  { %v8785_v32 = vpack.c.bf16 %v7349_v1, %v7349_v1  ;;  %v7176_v20 = vadd.f32 %v7168_v7, %v13251_v25  ;;  %v7161_v17 = vmax.f32 %v13311_v14, %v7125_v26  ;;  %v6832_v13 = vmax.f32 %v14509_v56, %v6787_v41 }
 0x678   :  { %7389 = vst.msk [vmem:[#allocation7 + $0x7c] sm:$0xf] %vm2687_vm3, %v8785_v32  ;;  %v7184_v54 = vmax.f32 %v7176_v20, 0.0  ;;  %v7169_v8 = vmax.f32 %v7153_v44, %v7161_v17  ;;  %v9125_v58 = vld [vmem:[#allocation7 + $0x70] sm:$0xff]   ;;  %v9130_v32 = vld [vmem:[#allocation7 + $0x20] sm:$0xff]  }
 0x679   :  { %v6803_v16 = vpop.permute.xlu0 %6802  ;;  %v6789_v53 = vpop.permute.xlu1 %6788 }
 0x67a   :  { %v8772_v4 = vpack.c.bf16 %v7184_v54, %v7184_v54  ;;  %v7177_v15 = vadd.f32 %v7169_v8, %v13255_v0  ;;  %v6840_v12 = vmax.f32 %v14510_v59, %v6803_v16  ;;  %v6833_v34 = vmax.f32 %v14511_v42, %v6789_v53  ;;  %v9132_v53 = vld [vmem:[#allocation7 + $0x18] sm:$0xff]   ;;  %v9148_v42 = vld [vmem:[%s13730_s5 + $0x30] ss:$8 sps:$4 sm:$0xff]  }
 0x67c   :  { %7224 = vst.msk [vmem:[#allocation7 + $0x48] sm:$0xf] %vm2687_vm3, %v8772_v4  ;;  %v7185_v35 = vmax.f32 %v7177_v15, 0.0  ;;  %v6848_v23 = vmax.f32 %v6832_v13, %v6840_v12  ;;  %v9131_v44 = vld [vmem:[#allocation7 + $0x58] sm:$0xff]   ;;  %v9133_v4 = vld [vmem:[#allocation7 + $0x50] sm:$0xff]  }
 0x67d   :  { %v7103_v62 = vpop.permute.xlu0 %7102  ;;  %v6805_v36 = vpop.permute.xlu1 %6804  ;;  %v9134_v15 = vld [vmem:[#allocation7 + $0x10] sm:$0xff]  }
 0x67e   :  { %v8773_v14 = vpack.c.bf16 %v7185_v35, %v7185_v35  ;;  %v6856_v24 = vadd.f32 %v6848_v23, %v13251_v25  ;;  %v6841_v21 = vmax.f32 %v14512_v60, %v6805_v36  ;;  %v7150_v31 = vmax.f32 %v14513_v9, %v7103_v62  ;;  %v9144_v23 = vld [vmem:[%s13730_s5 + $0x14] ss:$8 sps:$4 sm:$0xff]   ;;  %v9142_v62 = vld [vmem:[%s13730_s5 + $0x10] ss:$8 sps:$4 sm:$0xff]   ;;  %v9147_v36 = vld [vmem:[%s13730_s5 + $0x24] ss:$8 sps:$4 sm:$0xff]  }
 0x67f   :  { %v9123_v22 = vld [vmem:[#allocation7 + $0x78] sm:$0xff]  }
 0x680   :  { %7225 = vst.msk [vmem:[#allocation7 + $0x4c] sm:$0xf] %vm2687_vm3, %v8773_v14  ;;  %v6864_v45 = vmax.f32 %v6856_v24, 0.0  ;;  %v6849_v19 = vmax.f32 %v6833_v34, %v6841_v21  ;;  %8786 = vmatprep.subr.bf16.mxu0 %v9123_v22  ;;  %v9145_v14 = vld [vmem:[%s13730_s5 + $0x20] ss:$8 sps:$4 sm:$0xff]  }
 0x681   :  { %v7119_v50 = vpop.permute.xlu0 %7118  ;;  %v7105_v38 = vpop.permute.xlu1 %7104  ;;  %8787 = vmatpush3.bf16.msra.mxu0 %v9124_v57  ;;  %v9150_v24 = vld [vmem:[%s13730_s5 + $0x34] ss:$8 sps:$4 sm:$0xff]   ;;  %v9153_v34 = vld [vmem:[%s13730_s5 + $0x44] ss:$8 sps:$4 sm:$0xff]   ;;  %v9151_v60 = vld [vmem:[%s13730_s5 + $0x40] ss:$8 sps:$4 sm:$0xff]  }
 0x682   :  { %v8756_v49 = vpack.c.bf16 %v6864_v45, %v6864_v45  ;;  %v6857_v33 = vadd.f32 %v6849_v19, %v13255_v0  ;;  %v7158_v25 = vmax.f32 %v13335_v6, %v7119_v50  ;;  %8788 = vmatprep.subr.bf16.mxu0 %v9125_v58  ;;  %v7151_v39 = vmax.f32 %v13161_v27, %v7105_v38  ;;  %v9156_v21 = vld [vmem:[%s13730_s5 + $0x54] ss:$8 sps:$4 sm:$0xff]   ;;  %v9154_v22 = vld [vmem:[%s13730_s5 + $0x50] ss:$8 sps:$4 sm:$0xff]   ;;  %v9159_v45 = vld [vmem:[%s13730_s5 + $0x64] ss:$8 sps:$4 sm:$0xff]  }
 0x683   :  { %v7404_v19 = vld [vmem:[%s13730_s5 + $0x70] sm:$0xff]  ;;  %v9157_v57 = vld [vmem:[%s13730_s5 + $0x60] ss:$8 sps:$4 sm:$0xff]  }
 0x684   :  { %6904 = vst.msk [vmem:[#allocation7 + $0x8] sm:$0xf] %vm2687_vm3, %v8756_v49  ;;  %v6865_v5 = vmax.f32 %v6857_v33, 0.0  ;;  %v7166_v55 = vmax.f32 %v7150_v31, %v7158_v25  ;;  %v8615_v50 = vcombine.high %v7404_v19, %v7404_v19  ;;  %v8614_v38 = vcombine.low %v7404_v19, %v7404_v19  ;;  %v9162_v49 = vld [vmem:[%s13733_s7] sm:$0xff]  }
 0x685   :  { %v6783_v18 = vpop.permute.xlu0 %6782  ;;  %v7121_v63 = vpop.permute.xlu1 %7120  ;;  %8789 = vmatpush3.bf16.msra.mxu0 %v9126_v37  ;;  %8887 = vmatprep.mubr.msk.bf16.mxu1 %vm7924_vm6, %v9162_v49 }
 0x686   :  { %v8757_v40 = vpack.c.bf16 %v6865_v5, %v6865_v5  ;;  %v7174_v43 = vadd.f32 %v7166_v55, %v13265_v48  ;;  %v7159_v10 = vmax.f32 %v13347_v52, %v7121_v63  ;;  %8790 = vmatprep.subr.bf16.mxu0 %v9127_v11  ;;  %v6830_v7 = vmax.f32 %v13045_v51, %v6783_v18 }
 0x688   :  { %6905 = vst.msk [vmem:[#allocation7 + $0xc] sm:$0xf] %vm2687_vm3, %v8757_v40  ;;  %v7182_v0 = vmax.f32 %v7174_v43, 0.0  ;;  %v7167_v6 = vmax.f32 %v7151_v39, %v7159_v10 }
 0x689   :  { %v6799_v28 = vpop.permute.xlu0 %6798  ;;  %v6785_v46 = vpop.permute.xlu1 %6784  ;;  %8791 = vmatpush3.bf16.msra.mxu0 %v9128_v47 }
 0x68a   :  { %v8770_v1 = vpack.c.bf16 %v7182_v0, %v7182_v0  ;;  %v7175_v41 = vadd.f32 %v7167_v6, %v13271_v3  ;;  %v6838_v26 = vmax.f32 %v13099_v30, %v6799_v28  ;;  %8792 = vmatprep.subr.bf16.mxu0 %v9129_v2  ;;  %v6831_v8 = vmax.f32 %v13049_v61, %v6785_v46  ;;  %v9135_v61 = vld [vmem:[#allocation7 + $0x48] sm:$0xff]  }
 0x68c   :  { %7222 = vst.msk [vmem:[#allocation7 + $0x40] sm:$0xf] %vm2687_vm3, %v8770_v1  ;;  %v7183_v52 = vmax.f32 %v7175_v41, 0.0  ;;  %v6846_v27 = vmax.f32 %v6830_v7, %v6838_v26 }
 0x68d   :  { %v6801_v20 = vpop.permute.xlu1 %6800  ;;  %8793 = vmatpush3.bf16.msra.mxu0 %v9130_v32 }
 0x68e   :  { %v8771_v17 = vpack.c.bf16 %v7183_v52, %v7183_v52  ;;  %v6854_v54 = vadd.f32 %v6846_v27, %v13265_v48  ;;  %v6839_v51 = vmax.f32 %v13105_v29, %v6801_v20  ;;  %8794 = vmatprep.subr.bf16.mxu0 %v9131_v44 }
 0x68f   :  { %v9136_v29 = vld [vmem:[#allocation7 + $0x8] sm:$0xff]  }
 0x690   :  { %7223 = vst.msk [vmem:[#allocation7 + $0x44] sm:$0xf] %vm2687_vm3, %v8771_v17  ;;  %v6862_v30 = vmax.f32 %v6854_v54, 0.0  ;;  %v6847_v16 = vmax.f32 %v6831_v8, %v6839_v51 }
 0x691   :  { %8795 = vmatpush3.bf16.msra.mxu0 %v9132_v53 }
 0x692   :  { %v8754_v56 = vpack.c.bf16 %v6862_v30, %v6862_v30  ;;  %v6855_v13 = vadd.f32 %v6847_v16, %v13271_v3  ;;  %8796 = vmatprep.subr.bf16.mxu0 %v9133_v4  ;;  %v9139_v3 = vld [vmem:[%s13730_s5] ss:$8 sps:$4 sm:$0xff]  }
 0x694   :  { %6902 = vst.msk [vmem:[#allocation7] sm:$0xf] %vm2687_vm3, %v8754_v56  ;;  %v6863_v48 = vmax.f32 %v6855_v13, 0.0 }
 0x695   :  { %8797 = vmatpush3.bf16.msra.mxu0 %v9134_v15 }
 0x696   :  { %v8755_v59 = vpack.c.bf16 %v6863_v48, %v6863_v48  ;;  %8798 = vmatprep.subr.bf16.mxu0 %v9135_v61  ;;  %v13643_v58 = vpop.permute.xlu0 %7524 }
 0x697   :  { %v9137_v12 = vld [vmem:[#allocation7 + $0x40] sm:$0xff]  }
 0x698   :  { %6903 = vst.msk [vmem:[#allocation7 + $0x4] sm:$0xf] %vm2687_vm3, %v8755_v59 }
 0x699   :  { %8799 = vmatpush3.bf16.msra.mxu0 %v9136_v29 }
 0x69a   :  { %8800 = vmatprep.subr.bf16.mxu0 %v9137_v12  ;;  %v13648_v9 = vpop.permute.xlu1 %7514  ;;  %v7520_v31 = vpop.permute.xlu0 %7519 }
 0x69e   :  { %v13651_v33 = vpop.permute.xlu1 %7504  ;;  %v13653_v25 = vpop.permute.xlu0 %7509 }
 0x69f   :  { %v9138_v35 = vld [vmem:[#allocation7] sm:$0xff]  }
 0x6a0   :  { %8801 = vmatpush3.bf16.msra.mxu0 %v9138_v35 }
 0x6a2   :  { %v13655_v5 = vpop.permute.xlu1 %7494  ;;  %v13657_v55 = vpop.permute.xlu0 %7499 }
 0x6a3   :  { %7733 = vmatmul.mubr.bf16.vlgmr.msra.gmra.mxu0 %v9139_v3 }
 0x6a4   :  { %7740 = vmatprep.mubr.bf16.mxu0 %v9144_v23 }
 0x6a6   :  { %v13659_v37 = vpop.permute.xlu1 %7484  ;;  %v13661_v18 = vpop.permute.xlu0 %7489 }
 0x6aa   :  { %v13663_v63 = vpop.permute.xlu1 %7474  ;;  %v13665_v11 = vpop.permute.xlu0 %7479 }
 0x6ab   :  { %7741 = vmatmul.mubr.bf16.gmra.mxu0 %v9142_v62 }
 0x6ac   :  { %7748 = vmatprep.mubr.bf16.mxu0 %v9147_v36 }
 0x6ae   :  { %v7465_v40 = vpop.permute.xlu1 %7464  ;;  %v7470_v39 = vpop.permute.xlu0 %7469 }
 0x6b2   :  { %v7455_v47 = vpop.permute.xlu1 %7454  ;;  %v7460_v1 = vpop.permute.xlu0 %7459 }
 0x6b3   :  { %7749 = vmatmul.mubr.bf16.gmra.mxu0 %v9145_v14 }
 0x6b4   :  { %7756 = vmatprep.mubr.bf16.mxu0 %v9150_v24 }
 0x6bb   :  { %7757 = vmatmul.mubr.bf16.gmra.mxu0 %v9148_v42 }
 0x6bc   :  { %7764 = vmatprep.mubr.bf16.mxu0 %v9153_v34 }
 0x6c3   :  { %7765 = vmatmul.mubr.bf16.gmra.mxu0 %v9151_v60 }
 0x6c4   :  { %7772 = vmatprep.mubr.bf16.mxu0 %v9156_v21 }
 0x6cb   :  { %7773 = vmatmul.mubr.bf16.gmra.mxu0 %v9154_v22 }
 0x6cc   :  { %7780 = vmatprep.mubr.bf16.mxu0 %v9159_v45 }
 0x6d3   :  { %7781 = vmatmul.mubr.bf16.gmra.mxu0 %v9157_v57 }
 0x6d4   :  { %7788 = vmatprep.mubr.bf16.mxu0 %v8615_v50 }
 0x6db   :  { %7789 = vmatmul.mubr.bf16.gmra.mxu0 %v8614_v38 }
 0x763   :  { %v8802_v43 = vpop.f32.mrf.mxu0 }
 0x765   :  { %v8803_v10 = vpop.f32.mrf.mxu0 }
 0x766   :  { %v8804_v0 = vadd.f32 %v8803_v10, %v8802_v43 }
 0x767   :  { %v8805_v6 = vpop.f32.mrf.mxu0 }
 0x768   :  { %v7735_v46 = vadd.f32 %v8804_v0, %v7455_v47 }
 0x769   :  { %v8806_v28 = vpop.f32.mrf.mxu0 }
 0x76a   :  { %v8807_v2 = vadd.f32 %v8806_v28, %v8805_v6  ;;  %v7796_v52 = vmax.f32 %v7735_v46, 0.0 }
 0x76b   :  { %v8808_v7 = vpop.f32.mrf.mxu0 }
 0x76c   :  { %v7738_v41 = vadd.f32 %v8807_v2, %v7460_v1 }
 0x76d   :  { %v8809_v26 = vpop.f32.mrf.mxu0 }
 0x76e   :  { %v7797_v27 = vmax.f32 %v7738_v41, 0.0  ;;  %v8810_v32 = vadd.f32 %v8809_v26, %v8808_v7 }
 0x76f   :  { %v8811_v20 = vpop.f32.mrf.mxu0 }
 0x770   :  { %v13667_v44 = vpack.c.bf16 %v7797_v27, %v7796_v52  ;;  %v7743_v54 = vadd.f32 %v8810_v32, %v7465_v40 }
 0x771   :  { %v8812_v17 = vpop.f32.mrf.mxu0 }
 0x772   :  { %v8813_v8 = vadd.f32 %v8812_v17, %v8811_v20  ;;  %v7798_v53 = vmax.f32 %v7743_v54, 0.0 }
 0x773   :  { %v8814_v51 = vpop.f32.mrf.mxu0 }
 0x774   :  { %v7746_v30 = vadd.f32 %v8813_v8, %v7470_v39 }
 0x775   :  { %v8815_v16 = vpop.f32.mrf.mxu0 }
 0x776   :  { %v7799_v4 = vmax.f32 %v7746_v30, 0.0  ;;  %v8816_v8 = vadd.f32 %v8815_v16, %v8814_v51  ;;  %v9166_v51 = vld [vmem:[%s13733_s7 + $0x20] sm:$0xff]   ;;  %v9180_v16 = vmov 0.0  }
 0x777   :  { %v8817_v56 = vpop.f32.mrf.mxu0 }
 0x778   :  { %v13669_v13 = vpack.c.bf16 %v7799_v4, %v7798_v53 }
 0x779   :  { %v8818_v48 = vpop.f32.mrf.mxu0 }
 0x77a   :  { %v8819_v20 = vadd.f32 %v8818_v48, %v8817_v56 }
 0x77b   :  { %v8820_v15 = vpop.f32.mrf.mxu0 }
 0x77c   :  { %v7754_v53 = vadd.f32 %v8819_v20, %v13665_v11  ;;  %v9165_v11 = vld [vmem:[%s13733_s7 + $0x18] sm:$0xff]  }
 0x77d   :  { %v8821_v61 = vpop.f32.mrf.mxu0 }
 0x77e   :  { %v8822_v27 = vadd.f32 %v8821_v61, %v8820_v15  ;;  %v7801_v56 = vmax.f32 %v7754_v53, 0.0 }
 0x77f   :  { %v8823_v59 = vpop.f32.mrf.mxu0 }
 0x781   :  { %v8824_v29 = vpop.f32.mrf.mxu0 }
 0x782   :  { %v8825_v26 = vadd.f32 %v8824_v29, %v8823_v59 }
 0x783   :  { %v8826_v12 = vpop.f32.mrf.mxu0 }
 0x785   :  { %v8827_v35 = vpop.f32.mrf.mxu0 }
 0x786   :  { %v8828_v2 = vadd.f32 %v8827_v35, %v8826_v12  ;;  %v7894_v12 = vpop.permute.xlu1 %7893 }
 0x787   :  { %v8829_v3 = vpop.f32.mrf.mxu0 }
 0x789   :  { %v8830_v23 = vpop.f32.mrf.mxu0 }
 0x78a   :  { %v8831_v6 = vadd.f32 %v8830_v23, %v8829_v3 }
 0x78b   :  { %v8832_v62 = vpop.f32.mrf.mxu0 }
 0x78d   :  { %v8833_v36 = vpop.f32.mrf.mxu0 }
 0x78e   :  { %v8834_v43 = vadd.f32 %v8833_v36, %v8832_v62  ;;  %v7889_v62 = vpop.permute.xlu1 %7888 }
 0x78f   :  { %v8835_v14 = vpop.f32.mrf.mxu0 }
 0x790   :  { %v7775_v1 = vadd.f32 %v8834_v43, %v13651_v33  ;;  %v7762_v33 = vadd.f32 %v8825_v26, %v13661_v18 }
 0x791   :  { %v8836_v24 = vpop.f32.mrf.mxu0 }
 0x792   :  { %v8837_v50 = vadd.f32 %v8836_v24, %v8835_v14  ;;  %v7806_v32 = vmax.f32 %v7775_v1, 0.0  ;;  %v7803_v4 = vmax.f32 %v7762_v33, 0.0  ;;  %v7884_v14 = vpop.permute.xlu0 %7883 }
 0x793   :  { %v8838_v42 = vpop.f32.mrf.mxu0 }
 0x794   :  { %v7778_v47 = vadd.f32 %v8837_v50, %v13653_v25  ;;  %v7767_v25 = vadd.f32 %v8828_v2, %v13655_v5  ;;  %v7751_v5 = vadd.f32 %v8816_v8, %v13663_v63  ;;  %v9164_v63 = vld [vmem:[%s13733_s7 + $0x10] sm:$0xff]  }
 0x795   :  { %v8839_v34 = vpop.f32.mrf.mxu0 }
 0x796   :  { %v8840_v19 = vadd.f32 %v8839_v34, %v8838_v42  ;;  %v7807_v52 = vmax.f32 %v7778_v47, 0.0  ;;  %v7804_v30 = vmax.f32 %v7767_v25, 0.0  ;;  %v7800_v18 = vmax.f32 %v7751_v5, 0.0  ;;  %v7879_v34 = vpop.permute.xlu1 %7878  ;;  %v9168_v5 = vld [vmem:[%s13734_s9] sm:$0x1f]  }
 0x797   :  { %v8841_v60 = vpop.f32.mrf.mxu0 }
 0x798   :  { %v7783_v39 = vadd.f32 %v8840_v19, %v13648_v9  ;;  %v7816_v54 = vpack.c.bf16 %v7807_v52, %v7806_v32  ;;  %v7813_v61 = vpack.c.bf16 %v7801_v56, %v7800_v18 }
 0x799   :  { %v8842_v21 = vpop.f32.mrf.mxu0 }
 0x79a   :  { %v8843_v22 = vadd.f32 %v8842_v21, %v8841_v60  ;;  %v7808_v7 = vmax.f32 %v7783_v39, 0.0 }
 0x79b   :  { %v8844_v45 = vpop.f32.mrf.mxu0 }
 0x79c   :  { %v7786_v38 = vadd.f32 %v8843_v22, %v7520_v31  ;;  %v7770_v31 = vadd.f32 %v8831_v6, %v13657_v55  ;;  %v7759_v55 = vadd.f32 %v8822_v27, %v13659_v37  ;;  %v9163_v37 = vld [vmem:[%s13733_s7 + $0x8] sm:$0xff]   ;;  %v7874_v22 = vpop.permute.xlu0 %7873 }
 0x79d   :  { %v8845_v57 = vpop.f32.mrf.mxu0 }
 0x79e   :  { %v8846_v49 = vadd.f32 %v8845_v57, %v8844_v45  ;;  %v7809_v28 = vmax.f32 %v7786_v38, 0.0  ;;  %v7805_v17 = vmax.f32 %v7770_v31, 0.0  ;;  %v7802_v15 = vmax.f32 %v7759_v55, 0.0 }
 0x79f   :  { %v8847_v40 = vpop.f32.mrf.mxu0 }
 0x7a0   :  { %v7791_v10 = vadd.f32 %v8846_v49, %v13643_v58  ;;  %v7817_v58 = vpack.c.bf16 %v7809_v28, %v7808_v7  ;;  %v7815_v59 = vpack.c.bf16 %v7805_v17, %v7804_v30  ;;  %v7814_v48 = vpack.c.bf16 %v7803_v4, %v7802_v15  ;;  %v7869_v49 = vpop.permute.xlu1 %7868 }
 0x7a1   :  { %v8848_v0 = vpop.f32.mrf.mxu0 }
 0x7a2   :  { %v7810_v46 = vmax.f32 %v7791_v10, 0.0  ;;  %v7864_v0 = vpop.permute.xlu0 %7863 }
 0x7a4   :  { %v7818_v41 = vpack.c.bf16 %v7810_v46, %v7810_v46  ;;  %v7859_v7 = vpop.permute.xlu1 %7858 }
 0x7a6   :  { %8915 = vmatprep.subr.msk.bf16.mxu1 %vm227_vm1, %v7818_v41  ;;  %v7945_v9 = vsel %vm227_vm1, %v7818_v41, 0  ;;  %v7854_v31 = vpop.permute.xlu0 %7853 }
 0x7a7   :  { %8872 = vmatpush3.bf16.msra.mxu1 %v7945_v9 }
 0x7a8   :  { %8873 = vmatprep.subr.bf16.mxu1 %v7817_v58  ;;  %v7849_v32 = vpop.permute.xlu1 %7848 }
 0x7ab   :  { %8874 = vmatpush3.bf16.msra.mxu1 %v7817_v58 }
 0x7ac   :  { %8875 = vmatprep.subr.bf16.mxu1 %v7816_v54 }
 0x7af   :  { %8876 = vmatpush3.bf16.msra.mxu1 %v7816_v54  ;;  %v7844_v54 = vpop.permute.xlu0 %7843 }
 0x7b0   :  { %8877 = vmatprep.subr.bf16.mxu1 %v7815_v59 }
 0x7b3   :  { %8878 = vmatpush3.bf16.msra.mxu1 %v7815_v59  ;;  %v8051_v15 = vpop.permute.xlu0 %8050 }
 0x7b4   :  { %8879 = vmatprep.subr.bf16.mxu1 %v7814_v48 }
 0x7b7   :  { %8880 = vmatpush3.bf16.msra.mxu1 %v7814_v48 }
 0x7b8   :  { %8881 = vmatprep.subr.bf16.mxu1 %v7813_v61 }
 0x7bb   :  { %8882 = vmatpush3.bf16.msra.mxu1 %v7813_v61  ;;  %v8056_v61 = vpop.permute.xlu1 %8055 }
 0x7bc   :  { %8883 = vmatprep.subr.bf16.mxu1 %v13669_v13 }
 0x7bf   :  { %8884 = vmatpush3.bf16.msra.mxu1 %v13669_v13 }
 0x7c0   :  { %8885 = vmatprep.subr.bf16.mxu1 %v13667_v44 }
 0x7c3   :  { %8886 = vmatpush3.bf16.msra.mxu1 %v13667_v44  ;;  %v9167_v44 = vld [vmem:[%s13733_s7 + $0x28] ss:$0 sps:$4 sm:$0x33]  }
 0x7c4   :  { %8899 = vmatprep.subr.bf16.mxu1 %v9180_v16 }
 0x7c6   :  { %8888 = vmatmul.mubr.msk.bf16.vlgmr.msra.gmra.mxu1 %vm7924_vm6, %v9163_v37 }
 0x7c7   :  { %8891 = vmatprep.mubr.msk.bf16.mxu1 %vm7924_vm6, %v9164_v63 }
 0x7ce   :  { %8892 = vmatmul.mubr.msk.bf16.gmra.mxu1 %vm7924_vm6, %v9165_v11 }
 0x7cf   :  { %8895 = vmatprep.mubr.msk.bf16.mxu1 %vm7924_vm6, %v9166_v51 }
 0x7d6   :  { %8896 = vmatmul.mubr.msk.bf16.gmra.mxu1 %vm7924_vm6, %v9167_v44 }
 0x7d7   :  { %8911 = vmatprep.mubr.msk.bf16.mxu1 %vm9181_vm7, %v9180_v16 }
 0x886   :  { %v8889_v13 = vpop.f32.mrf.mxu1 }
 0x887   :  { %v7990_v27 = vadd.f32 %v8889_v13, %v7854_v31 }
 0x888   :  { %v7981_v29 = vpop.f32.mrf.mxu1 }
 0x889   :  { %v8029_v8 = vmax.f32 %v7990_v27, 0.0  ;;  %v7982_v55 = vadd.f32 %v7981_v29, %v7844_v54 }
 0x88a   :  { %v8890_v35 = vpop.f32.mrf.mxu1 }
 0x88b   :  { %v7993_v52 = vadd.f32 %v8890_v35, %v7859_v7  ;;  %v8027_v4 = vmax.f32 %v7982_v55, 0.0 }
 0x88c   :  { %v7984_v3 = vpop.f32.mrf.mxu1 }
 0x88d   :  { %v8030_v20 = vmax.f32 %v7993_v52, 0.0  ;;  %v7985_v33 = vadd.f32 %v7984_v3, %v7849_v32 }
 0x88e   :  { %v8893_v23 = vpop.f32.mrf.mxu1 }
 0x88f   :  { %v8006_v6 = vadd.f32 %v8893_v23, %v7874_v22  ;;  %v8039_v30 = vpack.c.bf16 %v8030_v20, %v8029_v8  ;;  %v8028_v53 = vmax.f32 %v7985_v33, 0.0 }
 0x890   :  { %v7997_v36 = vpop.f32.mrf.mxu1 }
 0x891   :  { %v8033_v41 = vmax.f32 %v8006_v6, 0.0  ;;  %v7998_v26 = vadd.f32 %v7997_v36, %v7864_v0  ;;  %v8038_v59 = vpack.c.bf16 %v8028_v53, %v8027_v4 }
 0x892   :  { %v8894_v24 = vpop.f32.mrf.mxu1 }
 0x893   :  { %v8009_v43 = vadd.f32 %v8894_v24, %v7879_v34  ;;  %v8031_v25 = vmax.f32 %v7998_v26, 0.0 }
 0x894   :  { %v8000_v42 = vpop.f32.mrf.mxu1 }
 0x895   :  { %v8034_v46 = vmax.f32 %v8009_v43, 0.0  ;;  %v8001_v2 = vadd.f32 %v8000_v42, %v7869_v49 }
 0x896   :  { %v8897_v60 = vpop.f32.mrf.mxu1 }
 0x897   :  { %v8022_v21 = vadd.f32 %v8897_v60, %v7894_v12  ;;  %v8041_v9 = vpack.c.bf16 %v8034_v46, %v8033_v41  ;;  %v8032_v58 = vmax.f32 %v8001_v2, 0.0 }
 0x898   :  { %v8013_v45 = vpop.f32.mrf.mxu1 }
 0x899   :  { %v8037_v19 = vmax.f32 %v8022_v21, 0.0  ;;  %v8014_v38 = vadd.f32 %v8013_v45, %v7884_v14  ;;  %v8040_v17 = vpack.c.bf16 %v8032_v58, %v8031_v25 }
 0x89a   :  { %v8898_v57 = vpop.f32.mrf.mxu1 }
 0x89b   :  { %v8043_v50 = vpack.c.bf16 %v8037_v19, %v8037_v19  ;;  %v8035_v47 = vmax.f32 %v8014_v38, 0.0 }
 0x89c   :  { %v8016_v40 = vpop.f32.mrf.mxu1 }
 0x89d   :  { %v8017_v39 = vadd.f32 %v8016_v40, %v7889_v62  ;;  %v8069_v10 = vsel %vm8067_vm8, %v8043_v50, 0 }
 0x89e   :  { %8900 = vmatpush3.bf16.msra.mxu1 %v8069_v10 }
 0x89f   :  { %v8036_v28 = vmax.f32 %v8017_v39, 0.0  ;;  %8901 = vmatprep.subr.bf16.mxu1 %v9180_v16 }
 0x8a1   :  { %v8042_v1 = vpack.c.bf16 %v8036_v28, %v8035_v47 }
 0x8a3   :  { %8902 = vmatpush3.bf16.msra.mxu1 %v8042_v1 }
 0x8a4   :  { %8903 = vmatprep.subr.bf16.mxu1 %v9180_v16 }
 0x8a7   :  { %8904 = vmatpush3.bf16.msra.mxu1 %v8041_v9 }
 0x8a8   :  { %8905 = vmatprep.subr.bf16.mxu1 %v9180_v16 }
 0x8ab   :  { %8906 = vmatpush3.bf16.msra.mxu1 %v8040_v17 }
 0x8ac   :  { %8907 = vmatprep.subr.bf16.mxu1 %v9180_v16 }
 0x8af   :  { %8908 = vmatpush3.bf16.msra.mxu1 %v8039_v30 }
 0x8b0   :  { %8909 = vmatprep.subr.bf16.mxu1 %v9180_v16 }
 0x8b3   :  { %8910 = vmatpush3.bf16.msra.mxu1 %v8038_v59 }
 0x8b6   :  { %8912 = vmatmul.mubr.msk.bf16.vlgmr.msra.gmra.mxu1 %vm8063_vm9, %v9168_v5 }
 0x976   :  { %v8105_v56 = vpop.f32.mrf.mxu1 }
 0x977   :  { %v8106_v48 = vadd.f32 %v8105_v56, %v8051_v15 }
 0x978   :  { %v8913_v18 = vpop.f32.mrf.mxu1 }
 0x979   :  { %8113 = vst.msk [vmem:[%s13735_s11] sm:$0xff] %vm229_vm2, %v8106_v48 }
 0x97a   :  { %v8108_v37 = vpop.f32.mrf.mxu1 }
 0x97b   :  { %v8109_v63 = vadd.f32 %v8108_v37, %v8056_v61 }
 0x97c   :  { %v8914_v11 = vpop.f32.mrf.mxu1 }
 0x97d   :  { %8115 = vst.msk [vmem:[%s13735_s11 + $0x8] sm:$0x3] %vm8114_vm10, %v8109_v63 }

</bundles_post_ra>
